<compile_context>
chip_gen: v5e
topology: v5e:2x2
jax: 0.10.0
libtpu: 0.0.40
codegen_flags: <defaults>
</compile_context>

<pallas_src>
import jax
import jax.numpy as jnp
from jax import lax
from jax.experimental import pallas as pl
from jax.experimental.pallas import tpu as pltpu


# ----------------------------- elementwise helpers ------------------------------
def _elu(x):
    # ELU(alpha=1): x>0 -> x, else exp(x)-1.  (inf in the unselected branch is
    # discarded by the select; no 0*inf hazard.)
    return jnp.where(x > 0, x, jnp.exp(x) - 1.0)


def _sigmoid_approx(x):
    # exp on the EUP + approximate reciprocal on the EUP: keeps the divide off
    # the VALU.  (Only used inside the Pallas kernel.)
    return pl.reciprocal(1.0 + jnp.exp(-x), approx=True)


# ------------------- shifted convolutions as masked-shift matmuls ----------------
def _shift_fwd(x, mask):
    """t[r] = x[r-1] on the flattened (H*W, C) image, zeroed where w == 0."""
    z = jnp.zeros((1, x.shape[1]), x.dtype)
    t = jnp.concatenate([z, x[:-1, :]], axis=0)
    return jnp.where(mask, t, jnp.zeros_like(t))


def _shift_bwd(x, mask):
    """t[r] = x[r+1] on the flattened (H*W, C) image, zeroed where w == W-1."""
    z = jnp.zeros((1, x.shape[1]), x.dtype)
    t = jnp.concatenate([x[1:, :], z], axis=0)
    return jnp.where(mask, t, jnp.zeros_like(t))


def _shifted_conv(ep, en, wp, wn, b, W, m_l, m_r):
    """down[-right]-shifted conv (Kh=2, Kw=wp.shape[0]) over one flattened image.

    ep, en : (H*W, nf) f32     -- elu(x), elu(-x): the two concat_elu halves
             (the channel concat is never materialized; the weight is split).
    wp, wn : (Kw, nf, 2*Cout) bf16 -- packed so that [kx, ci, ky*Cout + co]
             == W[ky, kx, ci(+nf), co]; both Kh taps share one matmul (N axis).
    b      : (1, Cout) f32
    returns  (H*W, Cout) f32
    """
    R = ep.shape[0]
    kw = wp.shape[0]
    cout = wp.shape[-1] // 2
    epb = ep.astype(jnp.bfloat16)
    enb = en.astype(jnp.bfloat16)
    if kw == 3:      # down_shifted_conv2d: horizontal taps dw in {-1, 0, +1}
        taps_p = (_shift_fwd(epb, m_l), epb, _shift_bwd(epb, m_r))
        taps_n = (_shift_fwd(enb, m_l), enb, _shift_bwd(enb, m_r))
    else:            # down_right_shifted_conv2d: horizontal taps dw in {-1, 0}
        taps_p = (_shift_fwd(epb, m_l), epb)
        taps_n = (_shift_fwd(enb, m_l), enb)

    acc = jnp.zeros((R, 2 * cout), jnp.float32)
    for kx in range(kw):
        acc = acc + jnp.dot(taps_p[kx], wp[kx], preferred_element_type=jnp.float32)
        acc = acc + jnp.dot(taps_n[kx], wn[kx], preferred_element_type=jnp.float32)

    p_top = acc[:, :cout]        # ky = 0 taps (read from the row above)
    p_bot = acc[:, cout:]        # ky = 1 taps (same row)
    # shift the ky=0 partial sums down by exactly one image row (W flat rows)
    top_sh = jnp.concatenate(
        [jnp.zeros((W, cout), jnp.float32), p_top[:R - W, :]], axis=0)
    return top_sh + p_bot + b


# ----------------------------------- kernel --------------------------------------
def _layer_kernel(
    u_ref, ul_ref,
    uw1p_ref, uw1n_ref, ub1_ref, uw2p_ref, uw2n_ref, ub2_ref,
    lw1p_ref, lw1n_ref, lb1_ref,
    ninp_ref, ninn_ref, ninb_ref,
    lw2p_ref, lw2n_ref, lb2_ref,
    u_out_ref, ul_out_ref,
):
    _, H, W, nf = u_ref.shape
    R = H * W
    uf = u_ref[...].reshape(R, nf)            # f32 activations, flattened
    lf = ul_ref[...].reshape(R, nf)

    # Horizontal-tap validity masks in flattened (H*W, nf) space.
    wpos = lax.broadcasted_iota(jnp.int32, (H, W, nf), 1).reshape(R, nf)
    m_l = wpos > 0            # the "w-1" tap exists
    m_r = wpos < (W - 1)      # the "w+1" tap exists

    # ---------- u stream: gated_resnet with down_shifted_conv2d (2x3) ----------
    ep, en = _elu(uf), _elu(-uf)
    c1 = _shifted_conv(ep, en, uw1p_ref[...], uw1n_ref[...], ub1_ref[...],
                       W, m_l, m_r)
    e2p, e2n = _elu(c1), _elu(-c1)
    # TODO(synk): nn.Dropout2d(0.5) is eval-mode identity here.
    c2 = _shifted_conv(e2p, e2n, uw2p_ref[...], uw2n_ref[...], ub2_ref[...],
                       W, m_l, m_r)
    u_new = uf + c2[:, :nf] * _sigmoid_approx(c2[:, nf:])
    u_out_ref[...] = u_new.reshape(1, H, W, nf).astype(u_out_ref.dtype)

    # ---- ul stream: gated_resnet with down_right_shifted_conv2d (2x2) + nin ----
    lp, ln = _elu(lf), _elu(-lf)
    d1 = _shifted_conv(lp, ln, lw1p_ref[...], lw1n_ref[...], lb1_ref[...],
                       W, m_l, m_r)
    # nin skip on concat_elu(u_new); u_new is consumed straight from VMEM.
    sp = _elu(u_new).astype(jnp.bfloat16)
    sn = _elu(-u_new).astype(jnp.bfloat16)
    d1 = d1 + (jnp.dot(sp, ninp_ref[...], preferred_element_type=jnp.float32)
               + jnp.dot(sn, ninn_ref[...], preferred_element_type=jnp.float32)
               + ninb_ref[...])
    d2p, d2n = _elu(d1), _elu(-d1)
    d2 = _shifted_conv(d2p, d2n, lw2p_ref[...], lw2n_ref[...], lb2_ref[...],
                       W, m_l, m_r)
    ul_new = lf + d2[:, :nf] * _sigmoid_approx(d2[:, nf:])
    ul_out_ref[...] = ul_new.reshape(1, H, W, nf).astype(ul_out_ref.dtype)


# ---------------------------------- wrappers --------------------------------------
def _pack_conv_weight(w, nf):
    """(Kh=2, Kw, 2*nf, Cout) f32 -> (wp, wn), each (Kw, nf, Kh*Cout) bf16.

    wp[kx, ci, ky*Cout + co] = w[ky, kx, ci, co]        (concat_elu "+x" half)
    wn[kx, ci, ky*Cout + co] = w[ky, kx, nf + ci, co]   (concat_elu "-x" half)
    """
    kh, kw, _, cout = w.shape

    def pack(half):
        return jnp.transpose(half, (1, 2, 0, 3)).reshape(kw, nf, kh * cout)

    return (pack(w[:, :, :nf, :]).astype(jnp.bfloat16),
            pack(w[:, :, nf:, :]).astype(jnp.bfloat16))


def _pack_layer_params(p_u, p_ul, nf):
    uw1p, uw1n = _pack_conv_weight(p_u["w1"], nf)
    uw2p, uw2n = _pack_conv_weight(p_u["w2"], nf)
    lw1p, lw1n = _pack_conv_weight(p_ul["w1"], nf)
    lw2p, lw2n = _pack_conv_weight(p_ul["w2"], nf)
    return (uw1p, uw1n, p_u["b1"], uw2p, uw2n, p_u["b2"],
            lw1p, lw1n, p_ul["b1"],
            p_ul["wn"][:nf].astype(jnp.bfloat16),
            p_ul["wn"][nf:].astype(jnp.bfloat16), p_ul["bn"],
            lw2p, lw2n, p_ul["b2"])


def _fused_layer(u, ul, packed):
    B, H, W, nf = u.shape
    act_spec = pl.BlockSpec((1, H, W, nf), lambda b: (b, 0, 0, 0))
    # constant index_map -> weights/biases stay VMEM-resident across grid steps
    w_specs = [pl.BlockSpec(p.shape, lambda b, n=p.ndim: (0,) * n) for p in packed]
    return pl.pallas_call(
        _layer_kernel,
        grid=(B,),
        in_specs=[act_spec, act_spec] + w_specs,
        out_specs=(act_spec, act_spec),
        out_shape=(jax.ShapeDtypeStruct(u.shape, u.dtype),
                   jax.ShapeDtypeStruct(ul.shape, ul.dtype)),
        compiler_params=pltpu.CompilerParams(
            dimension_semantics=("parallel",),
            vmem_limit_bytes=48 * 1024 * 1024),
    )(u, ul, *packed)


def pixelcnn_layer_up(u, ul, params):
    """Matches PixelCNNLayer_up.forward: returns (u_list, ul_list). NHWC tensors."""
    nf = u.shape[-1]
    u_list, ul_list = [], []
    for p_u, p_ul in params:
        u, ul = _fused_layer(u, ul, _pack_layer_params(p_u, p_ul, nf))
        u_list.append(u)
        ul_list.append(ul)
    return u_list, ul_list


pixelcnn_layer_up_jit = jax.jit(pixelcnn_layer_up)


# --------------------------- pure-JAX reference (check) ---------------------------
def _concat_elu_ref(x):
    return _elu(jnp.concatenate([x, -x], axis=-1))


def _ref_conv(x, w, b, pad_hw):
    # Matches the kernel's precision: bf16 operands, f32 accumulation.
    out = lax.conv_general_dilated(
        x.astype(jnp.bfloat16), w.astype(jnp.bfloat16),
        window_strides=(1, 1), padding=pad_hw,
        dimension_numbers=("NHWC", "HWIO", "NHWC"),
        preferred_element_type=jnp.float32)
    return out + b.reshape(1, 1, 1, -1)


def _ref_gated_u(x, p):
    c1 = _ref_conv(_concat_elu_ref(x), p["w1"], p["b1"], ((1, 0), (1, 1)))
    c2 = _ref_conv(_concat_elu_ref(c1), p["w2"], p["b2"], ((1, 0), (1, 1)))
    a, g = jnp.split(c2, 2, axis=-1)
    return x + a * jax.nn.sigmoid(g)


def _ref_gated_ul(x, a_in, p):
    c1 = _ref_conv(_concat_elu_ref(x), p["w1"], p["b1"], ((1, 0), (1, 0)))
    skip = jnp.einsum("bhwc,cf->bhwf",
                      _concat_elu_ref(a_in).astype(jnp.bfloat16),
                      p["wn"].astype(jnp.bfloat16),
                      preferred_element_type=jnp.float32)
    c1 = c1 + skip + p["bn"].reshape(1, 1, 1, -1)
    c2 = _ref_conv(_concat_elu_ref(c1), p["w2"], p["b2"], ((1, 0), (1, 0)))
    a2, g = jnp.split(c2, 2, axis=-1)
    return x + a2 * jax.nn.sigmoid(g)


# ---------------------------------- parameters ------------------------------------
def init_params(key, nr_resnet, nf):
    params = []
    for i in range(nr_resnet):
        ks = jax.random.split(jax.random.fold_in(key, i), 10)

        def w(k, shape):
            return 0.05 * jax.random.normal(k, shape, jnp.float32)

        p_u = dict(  # down_shifted_conv2d: filter (2,3)
            w1=w(ks[0], (2, 3, 2 * nf, nf)),     b1=w(ks[1], (1, nf)),
            w2=w(ks[2], (2, 3, 2 * nf, 2 * nf)), b2=w(ks[3], (1, 2 * nf)),
        )
        p_ul = dict(  # down_right_shifted_conv2d: filter (2,2) + nin skip
            w1=w(ks[4], (2, 2, 2 * nf, nf)),     b1=w(ks[5], (1, nf)),
            wn=w(ks[6], (2 * nf, nf)),           bn=w(ks[7], (1, nf)),
            w2=w(ks[8], (2, 2, 2 * nf, 2 * nf)), b2=w(ks[9], (1, 2 * nf)),
        )
        params.append((p_u, p_ul))
    return params


# -------------------------------------- main --------------------------------------
if __name__ == "__main__":
    key = jax.random.PRNGKey(0)
    B, F, H, W = 2, 8, 16, 16          # nr_filters = 8
    nr_resnet = 2

    ku, kul, kp = jax.random.split(key, 3)
    u_nchw = jax.random.normal(ku, (B, F, H, W), jnp.float32)   # PyTorch-style NCHW
    ul_nchw = jax.random.normal(kul, (B, F, H, W), jnp.float32)
    params = init_params(kp, nr_resnet, F)

    # NCHW -> NHWC for the kernels
    u = jnp.transpose(u_nchw, (0, 2, 3, 1))
    ul = jnp.transpose(ul_nchw, (0, 2, 3, 1))

    u_list, ul_list = pixelcnn_layer_up_jit(u, ul, params)
    jax.block_until_ready(ul_list[-1])

    # Correctness: pure-JAX reference of the same math (bf16 matmul operands,
    # f32 accumulation / elementwise).  Tolerance absorbs the approximate-
    # reciprocal sigmoid and accumulation-order differences.
    u_r, ul_r = u, ul
    for i, (p_u, p_ul) in enumerate(params):
        u_r = _ref_gated_u(u_r, p_u)
        ul_r = _ref_gated_ul(ul_r, u_r, p_ul)
        assert jnp.allclose(u_list[i], u_r, atol=2e-2, rtol=2e-2), \
            f"u mismatch at layer {i}"
        assert jnp.allclose(ul_list[i], ul_r, atol=2e-2, rtol=2e-2), \
            f"ul mismatch at layer {i}"

    print("KERNEL_OK")
</pallas_src>

<mosaic_0001>
module attributes {stable_mosaic.version = 11 : i64} {
  func.func @_layer_kernel(%arg0: i32, %arg1: memref<1x16x16x8xf32, #tpu.memory_space<vmem>>, %arg2: memref<1x16x16x8xf32, #tpu.memory_space<vmem>>, %arg3: memref<3x8x16xbf16, #tpu.memory_space<vmem>>, %arg4: memref<3x8x16xbf16, #tpu.memory_space<vmem>>, %arg5: memref<1x8xf32, #tpu.memory_space<vmem>>, %arg6: memref<3x8x32xbf16, #tpu.memory_space<vmem>>, %arg7: memref<3x8x32xbf16, #tpu.memory_space<vmem>>, %arg8: memref<1x16xf32, #tpu.memory_space<vmem>>, %arg9: memref<2x8x16xbf16, #tpu.memory_space<vmem>>, %arg10: memref<2x8x16xbf16, #tpu.memory_space<vmem>>, %arg11: memref<1x8xf32, #tpu.memory_space<vmem>>, %arg12: memref<8x8xbf16, #tpu.memory_space<vmem>>, %arg13: memref<8x8xbf16, #tpu.memory_space<vmem>>, %arg14: memref<1x8xf32, #tpu.memory_space<vmem>>, %arg15: memref<2x8x32xbf16, #tpu.memory_space<vmem>>, %arg16: memref<2x8x32xbf16, #tpu.memory_space<vmem>>, %arg17: memref<1x16xf32, #tpu.memory_space<vmem>>, %arg18: memref<1x16x16x8xf32, #tpu.memory_space<vmem>>, %arg19: memref<1x16x16x8xf32, #tpu.memory_space<vmem>>) attributes {dimension_semantics = [#tpu.dimension_semantics<parallel>], iteration_bounds = array<i64: 2>, scalar_prefetch = 0 : i64, scratch_operands = 0 : i64, tpu.core_type = #tpu.core_type<tc>, window_params = [{transform_indices = @transform_0, window_bounds = array<i64: 1, 16, 16, 8>}, {transform_indices = @transform_1, window_bounds = array<i64: 1, 16, 16, 8>}, {pipeline_mode = #tpu.pipeline_mode<synchronous>, transform_indices = @transform_2, window_bounds = array<i64: 3, 8, 16>}, {pipeline_mode = #tpu.pipeline_mode<synchronous>, transform_indices = @transform_3, window_bounds = array<i64: 3, 8, 16>}, {pipeline_mode = #tpu.pipeline_mode<synchronous>, transform_indices = @transform_4, window_bounds = array<i64: 1, 8>}, {pipeline_mode = #tpu.pipeline_mode<synchronous>, transform_indices = @transform_5, window_bounds = array<i64: 3, 8, 32>}, {pipeline_mode = #tpu.pipeline_mode<synchronous>, transform_indices = @transform_6, window_bounds = array<i64: 3, 8, 32>}, {pipeline_mode = #tpu.pipeline_mode<synchronous>, transform_indices = @transform_7, window_bounds = array<i64: 1, 16>}, {pipeline_mode = #tpu.pipeline_mode<synchronous>, transform_indices = @transform_8, window_bounds = array<i64: 2, 8, 16>}, {pipeline_mode = #tpu.pipeline_mode<synchronous>, transform_indices = @transform_9, window_bounds = array<i64: 2, 8, 16>}, {pipeline_mode = #tpu.pipeline_mode<synchronous>, transform_indices = @transform_10, window_bounds = array<i64: 1, 8>}, {pipeline_mode = #tpu.pipeline_mode<synchronous>, transform_indices = @transform_11, window_bounds = array<i64: 8, 8>}, {pipeline_mode = #tpu.pipeline_mode<synchronous>, transform_indices = @transform_12, window_bounds = array<i64: 8, 8>}, {pipeline_mode = #tpu.pipeline_mode<synchronous>, transform_indices = @transform_13, window_bounds = array<i64: 1, 8>}, {pipeline_mode = #tpu.pipeline_mode<synchronous>, transform_indices = @transform_14, window_bounds = array<i64: 2, 8, 32>}, {pipeline_mode = #tpu.pipeline_mode<synchronous>, transform_indices = @transform_15, window_bounds = array<i64: 2, 8, 32>}, {pipeline_mode = #tpu.pipeline_mode<synchronous>, transform_indices = @transform_16, window_bounds = array<i64: 1, 16>}, {transform_indices = @transform_17, window_bounds = array<i64: 1, 16, 16, 8>}, {transform_indices = @transform_18, window_bounds = array<i64: 1, 16, 16, 8>}]} {
    %c0 = arith.constant 0 : index
    %c0_0 = arith.constant 0 : index
    %c0_1 = arith.constant 0 : index
    %c0_2 = arith.constant 0 : index
    %0 = vector.load %arg1[%c0, %c0_0, %c0_1, %c0_2] : memref<1x16x16x8xf32, #tpu.memory_space<vmem>>, vector<1x16x16x8xf32>
    %1 = vector.shape_cast %0 : vector<1x16x16x8xf32> to vector<256x8xf32>
    %c0_3 = arith.constant 0 : index
    %c0_4 = arith.constant 0 : index
    %c0_5 = arith.constant 0 : index
    %c0_6 = arith.constant 0 : index
    %2 = vector.load %arg2[%c0_3, %c0_4, %c0_5, %c0_6] : memref<1x16x16x8xf32, #tpu.memory_space<vmem>>, vector<1x16x16x8xf32>
    %3 = vector.shape_cast %2 : vector<1x16x16x8xf32> to vector<256x8xf32>
    %4 = tpu.iota {dimensions = array<i32: 1>} : vector<16x16x8xi32>
    %5 = vector.shape_cast %4 : vector<16x16x8xi32> to vector<256x8xi32>
    %c0_i32 = arith.constant 0 : i32
    %6 = vector.broadcast %c0_i32 : i32 to vector<256x8xi32>
    %7 = arith.cmpi sgt, %5, %6 : vector<256x8xi32>
    %c15_i32 = arith.constant 15 : i32
    %8 = vector.broadcast %c15_i32 : i32 to vector<256x8xi32>
    %9 = arith.cmpi slt, %5, %8 : vector<256x8xi32>
    %cst = arith.constant 0.000000e+00 : f32
    %10 = vector.broadcast %cst : f32 to vector<256x8xf32>
    %11 = arith.cmpf ogt, %1, %10 : vector<256x8xf32>
    %12 = math.exp %1 : vector<256x8xf32>
    %cst_7 = arith.constant 1.000000e+00 : f32
    %13 = vector.broadcast %cst_7 : f32 to vector<256x8xf32>
    %14 = arith.subf %12, %13 : vector<256x8xf32>
    %15 = arith.select %11, %1, %14 : vector<256x8xi1>, vector<256x8xf32>
    %cst_8 = arith.constant 0.000000e+00 : f32
    %16 = vector.broadcast %cst_8 : f32 to vector<256x8xf32>
    %17 = arith.subf %16, %1 : vector<256x8xf32>
    %cst_9 = arith.constant 0.000000e+00 : f32
    %18 = vector.broadcast %cst_9 : f32 to vector<256x8xf32>
    %19 = arith.cmpf ogt, %17, %18 : vector<256x8xf32>
    %20 = math.exp %17 : vector<256x8xf32>
    %cst_10 = arith.constant 1.000000e+00 : f32
    %21 = vector.broadcast %cst_10 : f32 to vector<256x8xf32>
    %22 = arith.subf %20, %21 : vector<256x8xf32>
    %23 = arith.select %19, %17, %22 : vector<256x8xi1>, vector<256x8xf32>
    %c0_11 = arith.constant 0 : index
    %c0_12 = arith.constant 0 : index
    %c0_13 = arith.constant 0 : index
    %24 = vector.load %arg3[%c0_11, %c0_12, %c0_13] : memref<3x8x16xbf16, #tpu.memory_space<vmem>>, vector<3x8x16xbf16>
    %c0_14 = arith.constant 0 : index
    %c0_15 = arith.constant 0 : index
    %c0_16 = arith.constant 0 : index
    %25 = vector.load %arg4[%c0_14, %c0_15, %c0_16] : memref<3x8x16xbf16, #tpu.memory_space<vmem>>, vector<3x8x16xbf16>
    %c0_17 = arith.constant 0 : index
    %c0_18 = arith.constant 0 : index
    %26 = vector.load %arg5[%c0_17, %c0_18] : memref<1x8xf32, #tpu.memory_space<vmem>>, vector<1x8xf32>
    %27 = arith.truncf %15 : vector<256x8xf32> to vector<256x8xbf16>
    %28 = arith.truncf %23 : vector<256x8xf32> to vector<256x8xbf16>
    %cst_19 = arith.constant 0.000000e+00 : bf16
    %29 = vector.broadcast %cst_19 : bf16 to vector<1x8xbf16>
    %30 = vector.extract_strided_slice %27 {offsets = [0, 0], sizes = [255, 8], strides = [1, 1]} : vector<256x8xbf16> to vector<255x8xbf16>
    %31 = tpu.concatenate %29, %30 in 0 : vector<1x8xbf16>, vector<255x8xbf16> -> vector<256x8xbf16>
    %cst_20 = arith.constant 0.000000e+00 : bf16
    %32 = vector.broadcast %cst_20 : bf16 to vector<256x8xbf16>
    %33 = arith.select %7, %31, %32 : vector<256x8xi1>, vector<256x8xbf16>
    %cst_21 = arith.constant 0.000000e+00 : bf16
    %34 = vector.broadcast %cst_21 : bf16 to vector<1x8xbf16>
    %35 = vector.extract_strided_slice %27 {offsets = [1, 0], sizes = [255, 8], strides = [1, 1]} : vector<256x8xbf16> to vector<255x8xbf16>
    %36 = tpu.concatenate %35, %34 in 0 : vector<255x8xbf16>, vector<1x8xbf16> -> vector<256x8xbf16>
    %cst_22 = arith.constant 0.000000e+00 : bf16
    %37 = vector.broadcast %cst_22 : bf16 to vector<256x8xbf16>
    %38 = arith.select %9, %36, %37 : vector<256x8xi1>, vector<256x8xbf16>
    %cst_23 = arith.constant 0.000000e+00 : bf16
    %39 = vector.broadcast %cst_23 : bf16 to vector<1x8xbf16>
    %40 = vector.extract_strided_slice %28 {offsets = [0, 0], sizes = [255, 8], strides = [1, 1]} : vector<256x8xbf16> to vector<255x8xbf16>
    %41 = tpu.concatenate %39, %40 in 0 : vector<1x8xbf16>, vector<255x8xbf16> -> vector<256x8xbf16>
    %cst_24 = arith.constant 0.000000e+00 : bf16
    %42 = vector.broadcast %cst_24 : bf16 to vector<256x8xbf16>
    %43 = arith.select %7, %41, %42 : vector<256x8xi1>, vector<256x8xbf16>
    %cst_25 = arith.constant 0.000000e+00 : bf16
    %44 = vector.broadcast %cst_25 : bf16 to vector<1x8xbf16>
    %45 = vector.extract_strided_slice %28 {offsets = [1, 0], sizes = [255, 8], strides = [1, 1]} : vector<256x8xbf16> to vector<255x8xbf16>
    %46 = tpu.concatenate %45, %44 in 0 : vector<255x8xbf16>, vector<1x8xbf16> -> vector<256x8xbf16>
    %cst_26 = arith.constant 0.000000e+00 : bf16
    %47 = vector.broadcast %cst_26 : bf16 to vector<256x8xbf16>
    %48 = arith.select %9, %46, %47 : vector<256x8xi1>, vector<256x8xbf16>
    %cst_27 = arith.constant 0.000000e+00 : f32
    %49 = vector.broadcast %cst_27 : f32 to vector<256x16xf32>
    %50 = vector.extract_strided_slice %24 {offsets = [0, 0, 0], sizes = [1, 8, 16], strides = [1, 1, 1]} : vector<3x8x16xbf16> to vector<1x8x16xbf16>
    %51 = vector.shape_cast %50 : vector<1x8x16xbf16> to vector<8x16xbf16>
    %cst_28 = arith.constant dense<0.000000e+00> : vector<256x16xf32>
    %52 = tpu.matmul %33, %51, %cst_28 {dimension_numbers = #tpu.dot_dimension_numbers<[1], [0], [0], [1], [0, 0, 1, 1], [], []>} : vector<256x8xbf16>, vector<8x16xbf16>, vector<256x16xf32> -> vector<256x16xf32>
    %53 = arith.addf %49, %52 : vector<256x16xf32>
    %54 = vector.extract_strided_slice %25 {offsets = [0, 0, 0], sizes = [1, 8, 16], strides = [1, 1, 1]} : vector<3x8x16xbf16> to vector<1x8x16xbf16>
    %55 = vector.shape_cast %54 : vector<1x8x16xbf16> to vector<8x16xbf16>
    %cst_29 = arith.constant dense<0.000000e+00> : vector<256x16xf32>
    %56 = tpu.matmul %43, %55, %cst_29 {dimension_numbers = #tpu.dot_dimension_numbers<[1], [0], [0], [1], [0, 0, 1, 1], [], []>} : vector<256x8xbf16>, vector<8x16xbf16>, vector<256x16xf32> -> vector<256x16xf32>
    %57 = arith.addf %53, %56 : vector<256x16xf32>
    %58 = vector.extract_strided_slice %24 {offsets = [1, 0, 0], sizes = [1, 8, 16], strides = [1, 1, 1]} : vector<3x8x16xbf16> to vector<1x8x16xbf16>
    %59 = vector.shape_cast %58 : vector<1x8x16xbf16> to vector<8x16xbf16>
    %cst_30 = arith.constant dense<0.000000e+00> : vector<256x16xf32>
    %60 = tpu.matmul %27, %59, %cst_30 {dimension_numbers = #tpu.dot_dimension_numbers<[1], [0], [0], [1], [0, 0, 1, 1], [], []>} : vector<256x8xbf16>, vector<8x16xbf16>, vector<256x16xf32> -> vector<256x16xf32>
    %61 = arith.addf %57, %60 : vector<256x16xf32>
    %62 = vector.extract_strided_slice %25 {offsets = [1, 0, 0], sizes = [1, 8, 16], strides = [1, 1, 1]} : vector<3x8x16xbf16> to vector<1x8x16xbf16>
    %63 = vector.shape_cast %62 : vector<1x8x16xbf16> to vector<8x16xbf16>
    %cst_31 = arith.constant dense<0.000000e+00> : vector<256x16xf32>
    %64 = tpu.matmul %28, %63, %cst_31 {dimension_numbers = #tpu.dot_dimension_numbers<[1], [0], [0], [1], [0, 0, 1, 1], [], []>} : vector<256x8xbf16>, vector<8x16xbf16>, vector<256x16xf32> -> vector<256x16xf32>
    %65 = arith.addf %61, %64 : vector<256x16xf32>
    %66 = vector.extract_strided_slice %24 {offsets = [2, 0, 0], sizes = [1, 8, 16], strides = [1, 1, 1]} : vector<3x8x16xbf16> to vector<1x8x16xbf16>
    %67 = vector.shape_cast %66 : vector<1x8x16xbf16> to vector<8x16xbf16>
    %cst_32 = arith.constant dense<0.000000e+00> : vector<256x16xf32>
    %68 = tpu.matmul %38, %67, %cst_32 {dimension_numbers = #tpu.dot_dimension_numbers<[1], [0], [0], [1], [0, 0, 1, 1], [], []>} : vector<256x8xbf16>, vector<8x16xbf16>, vector<256x16xf32> -> vector<256x16xf32>
    %69 = arith.addf %65, %68 : vector<256x16xf32>
    %70 = vector.extract_strided_slice %25 {offsets = [2, 0, 0], sizes = [1, 8, 16], strides = [1, 1, 1]} : vector<3x8x16xbf16> to vector<1x8x16xbf16>
    %71 = vector.shape_cast %70 : vector<1x8x16xbf16> to vector<8x16xbf16>
    %cst_33 = arith.constant dense<0.000000e+00> : vector<256x16xf32>
    %72 = tpu.matmul %48, %71, %cst_33 {dimension_numbers = #tpu.dot_dimension_numbers<[1], [0], [0], [1], [0, 0, 1, 1], [], []>} : vector<256x8xbf16>, vector<8x16xbf16>, vector<256x16xf32> -> vector<256x16xf32>
    %73 = arith.addf %69, %72 : vector<256x16xf32>
    %74 = vector.extract_strided_slice %73 {offsets = [0, 0], sizes = [256, 8], strides = [1, 1]} : vector<256x16xf32> to vector<256x8xf32>
    %75 = vector.extract_strided_slice %73 {offsets = [0, 8], sizes = [256, 8], strides = [1, 1]} : vector<256x16xf32> to vector<256x8xf32>
    %cst_34 = arith.constant 0.000000e+00 : f32
    %76 = vector.broadcast %cst_34 : f32 to vector<16x8xf32>
    %77 = vector.extract_strided_slice %74 {offsets = [0, 0], sizes = [240, 8], strides = [1, 1]} : vector<256x8xf32> to vector<240x8xf32>
    %78 = tpu.concatenate %76, %77 in 0 : vector<16x8xf32>, vector<240x8xf32> -> vector<256x8xf32>
    %79 = arith.addf %78, %75 : vector<256x8xf32>
    %80 = vector.broadcast %26 : vector<1x8xf32> to vector<256x8xf32>
    %81 = arith.addf %79, %80 : vector<256x8xf32>
    %cst_35 = arith.constant 0.000000e+00 : f32
    %82 = vector.broadcast %cst_35 : f32 to vector<256x8xf32>
    %83 = arith.cmpf ogt, %81, %82 : vector<256x8xf32>
    %84 = math.exp %81 : vector<256x8xf32>
    %cst_36 = arith.constant 1.000000e+00 : f32
    %85 = vector.broadcast %cst_36 : f32 to vector<256x8xf32>
    %86 = arith.subf %84, %85 : vector<256x8xf32>
    %87 = arith.select %83, %81, %86 : vector<256x8xi1>, vector<256x8xf32>
    %cst_37 = arith.constant 0.000000e+00 : f32
    %88 = vector.broadcast %cst_37 : f32 to vector<256x8xf32>
    %89 = arith.subf %88, %81 : vector<256x8xf32>
    %cst_38 = arith.constant 0.000000e+00 : f32
    %90 = vector.broadcast %cst_38 : f32 to vector<256x8xf32>
    %91 = arith.cmpf ogt, %89, %90 : vector<256x8xf32>
    %92 = math.exp %89 : vector<256x8xf32>
    %cst_39 = arith.constant 1.000000e+00 : f32
    %93 = vector.broadcast %cst_39 : f32 to vector<256x8xf32>
    %94 = arith.subf %92, %93 : vector<256x8xf32>
    %95 = arith.select %91, %89, %94 : vector<256x8xi1>, vector<256x8xf32>
    %c0_40 = arith.constant 0 : index
    %c0_41 = arith.constant 0 : index
    %c0_42 = arith.constant 0 : index
    %96 = vector.load %arg6[%c0_40, %c0_41, %c0_42] : memref<3x8x32xbf16, #tpu.memory_space<vmem>>, vector<3x8x32xbf16>
    %c0_43 = arith.constant 0 : index
    %c0_44 = arith.constant 0 : index
    %c0_45 = arith.constant 0 : index
    %97 = vector.load %arg7[%c0_43, %c0_44, %c0_45] : memref<3x8x32xbf16, #tpu.memory_space<vmem>>, vector<3x8x32xbf16>
    %c0_46 = arith.constant 0 : index
    %c0_47 = arith.constant 0 : index
    %98 = vector.load %arg8[%c0_46, %c0_47] : memref<1x16xf32, #tpu.memory_space<vmem>>, vector<1x16xf32>
    %99 = arith.truncf %87 : vector<256x8xf32> to vector<256x8xbf16>
    %100 = arith.truncf %95 : vector<256x8xf32> to vector<256x8xbf16>
    %cst_48 = arith.constant 0.000000e+00 : bf16
    %101 = vector.broadcast %cst_48 : bf16 to vector<1x8xbf16>
    %102 = vector.extract_strided_slice %99 {offsets = [0, 0], sizes = [255, 8], strides = [1, 1]} : vector<256x8xbf16> to vector<255x8xbf16>
    %103 = tpu.concatenate %101, %102 in 0 : vector<1x8xbf16>, vector<255x8xbf16> -> vector<256x8xbf16>
    %cst_49 = arith.constant 0.000000e+00 : bf16
    %104 = vector.broadcast %cst_49 : bf16 to vector<256x8xbf16>
    %105 = arith.select %7, %103, %104 : vector<256x8xi1>, vector<256x8xbf16>
    %cst_50 = arith.constant 0.000000e+00 : bf16
    %106 = vector.broadcast %cst_50 : bf16 to vector<1x8xbf16>
    %107 = vector.extract_strided_slice %99 {offsets = [1, 0], sizes = [255, 8], strides = [1, 1]} : vector<256x8xbf16> to vector<255x8xbf16>
    %108 = tpu.concatenate %107, %106 in 0 : vector<255x8xbf16>, vector<1x8xbf16> -> vector<256x8xbf16>
    %cst_51 = arith.constant 0.000000e+00 : bf16
    %109 = vector.broadcast %cst_51 : bf16 to vector<256x8xbf16>
    %110 = arith.select %9, %108, %109 : vector<256x8xi1>, vector<256x8xbf16>
    %cst_52 = arith.constant 0.000000e+00 : bf16
    %111 = vector.broadcast %cst_52 : bf16 to vector<1x8xbf16>
    %112 = vector.extract_strided_slice %100 {offsets = [0, 0], sizes = [255, 8], strides = [1, 1]} : vector<256x8xbf16> to vector<255x8xbf16>
    %113 = tpu.concatenate %111, %112 in 0 : vector<1x8xbf16>, vector<255x8xbf16> -> vector<256x8xbf16>
    %cst_53 = arith.constant 0.000000e+00 : bf16
    %114 = vector.broadcast %cst_53 : bf16 to vector<256x8xbf16>
    %115 = arith.select %7, %113, %114 : vector<256x8xi1>, vector<256x8xbf16>
    %cst_54 = arith.constant 0.000000e+00 : bf16
    %116 = vector.broadcast %cst_54 : bf16 to vector<1x8xbf16>
    %117 = vector.extract_strided_slice %100 {offsets = [1, 0], sizes = [255, 8], strides = [1, 1]} : vector<256x8xbf16> to vector<255x8xbf16>
    %118 = tpu.concatenate %117, %116 in 0 : vector<255x8xbf16>, vector<1x8xbf16> -> vector<256x8xbf16>
    %cst_55 = arith.constant 0.000000e+00 : bf16
    %119 = vector.broadcast %cst_55 : bf16 to vector<256x8xbf16>
    %120 = arith.select %9, %118, %119 : vector<256x8xi1>, vector<256x8xbf16>
    %cst_56 = arith.constant 0.000000e+00 : f32
    %121 = vector.broadcast %cst_56 : f32 to vector<256x32xf32>
    %122 = vector.extract_strided_slice %96 {offsets = [0, 0, 0], sizes = [1, 8, 32], strides = [1, 1, 1]} : vector<3x8x32xbf16> to vector<1x8x32xbf16>
    %123 = vector.shape_cast %122 : vector<1x8x32xbf16> to vector<8x32xbf16>
    %cst_57 = arith.constant dense<0.000000e+00> : vector<256x32xf32>
    %124 = tpu.matmul %105, %123, %cst_57 {dimension_numbers = #tpu.dot_dimension_numbers<[1], [0], [0], [1], [0, 0, 1, 1], [], []>} : vector<256x8xbf16>, vector<8x32xbf16>, vector<256x32xf32> -> vector<256x32xf32>
    %125 = arith.addf %121, %124 : vector<256x32xf32>
    %126 = vector.extract_strided_slice %97 {offsets = [0, 0, 0], sizes = [1, 8, 32], strides = [1, 1, 1]} : vector<3x8x32xbf16> to vector<1x8x32xbf16>
    %127 = vector.shape_cast %126 : vector<1x8x32xbf16> to vector<8x32xbf16>
    %cst_58 = arith.constant dense<0.000000e+00> : vector<256x32xf32>
    %128 = tpu.matmul %115, %127, %cst_58 {dimension_numbers = #tpu.dot_dimension_numbers<[1], [0], [0], [1], [0, 0, 1, 1], [], []>} : vector<256x8xbf16>, vector<8x32xbf16>, vector<256x32xf32> -> vector<256x32xf32>
    %129 = arith.addf %125, %128 : vector<256x32xf32>
    %130 = vector.extract_strided_slice %96 {offsets = [1, 0, 0], sizes = [1, 8, 32], strides = [1, 1, 1]} : vector<3x8x32xbf16> to vector<1x8x32xbf16>
    %131 = vector.shape_cast %130 : vector<1x8x32xbf16> to vector<8x32xbf16>
    %cst_59 = arith.constant dense<0.000000e+00> : vector<256x32xf32>
    %132 = tpu.matmul %99, %131, %cst_59 {dimension_numbers = #tpu.dot_dimension_numbers<[1], [0], [0], [1], [0, 0, 1, 1], [], []>} : vector<256x8xbf16>, vector<8x32xbf16>, vector<256x32xf32> -> vector<256x32xf32>
    %133 = arith.addf %129, %132 : vector<256x32xf32>
    %134 = vector.extract_strided_slice %97 {offsets = [1, 0, 0], sizes = [1, 8, 32], strides = [1, 1, 1]} : vector<3x8x32xbf16> to vector<1x8x32xbf16>
    %135 = vector.shape_cast %134 : vector<1x8x32xbf16> to vector<8x32xbf16>
    %cst_60 = arith.constant dense<0.000000e+00> : vector<256x32xf32>
    %136 = tpu.matmul %100, %135, %cst_60 {dimension_numbers = #tpu.dot_dimension_numbers<[1], [0], [0], [1], [0, 0, 1, 1], [], []>} : vector<256x8xbf16>, vector<8x32xbf16>, vector<256x32xf32> -> vector<256x32xf32>
    %137 = arith.addf %133, %136 : vector<256x32xf32>
    %138 = vector.extract_strided_slice %96 {offsets = [2, 0, 0], sizes = [1, 8, 32], strides = [1, 1, 1]} : vector<3x8x32xbf16> to vector<1x8x32xbf16>
    %139 = vector.shape_cast %138 : vector<1x8x32xbf16> to vector<8x32xbf16>
    %cst_61 = arith.constant dense<0.000000e+00> : vector<256x32xf32>
    %140 = tpu.matmul %110, %139, %cst_61 {dimension_numbers = #tpu.dot_dimension_numbers<[1], [0], [0], [1], [0, 0, 1, 1], [], []>} : vector<256x8xbf16>, vector<8x32xbf16>, vector<256x32xf32> -> vector<256x32xf32>
    %141 = arith.addf %137, %140 : vector<256x32xf32>
    %142 = vector.extract_strided_slice %97 {offsets = [2, 0, 0], sizes = [1, 8, 32], strides = [1, 1, 1]} : vector<3x8x32xbf16> to vector<1x8x32xbf16>
    %143 = vector.shape_cast %142 : vector<1x8x32xbf16> to vector<8x32xbf16>
    %cst_62 = arith.constant dense<0.000000e+00> : vector<256x32xf32>
    %144 = tpu.matmul %120, %143, %cst_62 {dimension_numbers = #tpu.dot_dimension_numbers<[1], [0], [0], [1], [0, 0, 1, 1], [], []>} : vector<256x8xbf16>, vector<8x32xbf16>, vector<256x32xf32> -> vector<256x32xf32>
    %145 = arith.addf %141, %144 : vector<256x32xf32>
    %146 = vector.extract_strided_slice %145 {offsets = [0, 0], sizes = [256, 16], strides = [1, 1]} : vector<256x32xf32> to vector<256x16xf32>
    %147 = vector.extract_strided_slice %145 {offsets = [0, 16], sizes = [256, 16], strides = [1, 1]} : vector<256x32xf32> to vector<256x16xf32>
    %cst_63 = arith.constant 0.000000e+00 : f32
    %148 = vector.broadcast %cst_63 : f32 to vector<16x16xf32>
    %149 = vector.extract_strided_slice %146 {offsets = [0, 0], sizes = [240, 16], strides = [1, 1]} : vector<256x16xf32> to vector<240x16xf32>
    %150 = tpu.concatenate %148, %149 in 0 : vector<16x16xf32>, vector<240x16xf32> -> vector<256x16xf32>
    %151 = arith.addf %150, %147 : vector<256x16xf32>
    %152 = vector.broadcast %98 : vector<1x16xf32> to vector<256x16xf32>
    %153 = arith.addf %151, %152 : vector<256x16xf32>
    %154 = vector.extract_strided_slice %153 {offsets = [0, 0], sizes = [256, 8], strides = [1, 1]} : vector<256x16xf32> to vector<256x8xf32>
    %155 = vector.extract_strided_slice %153 {offsets = [0, 8], sizes = [256, 8], strides = [1, 1]} : vector<256x16xf32> to vector<256x8xf32>
    %cst_64 = arith.constant 0.000000e+00 : f32
    %156 = vector.broadcast %cst_64 : f32 to vector<256x8xf32>
    %157 = arith.subf %156, %155 : vector<256x8xf32>
    %158 = math.exp %157 : vector<256x8xf32>
    %cst_65 = arith.constant 1.000000e+00 : f32
    %159 = vector.broadcast %cst_65 : f32 to vector<256x8xf32>
    %160 = arith.addf %159, %158 : vector<256x8xf32>
    %161 = tpu.reciprocal %160 {approx = true} : vector<256x8xf32> -> vector<256x8xf32>
    %162 = arith.mulf %154, %161 : vector<256x8xf32>
    %163 = arith.addf %1, %162 : vector<256x8xf32>
    %164 = vector.shape_cast %163 : vector<256x8xf32> to vector<1x16x16x8xf32>
    %c0_66 = arith.constant 0 : index
    %c0_67 = arith.constant 0 : index
    %c0_68 = arith.constant 0 : index
    %c0_69 = arith.constant 0 : index
    %165 = vector.load %arg18[%c0_66, %c0_67, %c0_68, %c0_69] : memref<1x16x16x8xf32, #tpu.memory_space<vmem>>, vector<1x16x16x8xf32>
    tpu.vector_store %arg18[%c0_66, %c0_67, %c0_68, %c0_69], %164 {strides = array<i32>} : memref<1x16x16x8xf32, #tpu.memory_space<vmem>>, vector<1x16x16x8xf32>,
    %cst_70 = arith.constant 0.000000e+00 : f32
    %166 = vector.broadcast %cst_70 : f32 to vector<256x8xf32>
    %167 = arith.cmpf ogt, %3, %166 : vector<256x8xf32>
    %168 = math.exp %3 : vector<256x8xf32>
    %cst_71 = arith.constant 1.000000e+00 : f32
    %169 = vector.broadcast %cst_71 : f32 to vector<256x8xf32>
    %170 = arith.subf %168, %169 : vector<256x8xf32>
    %171 = arith.select %167, %3, %170 : vector<256x8xi1>, vector<256x8xf32>
    %cst_72 = arith.constant 0.000000e+00 : f32
    %172 = vector.broadcast %cst_72 : f32 to vector<256x8xf32>
    %173 = arith.subf %172, %3 : vector<256x8xf32>
    %cst_73 = arith.constant 0.000000e+00 : f32
    %174 = vector.broadcast %cst_73 : f32 to vector<256x8xf32>
    %175 = arith.cmpf ogt, %173, %174 : vector<256x8xf32>
    %176 = math.exp %173 : vector<256x8xf32>
    %cst_74 = arith.constant 1.000000e+00 : f32
    %177 = vector.broadcast %cst_74 : f32 to vector<256x8xf32>
    %178 = arith.subf %176, %177 : vector<256x8xf32>
    %179 = arith.select %175, %173, %178 : vector<256x8xi1>, vector<256x8xf32>
    %c0_75 = arith.constant 0 : index
    %c0_76 = arith.constant 0 : index
    %c0_77 = arith.constant 0 : index
    %180 = vector.load %arg9[%c0_75, %c0_76, %c0_77] : memref<2x8x16xbf16, #tpu.memory_space<vmem>>, vector<2x8x16xbf16>
    %c0_78 = arith.constant 0 : index
    %c0_79 = arith.constant 0 : index
    %c0_80 = arith.constant 0 : index
    %181 = vector.load %arg10[%c0_78, %c0_79, %c0_80] : memref<2x8x16xbf16, #tpu.memory_space<vmem>>, vector<2x8x16xbf16>
    %c0_81 = arith.constant 0 : index
    %c0_82 = arith.constant 0 : index
    %182 = vector.load %arg11[%c0_81, %c0_82] : memref<1x8xf32, #tpu.memory_space<vmem>>, vector<1x8xf32>
    %183 = arith.truncf %171 : vector<256x8xf32> to vector<256x8xbf16>
    %184 = arith.truncf %179 : vector<256x8xf32> to vector<256x8xbf16>
    %cst_83 = arith.constant 0.000000e+00 : bf16
    %185 = vector.broadcast %cst_83 : bf16 to vector<1x8xbf16>
    %186 = vector.extract_strided_slice %183 {offsets = [0, 0], sizes = [255, 8], strides = [1, 1]} : vector<256x8xbf16> to vector<255x8xbf16>
    %187 = tpu.concatenate %185, %186 in 0 : vector<1x8xbf16>, vector<255x8xbf16> -> vector<256x8xbf16>
    %cst_84 = arith.constant 0.000000e+00 : bf16
    %188 = vector.broadcast %cst_84 : bf16 to vector<256x8xbf16>
    %189 = arith.select %7, %187, %188 : vector<256x8xi1>, vector<256x8xbf16>
    %cst_85 = arith.constant 0.000000e+00 : bf16
    %190 = vector.broadcast %cst_85 : bf16 to vector<1x8xbf16>
    %191 = vector.extract_strided_slice %184 {offsets = [0, 0], sizes = [255, 8], strides = [1, 1]} : vector<256x8xbf16> to vector<255x8xbf16>
    %192 = tpu.concatenate %190, %191 in 0 : vector<1x8xbf16>, vector<255x8xbf16> -> vector<256x8xbf16>
    %cst_86 = arith.constant 0.000000e+00 : bf16
    %193 = vector.broadcast %cst_86 : bf16 to vector<256x8xbf16>
    %194 = arith.select %7, %192, %193 : vector<256x8xi1>, vector<256x8xbf16>
    %cst_87 = arith.constant 0.000000e+00 : f32
    %195 = vector.broadcast %cst_87 : f32 to vector<256x16xf32>
    %196 = vector.extract_strided_slice %180 {offsets = [0, 0, 0], sizes = [1, 8, 16], strides = [1, 1, 1]} : vector<2x8x16xbf16> to vector<1x8x16xbf16>
    %197 = vector.shape_cast %196 : vector<1x8x16xbf16> to vector<8x16xbf16>
    %cst_88 = arith.constant dense<0.000000e+00> : vector<256x16xf32>
    %198 = tpu.matmul %189, %197, %cst_88 {dimension_numbers = #tpu.dot_dimension_numbers<[1], [0], [0], [1], [0, 0, 1, 1], [], []>} : vector<256x8xbf16>, vector<8x16xbf16>, vector<256x16xf32> -> vector<256x16xf32>
    %199 = arith.addf %195, %198 : vector<256x16xf32>
    %200 = vector.extract_strided_slice %181 {offsets = [0, 0, 0], sizes = [1, 8, 16], strides = [1, 1, 1]} : vector<2x8x16xbf16> to vector<1x8x16xbf16>
    %201 = vector.shape_cast %200 : vector<1x8x16xbf16> to vector<8x16xbf16>
    %cst_89 = arith.constant dense<0.000000e+00> : vector<256x16xf32>
    %202 = tpu.matmul %194, %201, %cst_89 {dimension_numbers = #tpu.dot_dimension_numbers<[1], [0], [0], [1], [0, 0, 1, 1], [], []>} : vector<256x8xbf16>, vector<8x16xbf16>, vector<256x16xf32> -> vector<256x16xf32>
    %203 = arith.addf %199, %202 : vector<256x16xf32>
    %204 = vector.extract_strided_slice %180 {offsets = [1, 0, 0], sizes = [1, 8, 16], strides = [1, 1, 1]} : vector<2x8x16xbf16> to vector<1x8x16xbf16>
    %205 = vector.shape_cast %204 : vector<1x8x16xbf16> to vector<8x16xbf16>
    %cst_90 = arith.constant dense<0.000000e+00> : vector<256x16xf32>
    %206 = tpu.matmul %183, %205, %cst_90 {dimension_numbers = #tpu.dot_dimension_numbers<[1], [0], [0], [1], [0, 0, 1, 1], [], []>} : vector<256x8xbf16>, vector<8x16xbf16>, vector<256x16xf32> -> vector<256x16xf32>
    %207 = arith.addf %203, %206 : vector<256x16xf32>
    %208 = vector.extract_strided_slice %181 {offsets = [1, 0, 0], sizes = [1, 8, 16], strides = [1, 1, 1]} : vector<2x8x16xbf16> to vector<1x8x16xbf16>
    %209 = vector.shape_cast %208 : vector<1x8x16xbf16> to vector<8x16xbf16>
    %cst_91 = arith.constant dense<0.000000e+00> : vector<256x16xf32>
    %210 = tpu.matmul %184, %209, %cst_91 {dimension_numbers = #tpu.dot_dimension_numbers<[1], [0], [0], [1], [0, 0, 1, 1], [], []>} : vector<256x8xbf16>, vector<8x16xbf16>, vector<256x16xf32> -> vector<256x16xf32>
    %211 = arith.addf %207, %210 : vector<256x16xf32>
    %212 = vector.extract_strided_slice %211 {offsets = [0, 0], sizes = [256, 8], strides = [1, 1]} : vector<256x16xf32> to vector<256x8xf32>
    %213 = vector.extract_strided_slice %211 {offsets = [0, 8], sizes = [256, 8], strides = [1, 1]} : vector<256x16xf32> to vector<256x8xf32>
    %cst_92 = arith.constant 0.000000e+00 : f32
    %214 = vector.broadcast %cst_92 : f32 to vector<16x8xf32>
    %215 = vector.extract_strided_slice %212 {offsets = [0, 0], sizes = [240, 8], strides = [1, 1]} : vector<256x8xf32> to vector<240x8xf32>
    %216 = tpu.concatenate %214, %215 in 0 : vector<16x8xf32>, vector<240x8xf32> -> vector<256x8xf32>
    %217 = arith.addf %216, %213 : vector<256x8xf32>
    %218 = vector.broadcast %182 : vector<1x8xf32> to vector<256x8xf32>
    %219 = arith.addf %217, %218 : vector<256x8xf32>
    %cst_93 = arith.constant 0.000000e+00 : f32
    %220 = vector.broadcast %cst_93 : f32 to vector<256x8xf32>
    %221 = arith.cmpf ogt, %163, %220 : vector<256x8xf32>
    %222 = math.exp %163 : vector<256x8xf32>
    %cst_94 = arith.constant 1.000000e+00 : f32
    %223 = vector.broadcast %cst_94 : f32 to vector<256x8xf32>
    %224 = arith.subf %222, %223 : vector<256x8xf32>
    %225 = arith.select %221, %163, %224 : vector<256x8xi1>, vector<256x8xf32>
    %226 = arith.truncf %225 : vector<256x8xf32> to vector<256x8xbf16>
    %cst_95 = arith.constant 0.000000e+00 : f32
    %227 = vector.broadcast %cst_95 : f32 to vector<256x8xf32>
    %228 = arith.subf %227, %163 : vector<256x8xf32>
    %cst_96 = arith.constant 0.000000e+00 : f32
    %229 = vector.broadcast %cst_96 : f32 to vector<256x8xf32>
    %230 = arith.cmpf ogt, %228, %229 : vector<256x8xf32>
    %231 = math.exp %228 : vector<256x8xf32>
    %cst_97 = arith.constant 1.000000e+00 : f32
    %232 = vector.broadcast %cst_97 : f32 to vector<256x8xf32>
    %233 = arith.subf %231, %232 : vector<256x8xf32>
    %234 = arith.select %230, %228, %233 : vector<256x8xi1>, vector<256x8xf32>
    %235 = arith.truncf %234 : vector<256x8xf32> to vector<256x8xbf16>
    %c0_98 = arith.constant 0 : index
    %c0_99 = arith.constant 0 : index
    %236 = vector.load %arg12[%c0_98, %c0_99] : memref<8x8xbf16, #tpu.memory_space<vmem>>, vector<8x8xbf16>
    %cst_100 = arith.constant dense<0.000000e+00> : vector<256x8xf32>
    %237 = tpu.matmul %226, %236, %cst_100 {dimension_numbers = #tpu.dot_dimension_numbers<[1], [0], [0], [1], [0, 0, 1, 1], [], []>} : vector<256x8xbf16>, vector<8x8xbf16>, vector<256x8xf32> -> vector<256x8xf32>
    %c0_101 = arith.constant 0 : index
    %c0_102 = arith.constant 0 : index
    %238 = vector.load %arg13[%c0_101, %c0_102] : memref<8x8xbf16, #tpu.memory_space<vmem>>, vector<8x8xbf16>
    %cst_103 = arith.constant dense<0.000000e+00> : vector<256x8xf32>
    %239 = tpu.matmul %235, %238, %cst_103 {dimension_numbers = #tpu.dot_dimension_numbers<[1], [0], [0], [1], [0, 0, 1, 1], [], []>} : vector<256x8xbf16>, vector<8x8xbf16>, vector<256x8xf32> -> vector<256x8xf32>
    %240 = arith.addf %237, %239 : vector<256x8xf32>
    %c0_104 = arith.constant 0 : index
    %c0_105 = arith.constant 0 : index
    %241 = vector.load %arg14[%c0_104, %c0_105] : memref<1x8xf32, #tpu.memory_space<vmem>>, vector<1x8xf32>
    %242 = vector.broadcast %241 : vector<1x8xf32> to vector<256x8xf32>
    %243 = arith.addf %240, %242 : vector<256x8xf32>
    %244 = arith.addf %219, %243 : vector<256x8xf32>
    %cst_106 = arith.constant 0.000000e+00 : f32
    %245 = vector.broadcast %cst_106 : f32 to vector<256x8xf32>
    %246 = arith.cmpf ogt, %244, %245 : vector<256x8xf32>
    %247 = math.exp %244 : vector<256x8xf32>
    %cst_107 = arith.constant 1.000000e+00 : f32
    %248 = vector.broadcast %cst_107 : f32 to vector<256x8xf32>
    %249 = arith.subf %247, %248 : vector<256x8xf32>
    %250 = arith.select %246, %244, %249 : vector<256x8xi1>, vector<256x8xf32>
    %cst_108 = arith.constant 0.000000e+00 : f32
    %251 = vector.broadcast %cst_108 : f32 to vector<256x8xf32>
    %252 = arith.subf %251, %244 : vector<256x8xf32>
    %cst_109 = arith.constant 0.000000e+00 : f32
    %253 = vector.broadcast %cst_109 : f32 to vector<256x8xf32>
    %254 = arith.cmpf ogt, %252, %253 : vector<256x8xf32>
    %255 = math.exp %252 : vector<256x8xf32>
    %cst_110 = arith.constant 1.000000e+00 : f32
    %256 = vector.broadcast %cst_110 : f32 to vector<256x8xf32>
    %257 = arith.subf %255, %256 : vector<256x8xf32>
    %258 = arith.select %254, %252, %257 : vector<256x8xi1>, vector<256x8xf32>
    %c0_111 = arith.constant 0 : index
    %c0_112 = arith.constant 0 : index
    %c0_113 = arith.constant 0 : index
    %259 = vector.load %arg15[%c0_111, %c0_112, %c0_113] : memref<2x8x32xbf16, #tpu.memory_space<vmem>>, vector<2x8x32xbf16>
    %c0_114 = arith.constant 0 : index
    %c0_115 = arith.constant 0 : index
    %c0_116 = arith.constant 0 : index
    %260 = vector.load %arg16[%c0_114, %c0_115, %c0_116] : memref<2x8x32xbf16, #tpu.memory_space<vmem>>, vector<2x8x32xbf16>
    %c0_117 = arith.constant 0 : index
    %c0_118 = arith.constant 0 : index
    %261 = vector.load %arg17[%c0_117, %c0_118] : memref<1x16xf32, #tpu.memory_space<vmem>>, vector<1x16xf32>
    %262 = arith.truncf %250 : vector<256x8xf32> to vector<256x8xbf16>
    %263 = arith.truncf %258 : vector<256x8xf32> to vector<256x8xbf16>
    %cst_119 = arith.constant 0.000000e+00 : bf16
    %264 = vector.broadcast %cst_119 : bf16 to vector<1x8xbf16>
    %265 = vector.extract_strided_slice %262 {offsets = [0, 0], sizes = [255, 8], strides = [1, 1]} : vector<256x8xbf16> to vector<255x8xbf16>
    %266 = tpu.concatenate %264, %265 in 0 : vector<1x8xbf16>, vector<255x8xbf16> -> vector<256x8xbf16>
    %cst_120 = arith.constant 0.000000e+00 : bf16
    %267 = vector.broadcast %cst_120 : bf16 to vector<256x8xbf16>
    %268 = arith.select %7, %266, %267 : vector<256x8xi1>, vector<256x8xbf16>
    %cst_121 = arith.constant 0.000000e+00 : bf16
    %269 = vector.broadcast %cst_121 : bf16 to vector<1x8xbf16>
    %270 = vector.extract_strided_slice %263 {offsets = [0, 0], sizes = [255, 8], strides = [1, 1]} : vector<256x8xbf16> to vector<255x8xbf16>
    %271 = tpu.concatenate %269, %270 in 0 : vector<1x8xbf16>, vector<255x8xbf16> -> vector<256x8xbf16>
    %cst_122 = arith.constant 0.000000e+00 : bf16
    %272 = vector.broadcast %cst_122 : bf16 to vector<256x8xbf16>
    %273 = arith.select %7, %271, %272 : vector<256x8xi1>, vector<256x8xbf16>
    %cst_123 = arith.constant 0.000000e+00 : f32
    %274 = vector.broadcast %cst_123 : f32 to vector<256x32xf32>
    %275 = vector.extract_strided_slice %259 {offsets = [0, 0, 0], sizes = [1, 8, 32], strides = [1, 1, 1]} : vector<2x8x32xbf16> to vector<1x8x32xbf16>
    %276 = vector.shape_cast %275 : vector<1x8x32xbf16> to vector<8x32xbf16>
    %cst_124 = arith.constant dense<0.000000e+00> : vector<256x32xf32>
    %277 = tpu.matmul %268, %276, %cst_124 {dimension_numbers = #tpu.dot_dimension_numbers<[1], [0], [0], [1], [0, 0, 1, 1], [], []>} : vector<256x8xbf16>, vector<8x32xbf16>, vector<256x32xf32> -> vector<256x32xf32>
    %278 = arith.addf %274, %277 : vector<256x32xf32>
    %279 = vector.extract_strided_slice %260 {offsets = [0, 0, 0], sizes = [1, 8, 32], strides = [1, 1, 1]} : vector<2x8x32xbf16> to vector<1x8x32xbf16>
    %280 = vector.shape_cast %279 : vector<1x8x32xbf16> to vector<8x32xbf16>
    %cst_125 = arith.constant dense<0.000000e+00> : vector<256x32xf32>
    %281 = tpu.matmul %273, %280, %cst_125 {dimension_numbers = #tpu.dot_dimension_numbers<[1], [0], [0], [1], [0, 0, 1, 1], [], []>} : vector<256x8xbf16>, vector<8x32xbf16>, vector<256x32xf32> -> vector<256x32xf32>
    %282 = arith.addf %278, %281 : vector<256x32xf32>
    %283 = vector.extract_strided_slice %259 {offsets = [1, 0, 0], sizes = [1, 8, 32], strides = [1, 1, 1]} : vector<2x8x32xbf16> to vector<1x8x32xbf16>
    %284 = vector.shape_cast %283 : vector<1x8x32xbf16> to vector<8x32xbf16>
    %cst_126 = arith.constant dense<0.000000e+00> : vector<256x32xf32>
    %285 = tpu.matmul %262, %284, %cst_126 {dimension_numbers = #tpu.dot_dimension_numbers<[1], [0], [0], [1], [0, 0, 1, 1], [], []>} : vector<256x8xbf16>, vector<8x32xbf16>, vector<256x32xf32> -> vector<256x32xf32>
    %286 = arith.addf %282, %285 : vector<256x32xf32>
    %287 = vector.extract_strided_slice %260 {offsets = [1, 0, 0], sizes = [1, 8, 32], strides = [1, 1, 1]} : vector<2x8x32xbf16> to vector<1x8x32xbf16>
    %288 = vector.shape_cast %287 : vector<1x8x32xbf16> to vector<8x32xbf16>
    %cst_127 = arith.constant dense<0.000000e+00> : vector<256x32xf32>
    %289 = tpu.matmul %263, %288, %cst_127 {dimension_numbers = #tpu.dot_dimension_numbers<[1], [0], [0], [1], [0, 0, 1, 1], [], []>} : vector<256x8xbf16>, vector<8x32xbf16>, vector<256x32xf32> -> vector<256x32xf32>
    %290 = arith.addf %286, %289 : vector<256x32xf32>
    %291 = vector.extract_strided_slice %290 {offsets = [0, 0], sizes = [256, 16], strides = [1, 1]} : vector<256x32xf32> to vector<256x16xf32>
    %292 = vector.extract_strided_slice %290 {offsets = [0, 16], sizes = [256, 16], strides = [1, 1]} : vector<256x32xf32> to vector<256x16xf32>
    %cst_128 = arith.constant 0.000000e+00 : f32
    %293 = vector.broadcast %cst_128 : f32 to vector<16x16xf32>
    %294 = vector.extract_strided_slice %291 {offsets = [0, 0], sizes = [240, 16], strides = [1, 1]} : vector<256x16xf32> to vector<240x16xf32>
    %295 = tpu.concatenate %293, %294 in 0 : vector<16x16xf32>, vector<240x16xf32> -> vector<256x16xf32>
    %296 = arith.addf %295, %292 : vector<256x16xf32>
    %297 = vector.broadcast %261 : vector<1x16xf32> to vector<256x16xf32>
    %298 = arith.addf %296, %297 : vector<256x16xf32>
    %299 = vector.extract_strided_slice %298 {offsets = [0, 0], sizes = [256, 8], strides = [1, 1]} : vector<256x16xf32> to vector<256x8xf32>
    %300 = vector.extract_strided_slice %298 {offsets = [0, 8], sizes = [256, 8], strides = [1, 1]} : vector<256x16xf32> to vector<256x8xf32>
    %cst_129 = arith.constant 0.000000e+00 : f32
    %301 = vector.broadcast %cst_129 : f32 to vector<256x8xf32>
    %302 = arith.subf %301, %300 : vector<256x8xf32>
    %303 = math.exp %302 : vector<256x8xf32>
    %cst_130 = arith.constant 1.000000e+00 : f32
    %304 = vector.broadcast %cst_130 : f32 to vector<256x8xf32>
    %305 = arith.addf %304, %303 : vector<256x8xf32>
    %306 = tpu.reciprocal %305 {approx = true} : vector<256x8xf32> -> vector<256x8xf32>
    %307 = arith.mulf %299, %306 : vector<256x8xf32>
    %308 = arith.addf %3, %307 : vector<256x8xf32>
    %309 = vector.shape_cast %308 : vector<256x8xf32> to vector<1x16x16x8xf32>
    %c0_131 = arith.constant 0 : index
    %c0_132 = arith.constant 0 : index
    %c0_133 = arith.constant 0 : index
    %c0_134 = arith.constant 0 : index
    %310 = vector.load %arg19[%c0_131, %c0_132, %c0_133, %c0_134] : memref<1x16x16x8xf32, #tpu.memory_space<vmem>>, vector<1x16x16x8xf32>
    tpu.vector_store %arg19[%c0_131, %c0_132, %c0_133, %c0_134], %309 {strides = array<i32>} : memref<1x16x16x8xf32, #tpu.memory_space<vmem>>, vector<1x16x16x8xf32>,
    return
  }
  func.func @transform_0(%arg0: i32) -> (i32, i32, i32, i32) {
    %c0_i32 = arith.constant 0 : i32
    %c0_i32_0 = arith.constant 0 : i32
    %c0_i32_1 = arith.constant 0 : i32
    %c0_i32_2 = arith.constant 0 : i32
    return %arg0, %c0_i32, %c0_i32_0, %c0_i32_1 : i32, i32, i32, i32
  }
  func.func @transform_1(%arg0: i32) -> (i32, i32, i32, i32) {
    %c0_i32 = arith.constant 0 : i32
    %c0_i32_0 = arith.constant 0 : i32
    %c0_i32_1 = arith.constant 0 : i32
    %c0_i32_2 = arith.constant 0 : i32
    return %arg0, %c0_i32, %c0_i32_0, %c0_i32_1 : i32, i32, i32, i32
  }
  func.func @transform_2(%arg0: i32) -> (i32, i32, i32) {
    %c0_i32 = arith.constant 0 : i32
    %c0_i32_0 = arith.constant 0 : i32
    %c0_i32_1 = arith.constant 0 : i32
    %c0_i32_2 = arith.constant 0 : i32
    return %c0_i32, %c0_i32_0, %c0_i32_1 : i32, i32, i32
  }
  func.func @transform_3(%arg0: i32) -> (i32, i32, i32) {
    %c0_i32 = arith.constant 0 : i32
    %c0_i32_0 = arith.constant 0 : i32
    %c0_i32_1 = arith.constant 0 : i32
    %c0_i32_2 = arith.constant 0 : i32
    return %c0_i32, %c0_i32_0, %c0_i32_1 : i32, i32, i32
  }
  func.func @transform_4(%arg0: i32) -> (i32, i32) {
    %c0_i32 = arith.constant 0 : i32
    %c0_i32_0 = arith.constant 0 : i32
    %c0_i32_1 = arith.constant 0 : i32
    return %c0_i32, %c0_i32_0 : i32, i32
  }
  func.func @transform_5(%arg0: i32) -> (i32, i32, i32) {
    %c0_i32 = arith.constant 0 : i32
    %c0_i32_0 = arith.constant 0 : i32
    %c0_i32_1 = arith.constant 0 : i32
    %c0_i32_2 = arith.constant 0 : i32
    return %c0_i32, %c0_i32_0, %c0_i32_1 : i32, i32, i32
  }
  func.func @transform_6(%arg0: i32) -> (i32, i32, i32) {
    %c0_i32 = arith.constant 0 : i32
    %c0_i32_0 = arith.constant 0 : i32
    %c0_i32_1 = arith.constant 0 : i32
    %c0_i32_2 = arith.constant 0 : i32
    return %c0_i32, %c0_i32_0, %c0_i32_1 : i32, i32, i32
  }
  func.func @transform_7(%arg0: i32) -> (i32, i32) {
    %c0_i32 = arith.constant 0 : i32
    %c0_i32_0 = arith.constant 0 : i32
    %c0_i32_1 = arith.constant 0 : i32
    return %c0_i32, %c0_i32_0 : i32, i32
  }
  func.func @transform_8(%arg0: i32) -> (i32, i32, i32) {
    %c0_i32 = arith.constant 0 : i32
    %c0_i32_0 = arith.constant 0 : i32
    %c0_i32_1 = arith.constant 0 : i32
    %c0_i32_2 = arith.constant 0 : i32
    return %c0_i32, %c0_i32_0, %c0_i32_1 : i32, i32, i32
  }
  func.func @transform_9(%arg0: i32) -> (i32, i32, i32) {
    %c0_i32 = arith.constant 0 : i32
    %c0_i32_0 = arith.constant 0 : i32
    %c0_i32_1 = arith.constant 0 : i32
    %c0_i32_2 = arith.constant 0 : i32
    return %c0_i32, %c0_i32_0, %c0_i32_1 : i32, i32, i32
  }
  func.func @transform_10(%arg0: i32) -> (i32, i32) {
    %c0_i32 = arith.constant 0 : i32
    %c0_i32_0 = arith.constant 0 : i32
    %c0_i32_1 = arith.constant 0 : i32
    return %c0_i32, %c0_i32_0 : i32, i32
  }
  func.func @transform_11(%arg0: i32) -> (i32, i32) {
    %c0_i32 = arith.constant 0 : i32
    %c0_i32_0 = arith.constant 0 : i32
    %c0_i32_1 = arith.constant 0 : i32
    return %c0_i32, %c0_i32_0 : i32, i32
  }
  func.func @transform_12(%arg0: i32) -> (i32, i32) {
    %c0_i32 = arith.constant 0 : i32
    %c0_i32_0 = arith.constant 0 : i32
    %c0_i32_1 = arith.constant 0 : i32
    return %c0_i32, %c0_i32_0 : i32, i32
  }
  func.func @transform_13(%arg0: i32) -> (i32, i32) {
    %c0_i32 = arith.constant 0 : i32
    %c0_i32_0 = arith.constant 0 : i32
    %c0_i32_1 = arith.constant 0 : i32
    return %c0_i32, %c0_i32_0 : i32, i32
  }
  func.func @transform_14(%arg0: i32) -> (i32, i32, i32) {
    %c0_i32 = arith.constant 0 : i32
    %c0_i32_0 = arith.constant 0 : i32
    %c0_i32_1 = arith.constant 0 : i32
    %c0_i32_2 = arith.constant 0 : i32
    return %c0_i32, %c0_i32_0, %c0_i32_1 : i32, i32, i32
  }
  func.func @transform_15(%arg0: i32) -> (i32, i32, i32) {
    %c0_i32 = arith.constant 0 : i32
    %c0_i32_0 = arith.constant 0 : i32
    %c0_i32_1 = arith.constant 0 : i32
    %c0_i32_2 = arith.constant 0 : i32
    return %c0_i32, %c0_i32_0, %c0_i32_1 : i32, i32, i32
  }
  func.func @transform_16(%arg0: i32) -> (i32, i32) {
    %c0_i32 = arith.constant 0 : i32
    %c0_i32_0 = arith.constant 0 : i32
    %c0_i32_1 = arith.constant 0 : i32
    return %c0_i32, %c0_i32_0 : i32, i32
  }
  func.func @transform_17(%arg0: i32) -> (i32, i32, i32, i32) {
    %c0_i32 = arith.constant 0 : i32
    %c0_i32_0 = arith.constant 0 : i32
    %c0_i32_1 = arith.constant 0 : i32
    %c0_i32_2 = arith.constant 0 : i32
    return %arg0, %c0_i32, %c0_i32_0, %c0_i32_1 : i32, i32, i32, i32
  }
  func.func @transform_18(%arg0: i32) -> (i32, i32, i32, i32) {
    %c0_i32 = arith.constant 0 : i32
    %c0_i32_0 = arith.constant 0 : i32
    %c0_i32_1 = arith.constant 0 : i32
    %c0_i32_2 = arith.constant 0 : i32
    return %arg0, %c0_i32, %c0_i32_0, %c0_i32_1 : i32, i32, i32, i32
  }
}

</mosaic_0001>

<bundles_post_ra>
// kernel: pixelcnn_layer_up.2
= control target key start
LH: loop header
LB: loop body
LE: loop exit
PB: predicated region body
PF: predicated region fallthrough
CT: control target
= control target key end

     0   :  { %s11875_s27 = smov 0   ;;  %s18381_s0 = inlined_call_operand.vmem [shape: f32[2,16,16,8], index: 0, kind: input, shape index: {}]   ;;  %s18382_s1 = inlined_call_operand.vmem [shape: f32[2,16,16,8], index: 1, kind: input, shape index: {}]   ;;  %s18383_s2 = inlined_call_operand.vmem [shape: bf16[3,8,16], index: 2, kind: input, shape index: {}]   ;;  %s18384_s3 = inlined_call_operand.vmem [shape: bf16[3,8,16], index: 3, kind: input, shape index: {}]   ;;  %s18385_s4 = inlined_call_operand.vmem [shape: f32[1,8], index: 4, kind: input, shape index: {}]   ;;  %s18386_s5 = inlined_call_operand.vmem [shape: bf16[3,8,32], index: 5, kind: input, shape index: {}]   ;;  %s18387_s6 = inlined_call_operand.vmem [shape: bf16[3,8,32], index: 6, kind: input, shape index: {}]   ;;  %s18388_s7 = inlined_call_operand.vmem [shape: f32[1,16], index: 7, kind: input, shape index: {}]   ;;  %s18389_s8 = inlined_call_operand.vmem [shape: bf16[2,8,16], index: 8, kind: input, shape index: {}]   ;;  %s18390_s9 = inlined_call_operand.vmem [shape: bf16[2,8,16], index: 9, kind: input, shape index: {}]   ;;  %s18391_s10 = inlined_call_operand.vmem [shape: f32[1,8], index: 10, kind: input, shape index: {}]   ;;  %s18392_s11 = inlined_call_operand.vmem [shape: bf16[8,8], index: 11, kind: input, shape index: {}]   ;;  %s18393_s12 = inlined_call_operand.vmem [shape: bf16[8,8], index: 12, kind: input, shape index: {}]   ;;  %s18394_s13 = inlined_call_operand.vmem [shape: f32[1,8], index: 13, kind: input, shape index: {}]   ;;  %s18395_s14 = inlined_call_operand.vmem [shape: bf16[2,8,32], index: 14, kind: input, shape index: {}]   ;;  %s18396_s15 = inlined_call_operand.vmem [shape: bf16[2,8,32], index: 15, kind: input, shape index: {}]   ;;  %s18397_s16 = inlined_call_operand.vmem [shape: f32[1,16], index: 16, kind: input, shape index: {}]   ;;  %s18398_s17 = inlined_call_operand.vmem [shape: f32[2,16,16,8], index: 17, kind: output, shape index: {0}]   ;;  %s18399_s18 = inlined_call_operand.vmem [shape: f32[2,16,16,8], index: 18, kind: output, shape index: {1}]  }
   0x1   :  { %18535 = sst [smem:[#allocation82_spill]] %s18381_s0 }
   0x2   :  { %18536 = sst [smem:[#allocation83_spill]] %s18382_s1 }
   0x3   :  { %18537 = sst [smem:[#allocation84_spill]] %s18383_s2 }
   0x4 LB: > { %s10085_s28 = sadd.s32 4294967295, %s11774_s27   ;;  %p10089_p0 = scmp.ge.s32.totalorder %s11774_s27, 1  ;;  %s11774_s27 = sphi %s11875_s27, %s29_s27  }
   0x5   : > { %p525_p1 = scmp.lt.s32.totalorder %s11774_s27, 3 }
   0x7   : > { %p526_p2 = pnand %p10089_p0, %p525_p1 }
   0x9   : > { %529 = sbr.rel (%p526_p2) target bundleno = 2292 (0x8f4), region = 88 }
   0xe   : > { %s18538_s0 = sld [smem:[#allocation84_spill]]  ;;  %vm1829_vm0 = vcmask 1043456   ;;  %v1038_v1 = vld [vmem:[%s18384_s3] sm:$0xf]  ;;  %p589_p3 = scmp.lt.s32.totalorder %s10085_s28, 1  ;;  %v676_v2 = vlaneseq  ;;  %vm11776_vm1 = vmmov 1  }
   0xf   : > { %v1831_v4 = vsel %vm1829_vm0, %v1038_v1, 0  ;;  %vm1334_vm2 = vmpackc.low %vm11776_vm1, %vm11776_vm1  ;;  %v18455_v6 = vmov 0   ;;  %s18539_s2 = sld [smem:[#allocation82_spill]]  ;;  %v1039_v1 = vld [vmem:[%s18384_s3 + $0x4] sm:$0xf]  ;;  %s11778_s25 = smov 120  }
  0x10   : > { %10780 = vmatpush.bf16.msra.mxu2 %v1831_v4  ;;  %s18988_s28 = smov (!%p589_p3, %s10085_s28), 1  ;;  %v11891_v5 = vshrl.u32 %v676_v2, 7  ;;  %v1336_v7 = vsel %vm1334_vm2, 65537, %v18455_v6  ;;  %1840 = vmatpush.bf16.msra.mxu0 %v1831_v4  ;;  %v11914_v17 = vunpack.c.l.b16 %v18455_v6  ;;  %v11918_v19 = vunpack.c.h.b16 %v18455_v6  ;;  %s18689_s26 = sld [smem:[#allocation83_spill]] }
  0x11   : > { %s11894_s20 = sshll.u32 %s18988_s28, 8  ;;  %v1338_v11 = vunpack.c.l.b16 %v1336_v7  ;;  %s11779_s29 = smov 112  }
  0x12   : > { %vm679_vm3 = vcmp.gt.s32.totalorder %v11891_v5, 0  ;;  %s15763_s22 = scalar_lea.vmem %s18398_s17, %s11894_s20  ;;  %s18149_s30 = scalar_lea.vmem %s18399_s18, %s11894_s20 }
  0x13   : > { %vm1333_vm4 = vmpackc.low %vm679_vm3, %vm679_vm3  ;;  %v11922_v21 = vunpack.i.l.s16 %v1338_v11 }
  0x14   : > { %v1035_v0 = vld [vmem:[%s18538_s0] sm:$0xf]  ;;  %v1335_v16 = vsel %vm1333_vm4, 65537, %v18455_v6  ;;  %v1036_v28 = vld [vmem:[%s18538_s0 + $0x4] sm:$0xf] }
  0x15   : > { %v1971_v3 = vsel %vm1829_vm0, %v1035_v0, 0  ;;  %s11901_s23 = scalar_lea.vmem %s18539_s2, %s11894_s20  ;;  %v1337_v25 = vunpack.c.l.b16 %v1335_v16  ;;  %v2095_v33 = vsel %vm1829_vm0, %v1036_v28, 0  ;;  %vm1345_vm1 = vcmp.ne.s32.totalorder %v11922_v21, %v11918_v19 }
  0x16   : > { %10781 = vmatpush.bf16.msra.mxu3 %v1971_v3  ;;  %1980 = vmatpush.bf16.msra.mxu1 %v1971_v3  ;;  %v626_v8 = vld [vmem:[%s11901_s23 + $0x70] sm:$0xff]  ;;  %v627_v9 = vld [vmem:[%s11901_s23 + $0x78] sm:$0xff]  ;;  %v11906_v10 = vld [vmem:[%s11901_s23 + $0x80] sm:$0xff]  ;;  %vm1186_vm4 = vsmask.f32 256  ;;  %v2251_v16 = vsel %vm1829_vm0, %v1039_v1, 0  ;;  %s14763_s28 = scalar_lea.vmem %s18689_s26, %s11894_s20 }
  0x17   : > { %v11909_v12 = vld [vmem:[%s11901_s23 + $0x88] sm:$0xff]  ;;  %v743_v13 = vmul.f32 1.442695, %v626_v8  ;;  %v745_v14 = vmul.f32 1.442695, %v627_v9  ;;  %v11920_v20 = vsub.f32 0.0, %v626_v8  ;;  %v11954_v37 = vunpack.i.l.s16 %v1337_v25  ;;  %2104 = vmatpush.bf16.msrb.mxu2 %v2095_v33 }
  0x18   : > { %v747_v15 = vmul.f32 1.442695, %v11906_v10  ;;  %v749_v18 = vmul.f32 1.442695, %v11909_v12  ;;  %v11924_v22 = vsub.f32 0.0, %v627_v9  ;;  %v11927_v23 = vsub.f32 0.0, %v11906_v10 }
  0x19   : > { %10799 = vpow2.f32 %v743_v13  ;;  %v11930_v24 = vld [vmem:[%s11901_s23] sm:$0xff]  ;;  %v11933_v26 = vsub.f32 0.0, %v11909_v12  ;;  %v935_v27 = vmul.f32 1.442695, %v11920_v20  ;;  %v11940_v29 = vld [vmem:[%s11901_s23 + $0x8] sm:$0xff]  ;;  %vm697_vm5 = vcmp.gt.f32.partialorder %v626_v8, 0.0 }
  0x1a   : > { %10801 = vpow2.f32 %v745_v14  ;;  %vm698_vm6 = vcmp.gt.f32.partialorder %v627_v9, 0.0  ;;  %vm699_vm7 = vcmp.gt.f32.partialorder %v11906_v10, 0.0  ;;  %vm700_vm8 = vcmp.gt.f32.partialorder %v11909_v12, 0.0  ;;  %2260 = vmatpush.bf16.msrb.mxu3 %v2251_v16 }
  0x1b   : > { %10803 = vpow2.f32 %v747_v15  ;;  %v937_v30 = vmul.f32 1.442695, %v11924_v22  ;;  %v939_v31 = vmul.f32 1.442695, %v11927_v23  ;;  %v941_v32 = vmul.f32 1.442695, %v11933_v26 }
  0x1c   : > { %10805 = vpow2.f32 %v749_v18  ;;  %v11949_v34 = vsub.f32 0.0, %v11930_v24  ;;  %v11952_v35 = vsub.f32 0.0, %v11940_v29  ;;  %vm889_vm9 = vcmp.gt.f32.partialorder %v11920_v20, 0.0 }
  0x1d   : > { %10807 = vpow2.f32 %v935_v27  ;;  %vm890_vm10 = vcmp.gt.f32.partialorder %v11924_v22, 0.0  ;;  %vm891_vm11 = vcmp.gt.f32.partialorder %v11927_v23, 0.0  ;;  %vm892_vm12 = vcmp.gt.f32.partialorder %v11933_v26, 0.0 }
  0x1e   : > { %10809 = vpow2.f32 %v937_v30  ;;  %v907_v42 = vmul.f32 1.442695, %v11949_v34  ;;  %v909_v43 = vmul.f32 1.442695, %v11952_v35  ;;  %vm875_vm13 = vcmp.gt.f32.partialorder %v11949_v34, 0.0 }
  0x1f   : > { %v10800_v36 = vpop.eup %10799  ;;  %10811 = vpow2.f32 %v939_v31  ;;  %vm876_vm14 = vcmp.gt.f32.partialorder %v11952_v35, 0.0  ;;  %v715_v47 = vmul.f32 1.442695, %v11930_v24  ;;  %v717_v48 = vmul.f32 1.442695, %v11940_v29 }
  0x20   : > { %v10802_v38 = vpop.eup %10801  ;;  %v10112_v39 = vadd.f32 -1.0, %v10800_v36  ;;  %10813 = vpow2.f32 %v941_v32  ;;  %vm1344_vm15 = vcmp.ne.s32.totalorder %v11954_v37, %v11914_v17  ;;  %vm683_vm2 = vcmp.gt.f32.partialorder %v11930_v24, 0.0 }
  0x21   : > { %v10804_v40 = vpop.eup %10803  ;;  %v10113_v41 = vadd.f32 -1.0, %v10802_v38  ;;  %10815 = vpow2.f32 %v907_v42  ;;  %vm684_vm3 = vcmp.gt.f32.partialorder %v11940_v29, 0.0 }
  0x22   : > { %v10806_v44 = vpop.eup %10805  ;;  %v10114_v45 = vadd.f32 -1.0, %v10804_v40  ;;  %v825_v46 = vsel %vm697_vm5, %v626_v8, %v10112_v39  ;;  %10817 = vpow2.f32 %v909_v43  ;;  %vm1780_vm5 = vcmask 64512  }
  0x23   : > { %v10808_v49 = vpop.eup %10807  ;;  %v10115_v50 = vadd.f32 -1.0, %v10806_v44  ;;  %v826_v51 = vsel %vm698_vm6, %v627_v9, %v10113_v41  ;;  %v1056_v52 = vpack.c.bf16 %v825_v46, %v825_v46  ;;  %10819 = vpow2.f32 %v715_v47  ;;  %vm12035_vm6 = vmpackc.low %vm1345_vm1, %vm1344_vm15 }
  0x24   : > { %v827_v53 = vsel %vm699_vm7, %v11906_v10, %v10114_v45  ;;  %v1057_v54 = vpack.c.bf16 %v826_v51, %v826_v51  ;;  %v10144_v55 = vadd.f32 -1.0, %v10808_v49  ;;  %v10810_v56 = vpop.eup %10809  ;;  %10821 = vpow2.f32 %v717_v48 }
  0x25   : > { %v828_v57 = vsel %vm700_vm8, %v11909_v12, %v10115_v50  ;;  %v1058_v58 = vpack.c.bf16 %v827_v53, %v827_v53  ;;  %v1152_v59 = vunpack.c.l.b16 %v1056_v52  ;;  %v10812_v60 = vpop.eup %10811  ;;  %v10145_v63 = vadd.f32 -1.0, %v10810_v56  ;;  %v1040_v56 = vld [vmem:[%s18384_s3 + $0x8] sm:$0xf] }
  0x26   : > { %v1059_v61 = vpack.c.bf16 %v828_v57, %v828_v57  ;;  %v1153_v62 = vunpack.c.l.b16 %v1057_v54  ;;  %v1017_v0 = vsel %vm889_vm9, %v11920_v20, %v10144_v55  ;;  %v10814_v2 = vpop.eup %10813  ;;  %v10146_v4 = vadd.f32 -1.0, %v10812_v60 }
  0x27   : > { %v1154_v3 = vunpack.c.l.b16 %v1058_v58  ;;  %v1088_v7 = vpack.c.bf16 %v1017_v0, %v1017_v0  ;;  %v10147_v10 = vadd.f32 -1.0, %v10814_v2  ;;  %v1018_v11 = vsel %vm890_vm10, %v11924_v22, %v10145_v63  ;;  %v10816_v12 = vpop.eup %10815  ;;  %v12058_v63 = vld [vmem:[%s11901_s23 + $0x98] sm:$0xff] }
  0x28   : > { %v1155_v8 = vunpack.c.l.b16 %v1059_v61  ;;  %v11986_v9 = vpack.c.b16 %v1153_v62, %v1152_v59  ;;  %v1019_v13 = vsel %vm891_vm11, %v11927_v23, %v10146_v4  ;;  %v1089_v14 = vpack.c.bf16 %v1018_v11, %v1018_v11  ;;  %v10818_v18 = vpop.eup %10817  ;;  %v12055_v62 = vld [vmem:[%s11901_s23 + $0x90] sm:$0xff] }
  0x29   : > { %v1506_v15 = vunpack.c.l.b16 %v1088_v7  ;;  %v1020_v27 = vsel %vm892_vm12, %v11933_v26, %v10147_v10  ;;  %v1090_v22 = vpack.c.bf16 %v1019_v13, %v1019_v13  ;;  %v10820_v28 = vpop.eup %10819  ;;  %v10130_v32 = vadd.f32 -1.0, %v10816_v12  ;;  %v1037_v26 = vld [vmem:[%s18538_s0 + $0x8] sm:$0xf]  ;;  %v12075_v10 = vld [vmem:[%s11901_s23 + $0x10] sm:$0xff] }
  0x2a   : > { %v11995_v20 = vpack.c.b16 %v1155_v8, %v1154_v3  ;;  %v18418_v25 = vshrl.u32 %v11986_v9, 16  ;;  %v1091_v30 = vpack.c.bf16 %v1020_v27, %v1020_v27  ;;  %v1507_v31 = vunpack.c.l.b16 %v1089_v14  ;;  %v10822_v40 = vpop.eup %10821 }
  0x2b   : > { %v10131_v23 = vadd.f32 -1.0, %v10818_v18  ;;  %v1508_v39 = vunpack.c.l.b16 %v1090_v22  ;;  %v1003_v43 = vsel %vm875_vm13, %v11949_v34, %v10130_v32  ;;  %v10098_v48 = vadd.f32 -1.0, %v10820_v28 }
  0x2c   : > { %v12003_v33 = vrot.slane %v18418_v25, 7  ;;  %v18409_v36 = vshrl.u32 %v11995_v20, 16  ;;  %v18413_v38 = vshll.u32 %v11995_v20, 16  ;;  %v1509_v41 = vunpack.c.l.b16 %v1091_v30 }
  0x2d   : > { %v12010_v42 = vpack.c.b16 %v1507_v31, %v1506_v15  ;;  %v1004_v44 = vsel %vm876_vm14, %v11952_v35, %v10131_v23  ;;  %v1074_v46 = vpack.c.bf16 %v1003_v43, %v1003_v43  ;;  %v10099_v51 = vadd.f32 -1.0, %v10822_v40 }
  0x2e   : > { %v12020_v45 = vrot.slane %v18409_v36, 7  ;;  %v1075_v47 = vpack.c.bf16 %v1004_v44, %v1004_v44  ;;  %v12022_v49 = vpack.c.b16 %v1509_v41, %v1508_v39  ;;  %v2423_v52 = vsel %vm1829_vm0, %v1037_v26, 0  ;;  %v12113_v39 = vld [vmem:[%s11901_s23 + $0x18] sm:$0xff] }
  0x2f   : > { %v18412_v50 = vshrl.u32 %v12010_v42, 16  ;;  %v18540_v35 = vmov 0  ;;  %v1492_v53 = vunpack.c.l.b16 %v1074_v46  ;;  %v811_v55 = vsel %vm683_vm2, %v11930_v24, %v10098_v48  ;;  %2432 = vmatpush.bf16.msrb.mxu0 %v2423_v52 }
  0x30   : > { %v1256_v34 = vor.u32 %v18413_v38, %v12020_v45  ;;  %v18541_v35 = vsel %vm12035_vm6, 4294967295, %v18540_v35  ;;  %v1493_v54 = vunpack.c.l.b16 %v1075_v47  ;;  %v18406_v37 = vshrl.u32 %v12022_v49, 16 }
  0x31   : > { %18542 = vst [vmem:[#allocation2_spill] sm:$0xff] %v18541_v35  ;;  %v18410_v57 = vshll.u32 %v12022_v49, 16  ;;  %vm1330_vm7 = vcmask 1040384   ;;  %v812_v58 = vsel %vm684_vm3, %v11940_v29, %v10099_v51  ;;  %v1042_v24 = vpack.c.bf16 %v811_v55, %v811_v55  ;;  %v12138_v51 = vld [vmem:[%s11901_s23 + $0xa0] sm:$0xff] }
  0x32   : > { %v1257_v59 = vsel %vm1186_vm4, %v12003_v33, %v1256_v34  ;;  %v12052_v60 = vpack.c.b16 %v1493_v54, %v1492_v53  ;;  %v1043_v61 = vpack.c.bf16 %v812_v58, %v812_v58  ;;  %v12064_v1 = vrot.slane %v18412_v50, 7  ;;  %vm12095_vm8 = vmand %vm1330_vm7, %vm1186_vm4  ;;  %v12149_v58 = vld [vmem:[%s11901_s23 + $0xa8] sm:$0xff] }
  0x33   : > { %v1355_v0 = vsel %vm12035_vm6, %v1257_v59, 0  ;;  %v12068_v29 = vrot.slane %v18406_v37, 7  ;;  %v2595_v2 = vsel %vm1829_vm0, %v1040_v56, 0  ;;  %v1138_v7 = vunpack.c.l.b16 %v1042_v24 }
  0x34   : > { %10190 = vmatmul.msk.bf16.vlgmr.msra.gmra.mxu3 %vm1780_vm5, %v1355_v0  ;;  %v18439_v3 = vshrl.u32 %v12052_v60, 16  ;;  %v18440_v4 = vshll.u32 %v12052_v60, 16  ;;  %v1139_v8 = vunpack.c.l.b16 %v1043_v61  ;;  %2604 = vmatpush.bf16.msrb.mxu1 %v2595_v2  ;;  %v751_v12 = vmul.f32 1.442695, %v12055_v62 }
  0x35   : > { %v1609_v11 = vor.u32 %v18410_v57, %v12068_v29  ;;  %v753_v13 = vmul.f32 1.442695, %v12058_v63  ;;  %v12089_v16 = vsub.f32 0.0, %v12055_v62  ;;  %v18543_v27 = vmov 0 }
  0x36   : > { %v12084_v14 = vrot.slane %v18439_v3, 7  ;;  %v12086_v15 = vpack.c.b16 %v1139_v8, %v1138_v7  ;;  %v18544_v27 = vsel %vm12095_vm8, 4294967295, %v18543_v27  ;;  %10823 = vpow2.f32 %v751_v12 }
  0x37   : > { %v1610_v18 = vsel %vm1186_vm4, %v12064_v1, %v1609_v11  ;;  %18545 = vst [vmem:[#allocation3_spill] sm:$0xff] %v18544_v27  ;;  %v12100_v22 = vsub.f32 0.0, %v12058_v63  ;;  %v12103_v28 = vsub.f32 0.0, %v12075_v10  ;;  %10825 = vpow2.f32 %v753_v13 }
  0x38   : > { %v1692_v30 = vsel %vm12035_vm6, %v1610_v18, 0  ;;  %v1546_v31 = vor.u32 %v18440_v4, %v12084_v14  ;;  %v18443_v32 = vshrl.u32 %v12086_v15, 16  ;;  %v18444_v23 = vshll.u32 %v12086_v15, 16 }
  0x39   : > { %10174 = vmatmul.msk.bf16.vlgmr.msra.gmra.mxu2 %vm1780_vm5, %v1692_v30  ;;  %v943_v26 = vmul.f32 1.442695, %v12089_v16  ;;  %vm701_vm9 = vcmp.gt.f32.partialorder %v12055_v62, 0.0  ;;  %v945_v43 = vmul.f32 1.442695, %v12100_v22  ;;  %vm702_vm10 = vcmp.gt.f32.partialorder %v12058_v63, 0.0 }
  0x3a   : > { %v1683_v40 = vsel %vm12095_vm8, 0, %v1546_v31  ;;  %v12121_v41 = vrot.slane %v18443_v32, 7  ;;  %v12129_v46 = vsub.f32 0.0, %v12113_v39  ;;  %vm893_vm11 = vcmp.gt.f32.partialorder %v12089_v16, 0.0 }
  0x3b   : > { %v1684_v44 = vsel %vm12035_vm6, %v1683_v40, 0  ;;  %10827 = vpow2.f32 %v943_v26  ;;  %v911_v48 = vmul.f32 1.442695, %v12103_v28  ;;  %vm894_vm12 = vcmp.gt.f32.partialorder %v12100_v22, 0.0 }
  0x3c   : > { %10166 = vmatmul.msk.bf16.vlgmr.msra.gmra.mxu0 %vm1780_vm5, %v1684_v44  ;;  %v1193_v47 = vor.u32 %v18444_v23, %v12121_v41  ;;  %10829 = vpow2.f32 %v945_v43  ;;  %v10824_v52 = vpop.eup %10823  ;;  %vm877_vm13 = vcmp.gt.f32.partialorder %v12103_v28, 0.0  ;;  %v913_v34 = vmul.f32 1.442695, %v12129_v46 }
  0x3d   : > { %v719_v53 = vmul.f32 1.442695, %v12075_v10  ;;  %v10116_v55 = vadd.f32 -1.0, %v10824_v52  ;;  %10831 = vpow2.f32 %v911_v48  ;;  %vm685_vm14 = vcmp.gt.f32.partialorder %v12075_v10, 0.0  ;;  %v10826_v59 = vpop.eup %10825 }
  0x3e   : > { %v1332_v54 = vsel %vm12095_vm8, 0, %v1193_v47  ;;  %v721_v56 = vmul.f32 1.442695, %v12113_v39  ;;  %vm878_vm15 = vcmp.gt.f32.partialorder %v12129_v46, 0.0  ;;  %10833 = vpow2.f32 %v913_v34 }
  0x3f   : > { %v1347_v24 = vsel %vm12035_vm6, %v1332_v54, 0  ;;  %vm686_vm1 = vcmp.gt.f32.partialorder %v12113_v39, 0.0  ;;  %v10117_v61 = vadd.f32 -1.0, %v10826_v59  ;;  %v829_v0 = vsel %vm701_vm9, %v12055_v62, %v10116_v55 }
  0x40   : > { %10182 = vmatmul.msk.bf16.vlgmr.msra.gmra.mxu1 %vm1780_vm5, %v1347_v24  ;;  %10835 = vpow2.f32 %v719_v53  ;;  %v755_v2 = vmul.f32 1.442695, %v12138_v51  ;;  %v1060_v8 = vpack.c.bf16 %v829_v0, %v829_v0  ;;  %v757_v11 = vmul.f32 1.442695, %v12149_v58 }
  0x41   : > { %v10828_v7 = vpop.eup %10827  ;;  %10837 = vpow2.f32 %v721_v56  ;;  %v12162_v12 = vsub.f32 0.0, %v12138_v51  ;;  %v830_v18 = vsel %vm702_vm10, %v12058_v63, %v10117_v61  ;;  %v12168_v62 = vsub.f32 0.0, %v12149_v58 }
  0x42   : > { %v10830_v13 = vpop.eup %10829  ;;  %v10148_v30 = vadd.f32 -1.0, %v10828_v7  ;;  %10839 = vpow2.f32 %v755_v2  ;;  %v1061_v31 = vpack.c.bf16 %v830_v18, %v830_v18  ;;  %v1156_v26 = vunpack.c.l.b16 %v1060_v8 }
  0x43   : > { %v10149_v40 = vadd.f32 -1.0, %v10830_v13  ;;  %10841 = vpow2.f32 %v757_v11  ;;  %v10832_v43 = vpop.eup %10831  ;;  %vm703_vm2 = vcmp.gt.f32.partialorder %v12138_v51, 0.0  ;;  %vm704_vm3 = vcmp.gt.f32.partialorder %v12149_v58, 0.0 }
  0x44   : > { %v1021_v44 = vsel %vm893_vm11, %v12089_v16, %v10148_v30  ;;  %v947_v63 = vmul.f32 1.442695, %v12162_v12  ;;  %v10834_v47 = vpop.eup %10833  ;;  %v1157_v48 = vunpack.c.l.b16 %v1061_v31  ;;  %v10132_v53 = vadd.f32 -1.0, %v10832_v43 }
  0x45   : > { %v1022_v52 = vsel %vm894_vm12, %v12100_v22, %v10149_v40  ;;  %v1092_v34 = vpack.c.bf16 %v1021_v44, %v1021_v44  ;;  %v10133_v56 = vadd.f32 -1.0, %v10834_v47  ;;  %v949_v16 = vmul.f32 1.442695, %v12168_v62 }
  0x46   : > { %v10836_v54 = vpop.eup %10835  ;;  %v1093_v55 = vpack.c.bf16 %v1022_v52, %v1022_v52  ;;  %10843 = vpow2.f32 %v947_v63  ;;  %v12180_v24 = vpack.c.b16 %v1157_v48, %v1156_v26  ;;  %v1005_v0 = vsel %vm877_vm13, %v12103_v28, %v10132_v53 }
  0x47   : > { %v10838_v59 = vpop.eup %10837  ;;  %v1510_v61 = vunpack.c.l.b16 %v1092_v34  ;;  %v10100_v2 = vadd.f32 -1.0, %v10836_v54  ;;  %v1006_v22 = vsel %vm878_vm15, %v12129_v46, %v10133_v56  ;;  %v1076_v11 = vpack.c.bf16 %v1005_v0, %v1005_v0 }
  0x48   : > { %v10840_v7 = vpop.eup %10839  ;;  %v1511_v8 = vunpack.c.l.b16 %v1093_v55  ;;  %v10101_v13 = vadd.f32 -1.0, %v10838_v59  ;;  %vm895_vm7 = vcmp.gt.f32.partialorder %v12162_v12, 0.0  ;;  %v18404_v30 = vshrl.u32 %v12180_v24, 16 }
  0x49   : > { %v10842_v18 = vpop.eup %10841  ;;  %v18408_v31 = vshll.u32 %v12180_v24, 16  ;;  %v1077_v26 = vpack.c.bf16 %v1006_v22, %v1006_v22  ;;  %v813_v28 = vsel %vm685_vm14, %v12075_v10, %v10100_v2  ;;  %v1494_v43 = vunpack.c.l.b16 %v1076_v11 }
  0x4a   : > { %v12194_v40 = vpack.c.b16 %v1511_v8, %v1510_v61  ;;  %v814_v46 = vsel %vm686_vm1, %v12113_v39, %v10101_v13  ;;  %v1044_v44 = vpack.c.bf16 %v813_v28, %v813_v28  ;;  %v12201_v63 = vrot.slane %v18404_v30, 7 }
  0x4b   : > { %v1495_v47 = vunpack.c.l.b16 %v1077_v26  ;;  %v1045_v48 = vpack.c.bf16 %v814_v46, %v814_v46  ;;  %v10118_v52 = vadd.f32 -1.0, %v10840_v7  ;;  %v10119_v55 = vadd.f32 -1.0, %v10842_v18  ;;  %v12230_v18 = vld [vmem:[%s11901_s23 + $0x28] sm:$0xff] }
  0x4c   : > { %v10844_v34 = vpop.eup %10843  ;;  %v18402_v53 = vshrl.u32 %v12194_v40, 16  ;;  %v18405_v10 = vshll.u32 %v12194_v40, 16  ;;  %v1140_v54 = vunpack.c.l.b16 %v1044_v44  ;;  %v1264_v39 = vor.u32 %v18408_v31, %v12201_v63 }
  0x4d   : > { %v12208_v56 = vpack.c.b16 %v1495_v47, %v1494_v43  ;;  %v1141_v59 = vunpack.c.l.b16 %v1045_v48  ;;  %v831_v61 = vsel %vm703_vm2, %v12138_v51, %v10118_v52  ;;  %v832_v2 = vsel %vm704_vm3, %v12149_v58, %v10119_v55  ;;  %v12227_v51 = vld [vmem:[%s11901_s23 + $0x20] sm:$0xff] }
  0x4e   : > { %v12215_v0 = vrot.slane %v18402_v53, 7  ;;  %v1062_v7 = vpack.c.bf16 %v831_v61, %v831_v61  ;;  %10845 = vpow2.f32 %v949_v16  ;;  %v1265_v8 = vsel %vm1186_vm4, %v12020_v45, %v1264_v39  ;;  %v12326_v53 = vld [vmem:[%s11901_s23 + $0x38] sm:$0xff] }
  0x4f   : > { %v18424_v22 = vshrl.u32 %v12208_v56, 16  ;;  %v18438_v11 = vshll.u32 %v12208_v56, 16  ;;  %v12224_v13 = vpack.c.b16 %v1141_v59, %v1140_v54  ;;  %v1356_v26 = vsel %vm12035_vm6, %v1265_v8, 0 }
  0x50   : > { %v1617_v58 = vor.u32 %v18405_v10, %v12215_v0  ;;  %v1063_v16 = vpack.c.bf16 %v832_v2, %v832_v2  ;;  %v1158_v28 = vunpack.c.l.b16 %v1062_v7  ;;  %10191 = vmatmul.msk.bf16.gmra.mxu3 %vm1780_vm5, %v1356_v26  ;;  %v10150_v44 = vadd.f32 -1.0, %v10844_v34 }
  0x51   : > { %v12240_v45 = vrot.slane %v18424_v22, 7  ;;  %v18436_v43 = vshrl.u32 %v12224_v13, 16  ;;  %v18441_v46 = vshll.u32 %v12224_v13, 16  ;;  %v12247_v52 = vsub.f32 0.0, %v12227_v51 }
  0x52   : > { %v1618_v47 = vsel %vm1186_vm4, %v12068_v29, %v1617_v58  ;;  %v1159_v48 = vunpack.c.l.b16 %v1063_v16  ;;  %v12250_v54 = vsub.f32 0.0, %v12230_v18  ;;  %v1023_v29 = vsel %vm895_vm7, %v12162_v12, %v10150_v44 }
  0x53   : > { %v1693_v55 = vsel %vm12035_vm6, %v1618_v47, 0  ;;  %v1553_v39 = vor.u32 %v18438_v11, %v12240_v45  ;;  %v12259_v34 = vrot.slane %v18436_v43, 7  ;;  %vm896_vm9 = vcmp.gt.f32.partialorder %v12168_v62, 0.0 }
  0x54   : > { %v10846_v59 = vpop.eup %10845  ;;  %10175 = vmatmul.msk.bf16.gmra.mxu2 %vm1780_vm5, %v1693_v55  ;;  %v12265_v61 = vpack.c.b16 %v1159_v48, %v1158_v28  ;;  %v1094_v2 = vpack.c.bf16 %v1023_v29, %v1023_v29  ;;  %v915_v12 = vmul.f32 1.442695, %v12247_v52  ;;  %vm879_vm10 = vcmp.gt.f32.partialorder %v12247_v52, 0.0 }
  0x55   : > { %v1554_v7 = vsel %vm1186_vm4, %v12084_v14, %v1553_v39  ;;  %v1200_v8 = vor.u32 %v18441_v46, %v12259_v34  ;;  %v10151_v26 = vadd.f32 -1.0, %v10846_v59  ;;  %v917_v47 = vmul.f32 1.442695, %v12250_v54  ;;  %v12291_v59 = vld [vmem:[%s11901_s23 + $0xb0] sm:$0xff] }
  0x56   : > { %v1685_v58 = vsel %vm12035_vm6, %v1554_v7, 0  ;;  %v18401_v16 = vshrl.u32 %v12265_v61, 16  ;;  %v18403_v28 = vshll.u32 %v12265_v61, 16  ;;  %10847 = vpow2.f32 %v915_v12  ;;  %v12294_v7 = vld [vmem:[%s11901_s23 + $0xb8] sm:$0xff] }
  0x57   : > { %10167 = vmatmul.msk.bf16.gmra.mxu0 %vm1780_vm5, %v1685_v58  ;;  %v1201_v14 = vsel %vm1186_vm4, %v12121_v41, %v1200_v8  ;;  %v1024_v44 = vsel %vm896_vm9, %v12168_v62, %v10151_v26  ;;  %v1512_v29 = vunpack.c.l.b16 %v1094_v2  ;;  %vm880_vm11 = vcmp.gt.f32.partialorder %v12250_v54, 0.0 }
  0x58   : > { %v1348_v48 = vsel %vm12035_vm6, %v1201_v14, 0  ;;  %v12288_v55 = vrot.slane %v18401_v16, 7  ;;  %v1095_v39 = vpack.c.bf16 %v1024_v44, %v1024_v44  ;;  %10849 = vpow2.f32 %v917_v47 }
  0x59   : > { %10183 = vmatmul.msk.bf16.gmra.mxu1 %vm1780_vm5, %v1348_v48  ;;  %v723_v41 = vmul.f32 1.442695, %v12227_v51  ;;  %v725_v62 = vmul.f32 1.442695, %v12230_v18  ;;  %vm687_vm12 = vcmp.gt.f32.partialorder %v12227_v51, 0.0  ;;  %vm688_vm13 = vcmp.gt.f32.partialorder %v12230_v18, 0.0 }
  0x5a   : > { %v1272_v8 = vor.u32 %v18403_v28, %v12288_v55  ;;  %v1513_v26 = vunpack.c.l.b16 %v1095_v39  ;;  %vm705_vm14 = vcmp.gt.f32.partialorder %v12291_v59, 0.0  ;;  %v759_v2 = vmul.f32 1.442695, %v12291_v59  ;;  %v12319_v48 = vld [vmem:[%s11901_s23 + $0x30] sm:$0xff] }
  0x5b   : > { %10851 = vpow2.f32 %v723_v41  ;;  %v761_v12 = vmul.f32 1.442695, %v12294_v7  ;;  %v12309_v58 = vsub.f32 0.0, %v12291_v59  ;;  %v12316_v47 = vsub.f32 0.0, %v12294_v7 }
  0x5c   : > { %v1273_v14 = vsel %vm1186_vm4, %v12201_v63, %v1272_v8  ;;  %v12313_v44 = vpack.c.b16 %v1513_v26, %v1512_v29  ;;  %10853 = vpow2.f32 %v725_v62  ;;  %v10848_v39 = vpop.eup %10847  ;;  %vm706_vm15 = vcmp.gt.f32.partialorder %v12294_v7, 0.0 }
  0x5d   : > { %v1357_v41 = vsel %vm12035_vm6, %v1273_v14, 0  ;;  %10855 = vpow2.f32 %v759_v2  ;;  %v951_v16 = vmul.f32 1.442695, %v12309_v58  ;;  %v10134_v62 = vadd.f32 -1.0, %v10848_v39 }
  0x5e   : > { %v18407_v63 = vshrl.u32 %v12313_v44, 16  ;;  %v18411_v29 = vshll.u32 %v12313_v44, 16  ;;  %10857 = vpow2.f32 %v761_v12  ;;  %v10850_v8 = vpop.eup %10849  ;;  %vm897_vm1 = vcmp.gt.f32.partialorder %v12309_v58, 0.0 }
  0x5f   : > { %10859 = vpow2.f32 %v951_v16  ;;  %v953_v26 = vmul.f32 1.442695, %v12316_v47  ;;  %v849_v14 = vsub.f32 0.0, %v12319_v48  ;;  %v10135_v28 = vadd.f32 -1.0, %v10850_v8 }
  0x60   : > { %v12335_v2 = vrot.slane %v18407_v63, 7  ;;  %v1007_v30 = vsel %vm879_vm10, %v12247_v52, %v10134_v62  ;;  %v12341_v39 = vsub.f32 0.0, %v12326_v53  ;;  %10192 = vmatmul.msk.bf16.gmra.mxu3 %vm1780_vm5, %v1357_v41  ;;  %vm898_vm2 = vcmp.gt.f32.partialorder %v12316_v47, 0.0 }
  0x61   : > { %v10852_v12 = vpop.eup %10851  ;;  %v1078_v16 = vpack.c.bf16 %v1007_v30, %v1007_v30  ;;  %10861 = vpow2.f32 %v953_v26  ;;  %v919_v10 = vmul.f32 1.442695, %v849_v14  ;;  %v1008_v52 = vsel %vm880_vm11, %v12250_v54, %v10135_v28 }
  0x62   : > { %v10854_v37 = vpop.eup %10853  ;;  %v1625_v8 = vor.u32 %v18411_v29, %v12335_v2  ;;  %v10102_v62 = vadd.f32 -1.0, %v10852_v12  ;;  %vm881_vm3 = vcmp.gt.f32.partialorder %v849_v14, 0.0  ;;  %v1079_v31 = vpack.c.bf16 %v1008_v52, %v1008_v52 }
  0x63   : > { %v10856_v63 = vpop.eup %10855  ;;  %v1496_v36 = vunpack.c.l.b16 %v1078_v16  ;;  %v10103_v41 = vadd.f32 -1.0, %v10854_v37  ;;  %10863 = vpow2.f32 %v919_v10  ;;  %v921_v50 = vmul.f32 1.442695, %v12341_v39 }
  0x64   : > { %v10858_v30 = vpop.eup %10857  ;;  %v1626_v26 = vsel %vm1186_vm4, %v12215_v0, %v1625_v8  ;;  %v815_v57 = vsel %vm687_vm12, %v12227_v51, %v10102_v62  ;;  %v10120_v29 = vadd.f32 -1.0, %v10856_v63  ;;  %v1497_v28 = vunpack.c.l.b16 %v1079_v31 }
  0x65   : > { %v10860_v38 = vpop.eup %10859  ;;  %v1694_v54 = vsel %vm12035_vm6, %v1626_v26, 0  ;;  %v816_v37 = vsel %vm688_vm13, %v12230_v18, %v10103_v41  ;;  %v1046_v10 = vpack.c.bf16 %v815_v57, %v815_v57  ;;  %v10121_v12 = vadd.f32 -1.0, %v10858_v30 }
  0x66   : > { %10176 = vmatmul.msk.bf16.gmra.mxu2 %vm1780_vm5, %v1694_v54  ;;  %v1047_v0 = vpack.c.bf16 %v816_v37, %v816_v37  ;;  %v833_v51 = vsel %vm705_vm14, %v12291_v59, %v10120_v29  ;;  %v10152_v63 = vadd.f32 -1.0, %v10860_v38  ;;  %v12366_v8 = vpack.c.b16 %v1497_v28, %v1496_v36 }
  0x67   : > { %v10862_v16 = vpop.eup %10861  ;;  %v1142_v52 = vunpack.c.l.b16 %v1046_v10  ;;  %v1064_v62 = vpack.c.bf16 %v833_v51, %v833_v51  ;;  %10865 = vpow2.f32 %v921_v50  ;;  %v834_v57 = vsel %vm706_vm15, %v12294_v7, %v10121_v12 }
  0x68   : > { %v1143_v31 = vunpack.c.l.b16 %v1047_v0  ;;  %v10153_v18 = vadd.f32 -1.0, %v10862_v16  ;;  %v1025_v41 = vsel %vm897_vm1, %v12309_v58, %v10152_v63  ;;  %v18420_v59 = vshrl.u32 %v12366_v8, 16 }
  0x69   : > { %v10864_v30 = vpop.eup %10863  ;;  %v18423_v38 = vshll.u32 %v12366_v8, 16  ;;  %v1065_v36 = vpack.c.bf16 %v834_v57, %v834_v57  ;;  %v1160_v29 = vunpack.c.l.b16 %v1064_v62  ;;  %v1096_v54 = vpack.c.bf16 %v1025_v41, %v1025_v41 }
  0x6a   : > { %v12376_v26 = vpack.c.b16 %v1143_v31, %v1142_v52  ;;  %v1026_v50 = vsel %vm898_vm2, %v12316_v47, %v10153_v18  ;;  %v10136_v7 = vadd.f32 -1.0, %v10864_v30  ;;  %v12383_v28 = vrot.slane %v18420_v59, 7 }
  0x6b   : > { %v1161_v58 = vunpack.c.l.b16 %v1065_v36  ;;  %v1097_v37 = vpack.c.bf16 %v1026_v50, %v1026_v50  ;;  %vm882_vm7 = vcmp.gt.f32.partialorder %v12341_v39, 0.0  ;;  %v1514_v12 = vunpack.c.l.b16 %v1096_v54 }
  0x6c   : > { %v18421_v10 = vshrl.u32 %v12376_v26, 16  ;;  %v18426_v0 = vshll.u32 %v12376_v26, 16  ;;  %v1009_v51 = vsel %vm881_vm3, %v849_v14, %v10136_v7  ;;  %v1561_v47 = vor.u32 %v18423_v38, %v12383_v28 }
  0x6d   : > { %v10866_v63 = vpop.eup %10865  ;;  %v12392_v16 = vpack.c.b16 %v1161_v58, %v1160_v29  ;;  %v1515_v52 = vunpack.c.l.b16 %v1097_v37  ;;  %v1080_v62 = vpack.c.bf16 %v1009_v51, %v1009_v51  ;;  %v727_v18 = vmul.f32 1.442695, %v12319_v48  ;;  %v12421_v51 = vld [vmem:[%s11901_s23 + $0xc0] sm:$0xff] }
  0x6e   : > { %v12396_v31 = vrot.slane %v18421_v10, 7  ;;  %v10137_v57 = vadd.f32 -1.0, %v10866_v63  ;;  %v1562_v14 = vsel %vm1186_vm4, %v12240_v45, %v1561_v47  ;;  %v12424_v63 = vld [vmem:[%s11901_s23 + $0xc8] sm:$0xff]  ;;  %v729_v47 = vmul.f32 1.442695, %v12326_v53 }
  0x6f   : > { %v18415_v41 = vshrl.u32 %v12392_v16, 16  ;;  %v18417_v30 = vshll.u32 %v12392_v16, 16  ;;  %v12403_v36 = vpack.c.b16 %v1515_v52, %v1514_v12  ;;  %v1686_v29 = vsel %vm12035_vm6, %v1562_v14, 0 }
  0x70   : > { %v1208_v50 = vor.u32 %v18426_v0, %v12396_v31  ;;  %v1010_v54 = vsel %vm882_vm7, %v12341_v39, %v10137_v57  ;;  %v1498_v7 = vunpack.c.l.b16 %v1080_v62  ;;  %10168 = vmatmul.msk.bf16.gmra.mxu0 %vm1780_vm5, %v1686_v29  ;;  %10867 = vpow2.f32 %v727_v18  ;;  %v12439_v29 = vld [vmem:[%s11901_s23 + $0x40] sm:$0xff] }
  0x71   : > { %v12416_v45 = vrot.slane %v18415_v41, 7  ;;  %v18414_v58 = vshrl.u32 %v12403_v36, 16  ;;  %v18416_v37 = vshll.u32 %v12403_v36, 16  ;;  %v1081_v12 = vpack.c.bf16 %v1010_v54, %v1010_v54 }
  0x72   : > { %v1209_v39 = vsel %vm1186_vm4, %v12259_v34, %v1208_v50  ;;  %vm689_vm9 = vcmp.gt.f32.partialorder %v12319_v48, 0.0  ;;  %10869 = vpow2.f32 %v729_v47  ;;  %v763_v34 = vmul.f32 1.442695, %v12421_v51 }
  0x73   : > { %v1349_v52 = vsel %vm12035_vm6, %v1209_v39, 0  ;;  %v1280_v62 = vor.u32 %v18417_v30, %v12416_v45  ;;  %v12436_v57 = vrot.slane %v18414_v58, 7  ;;  %v1499_v14 = vunpack.c.l.b16 %v1081_v12  ;;  %v12461_v58 = vld [vmem:[%s11901_s23 + $0x48] sm:$0xff] }
  0x74   : > { %10184 = vmatmul.msk.bf16.gmra.mxu1 %vm1780_vm5, %v1349_v52  ;;  %v765_v18 = vmul.f32 1.442695, %v12424_v63  ;;  %v12453_v12 = vsub.f32 0.0, %v12421_v51  ;;  %10871 = vpow2.f32 %v763_v34  ;;  %v12458_v47 = vsub.f32 0.0, %v12424_v63 }
  0x75   : > { %v1281_v50 = vsel %vm1186_vm4, %v12288_v55, %v1280_v62  ;;  %v1633_v54 = vor.u32 %v18416_v37, %v12436_v57  ;;  %v12450_v39 = vpack.c.b16 %v1499_v14, %v1498_v7  ;;  %v12464_v55 = vsub.f32 0.0, %v12439_v29 }
  0x76   : > { %v1358_v52 = vsel %vm12035_vm6, %v1281_v50, 0  ;;  %10873 = vpow2.f32 %v765_v18  ;;  %v10868_v50 = vpop.eup %10867  ;;  %vm690_vm10 = vcmp.gt.f32.partialorder %v12326_v53, 0.0  ;;  %vm707_vm11 = vcmp.gt.f32.partialorder %v12421_v51, 0.0 }
  0x77   : > { %10193 = vmatmul.msk.bf16.gmra.mxu3 %vm1780_vm5, %v1358_v52  ;;  %v1634_v7 = vsel %vm1186_vm4, %v12335_v2, %v1633_v54  ;;  %v18419_v62 = vshrl.u32 %v12450_v39, 16  ;;  %v18422_v14 = vshll.u32 %v12450_v39, 16  ;;  %v955_v41 = vmul.f32 1.442695, %v12453_v12 }
  0x78   : > { %v1695_v34 = vsel %vm12035_vm6, %v1634_v7, 0  ;;  %v10104_v54 = vadd.f32 -1.0, %v10868_v50  ;;  %v957_v52 = vmul.f32 1.442695, %v12458_v47  ;;  %v12483_v18 = vsub.f32 0.0, %v12461_v58  ;;  %v10870_v37 = vpop.eup %10869 }
  0x79   : > { %10177 = vmatmul.msk.bf16.gmra.mxu2 %vm1780_vm5, %v1695_v34  ;;  %v12479_v2 = vrot.slane %v18419_v62, 7  ;;  %vm708_vm12 = vcmp.gt.f32.partialorder %v12424_v63, 0.0  ;;  %vm899_vm13 = vcmp.gt.f32.partialorder %v12453_v12, 0.0  ;;  %10875 = vpow2.f32 %v955_v41 }
  0x7a   : > { %v923_v7 = vmul.f32 1.442695, %v12464_v55  ;;  %v10105_v30 = vadd.f32 -1.0, %v10870_v37  ;;  %v817_v50 = vsel %vm689_vm9, %v12319_v48, %v10104_v54  ;;  %10877 = vpow2.f32 %v957_v52  ;;  %v10872_v25 = vpop.eup %10871 }
  0x7b   : > { %v1569_v34 = vor.u32 %v18422_v14, %v12479_v2  ;;  %v1048_v62 = vpack.c.bf16 %v817_v50, %v817_v50  ;;  %vm900_vm14 = vcmp.gt.f32.partialorder %v12458_v47, 0.0  ;;  %v925_v59 = vmul.f32 1.442695, %v12483_v18 }
  0x7c   : > { %10879 = vpow2.f32 %v923_v7  ;;  %v10874_v41 = vpop.eup %10873  ;;  %v818_v37 = vsel %vm690_vm10, %v12326_v53, %v10105_v30  ;;  %v10122_v14 = vadd.f32 -1.0, %v10872_v25  ;;  %vm883_vm15 = vcmp.gt.f32.partialorder %v12464_v55, 0.0 }
  0x7d   : > { %v1570_v10 = vsel %vm1186_vm4, %v12383_v28, %v1569_v34  ;;  %v1049_v54 = vpack.c.bf16 %v818_v37, %v818_v37  ;;  %v1144_v52 = vunpack.c.l.b16 %v1048_v62  ;;  %v10123_v7 = vadd.f32 -1.0, %v10874_v41  ;;  %v12515_v62 = vld [vmem:[%s11901_s23 + $0xd0] sm:$0xff] }
  0x7e   : > { %v1687_v48 = vsel %vm12035_vm6, %v1570_v10, 0  ;;  %v835_v50 = vsel %vm707_vm11, %v12421_v51, %v10122_v14  ;;  %10881 = vpow2.f32 %v925_v59  ;;  %vm691_vm1 = vcmp.gt.f32.partialorder %v12439_v29, 0.0 }
  0x7f   : > { %v731_v28 = vmul.f32 1.442695, %v12439_v29  ;;  %v733_v25 = vmul.f32 1.442695, %v12461_v58  ;;  %v10876_v53 = vpop.eup %10875  ;;  %v1145_v30 = vunpack.c.l.b16 %v1049_v54  ;;  %v836_v10 = vsel %vm708_vm12, %v12424_v63, %v10123_v7 }
  0x80   : > { %v1066_v34 = vpack.c.bf16 %v835_v50, %v835_v50  ;;  %vm884_vm2 = vcmp.gt.f32.partialorder %v12483_v18, 0.0  ;;  %v10878_v41 = vpop.eup %10877  ;;  %10169 = vmatmul.msk.bf16.gmra.mxu0 %vm1780_vm5, %v1687_v48  ;;  %v1067_v59 = vpack.c.bf16 %v836_v10, %v836_v10  ;;  %v10154_v51 = vadd.f32 -1.0, %v10876_v53 }
  0x81   : > { %vm692_vm3 = vcmp.gt.f32.partialorder %v12461_v58, 0.0  ;;  %10883 = vpow2.f32 %v731_v28  ;;  %v12519_v37 = vpack.c.b16 %v1145_v30, %v1144_v52  ;;  %v10155_v38 = vadd.f32 -1.0, %v10878_v41 }
  0x82   : > { %v10880_v14 = vpop.eup %10879  ;;  %v1162_v54 = vunpack.c.l.b16 %v1066_v34  ;;  %10885 = vpow2.f32 %v733_v25  ;;  %v1163_v63 = vunpack.c.l.b16 %v1067_v59  ;;  %v1027_v7 = vsel %vm899_vm13, %v12453_v12, %v10154_v51  ;;  %v12532_v25 = vld [vmem:[%s11901_s23 + $0xd8] sm:$0xff] }
  0x83   : > { %v10138_v50 = vadd.f32 -1.0, %v10880_v14  ;;  %vm709_vm7 = vcmp.gt.f32.partialorder %v12515_v62, 0.0  ;;  %v767_v48 = vmul.f32 1.442695, %v12515_v62  ;;  %v18425_v53 = vshrl.u32 %v12519_v37, 16 }
  0x84   : > { %v18427_v28 = vshll.u32 %v12519_v37, 16  ;;  %v1028_v52 = vsel %vm900_vm14, %v12458_v47, %v10155_v38  ;;  %v1098_v30 = vpack.c.bf16 %v1027_v7, %v1027_v7  ;;  %v10882_v10 = vpop.eup %10881  ;;  %v12534_v34 = vpack.c.b16 %v1163_v63, %v1162_v54 }
  0x85   : > { %v1099_v12 = vpack.c.bf16 %v1028_v52, %v1028_v52  ;;  %v1011_v41 = vsel %vm883_vm15, %v12464_v55, %v10138_v50  ;;  %10887 = vpow2.f32 %v767_v48  ;;  %v12541_v59 = vrot.slane %v18425_v53, 7 }
  0x86   : > { %v1516_v51 = vunpack.c.l.b16 %v1098_v30  ;;  %v10139_v14 = vadd.f32 -1.0, %v10882_v10  ;;  %v1082_v22 = vpack.c.bf16 %v1011_v41, %v1011_v41  ;;  %v18429_v47 = vshrl.u32 %v12534_v34, 16 }
  0x87   : > { %v10884_v38 = vpop.eup %10883  ;;  %v18431_v7 = vshll.u32 %v12534_v34, 16  ;;  %v1517_v54 = vunpack.c.l.b16 %v1099_v12  ;;  %v769_v63 = vmul.f32 1.442695, %v12532_v25  ;;  %v1216_v55 = vor.u32 %v18427_v28, %v12541_v59 }
  0x88   : > { %v10886_v52 = vpop.eup %10885  ;;  %v1012_v50 = vsel %vm884_vm2, %v12483_v18, %v10139_v14  ;;  %v1500_v48 = vunpack.c.l.b16 %v1082_v22  ;;  %v10106_v30 = vadd.f32 -1.0, %v10884_v38  ;;  %v12554_v10 = vrot.slane %v18429_v47, 7 }
  0x89   : > { %v12556_v41 = vpack.c.b16 %v1517_v54, %v1516_v51  ;;  %v1083_v12 = vpack.c.bf16 %v1012_v50, %v1012_v50  ;;  %v10107_v53 = vadd.f32 -1.0, %v10886_v52  ;;  %v1217_v0 = vsel %vm1186_vm4, %v12396_v31, %v1216_v55 }
  0x8a   : > { %v819_v28 = vsel %vm691_vm1, %v12439_v29, %v10106_v30  ;;  %10889 = vpow2.f32 %v769_v63  ;;  %v12564_v18 = vsub.f32 0.0, %v12515_v62  ;;  %v1350_v14 = vsel %vm12035_vm6, %v1217_v0, 0 }
  0x8b   : > { %v10888_v22 = vpop.eup %10887  ;;  %v1288_v51 = vor.u32 %v18431_v7, %v12554_v10  ;;  %v18428_v38 = vshrl.u32 %v12556_v41, 16  ;;  %v18430_v31 = vshll.u32 %v12556_v41, 16  ;;  %10185 = vmatmul.msk.bf16.gmra.mxu1 %vm1780_vm5, %v1350_v14  ;;  %v1501_v54 = vunpack.c.l.b16 %v1083_v12 }
  0x8c   : > { %v820_v29 = vsel %vm692_vm3, %v12461_v58, %v10107_v53  ;;  %v1050_v63 = vpack.c.bf16 %v819_v28, %v819_v28  ;;  %v10124_v52 = vadd.f32 -1.0, %v10888_v22  ;;  %v12584_v30 = vsub.f32 0.0, %v12532_v25 }
  0x8d   : > { %v1289_v0 = vsel %vm1186_vm4, %v12416_v45, %v1288_v51  ;;  %v12581_v55 = vrot.slane %v18428_v38, 7  ;;  %v1051_v50 = vpack.c.bf16 %v820_v29, %v820_v29  ;;  %v12588_v14 = vpack.c.b16 %v1501_v54, %v1500_v48 }
  0x8e   : > { %v1359_v12 = vsel %vm12035_vm6, %v1289_v0, 0  ;;  %v1146_v58 = vunpack.c.l.b16 %v1050_v63  ;;  %v837_v45 = vsel %vm709_vm7, %v12515_v62, %v10124_v52  ;;  %vm710_vm9 = vcmp.gt.f32.partialorder %v12532_v25, 0.0  ;;  %v12602_v63 = vld [vmem:[%s11901_s23 + $0x50] sm:$0xff] }
  0x8f   : > { %10194 = vmatmul.msk.bf16.gmra.mxu3 %vm1780_vm5, %v1359_v12  ;;  %v1641_v53 = vor.u32 %v18430_v31, %v12581_v55  ;;  %v1147_v28 = vunpack.c.l.b16 %v1051_v50  ;;  %v1068_v22 = vpack.c.bf16 %v837_v45, %v837_v45  ;;  %v18432_v29 = vshrl.u32 %v12588_v14, 16  ;;  %v12609_v50 = vld [vmem:[%s11901_s23 + $0x58] sm:$0xff] }
  0x90   : > { %v10890_v51 = vpop.eup %10889  ;;  %v18434_v48 = vshll.u32 %v12588_v14, 16  ;;  %v959_v54 = vmul.f32 1.442695, %v12564_v18  ;;  %v961_v47 = vmul.f32 1.442695, %v12584_v30  ;;  %vm901_vm10 = vcmp.gt.f32.partialorder %v12564_v18, 0.0 }
  0x91   : > { %v1642_v62 = vsel %vm1186_vm4, %v12436_v57, %v1641_v53  ;;  %v12606_v52 = vpack.c.b16 %v1147_v28, %v1146_v58  ;;  %v10125_v0 = vadd.f32 -1.0, %v10890_v51  ;;  %v1164_v12 = vunpack.c.l.b16 %v1068_v22 }
  0x92   : > { %v1696_v45 = vsel %vm12035_vm6, %v1642_v62, 0  ;;  %v12615_v38 = vrot.slane %v18432_v29, 7  ;;  %10891 = vpow2.f32 %v959_v54  ;;  %v853_v28 = vsub.f32 0.0, %v12602_v63 }
  0x93   : > { %10178 = vmatmul.msk.bf16.gmra.mxu2 %vm1780_vm5, %v1696_v45  ;;  %v18433_v57 = vshrl.u32 %v12606_v52, 16  ;;  %v18435_v58 = vshll.u32 %v12606_v52, 16  ;;  %v838_v53 = vsel %vm710_vm9, %v12532_v25, %v10125_v0  ;;  %10893 = vpow2.f32 %v961_v47 }
  0x94   : > { %v1577_v22 = vor.u32 %v18434_v48, %v12615_v38  ;;  %v1069_v51 = vpack.c.bf16 %v838_v53, %v838_v53  ;;  %v854_v54 = vsub.f32 0.0, %v12609_v50  ;;  %v927_v45 = vmul.f32 1.442695, %v853_v28 }
  0x95   : > { %v12629_v62 = vrot.slane %v18433_v57, 7  ;;  %vm902_vm11 = vcmp.gt.f32.partialorder %v12584_v30, 0.0  ;;  %vm885_vm12 = vcmp.gt.f32.partialorder %v853_v28, 0.0  ;;  %vm693_vm13 = vcmp.gt.f32.partialorder %v12602_v63, 0.0 }
  0x96   : > { %v1578_v25 = vsel %vm1186_vm4, %v12479_v2, %v1577_v22  ;;  %v1165_v0 = vunpack.c.l.b16 %v1069_v51  ;;  %v929_v31 = vmul.f32 1.442695, %v854_v54  ;;  %10895 = vpow2.f32 %v927_v45  ;;  %v12647_v51 = vld [vmem:[%s11901_s23 + $0xe0] sm:$0xff]  ;;  %v12653_v45 = vld [vmem:[%s11901_s23 + $0xe8] sm:$0xff] }
  0x97   : > { %v1688_v47 = vsel %vm12035_vm6, %v1578_v25, 0  ;;  %v1224_v53 = vor.u32 %v18435_v58, %v12629_v62  ;;  %v735_v2 = vmul.f32 1.442695, %v12602_v63  ;;  %v737_v22 = vmul.f32 1.442695, %v12609_v50 }
  0x98   : > { %v10892_v7 = vpop.eup %10891  ;;  %10170 = vmatmul.msk.bf16.gmra.mxu0 %vm1780_vm5, %v1688_v47  ;;  %v12641_v29 = vpack.c.b16 %v1165_v0, %v1164_v12  ;;  %10897 = vpow2.f32 %v929_v31  ;;  %vm886_vm14 = vcmp.gt.f32.partialorder %v854_v54, 0.0  ;;  %vm694_vm15 = vcmp.gt.f32.partialorder %v12609_v50, 0.0 }
  0x99   : > { %v1225_v25 = vsel %vm1186_vm4, %v12541_v59, %v1224_v53  ;;  %v10156_v57 = vadd.f32 -1.0, %v10892_v7  ;;  %v10894_v12 = vpop.eup %10893  ;;  %10899 = vpow2.f32 %v735_v2  ;;  %v771_v7 = vmul.f32 1.442695, %v12647_v51  ;;  %v12673_v2 = vld [vmem:[%s11901_s23 + $0x60] sm:$0xff] }
  0x9a   : > { %v1351_v31 = vsel %vm12035_vm6, %v1225_v25, 0  ;;  %v18437_v0 = vshrl.u32 %v12641_v29, 16  ;;  %v18442_v47 = vshll.u32 %v12641_v29, 16  ;;  %v10157_v48 = vadd.f32 -1.0, %v10894_v12 }
  0x9b   : > { %v1029_v59 = vsel %vm901_vm10, %v12564_v18, %v10156_v57  ;;  %10901 = vpow2.f32 %v737_v22  ;;  %10186 = vmatmul.msk.bf16.gmra.mxu1 %vm1780_vm5, %v1351_v31  ;;  %v773_v58 = vmul.f32 1.442695, %v12653_v45  ;;  %v12670_v43 = vsub.f32 0.0, %v12647_v51 }
  0x9c   : > { %v12666_v53 = vrot.slane %v18437_v0, 7  ;;  %v1100_v25 = vpack.c.bf16 %v1029_v59, %v1029_v59  ;;  %v10896_v12 = vpop.eup %10895  ;;  %v1030_v18 = vsel %vm902_vm11, %v12584_v30, %v10157_v48  ;;  %vm711_vm1 = vcmp.gt.f32.partialorder %v12647_v51, 0.0 }
  0x9d   : > { %vm712_vm2 = vcmp.gt.f32.partialorder %v12653_v45, 0.0  ;;  %10903 = vpow2.f32 %v771_v7  ;;  %v1101_v31 = vpack.c.bf16 %v1030_v18, %v1030_v18  ;;  %v10140_v0 = vadd.f32 -1.0, %v10896_v12 }
  0x9e   : > { %v10898_v57 = vpop.eup %10897  ;;  %v1296_v22 = vor.u32 %v18442_v47, %v12666_v53  ;;  %v1518_v59 = vunpack.c.l.b16 %v1100_v25  ;;  %10905 = vpow2.f32 %v773_v58  ;;  %v12684_v3 = vsub.f32 0.0, %v12653_v45 }
  0x9f   : > { %v10141_v11 = vadd.f32 -1.0, %v10898_v57  ;;  %v12687_v30 = vsub.f32 0.0, %v12673_v2  ;;  %v10900_v48 = vpop.eup %10899  ;;  %v1519_v4 = vunpack.c.l.b16 %v1101_v31  ;;  %v1013_v46 = vsel %vm885_vm12, %v853_v28, %v10140_v0 }
  0xa0   : > { %v1297_v7 = vsel %vm1186_vm4, %v12554_v10, %v1296_v22  ;;  %v963_v47 = vmul.f32 1.442695, %v12670_v43  ;;  %v1084_v18 = vpack.c.bf16 %v1013_v46, %v1013_v46  ;;  %v10108_v57 = vadd.f32 -1.0, %v10900_v48 }
  0xa1   : > { %v10902_v25 = vpop.eup %10901  ;;  %v1360_v58 = vsel %vm12035_vm6, %v1297_v7, 0  ;;  %v1014_v12 = vsel %vm886_vm14, %v854_v54, %v10141_v11  ;;  %v12697_v32 = vpack.c.b16 %v1519_v4, %v1518_v59  ;;  %vm903_vm3 = vcmp.gt.f32.partialorder %v12670_v43, 0.0  ;;  %v12705_v11 = vld [vmem:[%s11901_s23 + $0x68] sm:$0xff] }
  0xa2   : > { %10195 = vmatmul.msk.bf16.gmra.mxu3 %vm1780_vm5, %v1360_v58  ;;  %v1085_v23 = vpack.c.bf16 %v1014_v12, %v1014_v12  ;;  %v10109_v10 = vadd.f32 -1.0, %v10902_v25  ;;  %10907 = vpow2.f32 %v963_v47  ;;  %v1502_v28 = vunpack.c.l.b16 %v1084_v18 }
  0xa3   : > { %v10904_v22 = vpop.eup %10903  ;;  %v821_v0 = vsel %vm693_vm13, %v12602_v63, %v10108_v57  ;;  %v965_v31 = vmul.f32 1.442695, %v12684_v3  ;;  %v18445_v46 = vshrl.u32 %v12697_v32, 16  ;;  %v18446_v4 = vshll.u32 %v12697_v32, 16 }
  0xa4   : > { %v1503_v54 = vunpack.c.l.b16 %v1085_v23  ;;  %v822_v47 = vsel %vm694_vm15, %v12609_v50, %v10109_v10  ;;  %v10906_v59 = vpop.eup %10905  ;;  %v1052_v48 = vpack.c.bf16 %v821_v0, %v821_v0  ;;  %v10126_v25 = vadd.f32 -1.0, %v10904_v22 }
  0xa5   : > { %v1053_v7 = vpack.c.bf16 %v822_v47, %v822_v47  ;;  %10909 = vpow2.f32 %v965_v31  ;;  %v12714_v63 = vrot.slane %v18445_v46, 7  ;;  %v10127_v12 = vadd.f32 -1.0, %v10906_v59 }
  0xa6   : > { %v12716_v58 = vpack.c.b16 %v1503_v54, %v1502_v28  ;;  %v12719_v18 = vsub.f32 0.0, %v12705_v11  ;;  %v1148_v23 = vunpack.c.l.b16 %v1052_v48  ;;  %v839_v50 = vsel %vm711_vm1, %v12647_v51, %v10126_v25 }
  0xa7   : > { %v1149_v57 = vunpack.c.l.b16 %v1053_v7  ;;  %vm904_vm7 = vcmp.gt.f32.partialorder %v12684_v3, 0.0  ;;  %v1649_v22 = vor.u32 %v18446_v4, %v12714_v63  ;;  %v840_v31 = vsel %vm712_vm2, %v12653_v45, %v10127_v12 }
  0xa8   : > { %v10908_v10 = vpop.eup %10907  ;;  %v18448_v28 = vshrl.u32 %v12716_v58, 16  ;;  %v18451_v0 = vshll.u32 %v12716_v58, 16  ;;  %v1070_v47 = vpack.c.bf16 %v839_v50, %v839_v50  ;;  %v1071_v59 = vpack.c.bf16 %v840_v31, %v840_v31 }
  0xa9   : > { %v12733_v54 = vpack.c.b16 %v1149_v57, %v1148_v23  ;;  %v10158_v51 = vadd.f32 -1.0, %v10908_v10  ;;  %v1650_v48 = vsel %vm1186_vm4, %v12581_v55, %v1649_v22  ;;  %v931_v25 = vmul.f32 1.442695, %v12687_v30 }
  0xaa   : > { %v12739_v7 = vrot.slane %v18448_v28, 7  ;;  %v933_v46 = vmul.f32 1.442695, %v12719_v18  ;;  %v1697_v45 = vsel %vm12035_vm6, %v1650_v48, 0  ;;  %v1166_v57 = vunpack.c.l.b16 %v1070_v47 }
  0xab   : > { %v10910_v4 = vpop.eup %10909  ;;  %v18450_v12 = vshrl.u32 %v12733_v54, 16  ;;  %v18453_v23 = vshll.u32 %v12733_v54, 16  ;;  %10179 = vmatmul.msk.bf16.gmra.mxu2 %vm1780_vm5, %v1697_v45  ;;  %v1167_v50 = vunpack.c.l.b16 %v1071_v59  ;;  %v1031_v22 = vsel %vm903_vm3, %v12670_v43, %v10158_v51 }
  0xac   : > { %v1585_v55 = vor.u32 %v18451_v0, %v12739_v7  ;;  %v10159_v10 = vadd.f32 -1.0, %v10910_v4  ;;  %v1102_v48 = vpack.c.bf16 %v1031_v22, %v1031_v22  ;;  %10911 = vpow2.f32 %v931_v25 }
  0xad   : > { %v12756_v31 = vrot.slane %v18450_v12, 7  ;;  %v12760_v45 = vpack.c.b16 %v1167_v50, %v1166_v57  ;;  %10913 = vpow2.f32 %v933_v46  ;;  %v739_v57 = vmul.f32 1.442695, %v12673_v2 }
  0xae   : > { %v1586_v47 = vsel %vm1186_vm4, %v12615_v38, %v1585_v55  ;;  %v1032_v4 = vsel %vm904_vm7, %v12684_v3, %v10159_v10  ;;  %v1520_v22 = vunpack.c.l.b16 %v1102_v48  ;;  %v12775_v55 = vld [vmem:[%s11901_s23 + $0xf0] sm:$0xff]  ;;  %v12778_v3 = vld [vmem:[%s11901_s23 + $0xf8] sm:$0xff]  ;;  %vm887_vm9 = vcmp.gt.f32.partialorder %v12687_v30, 0.0 }
  0xaf   : > { %v1689_v43 = vsel %vm12035_vm6, %v1586_v47, 0  ;;  %v1232_v59 = vor.u32 %v18453_v23, %v12756_v31  ;;  %v1103_v51 = vpack.c.bf16 %v1032_v4, %v1032_v4  ;;  %v18447_v38 = vshrl.u32 %v12760_v45, 16 }
  0xb0   : > { %10171 = vmatmul.msk.bf16.gmra.mxu0 %vm1780_vm5, %v1689_v43  ;;  %v18449_v25 = vshll.u32 %v12760_v45, 16  ;;  %v741_v10 = vmul.f32 1.442695, %v12705_v11  ;;  %vm888_vm10 = vcmp.gt.f32.partialorder %v12719_v18, 0.0  ;;  %10915 = vpow2.f32 %v739_v57 }
  0xb1   : > { %v1233_v46 = vsel %vm1186_vm4, %v12629_v62, %v1232_v59  ;;  %v1521_v50 = vunpack.c.l.b16 %v1103_v51  ;;  %v12788_v47 = vrot.slane %v18447_v38, 7  ;;  %v775_v62 = vmul.f32 1.442695, %v12775_v55 }
  0xb2   : > { %v1352_v48 = vsel %vm12035_vm6, %v1233_v46, 0  ;;  %v10912_v4 = vpop.eup %10911  ;;  %10917 = vpow2.f32 %v741_v10  ;;  %v777_v59 = vmul.f32 1.442695, %v12778_v3  ;;  %v12800_v28 = vsub.f32 0.0, %v12775_v55 }
  0xb3   : > { %10187 = vmatmul.msk.bf16.gmra.mxu1 %vm1780_vm5, %v1352_v48  ;;  %v12792_v43 = vpack.c.b16 %v1521_v50, %v1520_v22  ;;  %v10914_v51 = vpop.eup %10913  ;;  %v1304_v46 = vor.u32 %v18449_v25, %v12788_v47  ;;  %v10142_v38 = vadd.f32 -1.0, %v10912_v4  ;;  %v12803_v57 = vsub.f32 0.0, %v12778_v3 }
  0xb4   : > { %v10143_v10 = vadd.f32 -1.0, %v10914_v51  ;;  %10919 = vpow2.f32 %v775_v62  ;;  %vm695_vm11 = vcmp.gt.f32.partialorder %v12673_v2, 0.0  ;;  %vm696_vm12 = vcmp.gt.f32.partialorder %v12705_v11, 0.0 }
  0xb5   : > { %v18452_v22 = vshrl.u32 %v12792_v43, 16  ;;  %v18454_v50 = vshll.u32 %v12792_v43, 16  ;;  %v1305_v48 = vsel %vm1186_vm4, %v12666_v53, %v1304_v46  ;;  %v1015_v25 = vsel %vm887_vm9, %v12687_v30, %v10142_v38 }
  0xb6   : > { %10921 = vpow2.f32 %v777_v59  ;;  %v1361_v4 = vsel %vm12035_vm6, %v1305_v48, 0  ;;  %v1016_v51 = vsel %vm888_vm10, %v12719_v18, %v10143_v10  ;;  %v1086_v62 = vpack.c.bf16 %v1015_v25, %v1015_v25  ;;  %v10916_v0 = vpop.eup %10915 }
  0xb7   : > { %v12816_v12 = vrot.slane %v18452_v22, 7  ;;  %10196 = vmatmul.msk.bf16.gmra.mxu3 %vm1780_vm5, %v1361_v4  ;;  %v1087_v53 = vpack.c.bf16 %v1016_v51, %v1016_v51  ;;  %v967_v30 = vmul.f32 1.442695, %v12800_v28  ;;  %v969_v38 = vmul.f32 1.442695, %v12803_v57 }
  0xb8   : > { %v10918_v59 = vpop.eup %10917  ;;  %v1504_v48 = vunpack.c.l.b16 %v1086_v62  ;;  %v10110_v18 = vadd.f32 -1.0, %v10916_v0  ;;  %vm713_vm13 = vcmp.gt.f32.partialorder %v12775_v55, 0.0  ;;  %vm714_vm14 = vcmp.gt.f32.partialorder %v12778_v3, 0.0 }
  0xb9   : > { %v1657_v46 = vor.u32 %v18454_v50, %v12816_v12  ;;  %v1505_v25 = vunpack.c.l.b16 %v1087_v53  ;;  %v10111_v10 = vadd.f32 -1.0, %v10918_v59  ;;  %10923 = vpow2.f32 %v967_v30 }
  0xba   : > { %v10920_v4 = vpop.eup %10919  ;;  %v823_v22 = vsel %vm695_vm11, %v12673_v2, %v10110_v18  ;;  %10925 = vpow2.f32 %v969_v38  ;;  %v1842_v38 = vpop.f32.mrf.mxu0  ;;  %vm905_vm15 = vcmp.gt.f32.partialorder %v12800_v28, 0.0  ;;  %vm906_vm1 = vcmp.gt.f32.partialorder %v12803_v57, 0.0 }
  0xbb   : > { %v1658_v51 = vsel %vm1186_vm4, %v12714_v63, %v1657_v46  ;;  %v12836_v50 = vpack.c.b16 %v1505_v25, %v1504_v48  ;;  %v824_v0 = vsel %vm696_vm12, %v12705_v11, %v10111_v10  ;;  %v1054_v53 = vpack.c.bf16 %v823_v22, %v823_v22 }
  0xbc   : > { %v10922_v23 = vpop.eup %10921  ;;  %v1698_v62 = vsel %vm12035_vm6, %v1658_v51, 0  ;;  %v1055_v30 = vpack.c.bf16 %v824_v0, %v824_v0  ;;  %v10128_v59 = vadd.f32 -1.0, %v10920_v4  ;;  %vm1363_vm7 = vsmask.f32 7424 }
  0xbd   : > { %10180 = vmatmul.msk.bf16.gmra.mxu2 %vm1780_vm5, %v1698_v62  ;;  %v10129_v6 = vadd.f32 -1.0, %v10922_v23  ;;  %v18463_v63 = vshrl.u32 %v12836_v50, 16  ;;  %v18466_v2 = vshll.u32 %v12836_v50, 16  ;;  %v1150_v46 = vunpack.c.l.b16 %v1054_v53  ;;  %v1982_v18 = vpop.f32.mrf.mxu1 }
  0xbe   : > { %v1151_v27 = vunpack.c.l.b16 %v1055_v30  ;;  %v841_v48 = vsel %vm713_vm13, %v12775_v55, %v10128_v59  ;;  %v12848_v22 = vadd.f32 %v1982_v18, %v1842_v38  ;;  %v2022_v18 = vpop.f32.mrf.mxu3  ;;  %vm1441_vm9 = vcmp.ne.s32.totalorder %v11922_v21, %v11914_v17 }
  0xbf   : > { %v842_v11 = vsel %vm714_vm14, %v12778_v3, %v10129_v6  ;;  %v10924_v25 = vpop.eup %10923  ;;  %v1590_v23 = vrot.slane %v18463_v63, 7  ;;  %v1072_v10 = vpack.c.bf16 %v841_v48, %v841_v48  ;;  %v18554_v17 = vshll.u32 %v12208_v56, 16 }
  0xc0   : > { %v1073_v4 = vpack.c.bf16 %v842_v11, %v842_v11  ;;  %v10926_v51 = vpop.eup %10925  ;;  %v12853_v62 = vpack.c.b16 %v1151_v27, %v1150_v46  ;;  %v10160_v55 = vadd.f32 -1.0, %v10924_v25  ;;  %vm1427_vm12 = vcmask 1047552  }
  0xc1   : > { %v1593_v0 = vor.u32 %v18466_v2, %v1590_v23  ;;  %v1168_v6 = vunpack.c.l.b16 %v1072_v10  ;;  %v10161_v53 = vadd.f32 -1.0, %v10926_v51  ;;  %v1702_v21 = vrot.slane %v18554_v17, 1  ;;  %vm13395_vm13 = vmand %vm1427_vm12, %vm1363_vm7 }
  0xc2   : > { %v1169_v3 = vunpack.c.l.b16 %v1073_v4  ;;  %v18465_v30 = vshrl.u32 %v12853_v62, 16  ;;  %v18467_v59 = vshll.u32 %v12853_v62, 16  ;;  %v1033_v38 = vsel %vm905_vm15, %v12800_v28, %v10160_v55 }
  0xc3   : > { %v1594_v27 = vsel %vm1186_vm4, %v12739_v7, %v1593_v0  ;;  %v1034_v48 = vsel %vm906_vm1, %v12803_v57, %v10161_v53  ;;  %v1104_v11 = vpack.c.bf16 %v1033_v38, %v1033_v38  ;;  %v1882_v7 = vpop.f32.mrf.mxu2  ;;  %v678_v53 = vadd.s32 8, %v11891_v5  ;;  %v12892_v5 = vpop.f32.mrf.mxu0 }
  0xc4   : > { %v12863_v46 = vpack.c.b16 %v1169_v3, %v1168_v6  ;;  %v1690_v25 = vsel %vm12035_vm6, %v1594_v27, 0  ;;  %v1237_v10 = vrot.slane %v18465_v30, 7  ;;  %v1105_v4 = vpack.c.bf16 %v1034_v48, %v1034_v48 }
  0xc5   : > { %10172 = vmatmul.msk.bf16.gmra.mxu0 %vm1780_vm5, %v1690_v25  ;;  %v1522_v55 = vunpack.c.l.b16 %v1104_v11  ;;  %v18462_v3 = vshll.u32 %v12010_v42, 16  ;;  %vm682_vm2 = vcmp.lt.s32.totalorder %v678_v53, 15 }
  0xc6   : > { %v18458_v28 = vshrl.u32 %v12863_v46, 16  ;;  %v18461_v51 = vshll.u32 %v12863_v46, 16  ;;  %v1240_v0 = vor.u32 %v18467_v59, %v1237_v10  ;;  %v1523_v57 = vunpack.c.l.b16 %v1105_v4  ;;  %vm1431_vm3 = vmpackc.low %vm682_vm2, %vm682_vm2 }
  0xc8   : > { %v1309_v6 = vrot.slane %v18458_v28, 7  ;;  %v1241_v38 = vsel %vm1186_vm4, %v12756_v31, %v1240_v0  ;;  %v12881_v27 = vpack.c.b16 %v1523_v57, %v1522_v55  ;;  %v12890_v28 = vadd.f32 %v2022_v18, %v1882_v7  ;;  %v12899_v0 = vpop.f32.mrf.mxu1  ;;  %v12901_v57 = vpop.f32.mrf.mxu3 }
  0xc9   : > { %v1353_v48 = vsel %vm12035_vm6, %v1241_v38, 0  ;;  %v1601_v55 = vor.u32 %v18462_v3, %v12064_v1  ;;  %v18464_v7 = vshll.u32 %v11986_v9, 16  ;;  %v18558_v3 = vshll.u32 %v12366_v8, 16 }
  0xca   : > { %v1312_v11 = vor.u32 %v18461_v51, %v1309_v6  ;;  %10188 = vmatmul.msk.bf16.gmra.mxu1 %vm1780_vm5, %v1353_v48  ;;  %v18459_v25 = vshrl.u32 %v12881_v27, 16  ;;  %v18460_v4 = vshll.u32 %v12881_v27, 16 }
  0xcb   : > { %v1602_v53 = vsel %vm1186_vm4, %v1590_v23, %v1601_v55  ;;  %v1248_v48 = vor.u32 %v18464_v7, %v12003_v33  ;;  %v18564_v7 = vshll.u32 %v12450_v39, 16 }
  0xcc   : > { %v1313_v31 = vsel %vm1186_vm4, %v12788_v47, %v1312_v11  ;;  %v1662_v18 = vrot.slane %v18459_v25, 7  ;;  %v12909_v47 = vpop.f32.mrf.mxu2 }
  0xcd   : > { %v1362_v6 = vsel %vm12035_vm6, %v1313_v31, 0  ;;  %v18546_v31 = vmov 0   ;;  %v1249_v23 = vsel %vm1186_vm4, %v1237_v10, %v1248_v48  ;;  %v18548_v10 = vshrl.u32 %v12086_v15, 16 }
  0xce   : > { %10197 = vmatmul.msk.bf16.gmra.mxu3 %vm1780_vm5, %v1362_v6  ;;  %v1665_v1 = vor.u32 %v18460_v4, %v1662_v18  ;;  %v1433_v6 = vsel %vm1431_vm3, 65537, %v18546_v31  ;;  %v1691_v18 = vsel %vm12035_vm6, %v1602_v53, 0 }
  0xcf   : > { %v1435_v55 = vunpack.c.l.b16 %v1433_v6  ;;  %v18549_v6 = vshll.u32 %v12224_v13, 16 }
  0xd0   : > { %v1666_v38 = vsel %vm1186_vm4, %v12816_v12, %v1665_v1 }
  0xd1   : > { %v1699_v11 = vsel %vm12035_vm6, %v1666_v38, 0  ;;  %v18547_v38 = vshll.u32 %v12086_v15, 16  ;;  %v10165_v53 = vunpack.i.l.s16 %v1435_v55 }
  0xd2   : > { %10181 = vmatmul.msk.bf16.gmra.mxu2 %vm1780_vm5, %v1699_v11  ;;  %v1354_v11 = vsel %vm12035_vm6, %v1249_v23, 0 }
  0xd3   : > { %v2027_v25 = vpop.f32.mrf.mxu3  ;;  %v1364_v51 = vrot.slane %v18547_v38, 1  ;;  %vm1442_vm10 = vcmp.ne.s32.totalorder %v10165_v53, %v11918_v19 }
  0xd4   : > { %v1847_v12 = vpop.f32.mrf.mxu0  ;;  %vm12952_vm11 = vmpackc.low %vm1442_vm10, %vm1441_vm9 }
  0xd5   : > { %10173 = vmatmul.msk.bf16.gmra.mxu0 %vm1780_vm5, %v1691_v18  ;;  %v1365_v48 = vor.u32 %v1364_v51, %v18548_v10  ;;  %v1366_v18 = vrot.slane %v18549_v6, 1 }
  0xd6   : > { %v1987_v1 = vpop.f32.mrf.mxu1 }
  0xd7   : > { %v12927_v4 = vadd.f32 %v1987_v1, %v1847_v12  ;;  %v1887_v33 = vpop.f32.mrf.mxu2  ;;  %v18550_v12 = vshll.u32 %v12052_v60, 16  ;;  %v1367_v51 = vsel %vm1363_vm7, %v1365_v48, %v1366_v18 }
  0xd8   : > { %v12933_v31 = vadd.f32 %v2027_v25, %v1887_v33  ;;  %v18553_v33 = vshrl.u32 %v12052_v60, 16  ;;  %v1444_v19 = vsel %vm12952_vm11, %v1367_v51, 0  ;;  %v18555_v51 = vshrl.u32 %v12224_v13, 16 }
  0xd9   : > { %v1700_v1 = vrot.slane %v18550_v12, 1 }
  0xda   : > { %10189 = vmatmul.msk.bf16.gmra.mxu1 %vm1780_vm5, %v1354_v11 }
  0xdb   : > { %v12947_v25 = vpop.f32.mrf.mxu3  ;;  %v1701_v38 = vor.u32 %v1700_v1, %v18553_v33  ;;  %v3265_v1 = vld [vmem:[%s18386_s5] sm:$0xf]  ;;  %v1368_v33 = vor.u32 %v1366_v18, %v18555_v51  ;;  %v1705_v18 = vrot.slane %v18558_v3, 1 }
  0xdc   : > { %v12966_v53 = vpop.f32.mrf.mxu0 }
  0xdd   : > { %v1703_v11 = vsel %vm1363_vm7, %v1701_v38, %v1702_v21  ;;  %v18556_v38 = vshll.u32 %v12376_v26, 16 }
  0xde   : > { %10214 = vmatmul.msk.bf16.vlgmr.msrb.gmra.mxu3 %vm1780_vm5, %v12052_v60  ;;  %v12968_v10 = vpop.f32.mrf.mxu1  ;;  %v1764_v60 = vsel %vm12952_vm11, %v1703_v11, 0  ;;  %v4165_v11 = vsel %vm1829_vm0, %v3265_v1, 0 }
  0xdf   : > { %v12949_v23 = vpop.f32.mrf.mxu2  ;;  %v1369_v17 = vrot.slane %v18556_v38, 1  ;;  %4174 = vmatpush.bf16.msra.mxu3 %v4165_v11  ;;  %v18561_v11 = vshll.u32 %v12519_v37, 16 }
  0xe2   : > { %10198 = vmatmul.msk.bf16.vlgmr.msrb.gmra.mxu2 %vm1780_vm5, %v12086_v15  ;;  %v3268_v15 = vld [vmem:[%s18387_s6] sm:$0xf] }
  0xe3   : > { %v2032_v48 = vpop.f32.mrf.mxu3 }
  0xe5   : > { %10230 = vmatmul.msk.bf16.vlgmr.msrb.gmra.mxu0 %vm1780_vm5, %v1444_v19  ;;  %v4025_v19 = vsel %vm1829_vm0, %v3268_v15, 0 }
  0xe6   : > { %4034 = vmatpush.bf16.msra.mxu2 %v4025_v19 }
  0xe9   : > { %v1892_v6 = vpop.f32.mrf.mxu2 }
  0xea   : > { %v12972_v12 = vadd.f32 %v2032_v48, %v1892_v6  ;;  %10246 = vmatmul.msk.bf16.vlgmr.msrb.gmra.mxu1 %vm1780_vm5, %v1764_v60  ;;  %v1370_v60 = vsel %vm1363_vm7, %v1368_v33, %v1369_v17  ;;  %v18557_v48 = vshrl.u32 %v12208_v56, 16 }
  0xeb   : > { %v12996_v15 = vpop.f32.mrf.mxu3  ;;  %v1445_v33 = vsel %vm12952_vm11, %v1370_v60, 0 }
  0xec   : > { %v1704_v6 = vor.u32 %v1702_v21, %v18557_v48  ;;  %18559 = vst [vmem:[#allocation4_spill] sm:$0xff] %v12996_v15  ;;  %v18560_v21 = vshrl.u32 %v12376_v26, 16 }
  0xed   : > { %v1852_v51 = vpop.f32.mrf.mxu0 }
  0xee   : > { %10215 = vmatmul.msk.bf16.gmra.mxu3 %vm1780_vm5, %v12208_v56  ;;  %v1706_v56 = vsel %vm1363_vm7, %v1704_v6, %v1705_v18  ;;  %v1371_v19 = vor.u32 %v1369_v17, %v18560_v21  ;;  %v1708_v17 = vrot.slane %v18564_v7, 1 }
  0xef   : > { %v1765_v3 = vsel %vm12952_vm11, %v1706_v56, 0  ;;  %v18563_v56 = vshrl.u32 %v12366_v8, 16 }
  0xf1   : > { %v1992_v63 = vpop.f32.mrf.mxu1  ;;  %v12998_v1 = vpop.f32.mrf.mxu2 }
  0xf2   : > { %v12994_v38 = vadd.f32 %v1992_v63, %v1852_v51  ;;  %10199 = vmatmul.msk.bf16.gmra.mxu2 %vm1780_vm5, %v12224_v13  ;;  %v1372_v13 = vrot.slane %v18561_v11, 1 }
  0xf5   : > { %10231 = vmatmul.msk.bf16.gmra.mxu0 %vm1780_vm5, %v1445_v33  ;;  %v13009_v63 = vpop.f32.mrf.mxu0  ;;  %v1373_v33 = vsel %vm1363_vm7, %v1371_v19, %v1372_v13 }
  0xf6   : > { %v1446_v21 = vsel %vm12952_vm11, %v1373_v33, 0  ;;  %v18567_v33 = vshll.u32 %v12606_v52, 16 }
  0xf9   : > { %v13019_v6 = vpop.f32.mrf.mxu1 }
  0xfa   : > { %10247 = vmatmul.msk.bf16.gmra.mxu1 %vm1780_vm5, %v1765_v3  ;;  %v2037_v48 = vpop.f32.mrf.mxu3  ;;  %v1707_v3 = vor.u32 %v1705_v18, %v18563_v56  ;;  %v1375_v56 = vrot.slane %v18567_v33, 1 }
  0xfc   : > { %v1897_v51 = vpop.f32.mrf.mxu2  ;;  %v1709_v11 = vsel %vm1363_vm7, %v1707_v3, %v1708_v17 }
  0xfd   : > { %v13015_v60 = vadd.f32 %v2037_v48, %v1897_v51  ;;  %v1857_v48 = vpop.f32.mrf.mxu0  ;;  %v1766_v19 = vsel %vm12952_vm11, %v1709_v11, 0 }
  0xfe   : > { %10216 = vmatmul.msk.bf16.gmra.mxu3 %vm1780_vm5, %v12366_v8 }
  0xff   : > { %18562 = vst [vmem:[#allocation5_spill] sm:$0xff] %v13015_v60 }
 0x102   : > { %10200 = vmatmul.msk.bf16.gmra.mxu2 %vm1780_vm5, %v12376_v26  ;;  %v13037_v7 = vpop.f32.mrf.mxu3  ;;  %v18566_v26 = vshrl.u32 %v12519_v37, 16 }
 0x103   : > { %18565 = vst [vmem:[#allocation6_spill] sm:$0xff] %v13037_v7 }
 0x104   : > { %v1374_v18 = vor.u32 %v1372_v13, %v18566_v26  ;;  %v13043_v3 = vpop.f32.mrf.mxu2 }
 0x105   : > { %10232 = vmatmul.msk.bf16.gmra.mxu0 %vm1780_vm5, %v1446_v21  ;;  %18568 = vst [vmem:[#allocation7_spill] sm:$0xff] %v13043_v3  ;;  %v13047_v21 = vpop.f32.mrf.mxu0 }
 0x106   : > { %v1376_v11 = vsel %vm1363_vm7, %v1374_v18, %v1375_v56 }
 0x107   : > { %v1447_v13 = vsel %vm12952_vm11, %v1376_v11, 0 }
 0x108   : > { %v1997_v51 = vpop.f32.mrf.mxu1 }
 0x109   : > { %v13034_v8 = vadd.f32 %v1997_v51, %v1857_v48  ;;  %v18569_v48 = vshrl.u32 %v12450_v39, 16  ;;  %v18570_v51 = vshll.u32 %v12588_v14, 16 }
 0x10a   : > { %10248 = vmatmul.msk.bf16.gmra.mxu1 %vm1780_vm5, %v1766_v19 }
 0x10b   : > { %v1710_v19 = vor.u32 %v1708_v17, %v18569_v48  ;;  %v1711_v30 = vrot.slane %v18570_v51, 1 }
 0x10d   : > { %v1712_v26 = vsel %vm1363_vm7, %v1710_v19, %v1711_v30  ;;  %v18573_v19 = vshll.u32 %v12733_v54, 16 }
 0x10e   : > { %10217 = vmatmul.msk.bf16.gmra.mxu3 %vm1780_vm5, %v12450_v39  ;;  %v1767_v39 = vsel %vm12952_vm11, %v1712_v26, 0  ;;  %v18575_v26 = vshrl.u32 %v12588_v14, 16 }
 0x10f   : > { %v1378_v7 = vrot.slane %v18573_v19, 1 }
 0x110   : > { %v13054_v2 = vpop.f32.mrf.mxu1 }
 0x112   : > { %10201 = vmatmul.msk.bf16.gmra.mxu2 %vm1780_vm5, %v12519_v37  ;;  %v2042_v33 = vpop.f32.mrf.mxu3  ;;  %v18572_v37 = vshrl.u32 %v12606_v52, 16 }
 0x114   : > { %v1377_v11 = vor.u32 %v1375_v56, %v18572_v37 }
 0x115   : > { %10233 = vmatmul.msk.bf16.gmra.mxu0 %vm1780_vm5, %v1447_v13  ;;  %v1862_v17 = vpop.f32.mrf.mxu0 }
 0x116   : > { %v1902_v18 = vpop.f32.mrf.mxu2 }
 0x117   : > { %v13062_v59 = vadd.f32 %v2042_v33, %v1902_v18  ;;  %v1379_v33 = vsel %vm1363_vm7, %v1377_v11, %v1378_v7  ;;  %v1713_v18 = vor.u32 %v1711_v30, %v18575_v26 }
 0x118   : > { %v2002_v48 = vpop.f32.mrf.mxu1  ;;  %v1448_v56 = vsel %vm12952_vm11, %v1379_v33, 0  ;;  %v18579_v33 = vshll.u32 %v12853_v62, 16 }
 0x119   : > { %18571 = vst [vmem:[#allocation8_spill] sm:$0xff] %v13062_v59  ;;  %v13066_v51 = vadd.f32 %v2002_v48, %v1862_v17  ;;  %v18576_v17 = vshll.u32 %v12716_v58, 16 }
 0x11a   : > { %10249 = vmatmul.msk.bf16.gmra.mxu1 %vm1780_vm5, %v1767_v39  ;;  %v13075_v13 = vpop.f32.mrf.mxu3 }
 0x11b   : > { %18574 = vst [vmem:[#allocation9_spill] sm:$0xff] %v13075_v13  ;;  %v1714_v48 = vrot.slane %v18576_v17, 1 }
 0x11d   : > { %v1715_v39 = vsel %vm1363_vm7, %v1713_v18, %v1714_v48  ;;  %v13087_v37 = vpop.f32.mrf.mxu0  ;;  %v1381_v18 = vrot.slane %v18579_v33, 1 }
 0x11e   : > { %10218 = vmatmul.msk.bf16.gmra.mxu3 %vm1780_vm5, %v12588_v14  ;;  %v13089_v19 = vpop.f32.mrf.mxu2  ;;  %v1768_v14 = vsel %vm12952_vm11, %v1715_v39, 0 }
 0x11f   : > { %18577 = vst [vmem:[#allocation10_spill] sm:$0xff] %v13089_v19 }
 0x120   : > { %v13092_v11 = vpop.f32.mrf.mxu1 }
 0x122   : > { %10202 = vmatmul.msk.bf16.gmra.mxu2 %vm1780_vm5, %v12606_v52  ;;  %v18578_v52 = vshrl.u32 %v12733_v54, 16 }
 0x124   : > { %v1380_v26 = vor.u32 %v1378_v7, %v18578_v52  ;;  %v18582_v7 = vshll.u32 %v12836_v50, 16 }
 0x125   : > { %10234 = vmatmul.msk.bf16.gmra.mxu0 %vm1780_vm5, %v1448_v56  ;;  %v2047_v30 = vpop.f32.mrf.mxu3 }
 0x126   : > { %v1382_v19 = vsel %vm1363_vm7, %v1380_v26, %v1381_v18  ;;  %v1717_v52 = vrot.slane %v18582_v7, 1  ;;  %v18587_v7 = vshrl.u32 %v12836_v50, 16 }
 0x127   : > { %v1449_v33 = vsel %vm12952_vm11, %v1382_v19, 0  ;;  %v18585_v19 = vshll.u32 %v11986_v9, 16 }
 0x12a   : > { %10250 = vmatmul.msk.bf16.gmra.mxu1 %vm1780_vm5, %v1768_v14  ;;  %v18581_v14 = vshrl.u32 %v12716_v58, 16 }
 0x12c   : > { %v1716_v3 = vor.u32 %v1714_v48, %v18581_v14 }
 0x12d   : > { %v1867_v17 = vpop.f32.mrf.mxu0  ;;  %v2049_v60 = vpop.f32.mrf.mxu3 }
 0x12e   : > { %10219 = vmatmul.msk.bf16.gmra.mxu3 %vm1780_vm5, %v12716_v58  ;;  %v1907_v13 = vpop.f32.mrf.mxu2  ;;  %v1718_v15 = vsel %vm1363_vm7, %v1716_v3, %v1717_v52 }
 0x12f   : > { %v13104_v59 = vadd.f32 %v2047_v30, %v1907_v13  ;;  %v1769_v30 = vsel %vm12952_vm11, %v1718_v15, 0 }
 0x130   : > { %v2007_v56 = vpop.f32.mrf.mxu1 }
 0x131   : > { %18580 = vst [vmem:[#allocation11_spill] sm:$0xff] %v13104_v59  ;;  %v13106_v39 = vadd.f32 %v2007_v56, %v1867_v17  ;;  %v1384_v17 = vrot.slane %v18585_v19, 1 }
 0x132   : > { %10203 = vmatmul.msk.bf16.gmra.mxu2 %vm1780_vm5, %v12733_v54  ;;  %v18584_v54 = vshrl.u32 %v12853_v62, 16 }
 0x134   : > { %v1383_v26 = vor.u32 %v1381_v18, %v18584_v54 }
 0x135   : > { %10235 = vmatmul.msk.bf16.gmra.mxu0 %vm1780_vm5, %v1449_v33  ;;  %v13122_v48 = vpop.f32.mrf.mxu0  ;;  %v1719_v33 = vor.u32 %v1717_v52, %v18587_v7 }
 0x136   : > { %v1909_v13 = vpop.f32.mrf.mxu2  ;;  %v1385_v15 = vsel %vm1363_vm7, %v1383_v26, %v1384_v17 }
 0x137   : > { %v13120_v58 = vadd.f32 %v2049_v60, %v1909_v13  ;;  %v18588_v13 = vshll.u32 %v12010_v42, 16  ;;  %v1450_v54 = vsel %vm12952_vm11, %v1385_v15, 0 }
 0x138   : > { %v13129_v3 = vpop.f32.mrf.mxu1 }
 0x139   : > { %18583 = vst [vmem:[#allocation12_spill] sm:$0xff] %v13120_v58  ;;  %v1720_v18 = vrot.slane %v18588_v13, 1  ;;  %v18590_v13 = vshrl.u32 %v11986_v9, 16 }
 0x13a   : > { %10251 = vmatmul.msk.bf16.gmra.mxu1 %vm1780_vm5, %v1769_v30  ;;  %v2052_v56 = vpop.f32.mrf.mxu3 }
 0x13b   : > { %v1721_v19 = vsel %vm1363_vm7, %v1719_v33, %v1720_v18  ;;  %v1386_v15 = vor.u32 %v1384_v17, %v18590_v13  ;;  %v18591_v33 = vshll.u32 %v11995_v20, 16 }
 0x13e   : > { %10220 = vmatmul.msk.bf16.gmra.mxu3 %vm1780_vm5, %v12836_v50  ;;  %v1770_v50 = vsel %vm12952_vm11, %v1721_v19, 0 }
 0x140   : > { %v1912_v60 = vpop.f32.mrf.mxu2 }
 0x141   : > { %v13134_v14 = vadd.f32 %v2052_v56, %v1912_v60 }
 0x142   : > { %v1872_v30 = vpop.f32.mrf.mxu0  ;;  %10204 = vmatmul.msk.bf16.gmra.mxu2 %vm1780_vm5, %v12853_v62  ;;  %v2054_v26 = vpop.f32.mrf.mxu3 }
 0x143   : > { %18586 = vst [vmem:[#allocation13_spill] sm:$0xff] %v13134_v14  ;;  %v1387_v14 = vrot.slane %v18591_v33, 1 }
 0x145   : > { %10236 = vmatmul.msk.bf16.gmra.mxu0 %vm1780_vm5, %v1450_v54  ;;  %v1388_v19 = vsel %vm1363_vm7, %v1386_v15, %v1387_v14 }
 0x146   : > { %v1451_v17 = vsel %vm12952_vm11, %v1388_v19, 0 }
 0x147   : > { %v2012_v56 = vpop.f32.mrf.mxu1 }
 0x148   : > { %v1914_v52 = vpop.f32.mrf.mxu2  ;;  %v13148_v60 = vadd.f32 %v2012_v56, %v1872_v30 }
 0x149   : > { %v13150_v7 = vadd.f32 %v2054_v26, %v1914_v52  ;;  %v18592_v26 = vshrl.u32 %v12010_v42, 16 }
 0x14a   : > { %10252 = vmatmul.msk.bf16.gmra.mxu1 %vm1780_vm5, %v1770_v50  ;;  %v1874_v62 = vpop.f32.mrf.mxu0  ;;  %v18593_v50 = vshll.u32 %v12022_v49, 16 }
 0x14b   : > { %18589 = vst [vmem:[#allocation14_spill] sm:$0xff] %v13150_v7  ;;  %v1722_v56 = vor.u32 %v1720_v18, %v18592_v26  ;;  %v18595_v26 = vshrl.u32 %v11995_v20, 16 }
 0x14c   : > { %v1723_v52 = vrot.slane %v18593_v50, 1 }
 0x14d   : > { %v1389_v19 = vor.u32 %v1387_v14, %v18595_v26  ;;  %v18599_v14 = vshll.u32 %v12194_v40, 16 }
 0x14e   : > { %10221 = vmatmul.msk.bf16.gmra.mxu3 %vm1780_vm5, %v12010_v42  ;;  %v1724_v13 = vsel %vm1363_vm7, %v1722_v56, %v1723_v52  ;;  %v18596_v56 = vshll.u32 %v12180_v24, 16 }
 0x14f   : > { %v2014_v54 = vpop.f32.mrf.mxu1  ;;  %v1771_v42 = vsel %vm12952_vm11, %v1724_v13, 0  ;;  %v1726_v26 = vrot.slane %v18599_v14, 1  ;;  %v18600_v14 = vshrl.u32 %v12180_v24, 16 }
 0x150   : > { %v13160_v58 = vadd.f32 %v2014_v54, %v1874_v62  ;;  %v1390_v50 = vrot.slane %v18596_v56, 1 }
 0x151   : > { %v2057_v30 = vpop.f32.mrf.mxu3 }
 0x152   : > { %v1877_v7 = vpop.f32.mrf.mxu0  ;;  %10205 = vmatmul.msk.bf16.gmra.mxu2 %vm1780_vm5, %v11986_v9 }
 0x155   : > { %10237 = vmatmul.msk.bf16.gmra.mxu0 %vm1780_vm5, %v1451_v17  ;;  %v1917_v62 = vpop.f32.mrf.mxu2 }
 0x156   : > { %v13172_v15 = vadd.f32 %v2057_v30, %v1917_v62 }
 0x157   : > { %v2017_v33 = vpop.f32.mrf.mxu1 }
 0x158   : > { %18594 = vst [vmem:[#allocation15_spill] sm:$0xff] %v13172_v15  ;;  %v13176_v18 = vadd.f32 %v2017_v33, %v1877_v7  ;;  %v1391_v7 = vsel %vm1363_vm7, %v1389_v19, %v1390_v50 }
 0x159   : > { %v2059_v54 = vpop.f32.mrf.mxu3 }
 0x15a   : > { %10253 = vmatmul.msk.bf16.gmra.mxu1 %vm1780_vm5, %v1771_v42  ;;  %v1879_v9 = vpop.f32.mrf.mxu0  ;;  %v18598_v42 = vshrl.u32 %v12022_v49, 16 }
 0x15c   : > { %v1725_v15 = vor.u32 %v1723_v52, %v18598_v42 }
 0x15d   : > { %v1919_v17 = vpop.f32.mrf.mxu2 }
 0x15e   : > { %10222 = vmatmul.msk.bf16.gmra.mxu3 %vm1780_vm5, %v12022_v49  ;;  %v13185_v30 = vadd.f32 %v2059_v54, %v1919_v17  ;;  %v1452_v54 = vsel %vm12952_vm11, %v1391_v7, 0  ;;  %v1727_v56 = vsel %vm1363_vm7, %v1725_v15, %v1726_v26  ;;  %v1392_v7 = vor.u32 %v1390_v50, %v18600_v14 }
 0x15f   : > { %v2019_v62 = vpop.f32.mrf.mxu1  ;;  %v1772_v49 = vsel %vm12952_vm11, %v1727_v56, 0  ;;  %v18601_v15 = vshll.u32 %v12265_v61, 16 }
 0x160   : > { %18597 = vst [vmem:[#allocation16_spill] sm:$0xff] %v13185_v30  ;;  %v13188_v13 = vadd.f32 %v2019_v62, %v1879_v9 }
 0x161   : > { %v2262_v33 = vpop.f32.mrf.mxu3  ;;  %v1393_v30 = vrot.slane %v18601_v15, 1 }
 0x162   : > { %v2434_v59 = vpop.f32.mrf.mxu0  ;;  %10206 = vmatmul.msk.bf16.gmra.mxu2 %vm1780_vm5, %v11995_v20 }
 0x163   : > { %v1394_v50 = vsel %vm1363_vm7, %v1392_v7, %v1393_v30 }
 0x164   : > { %v1453_v14 = vsel %vm12952_vm11, %v1394_v50, 0 }
 0x165   : > { %10238 = vmatmul.msk.bf16.gmra.mxu0 %vm1780_vm5, %v1452_v54  ;;  %v2106_v9 = vpop.f32.mrf.mxu2  ;;  %v1985_v54 = vadd.f32 %v12899_v0, %v12892_v5  ;;  %v18603_v5 = vshll.u32 %v12313_v44, 16 }
 0x166   : > { %v2186_v19 = vadd.f32 %v2106_v9, %v12848_v22 }
 0x167   : > { %v2606_v17 = vpop.f32.mrf.mxu1  ;;  %v1729_v0 = vrot.slane %v18603_v5, 1 }
 0x168   : > { %v2342_v52 = vadd.f32 %v2262_v33, %v2186_v19 }
 0x169   : > { %v2264_v62 = vpop.f32.mrf.mxu3 }
 0x16a   : > { %10254 = vmatmul.msk.bf16.gmra.mxu1 %vm1780_vm5, %v1772_v49  ;;  %v2436_v42 = vpop.f32.mrf.mxu0  ;;  %v2514_v20 = vadd.f32 %v2434_v59, %v2342_v52  ;;  %v18602_v49 = vshrl.u32 %v12194_v40, 16 }
 0x16c   : > { %v13210_v22 = vadd.f32 %v2606_v17, %v2514_v20  ;;  %v1728_v52 = vor.u32 %v1726_v26, %v18602_v49 }
 0x16d   : > { %v2108_v9 = vpop.f32.mrf.mxu2 }
 0x16e   : > { %10223 = vmatmul.msk.bf16.gmra.mxu3 %vm1780_vm5, %v12194_v40  ;;  %v2187_v33 = vadd.f32 %v2108_v9, %v1985_v54  ;;  %2750 = vrot.lane.b32.xlu0 %v13210_v22, %s11778_s25  ;;  %v1730_v15 = vsel %vm1363_vm7, %v1728_v52, %v1729_v0 }
 0x16f   : > { %v2608_v59 = vpop.f32.mrf.mxu1 }
 0x170   : > { %v2343_v56 = vadd.f32 %v2264_v62, %v2187_v33 }
 0x171   : > { %v2267_v19 = vpop.f32.mrf.mxu3 }
 0x172   : > { %v2515_v17 = vadd.f32 %v2436_v42, %v2343_v56  ;;  %v2439_v20 = vpop.f32.mrf.mxu0  ;;  %10207 = vmatmul.msk.bf16.gmra.mxu2 %vm1780_vm5, %v12180_v24  ;;  %v1773_v42 = vsel %vm12952_vm11, %v1730_v15, 0  ;;  %v18605_v56 = vshll.u32 %v12392_v16, 16  ;;  %v18606_v15 = vshrl.u32 %v12313_v44, 16 }
 0x174   : > { %v13226_v54 = vadd.f32 %v2608_v59, %v2515_v17  ;;  %v18604_v59 = vshrl.u32 %v12265_v61, 16  ;;  %v1396_v49 = vrot.slane %v18605_v56, 1 }
 0x175   : > { %10239 = vmatmul.msk.bf16.gmra.mxu0 %vm1780_vm5, %v1453_v14  ;;  %v2111_v62 = vpop.f32.mrf.mxu2 }
 0x176   : > { %v2188_v40 = vadd.f32 %v2111_v62, %v12927_v4  ;;  %2752 = vrot.lane.b32.xlu0 %v13226_v54, %s11778_s25  ;;  %v1395_v50 = vor.u32 %v1393_v30, %v18604_v59  ;;  %v1990_v4 = vadd.f32 %v12968_v10, %v12966_v53  ;;  %v1731_v62 = vor.u32 %v1729_v0, %v18606_v15 }
 0x177   : > { %v2611_v26 = vpop.f32.mrf.mxu1  ;;  %v18607_v53 = vshll.u32 %v12403_v36, 16 }
 0x178   : > { %v2344_v24 = vadd.f32 %v2267_v19, %v2188_v40 }
 0x179   : > { %v2269_v7 = vpop.f32.mrf.mxu3  ;;  %v1732_v10 = vrot.slane %v18607_v53, 1 }
 0x17a   : > { %10255 = vmatmul.msk.bf16.gmra.mxu1 %vm1780_vm5, %v1773_v42  ;;  %v2441_v9 = vpop.f32.mrf.mxu0  ;;  %v2516_v33 = vadd.f32 %v2439_v20, %v2344_v24  ;;  %v1397_v20 = vsel %vm1363_vm7, %v1395_v50, %v1396_v49 }
 0x17b   : > { %v1454_v42 = vsel %vm12952_vm11, %v1397_v20, 0  ;;  %v1733_v24 = vsel %vm1363_vm7, %v1731_v62, %v1732_v10 }
 0x17c   : > { %v13241_v52 = vadd.f32 %v2611_v26, %v2516_v33 }
 0x17d   : > { %v2113_v5 = vpop.f32.mrf.mxu2 }
 0x17e   : > { %10224 = vmatmul.msk.bf16.gmra.mxu3 %vm1780_vm5, %v12313_v44  ;;  %v2189_v19 = vadd.f32 %v2113_v5, %v1990_v4  ;;  %2754 = vrot.lane.b32.xlu1 %v13241_v52, %s11778_s25  ;;  %v18608_v4 = vshrl.u32 %v12392_v16, 16 }
 0x17f   : > { %v2613_v17 = vpop.f32.mrf.mxu1 }
 0x180   : > { %v2345_v30 = vadd.f32 %v2269_v7, %v2189_v19  ;;  %v1398_v5 = vor.u32 %v1396_v49, %v18608_v4  ;;  %v18609_v19 = vshll.u32 %v12534_v34, 16  ;;  %v18612_v4 = vshrl.u32 %v12534_v34, 16 }
 0x181   : > { %v2272_v14 = vpop.f32.mrf.mxu3 }
 0x182   : > { %v2517_v40 = vadd.f32 %v2441_v9, %v2345_v30  ;;  %v2444_v26 = vpop.f32.mrf.mxu0  ;;  %10208 = vmatmul.msk.bf16.gmra.mxu2 %vm1780_vm5, %v12265_v61  ;;  %v1774_v9 = vsel %vm12952_vm11, %v1733_v24, 0 }
 0x184   : > { %v13257_v33 = vadd.f32 %v2613_v17, %v2517_v40  ;;  %v1399_v17 = vrot.slane %v18609_v19, 1  ;;  %v18610_v40 = vshrl.u32 %v12403_v36, 16  ;;  %v18613_v19 = vshll.u32 %v12641_v29, 16 }
 0x185   : > { %10240 = vmatmul.msk.bf16.gmra.mxu0 %vm1780_vm5, %v1454_v42  ;;  %v2116_v7 = vpop.f32.mrf.mxu2 }
 0x186   : > { %v2190_v44 = vadd.f32 %v2116_v7, %v12994_v38  ;;  %2756 = vrot.lane.b32.xlu1 %v13257_v33, %s11778_s25  ;;  %v1995_v38 = vadd.f32 %v13019_v6, %v13009_v63  ;;  %v1400_v62 = vsel %vm1363_vm7, %v1398_v5, %v1399_v17  ;;  %v18611_v63 = vshll.u32 %v12556_v41, 16 }
 0x187   : > { %v2616_v0 = vpop.f32.mrf.mxu1  ;;  %v1455_v7 = vsel %vm12952_vm11, %v1400_v62, 0  ;;  %v1401_v5 = vor.u32 %v1399_v17, %v18612_v4 }
 0x188   : > { %v2346_v61 = vadd.f32 %v2272_v14, %v2190_v44  ;;  %v1735_v6 = vrot.slane %v18611_v63, 1 }
 0x189   : > { %v2274_v59 = vpop.f32.mrf.mxu3 }
 0x18a   : > { %10256 = vmatmul.msk.bf16.gmra.mxu1 %vm1780_vm5, %v1774_v9  ;;  %v2446_v50 = vpop.f32.mrf.mxu0  ;;  %v2518_v56 = vadd.f32 %v2444_v26, %v2346_v61  ;;  %v1734_v26 = vor.u32 %v1732_v10, %v18610_v40  ;;  %v18614_v40 = vshrl.u32 %v12556_v41, 16 }
 0x18c   : > { %v13272_v20 = vadd.f32 %v2616_v0, %v2518_v56  ;;  %v1736_v44 = vsel %vm1363_vm7, %v1734_v26, %v1735_v6  ;;  %v1737_v26 = vor.u32 %v1735_v6, %v18614_v40 }
 0x18d   : > { %v2118_v30 = vpop.f32.mrf.mxu2  ;;  %v1775_v61 = vsel %vm12952_vm11, %v1736_v44, 0 }
 0x18e   : > { %10225 = vmatmul.msk.bf16.gmra.mxu3 %vm1780_vm5, %v12403_v36  ;;  %v2191_v14 = vadd.f32 %v2118_v30, %v1995_v38  ;;  %2758 = vrot.lane.b32.xlu2 %v13272_v20, %s11778_s25  ;;  %v1402_v38 = vrot.slane %v18613_v19, 1 }
 0x18f   : > { %v2618_v15 = vpop.f32.mrf.mxu1 }
 0x190   : > { %v2347_v49 = vadd.f32 %v2274_v59, %v2191_v14 }
 0x191   : > { %v2277_v53 = vpop.f32.mrf.mxu3 }
 0x192   : > { %v2519_v42 = vadd.f32 %v2446_v50, %v2347_v49  ;;  %v2449_v24 = vpop.f32.mrf.mxu0  ;;  %10209 = vmatmul.msk.bf16.gmra.mxu2 %vm1780_vm5, %v12392_v16  ;;  %v1403_v49 = vsel %vm1363_vm7, %v1401_v5, %v1402_v38 }
 0x194   : > { %v13288_v0 = vadd.f32 %v2618_v15, %v2519_v42 }
 0x195   : > { %10241 = vmatmul.msk.bf16.gmra.mxu0 %vm1780_vm5, %v1455_v7  ;;  %v2121_v9 = vpop.f32.mrf.mxu2 }
 0x196   : > { %v2192_v36 = vadd.f32 %v2121_v9, %v13034_v8  ;;  %2760 = vrot.lane.b32.xlu2 %v13288_v0, %s11778_s25  ;;  %v2000_v8 = vadd.f32 %v13054_v2, %v13047_v21  ;;  %v18615_v2 = vshll.u32 %v12697_v32, 16 }
 0x197   : > { %v2621_v10 = vpop.f32.mrf.mxu1 }
 0x198   : > { %v2348_v16 = vadd.f32 %v2277_v53, %v2192_v36  ;;  %v1738_v21 = vrot.slane %v18615_v2, 1 }
 0x199   : > { %v2279_v59 = vpop.f32.mrf.mxu3 }
 0x19a   : > { %v2520_v50 = vadd.f32 %v2449_v24, %v2348_v16  ;;  %10257 = vmatmul.msk.bf16.gmra.mxu1 %vm1780_vm5, %v1775_v61  ;;  %v2451_v56 = vpop.f32.mrf.mxu0  ;;  %v1456_v24 = vsel %vm12952_vm11, %v1403_v49, 0  ;;  %v1739_v7 = vsel %vm1363_vm7, %v1737_v26, %v1738_v21  ;;  %v18618_v49 = vshrl.u32 %v12697_v32, 16 }
 0x19b   : > { %v1776_v36 = vsel %vm12952_vm11, %v1739_v7, 0 }
 0x19c   : > { %v13303_v30 = vadd.f32 %v2621_v10, %v2520_v50 }
 0x19d   : > { %v2123_v14 = vpop.f32.mrf.mxu2 }
 0x19e   : > { %10226 = vmatmul.msk.bf16.gmra.mxu3 %vm1780_vm5, %v12556_v41  ;;  %v2193_v15 = vadd.f32 %v2123_v14, %v2000_v8  ;;  %2762 = vrot.lane.b32.xlu0 %v13303_v30, %s11778_s25 }
 0x19f   : > { %v2623_v62 = vpop.f32.mrf.mxu1 }
 0x1a0   : > { %v2349_v17 = vadd.f32 %v2279_v59, %v2193_v15  ;;  %v18616_v59 = vshrl.u32 %v12641_v29, 16 }
 0x1a1   : > { %v2282_v53 = vpop.f32.mrf.mxu3 }
 0x1a2   : > { %v2521_v63 = vadd.f32 %v2451_v56, %v2349_v17  ;;  %v2454_v42 = vpop.f32.mrf.mxu0  ;;  %10210 = vmatmul.msk.bf16.gmra.mxu2 %vm1780_vm5, %v12534_v34  ;;  %v1404_v50 = vor.u32 %v1402_v38, %v18616_v59  ;;  %v18617_v56 = vshll.u32 %v12760_v45, 16  ;;  %v1740_v17 = vor.u32 %v1738_v21, %v18618_v49 }
 0x1a4   : > { %v13319_v44 = vadd.f32 %v2623_v62, %v2521_v63  ;;  %v1405_v4 = vrot.slane %v18617_v56, 1 }
 0x1a5   : > { %10242 = vmatmul.msk.bf16.gmra.mxu0 %vm1780_vm5, %v1456_v24  ;;  %v2126_v9 = vpop.f32.mrf.mxu2 }
 0x1a6   : > { %v2194_v41 = vadd.f32 %v2126_v9, %v13066_v51  ;;  %2764 = vrot.lane.b32.xlu1 %v13319_v44, %s11778_s25  ;;  %v2005_v51 = vadd.f32 %v13092_v11, %v13087_v37  ;;  %v1406_v15 = vsel %vm1363_vm7, %v1404_v50, %v1405_v4  ;;  %v18619_v37 = vshll.u32 %v12792_v43, 16 }
 0x1a7   : > { %v2626_v6 = vpop.f32.mrf.mxu1  ;;  %v1457_v26 = vsel %vm12952_vm11, %v1406_v15, 0 }
 0x1a8   : > { %v2350_v34 = vadd.f32 %v2282_v53, %v2194_v41  ;;  %v1741_v11 = vrot.slane %v18619_v37, 1 }
 0x1a9   : > { %v2284_v10 = vpop.f32.mrf.mxu3 }
 0x1aa   : > { %v2522_v61 = vadd.f32 %v2454_v42, %v2350_v34  ;;  %10258 = vmatmul.msk.bf16.gmra.mxu1 %vm1780_vm5, %v1776_v36  ;;  %v2456_v16 = vpop.f32.mrf.mxu0  ;;  %v1742_v2 = vsel %vm1363_vm7, %v1740_v17, %v1741_v11  ;;  %v18621_v34 = vshll.u32 %v12863_v46, 16 }
 0x1ab   : > { %v1777_v24 = vsel %vm12952_vm11, %v1742_v2, 0  ;;  %v18624_v2 = vshrl.u32 %v12863_v46, 16 }
 0x1ac   : > { %v13334_v5 = vadd.f32 %v2626_v6, %v2522_v61  ;;  %v18620_v6 = vshrl.u32 %v12760_v45, 16 }
 0x1ad   : > { %v2128_v19 = vpop.f32.mrf.mxu2 }
 0x1ae   : > { %10227 = vmatmul.msk.bf16.gmra.mxu3 %vm1780_vm5, %v12697_v32  ;;  %v2195_v8 = vadd.f32 %v2128_v19, %v2005_v51  ;;  %2766 = vrot.lane.b32.xlu2 %v13334_v5, %s11778_s25  ;;  %v1407_v36 = vor.u32 %v1405_v4, %v18620_v6  ;;  %v18622_v19 = vshrl.u32 %v12792_v43, 16  ;;  %v18628_v6 = vshrl.u32 %v12881_v27, 16 }
 0x1af   : > { %v2628_v14 = vpop.f32.mrf.mxu1 }
 0x1b0   : > { %v2351_v38 = vadd.f32 %v2284_v10, %v2195_v8  ;;  %v1408_v10 = vrot.slane %v18621_v34, 1  ;;  %v1743_v8 = vor.u32 %v1741_v11, %v18622_v19 }
 0x1b1   : > { %v2287_v62 = vpop.f32.mrf.mxu3 }
 0x1b2   : > { %v2523_v53 = vadd.f32 %v2456_v16, %v2351_v38  ;;  %v2459_v40 = vpop.f32.mrf.mxu0  ;;  %10211 = vmatmul.msk.bf16.gmra.mxu2 %vm1780_vm5, %v12641_v29  ;;  %v1409_v56 = vsel %vm1363_vm7, %v1407_v36, %v1408_v10 }
 0x1b3   : > { %v1458_v38 = vsel %vm12952_vm11, %v1409_v56, 0 }
 0x1b4   : > { %v13350_v63 = vadd.f32 %v2628_v14, %v2523_v53 }
 0x1b5   : > { %10243 = vmatmul.msk.bf16.gmra.mxu0 %vm1780_vm5, %v1457_v26  ;;  %v2131_v42 = vpop.f32.mrf.mxu2 }
 0x1b6   : > { %v2196_v32 = vadd.f32 %v2131_v42, %v13106_v39  ;;  %2768 = vrot.lane.b32.xlu0 %v13350_v63, %s11778_s25  ;;  %v2010_v39 = vadd.f32 %v13129_v3, %v13122_v48  ;;  %v18623_v48 = vshll.u32 %v12881_v27, 16  ;;  %v1410_v42 = vor.u32 %v1408_v10, %v18624_v2 }
 0x1b7   : > { %v2631_v21 = vpop.f32.mrf.mxu1 }
 0x1b8   : > { %v2352_v29 = vadd.f32 %v2287_v62, %v2196_v32  ;;  %v1744_v3 = vrot.slane %v18623_v48, 1 }
 0x1b9   : > { %v2289_v7 = vpop.f32.mrf.mxu3 }
 0x1ba   : > { %v2524_v9 = vadd.f32 %v2459_v40, %v2352_v29  ;;  %10259 = vmatmul.msk.bf16.gmra.mxu1 %vm1780_vm5, %v1777_v24  ;;  %v2461_v41 = vpop.f32.mrf.mxu0  ;;  %v1745_v62 = vsel %vm1363_vm7, %v1743_v8, %v1744_v3  ;;  %v1746_v36 = vor.u32 %v1744_v3, %v18628_v6 }
 0x1bb   : > { %v1778_v11 = vsel %vm12952_vm11, %v1745_v62, 0 }
 0x1bc   : > { %v13365_v61 = vadd.f32 %v2631_v21, %v2524_v9 }
 0x1bd   : > { %v2133_v16 = vpop.f32.mrf.mxu2 }
 0x1be   : > { %10228 = vmatmul.msk.bf16.gmra.mxu3 %vm1780_vm5, %v12792_v43  ;;  %v2197_v59 = vadd.f32 %v2133_v16, %v2010_v39  ;;  %2770 = vrot.lane.b32.xlu1 %v13365_v61, %s11778_s25  ;;  %v1763_v39 = vsel %vm13395_vm13, %v1746_v36, 0 }
 0x1bf   : > { %v2633_v50 = vpop.f32.mrf.mxu1 }
 0x1c0   : > { %v2353_v4 = vadd.f32 %v2289_v7, %v2197_v59  ;;  %v1429_v7 = vsel %vm13395_vm13, %v1410_v42, 0 }
 0x1c1   : > { %v2292_v51 = vpop.f32.mrf.mxu3 }
 0x1c2   : > { %v2525_v14 = vadd.f32 %v2461_v41, %v2353_v4  ;;  %v2464_v15 = vpop.f32.mrf.mxu0  ;;  %10212 = vmatmul.msk.bf16.gmra.mxu2 %vm1780_vm5, %v12760_v45 }
 0x1c4   : > { %v13381_v49 = vadd.f32 %v2633_v50, %v2525_v14  ;;  %v3266_v14 = vld [vmem:[%s18386_s5 + $0x4] sm:$0xf] }
 0x1c5   : > { %10244 = vmatmul.msk.bf16.gmra.mxu0 %vm1780_vm5, %v1458_v38  ;;  %v2136_v17 = vpop.f32.mrf.mxu2  ;;  %v4289_v38 = vsel %vm1829_vm0, %v3266_v14, 0 }
 0x1c6   : > { %v2198_v43 = vadd.f32 %v2136_v17, %v13148_v60  ;;  %2772 = vrot.lane.b32.xlu2 %v13381_v49, %s11778_s25  ;;  %v18625_v60 = vmov 0  ;;  %4298 = vmatpush.bf16.msra.mxu0 %v4289_v38 }
 0x1c7   : > { %v2636_v37 = vpop.f32.mrf.mxu1  ;;  %v18626_v60 = vsel %vm13395_vm13, 4294967295, %v18625_v60 }
 0x1c8   : > { %v2354_v45 = vadd.f32 %v2292_v51, %v2198_v43  ;;  %18627 = vst [vmem:[#allocation17_spill] sm:$0xff] %v18626_v60 }
 0x1c9   : > { %v2294_v53 = vpop.f32.mrf.mxu3 }
 0x1ca   : > { %v2526_v40 = vadd.f32 %v2464_v15, %v2354_v45  ;;  %10260 = vmatmul.msk.bf16.gmra.mxu1 %vm1780_vm5, %v1778_v11  ;;  %v2466_v26 = vpop.f32.mrf.mxu0 }
 0x1cc   : > { %v13392_v32 = vadd.f32 %v2636_v37, %v2526_v40  ;;  %v3269_v37 = vld [vmem:[%s18387_s6 + $0x4] sm:$0xf] }
 0x1cd   : > { %v2138_v21 = vpop.f32.mrf.mxu2  ;;  %v4445_v11 = vsel %vm1829_vm0, %v3269_v37, 0 }
 0x1ce   : > { %10229 = vmatmul.msk.bf16.gmra.mxu3 %vm1780_vm5, %v12881_v27  ;;  %v2199_v24 = vadd.f32 %v2138_v21, %v13160_v58  ;;  %2774 = vrot.lane.b32.xlu0 %v13392_v32, %s11778_s25  ;;  %v1459_v58 = vsel %vm12952_vm11, %v1429_v7, 0 }
 0x1cf   : > { %v2638_v29 = vpop.f32.mrf.mxu1  ;;  %4454 = vmatpush.bf16.msra.mxu1 %v4445_v11 }
 0x1d0   : > { %v2355_v9 = vadd.f32 %v2294_v53, %v2199_v24 }
 0x1d1   : > { %v2297_v41 = vpop.f32.mrf.mxu3 }
 0x1d2   : > { %v2527_v34 = vadd.f32 %v2466_v26, %v2355_v9  ;;  %v2469_v10 = vpop.f32.mrf.mxu0  ;;  %10213 = vmatmul.msk.bf16.gmra.mxu2 %vm1780_vm5, %v12863_v46  ;;  %v1779_v46 = vsel %vm12952_vm11, %v1763_v39, 0 }
 0x1d4   : > { %v13414_v16 = vadd.f32 %v2638_v29, %v2527_v34 }
 0x1d5   : > { %10245 = vmatmul.msk.bf16.gmra.mxu0 %vm1780_vm5, %v1459_v58  ;;  %v2141_v59 = vpop.f32.mrf.mxu2 }
 0x1d6   : > { %v2200_v50 = vadd.f32 %v2141_v59, %v13176_v18  ;;  %2776 = vrot.lane.b32.xlu1 %v13414_v16, %s11778_s25  ;;  %v13428_v18 = vld [vmem:[%s18385_s4] ss:$0 sm:$0xff] }
 0x1d7   : > { %v2641_v27 = vpop.f32.mrf.mxu1 }
 0x1d8   : > { %v2356_v56 = vadd.f32 %v2297_v41, %v2200_v50 }
 0x1d9   : > { %v2299_v4 = vpop.f32.mrf.mxu3 }
 0x1da   : > { %v2528_v51 = vadd.f32 %v2469_v10, %v2356_v56  ;;  %10261 = vmatmul.msk.bf16.gmra.mxu1 %vm1780_vm5, %v1779_v46  ;;  %v2471_v19 = vpop.f32.mrf.mxu0  ;;  %v2025_v56 = vadd.f32 %v12901_v57, %v12909_v47 }
 0x1dc   : > { %v13423_v8 = vadd.f32 %v2641_v27, %v2528_v51 }
 0x1dd   : > { %v2143_v48 = vpop.f32.mrf.mxu2 }
 0x1de   : > { %v2201_v3 = vadd.f32 %v2143_v48, %v13188_v13  ;;  %2778 = vrot.lane.b32.xlu2 %v13423_v8, %s11778_s25 }
 0x1df   : > { %v2643_v15 = vpop.f32.mrf.mxu1 }
 0x1e0   : > { %v2357_v62 = vadd.f32 %v2299_v4, %v2201_v3  ;;  %v2751_v17 = vpop.permute.xlu0 %2750 }
 0x1e1   : > { %v2302_v43 = vpop.f32.mrf.mxu3  ;;  %v2881_v13 = vadd.f32 %v13428_v18, %v2751_v17 }
 0x1e2   : > { %v2529_v45 = vadd.f32 %v2471_v19, %v2357_v62  ;;  %v2474_v53 = vpop.f32.mrf.mxu0 }
 0x1e3   : > { %v2945_v40 = vmul.f32 1.442695, %v2881_v13  ;;  %v3073_v26 = vsub.f32 0.0, %v2881_v13  ;;  %vm2913_vm14 = vcmp.gt.f32.partialorder %v2881_v13, 0.0 }
 0x1e4   : > { %v13442_v2 = vadd.f32 %v2643_v15, %v2529_v45 }
 0x1e5   : > { %10927 = vpow2.f32 %v2945_v40  ;;  %v3137_v42 = vmul.f32 1.442695, %v3073_v26  ;;  %v2146_v21 = vpop.f32.mrf.mxu2  ;;  %vm3105_vm15 = vcmp.gt.f32.partialorder %v3073_v26, 0.0 }
 0x1e6   : > { %v2202_v24 = vadd.f32 %v2146_v21, %v12890_v28  ;;  %2780 = vrot.lane.b32.xlu0 %v13442_v2, %s11778_s25 }
 0x1e7   : > { %10929 = vpow2.f32 %v3137_v42  ;;  %v2646_v29 = vpop.f32.mrf.mxu1 }
 0x1e8   : > { %v2358_v7 = vadd.f32 %v2302_v43, %v2202_v24  ;;  %v2759_v9 = vpop.permute.xlu2 %2758  ;;  %v2753_v41 = vpop.permute.xlu0 %2752 }
 0x1e9   : > { %v2850_v6 = vadd.f32 %v2759_v9, %v13241_v52  ;;  %v2882_v36 = vadd.f32 %v13428_v18, %v2753_v41  ;;  %v2304_v34 = vpop.f32.mrf.mxu3 }
 0x1ea   : > { %v2530_v10 = vadd.f32 %v2474_v53, %v2358_v7  ;;  %v2476_v58 = vpop.f32.mrf.mxu0 }
 0x1eb   : > { %v10928_v39 = vpop.eup %10927  ;;  %v2947_v59 = vmul.f32 1.442695, %v2882_v36  ;;  %v3074_v50 = vsub.f32 0.0, %v2882_v36  ;;  %v13454_v4 = vadd.f32 %v13428_v18, %v2850_v6  ;;  %vm2914_vm1 = vcmp.gt.f32.partialorder %v2882_v36, 0.0 }
 0x1ec   : > { %v10262_v27 = vadd.f32 -1.0, %v10928_v39  ;;  %v13449_v28 = vadd.f32 %v2646_v29, %v2530_v10 }
 0x1ed   : > { %v10930_v46 = vpop.eup %10929  ;;  %10931 = vpow2.f32 %v2947_v59  ;;  %v2148_v52 = vpop.f32.mrf.mxu2  ;;  %v3139_v51 = vmul.f32 1.442695, %v3074_v50  ;;  %v2953_v62 = vmul.f32 1.442695, %v13454_v4  ;;  %v13461_v43 = vsub.f32 0.0, %v13454_v4 }
 0x1ee   : > { %2782 = vrot.lane.b32.xlu1 %v13449_v28, %s11778_s25  ;;  %v10294_v19 = vadd.f32 -1.0, %v10930_v46  ;;  %v2203_v3 = vadd.f32 %v2148_v52, %v2025_v56  ;;  %v3041_v14 = vsel %vm2913_vm14, %v2881_v13, %v10262_v27  ;;  %vm3106_vm2 = vcmp.gt.f32.partialorder %v3074_v50, 0.0  ;;  %v3270_v27 = vld [vmem:[%s18387_s6 + $0x8] sm:$0xf] }
 0x1ef   : > { %v2648_v48 = vpop.f32.mrf.mxu1  ;;  %10933 = vpow2.f32 %v3139_v51  ;;  %v3272_v40 = vpack.c.bf16 %v3041_v14, %v3041_v14  ;;  %v4789_v14 = vsel %vm1829_vm0, %v3270_v27, 0  ;;  %vm2917_vm10 = vcmp.gt.f32.partialorder %v13454_v4, 0.0 }
 0x1f0   : > { %v2761_v15 = vpop.permute.xlu2 %2760  ;;  %v2755_v38 = vpop.permute.xlu1 %2754  ;;  %v2359_v57 = vadd.f32 %v2304_v34, %v2203_v3  ;;  %v3233_v53 = vsel %vm3105_vm15, %v3073_v26, %v10294_v19  ;;  %10935 = vpow2.f32 %v2953_v62  ;;  %v3145_v26 = vmul.f32 1.442695, %v13461_v43  ;;  %v3267_v34 = vld [vmem:[%s18386_s5 + $0x8] sm:$0xf]  ;;  %4798 = vmatpush.bf16.msrb.mxu3 %v4789_v14 }
 0x1f1   : > { %v2851_v47 = vadd.f32 %v2761_v15, %v13257_v33  ;;  %v2307_v17 = vpop.f32.mrf.mxu3  ;;  %v2848_v37 = vadd.f32 %v2755_v38, %v13210_v22  ;;  %v3304_v9 = vpack.c.bf16 %v3233_v53, %v3233_v53  ;;  %v3368_v10 = vunpack.c.l.b16 %v3272_v40 }
 0x1f2   : > { %v2479_v11 = vpop.f32.mrf.mxu0  ;;  %v2531_v13 = vadd.f32 %v2476_v58, %v2359_v57  ;;  %v4617_v52 = vsel %vm1829_vm0, %v3267_v34, 0 }
 0x1f3   : > { %v10932_v45 = vpop.eup %10931  ;;  %v13465_v42 = vadd.f32 %v13428_v18, %v2851_v47  ;;  %v13468_v24 = vadd.f32 %v13428_v18, %v2848_v37  ;;  %4626 = vmatpush.bf16.msrb.mxu2 %v4617_v52 }
 0x1f4   : > { %v10263_v21 = vadd.f32 -1.0, %v10932_v45  ;;  %v13471_v7 = vadd.f32 %v2648_v48, %v2531_v13 }
 0x1f5   : > { %v2955_v33 = vmul.f32 1.442695, %v13465_v42  ;;  %v2151_v29 = vpop.f32.mrf.mxu2  ;;  %v10934_v22 = vpop.eup %10933  ;;  %v2949_v6 = vmul.f32 1.442695, %v13468_v24  ;;  %v13500_v13 = vsub.f32 0.0, %v13465_v42  ;;  %vm2918_vm3 = vcmp.gt.f32.partialorder %v13465_v42, 0.0 }
 0x1f6   : > { %v3042_v41 = vsel %vm2914_vm1, %v2882_v36, %v10263_v21  ;;  %v10295_v58 = vadd.f32 -1.0, %v10934_v22  ;;  %2784 = vrot.lane.b32.xlu2 %v13471_v7, %s11778_s25  ;;  %v13484_v36 = vsub.f32 0.0, %v13468_v24  ;;  %v2204_v46 = vadd.f32 %v2151_v29, %v12933_v31  ;;  %v10936_v47 = vpop.eup %10935 }
 0x1f7   : > { %v3273_v39 = vpack.c.bf16 %v3042_v41, %v3042_v41  ;;  %10937 = vpow2.f32 %v2955_v33  ;;  %v2651_v59 = vpop.f32.mrf.mxu1  ;;  %v2030_v31 = vadd.f32 %v12947_v25, %v12949_v23  ;;  %v10266_v27 = vadd.f32 -1.0, %v10936_v47 }
 0x1f8   : > { %10939 = vpow2.f32 %v2949_v6  ;;  %v2757_v56 = vpop.permute.xlu1 %2756  ;;  %v3234_v51 = vsel %vm3106_vm2, %v3074_v50, %v10295_v58  ;;  %v3141_v38 = vmul.f32 1.442695, %v13484_v36  ;;  %v2360_v62 = vadd.f32 %v2307_v17, %v2204_v46 }
 0x1f9   : > { %v3369_v19 = vunpack.c.l.b16 %v3273_v39  ;;  %v2849_v48 = vadd.f32 %v2757_v56, %v13226_v54  ;;  %v2309_v3 = vpop.f32.mrf.mxu3  ;;  %v3305_v15 = vpack.c.bf16 %v3234_v51, %v3234_v51  ;;  %10941 = vpow2.f32 %v3145_v26 }
 0x1fa   : > { %v2481_v57 = vpop.f32.mrf.mxu0  ;;  %v3688_v54 = vunpack.c.l.b16 %v3304_v9  ;;  %v2532_v53 = vadd.f32 %v2479_v11, %v2360_v62  ;;  %10943 = vpow2.f32 %v3141_v38  ;;  %vm2915_vm9 = vcmp.gt.f32.partialorder %v13468_v24, 0.0 }
 0x1fb   : > { %v13494_v37 = vpack.c.b16 %v3369_v19, %v3368_v10  ;;  %v13497_v50 = vadd.f32 %v13428_v18, %v2849_v48  ;;  %v3689_v45 = vunpack.c.l.b16 %v3305_v15  ;;  %v3147_v15 = vmul.f32 1.442695, %v13500_v13 }
 0x1fc   : > { %v13511_v9 = vadd.f32 %v2651_v59, %v2532_v53  ;;  %vm3107_vm12 = vcmp.gt.f32.partialorder %v13484_v36, 0.0  ;;  %vm3109_vm1 = vcmp.gt.f32.partialorder %v13461_v43, 0.0  ;;  %vm3110_vm2 = vcmp.gt.f32.partialorder %v13500_v13, 0.0 }
 0x1fd   : > { %v10938_v40 = vpop.eup %10937  ;;  %v2951_v17 = vmul.f32 1.442695, %v13497_v50  ;;  %v13504_v21 = vsub.f32 0.0, %v13497_v50  ;;  %v2153_v25 = vpop.f32.mrf.mxu2  ;;  %10358 = vmatmul.msk.bf16.vlgmr.msra.gmra.mxu0 %vm1780_vm5, %v13494_v37  ;;  %v3417_v23 = vshrl.u32 %v13494_v37, 16  ;;  %v13509_v29 = vpack.c.b16 %v3689_v45, %v3688_v54 }
 0x1fe   : > { %v10940_v33 = vpop.eup %10939  ;;  %v10267_v11 = vadd.f32 -1.0, %v10938_v40  ;;  %v2205_v22 = vadd.f32 %v2153_v25, %v2030_v31  ;;  %2786 = vrot.lane.b32.xlu0 %v13511_v9, %s11778_s25  ;;  %v3420_v58 = vshll.u32 %v13494_v37, 16  ;;  %vm2916_vm14 = vcmp.gt.f32.partialorder %v13497_v50, 0.0 }
 0x1ff   : > { %v10264_v26 = vadd.f32 -1.0, %v10940_v33  ;;  %10945 = vpow2.f32 %v2951_v17  ;;  %v3143_v41 = vmul.f32 1.442695, %v13504_v21  ;;  %v2653_v6 = vpop.f32.mrf.mxu1  ;;  %v13516_v34 = vrot.slane %v3417_v23, 7  ;;  %10374 = vmatmul.msk.bf16.vlgmr.msra.gmra.mxu1 %vm1780_vm5, %v13509_v29  ;;  %v10942_v59 = vpop.eup %10941 }
 0x200   : > { %v2361_v10 = vadd.f32 %v2309_v3, %v2205_v22  ;;  %v3737_v39 = vshrl.u32 %v13509_v29, 16  ;;  %v3740_v56 = vshll.u32 %v13509_v29, 16  ;;  %v10944_v52 = vpop.eup %10943  ;;  %v3046_v62 = vsel %vm2918_vm3, %v13465_v42, %v10267_v11 }
 0x201   : > { %v2312_v46 = vpop.f32.mrf.mxu3  ;;  %10947 = vpow2.f32 %v3143_v41  ;;  %v3422_v48 = vor.u32 %v3420_v58, %v13516_v34  ;;  %v3043_v14 = vsel %vm2915_vm9, %v13468_v24, %v10264_v26  ;;  %v10296_v38 = vadd.f32 -1.0, %v10944_v52 }
 0x202   : > { %v2533_v51 = vadd.f32 %v2481_v57, %v2361_v10  ;;  %v2484_v19 = vpop.f32.mrf.mxu0  ;;  %v13528_v3 = vrot.slane %v3737_v39, 7  ;;  %v3274_v40 = vpack.c.bf16 %v3043_v14, %v3043_v14  ;;  %v3045_v17 = vsel %vm2917_vm10, %v13454_v4, %v10266_v27 }
 0x203   : > { %v3559_v31 = vsel %vm12095_vm8, 0, %v3422_v48  ;;  %v3277_v29 = vpack.c.bf16 %v3046_v62, %v3046_v62  ;;  %v3576_v26 = vrot.slane %v3420_v58, 1  ;;  %v3235_v4 = vsel %vm3107_vm12, %v13484_v36, %v10296_v38 }
 0x204   : > { %v13538_v57 = vadd.f32 %v2653_v6, %v2533_v51  ;;  %v3742_v54 = vor.u32 %v3740_v56, %v13528_v3  ;;  %v3560_v53 = vsel %vm12035_vm6, %v3559_v31, 0  ;;  %10949 = vpow2.f32 %v3147_v15 }
 0x205   : > { %v10946_v45 = vpop.eup %10945  ;;  %v2156_v24 = vpop.f32.mrf.mxu2  ;;  %10342 = vmatmul.msk.bf16.vlgmr.msra.gmra.mxu3 %vm1780_vm5, %v3560_v53  ;;  %v3896_v6 = vrot.slane %v3740_v56, 1  ;;  %v3370_v48 = vunpack.c.l.b16 %v3274_v40  ;;  %vm3108_vm15 = vcmp.gt.f32.partialorder %v13504_v21, 0.0  ;;  %v3276_v14 = vpack.c.bf16 %v3045_v17, %v3045_v17 }
 0x206   : > { %v10265_v42 = vadd.f32 -1.0, %v10946_v45  ;;  %v2206_v25 = vadd.f32 %v2156_v24, %v12972_v12  ;;  %2788 = vrot.lane.b32.xlu1 %v13538_v57, %s11778_s25  ;;  %v3879_v33 = vsel %vm12095_vm8, 0, %v3742_v54  ;;  %v3373_v56 = vunpack.c.l.b16 %v3277_v29 }
 0x207   : > { %v10948_v11 = vpop.eup %10947  ;;  %v2656_v22 = vpop.f32.mrf.mxu1  ;;  %v3880_v41 = vsel %vm12035_vm6, %v3879_v33, 0  ;;  %v10298_v45 = vadd.f32 -1.0, %v10942_v59  ;;  %v13568_v40 = vor.u32 %v3896_v6, %v3737_v39 }
 0x208   : > { %v2362_v12 = vadd.f32 %v2312_v46, %v2206_v25  ;;  %10326 = vmatmul.msk.bf16.vlgmr.msra.gmra.mxu2 %vm1780_vm5, %v3880_v41  ;;  %v2767_v10 = vpop.permute.xlu2 %2766  ;;  %v3044_v27 = vsel %vm2916_vm14, %v13497_v50, %v10265_v42  ;;  %v10297_v52 = vadd.f32 -1.0, %v10948_v11  ;;  %v3306_v46 = vpack.c.bf16 %v3235_v4, %v3235_v4  ;;  %v18630_v50 = vld [vmem:[#allocation4_spill] sm:$0xff] }
 0x209   : > { %v2314_v51 = vpop.f32.mrf.mxu3  ;;  %v3275_v58 = vpack.c.bf16 %v3044_v27, %v3044_v27  ;;  %v2854_v15 = vadd.f32 %v2767_v10, %v13303_v30  ;;  %v2035_v24 = vadd.f32 %v18630_v50, %v12998_v1  ;;  %v3372_v25 = vunpack.c.l.b16 %v3276_v14 }
 0x20a   : > { %v2534_v62 = vadd.f32 %v2484_v19, %v2362_v12  ;;  %v2486_v31 = vpop.f32.mrf.mxu0  ;;  %v3236_v36 = vsel %vm3108_vm15, %v13504_v21, %v10297_v52  ;;  %v13572_v19 = vor.u32 %v3576_v26, %v3417_v23  ;;  %v10950_v17 = vpop.eup %10949  ;;  %v3690_v1 = vunpack.c.l.b16 %v3306_v46 }
 0x20b   : > { %v3371_v38 = vunpack.c.l.b16 %v3275_v58  ;;  %v3307_v54 = vpack.c.bf16 %v3236_v36, %v3236_v36  ;;  %v10299_v59 = vadd.f32 -1.0, %v10950_v17  ;;  %v13581_v37 = vadd.f32 %v13428_v18, %v2854_v15  ;;  %v18631_v17 = vld [vmem:[#allocation5_spill] sm:$0xff] }
 0x20c   : > { %v13566_v53 = vadd.f32 %v2656_v22, %v2534_v62  ;;  %v13586_v29 = vpack.c.b16 %v3373_v56, %v3372_v25  ;;  %v3237_v11 = vsel %vm3109_vm1, %v13461_v43, %v10298_v45 }
 0x20d   : > { %v2158_v21 = vpop.f32.mrf.mxu2  ;;  %v13574_v42 = vpack.c.b16 %v3371_v38, %v3370_v48  ;;  %v3691_v39 = vunpack.c.l.b16 %v3307_v54  ;;  %v3238_v4 = vsel %vm3110_vm2, %v13500_v13, %v10299_v59  ;;  %v3308_v13 = vpack.c.bf16 %v3237_v11, %v3237_v11 }
 0x20e   : > { %v2207_v30 = vadd.f32 %v2158_v21, %v2035_v24  ;;  %2790 = vrot.lane.b32.xlu2 %v13566_v53, %s11778_s25  ;;  %v3309_v52 = vpack.c.bf16 %v3238_v4, %v3238_v4  ;;  %v3432_v36 = vshrl.u32 %v13586_v29, 16  ;;  %v2961_v38 = vmul.f32 1.442695, %v13581_v37 }
 0x20f   : > { %v2658_v23 = vpop.f32.mrf.mxu1  ;;  %v3424_v33 = vshrl.u32 %v13574_v42, 16  ;;  %10359 = vmatmul.msk.bf16.gmra.mxu0 %vm1780_vm5, %v13574_v42  ;;  %v13589_v41 = vpack.c.b16 %v3691_v39, %v3690_v1  ;;  %v3427_v27 = vshll.u32 %v13574_v42, 16  ;;  %v3692_v1 = vunpack.c.l.b16 %v3308_v13  ;;  %v18632_v13 = vld [vmem:[#allocation7_spill] sm:$0xff] }
 0x210   : > { %v2363_v22 = vadd.f32 %v2314_v51, %v2207_v30  ;;  %v2763_v26 = vpop.permute.xlu0 %2762  ;;  %v3693_v15 = vunpack.c.l.b16 %v3309_v52  ;;  %vm2921_vm14 = vcmp.gt.f32.partialorder %v13581_v37, 0.0 }
 0x211   : > { %v2852_v12 = vadd.f32 %v2763_v26, %v13272_v20  ;;  %v2317_v6 = vpop.f32.mrf.mxu3  ;;  %v13595_v10 = vrot.slane %v3424_v33, 7  ;;  %v3744_v43 = vshrl.u32 %v13589_v41, 16  ;;  %10375 = vmatmul.msk.bf16.gmra.mxu1 %vm1780_vm5, %v13589_v41  ;;  %v3747_v51 = vshll.u32 %v13589_v41, 16 }
 0x212   : > { %v2535_v58 = vadd.f32 %v2486_v31, %v2363_v22  ;;  %v2489_v48 = vpop.f32.mrf.mxu0  ;;  %v13603_v20 = vsub.f32 0.0, %v13581_v37  ;;  %v3578_v11 = vrot.slane %v3427_v27, 1  ;;  %v13632_v41 = vpack.c.b16 %v3693_v15, %v3692_v1 }
 0x213   : > { %v13606_v14 = vadd.f32 %v13428_v18, %v2852_v12  ;;  %v3429_v62 = vor.u32 %v3427_v27, %v13595_v10  ;;  %v13612_v46 = vrot.slane %v3744_v43, 7  ;;  %v3898_v56 = vrot.slane %v3747_v51, 1 }
 0x214   : > { %v13610_v31 = vadd.f32 %v2658_v23, %v2535_v58  ;;  %v3153_v39 = vmul.f32 1.442695, %v13603_v20  ;;  %vm3113_vm15 = vcmp.gt.f32.partialorder %v13603_v20, 0.0 }
 0x215   : > { %v2957_v54 = vmul.f32 1.442695, %v13606_v14  ;;  %v13617_v45 = vsub.f32 0.0, %v13606_v14  ;;  %v2161_v50 = vpop.f32.mrf.mxu2  ;;  %v3430_v24 = vsel %vm1186_vm4, %v13516_v34, %v3429_v62  ;;  %v3749_v30 = vor.u32 %v3747_v51, %v13612_v46  ;;  %v18633_v62 = vld [vmem:[#allocation6_spill] sm:$0xff] }
 0x216   : > { %v2208_v21 = vadd.f32 %v2161_v50, %v18631_v17  ;;  %2792 = vrot.lane.b32.xlu0 %v13610_v31, %s11778_s25  ;;  %v3561_v25 = vsel %vm12035_vm6, %v3430_v24, 0  ;;  %v13636_v4 = vsel %vm1363_vm7, %v13568_v40, %v3898_v56  ;;  %v3435_v40 = vshll.u32 %v13586_v29, 16 }
 0x217   : > { %10951 = vpow2.f32 %v2957_v54  ;;  %v3149_v59 = vmul.f32 1.442695, %v13617_v45  ;;  %v2661_v23 = vpop.f32.mrf.mxu1  ;;  %10343 = vmatmul.msk.bf16.gmra.mxu3 %vm1780_vm5, %v3561_v25  ;;  %v3750_v26 = vsel %vm1186_vm4, %v13528_v3, %v3749_v30  ;;  %v2040_v15 = vadd.f32 %v18633_v62, %v18632_v13 }
 0x218   : > { %v2364_v34 = vadd.f32 %v2317_v6, %v2208_v21  ;;  %v2765_v22 = vpop.permute.xlu1 %2764  ;;  %10953 = vpow2.f32 %v2961_v38  ;;  %v3881_v52 = vsel %vm12035_vm6, %v3750_v26, 0  ;;  %v13643_v6 = vrot.slane %v3432_v36, 7 }
 0x219   : > { %v2853_v12 = vadd.f32 %v2765_v22, %v13288_v0  ;;  %v2319_v27 = vpop.f32.mrf.mxu3  ;;  %10327 = vmatmul.msk.bf16.gmra.mxu2 %vm1780_vm5, %v3881_v52  ;;  %10955 = vpow2.f32 %v3149_v59  ;;  %v13652_v0 = vsel %vm1363_vm7, %v13572_v19, %v3578_v11  ;;  %v3755_v30 = vshll.u32 %v13632_v41, 16 }
 0x21a   : > { %v2536_v58 = vadd.f32 %v2489_v48, %v2364_v34  ;;  %v2491_v51 = vpop.f32.mrf.mxu0  ;;  %v3752_v48 = vshrl.u32 %v13632_v41, 16  ;;  %10957 = vpow2.f32 %v3153_v39  ;;  %v3437_v21 = vor.u32 %v3435_v40, %v13643_v6 }
 0x21b   : > { %v13647_v3 = vadd.f32 %v13428_v18, %v2853_v12  ;;  %v3900_v1 = vor.u32 %v3898_v56, %v3744_v43  ;;  %vm2919_vm3 = vcmp.gt.f32.partialorder %v13606_v14, 0.0  ;;  %vm3111_vm10 = vcmp.gt.f32.partialorder %v13617_v45, 0.0 }
 0x21c   : > { %v13656_v38 = vadd.f32 %v2661_v23, %v2536_v58  ;;  %v3438_v12 = vsel %vm1186_vm4, %v13595_v10, %v3437_v21  ;;  %v13673_v52 = vrot.slane %v3752_v48, 7 }
 0x21d   : > { %v10952_v54 = vpop.eup %10951  ;;  %v2959_v50 = vmul.f32 1.442695, %v13647_v3  ;;  %v13661_v24 = vsub.f32 0.0, %v13647_v3  ;;  %v2163_v17 = vpop.f32.mrf.mxu2  ;;  %vm2920_vm9 = vcmp.gt.f32.partialorder %v13647_v3, 0.0 }
 0x21e   : > { %v10268_v25 = vadd.f32 -1.0, %v10952_v54  ;;  %v2209_v19 = vadd.f32 %v2163_v17, %v2040_v15  ;;  %2794 = vrot.lane.b32.xlu1 %v13656_v38, %s11778_s25  ;;  %v10954_v59 = vpop.eup %10953  ;;  %v3901_v54 = vrot.slane %v3755_v30, 1 }
 0x21f   : > { %10959 = vpow2.f32 %v2959_v50  ;;  %v3151_v39 = vmul.f32 1.442695, %v13661_v24  ;;  %v2663_v23 = vpop.f32.mrf.mxu1  ;;  %10360 = vmatmul.msk.bf16.gmra.mxu0 %vm1780_vm5, %v13586_v29  ;;  %v10956_v34 = vpop.eup %10955  ;;  %v3581_v50 = vrot.slane %v3435_v40, 1  ;;  %v10270_v10 = vadd.f32 -1.0, %v10954_v59 }
 0x220   : > { %v2365_v22 = vadd.f32 %v2319_v27, %v2209_v19  ;;  %v2773_v26 = vpop.permute.xlu2 %2772  ;;  %v3047_v58 = vsel %vm2919_vm3, %v13606_v14, %v10268_v25  ;;  %v10958_v13 = vpop.eup %10957  ;;  %v3580_v27 = vor.u32 %v3578_v11, %v3424_v33  ;;  %v10300_v14 = vadd.f32 -1.0, %v10956_v34 }
 0x221   : > { %v2857_v43 = vadd.f32 %v2773_v26, %v13350_v63  ;;  %v2322_v56 = vpop.f32.mrf.mxu3  ;;  %10961 = vpow2.f32 %v3151_v39  ;;  %10376 = vmatmul.msk.bf16.gmra.mxu1 %vm1780_vm5, %v13632_v41  ;;  %v3562_v63 = vsel %vm12035_vm6, %v3438_v12, 0  ;;  %v13690_v25 = vsel %vm1363_vm7, %v3900_v1, %v3901_v54  ;;  %v18634_v39 = vld [vmem:[#allocation8_spill] sm:$0xff] }
 0x222   : > { %v2537_v62 = vadd.f32 %v2491_v51, %v2365_v22  ;;  %v2494_v15 = vpop.f32.mrf.mxu0  ;;  %v3757_v51 = vor.u32 %v3755_v30, %v13673_v52  ;;  %v13693_v41 = vsel %vm1363_vm7, %v3580_v27, %v3581_v50  ;;  %v3278_v11 = vpack.c.bf16 %v3047_v58, %v3047_v58 }
 0x223   : > { %v13682_v17 = vadd.f32 %v13428_v18, %v2857_v43  ;;  %v10302_v40 = vadd.f32 -1.0, %v10958_v13  ;;  %vm3112_vm12 = vcmp.gt.f32.partialorder %v13661_v24, 0.0  ;;  %v3239_v26 = vsel %vm3111_vm10, %v13617_v45, %v10300_v14 }
 0x224   : > { %v13686_v21 = vadd.f32 %v2663_v23, %v2537_v62  ;;  %v3758_v1 = vsel %vm1186_vm4, %v13612_v46, %v3757_v51  ;;  %v13709_v12 = vor.u32 %v3901_v54, %v3752_v48  ;;  %v13716_v46 = vor.u32 %v3581_v50, %v3432_v36 }
 0x225   : > { %v10960_v42 = vpop.eup %10959  ;;  %v2166_v33 = vpop.f32.mrf.mxu2  ;;  %v13698_v59 = vsub.f32 0.0, %v13682_v17  ;;  %v2967_v34 = vmul.f32 1.442695, %v13682_v17  ;;  %v3374_v48 = vunpack.c.l.b16 %v3278_v11  ;;  %v3310_v36 = vpack.c.bf16 %v3239_v26, %v3239_v26 }
 0x226   : > { %v10269_v19 = vadd.f32 -1.0, %v10960_v42  ;;  %v2210_v30 = vadd.f32 %v2166_v33, %v18634_v39  ;;  %2796 = vrot.lane.b32.xlu2 %v13686_v21, %s11778_s25  ;;  %v18635_v42 = vld [vmem:[#allocation10_spill] sm:$0xff]  ;;  %v18636_v33 = vld [vmem:[#allocation9_spill] sm:$0xff]  ;;  %vm2924_vm1 = vcmp.gt.f32.partialorder %v13682_v17, 0.0 }
 0x227   : > { %v10962_v23 = vpop.eup %10961  ;;  %v2666_v22 = vpop.f32.mrf.mxu1  ;;  %10344 = vmatmul.msk.bf16.gmra.mxu3 %vm1780_vm5, %v3562_v63  ;;  %v3882_v63 = vsel %vm12035_vm6, %v3758_v1, 0  ;;  %10963 = vpow2.f32 %v2967_v34  ;;  %v2045_v11 = vadd.f32 %v18636_v33, %v18635_v42  ;;  %v13742_v1 = vsel %vm2921_vm14, %v13581_v37, %v10270_v10 }
 0x228   : > { %v2366_v43 = vadd.f32 %v2322_v56, %v2210_v30  ;;  %v2769_v58 = vpop.permute.xlu0 %2768  ;;  %v3048_v13 = vsel %vm2920_vm9, %v13647_v3, %v10269_v19  ;;  %v10301_v62 = vadd.f32 -1.0, %v10962_v23  ;;  %v3159_v56 = vmul.f32 1.442695, %v13698_v59 }
 0x229   : > { %v2855_v27 = vadd.f32 %v2769_v58, %v13319_v44  ;;  %v2324_v51 = vpop.f32.mrf.mxu3  ;;  %v3279_v45 = vpack.c.bf16 %v3048_v13, %v3048_v13  ;;  %10328 = vmatmul.msk.bf16.gmra.mxu2 %vm1780_vm5, %v3882_v63  ;;  %v3694_v34 = vunpack.c.l.b16 %v3310_v36  ;;  %v13753_v37 = vsel %vm3113_vm15, %v13603_v20, %v10302_v40 }
 0x22a   : > { %v2538_v54 = vadd.f32 %v2494_v15, %v2366_v43  ;;  %v2496_v14 = vpop.f32.mrf.mxu0  ;;  %v3240_v29 = vsel %vm3112_vm12, %v13661_v24, %v10301_v62  ;;  %10965 = vpow2.f32 %v3159_v56  ;;  %vm3116_vm2 = vcmp.gt.f32.partialorder %v13698_v59, 0.0 }
 0x22b   : > { %v13727_v44 = vadd.f32 %v13428_v18, %v2855_v27  ;;  %v3375_v3 = vunpack.c.l.b16 %v3279_v45  ;;  %v3311_v50 = vpack.c.bf16 %v3240_v29, %v3240_v29  ;;  %v3280_v27 = vpack.c.bf16 %v13742_v1, %v13742_v1 }
 0x22c   : > { %v13732_v15 = vadd.f32 %v2666_v22, %v2538_v54 }
 0x22d   : > { %v2963_v19 = vmul.f32 1.442695, %v13727_v44  ;;  %v13737_v24 = vsub.f32 0.0, %v13727_v44  ;;  %v2168_v39 = vpop.f32.mrf.mxu2  ;;  %v13739_v30 = vpack.c.b16 %v3375_v3, %v3374_v48  ;;  %v3695_v22 = vunpack.c.l.b16 %v3311_v50  ;;  %v10964_v63 = vpop.eup %10963 }
 0x22e   : > { %v2211_v23 = vadd.f32 %v2168_v39, %v2045_v11  ;;  %2798 = vrot.lane.b32.xlu0 %v13732_v15, %s11778_s25  ;;  %v10273_v50 = vadd.f32 -1.0, %v10964_v63  ;;  %vm2922_vm3 = vcmp.gt.f32.partialorder %v13727_v44, 0.0 }
 0x22f   : > { %10967 = vpow2.f32 %v2963_v19  ;;  %v3155_v26 = vmul.f32 1.442695, %v13737_v24  ;;  %v2668_v43 = vpop.f32.mrf.mxu1  ;;  %v3440_v58 = vshrl.u32 %v13739_v30, 16  ;;  %10361 = vmatmul.msk.bf16.gmra.mxu0 %vm1780_vm5, %v13739_v30  ;;  %v13755_v62 = vpack.c.b16 %v3695_v22, %v3694_v34 }
 0x230   : > { %v2367_v10 = vadd.f32 %v2324_v51, %v2211_v23  ;;  %v2771_v13 = vpop.permute.xlu1 %2770  ;;  %v3443_v54 = vshll.u32 %v13739_v30, 16  ;;  %vm3114_vm9 = vcmp.gt.f32.partialorder %v13737_v24, 0.0 }
 0x231   : > { %v2856_v45 = vadd.f32 %v2771_v13, %v13334_v5  ;;  %v2327_v48 = vpop.f32.mrf.mxu3  ;;  %v13762_v56 = vrot.slane %v3440_v58, 7  ;;  %10969 = vpow2.f32 %v3155_v26  ;;  %v3760_v51 = vshrl.u32 %v13755_v62, 16  ;;  %10377 = vmatmul.msk.bf16.gmra.mxu1 %vm1780_vm5, %v13755_v62  ;;  %v18637_v26 = vld [vmem:[#allocation11_spill] sm:$0xff] }
 0x232   : > { %v2539_v20 = vadd.f32 %v2496_v14, %v2367_v10  ;;  %v2499_v40 = vpop.f32.mrf.mxu0  ;;  %v3763_v29 = vshll.u32 %v13755_v62, 16  ;;  %v3312_v5 = vpack.c.bf16 %v13753_v37, %v13753_v37  ;;  %v10966_v14 = vpop.eup %10965 }
 0x233   : > { %v13773_v36 = vadd.f32 %v13428_v18, %v2856_v45  ;;  %v3445_v3 = vor.u32 %v3443_v54, %v13762_v56  ;;  %v13780_v33 = vrot.slane %v3760_v51, 7  ;;  %v3584_v45 = vrot.slane %v3443_v54, 1 }
 0x234   : > { %v13778_v42 = vadd.f32 %v2668_v43, %v2539_v20  ;;  %v3904_v34 = vrot.slane %v3763_v29, 1 }
 0x235   : > { %v10968_v11 = vpop.eup %10967  ;;  %v2965_v19 = vmul.f32 1.442695, %v13773_v36  ;;  %v13784_v39 = vsub.f32 0.0, %v13773_v36  ;;  %v2171_v1 = vpop.f32.mrf.mxu2  ;;  %v3446_v23 = vsel %vm1186_vm4, %v13643_v6, %v3445_v3  ;;  %v3765_v10 = vor.u32 %v3763_v29, %v13780_v33 }
 0x236   : > { %v10271_v22 = vadd.f32 -1.0, %v10968_v11  ;;  %v2212_v37 = vadd.f32 %v2171_v1, %v18637_v26  ;;  %2800 = vrot.lane.b32.xlu1 %v13778_v42, %s11778_s25  ;;  %v3563_v43 = vsel %vm12035_vm6, %v3446_v23, 0  ;;  %v10305_v6 = vadd.f32 -1.0, %v10966_v14 }
 0x237   : > { %v10970_v13 = vpop.eup %10969  ;;  %10971 = vpow2.f32 %v2965_v19  ;;  %v3157_v62 = vmul.f32 1.442695, %v13784_v39  ;;  %v2671_v63 = vpop.f32.mrf.mxu1  ;;  %10345 = vmatmul.msk.bf16.gmra.mxu3 %vm1780_vm5, %v3563_v43  ;;  %v3766_v3 = vsel %vm1186_vm4, %v13673_v52, %v3765_v10  ;;  %v3052_v52 = vsel %vm2924_vm1, %v13682_v17, %v10273_v50 }
 0x238   : > { %v2368_v20 = vadd.f32 %v2327_v48, %v2212_v37  ;;  %v3050_v11 = vsel %vm2922_vm3, %v13727_v44, %v10271_v22  ;;  %v10303_v1 = vadd.f32 -1.0, %v10970_v13  ;;  %v3883_v29 = vsel %vm12035_vm6, %v3766_v3, 0  ;;  %v2779_v54 = vpop.permute.xlu2 %2778 }
 0x239   : > { %v2329_v19 = vpop.f32.mrf.mxu3  ;;  %v3281_v23 = vpack.c.bf16 %v3050_v11, %v3050_v11  ;;  %10973 = vpow2.f32 %v3157_v62  ;;  %10329 = vmatmul.msk.bf16.gmra.mxu2 %vm1780_vm5, %v3883_v29  ;;  %v13811_v44 = vsel %vm1363_vm7, %v13709_v12, %v3904_v34  ;;  %v3376_v22 = vunpack.c.l.b16 %v3280_v27 }
 0x23a   : > { %v2540_v26 = vadd.f32 %v2499_v40, %v2368_v20  ;;  %v2501_v14 = vpop.f32.mrf.mxu0  ;;  %v3242_v48 = vsel %vm3114_vm9, %v13737_v24, %v10303_v1  ;;  %v3244_v40 = vsel %vm3116_vm2, %v13698_v59, %v10305_v6  ;;  %v13820_v24 = vsel %vm1363_vm7, %v13716_v46, %v3584_v45 }
 0x23b   : > { %v3377_v37 = vunpack.c.l.b16 %v3281_v23  ;;  %v3313_v43 = vpack.c.bf16 %v3242_v48, %v3242_v48  ;;  %v13822_v13 = vor.u32 %v3904_v34, %v3760_v51  ;;  %v13826_v17 = vor.u32 %v3584_v45, %v3440_v58 }
 0x23c   : > { %v13816_v10 = vadd.f32 %v2671_v63, %v2540_v26  ;;  %v3696_v62 = vunpack.c.l.b16 %v3312_v5  ;;  %v3283_v20 = vpack.c.bf16 %v3052_v52, %v3052_v52  ;;  %v2860_v59 = vadd.f32 %v2779_v54, %v13392_v32  ;;  %v18638_v63 = vld [vmem:[#allocation12_spill] sm:$0xff] }
 0x23d   : > { %v10972_v12 = vpop.eup %10971  ;;  %v2173_v27 = vpop.f32.mrf.mxu2  ;;  %v13828_v50 = vpack.c.b16 %v3377_v37, %v3376_v22  ;;  %v3697_v46 = vunpack.c.l.b16 %v3313_v43  ;;  %vm2923_vm10 = vcmp.gt.f32.partialorder %v13773_v36, 0.0  ;;  %vm3115_vm12 = vcmp.gt.f32.partialorder %v13784_v39, 0.0 }
 0x23e   : > { %v10272_v3 = vadd.f32 -1.0, %v10972_v12  ;;  %v2213_v6 = vadd.f32 %v2173_v27, %v18638_v63  ;;  %2802 = vrot.lane.b32.xlu2 %v13816_v10, %s11778_s25  ;;  %v3315_v5 = vpack.c.bf16 %v3244_v40, %v3244_v40  ;;  %v13849_v54 = vadd.f32 %v13428_v18, %v2860_v59 }
 0x23f   : > { %v10974_v51 = vpop.eup %10973  ;;  %v2673_v30 = vpop.f32.mrf.mxu1  ;;  %v18470_v58 = vshrl.u32 %v13828_v50, 16  ;;  %10362 = vmatmul.msk.bf16.gmra.mxu0 %vm1780_vm5, %v13828_v50  ;;  %v13839_v45 = vpack.c.b16 %v3697_v46, %v3696_v62  ;;  %v3451_v48 = vshll.u32 %v13828_v50, 16 }
 0x240   : > { %v2369_v34 = vadd.f32 %v2329_v19, %v2213_v6  ;;  %v2775_v32 = vpop.permute.xlu0 %2774  ;;  %v3051_v11 = vsel %vm2923_vm10, %v13773_v36, %v10272_v3  ;;  %v10304_v1 = vadd.f32 -1.0, %v10974_v51  ;;  %v3379_v3 = vunpack.c.l.b16 %v3283_v20 }
 0x241   : > { %v2858_v29 = vadd.f32 %v2775_v32, %v13365_v61  ;;  %v2332_v23 = vpop.f32.mrf.mxu3  ;;  %v13845_v26 = vrot.slane %v18470_v58, 7  ;;  %v3282_v52 = vpack.c.bf16 %v3051_v11, %v3051_v11  ;;  %v3768_v22 = vshrl.u32 %v13839_v45, 16  ;;  %10378 = vmatmul.msk.bf16.gmra.mxu1 %vm1780_vm5, %v13839_v45 }
 0x242   : > { %v2541_v19 = vadd.f32 %v2501_v14, %v2369_v34  ;;  %v3243_v61 = vsel %vm3115_vm12, %v13784_v39, %v10304_v1  ;;  %v2504_v37 = vpop.f32.mrf.mxu0  ;;  %v3771_v62 = vshll.u32 %v13839_v45, 16  ;;  %v3699_v46 = vunpack.c.l.b16 %v3315_v5  ;;  %v18641_v45 = vld [vmem:[#allocation15_spill] sm:$0xff] }
 0x243   : > { %v13858_v36 = vadd.f32 %v13428_v18, %v2858_v29  ;;  %v3453_v43 = vor.u32 %v3451_v48, %v13845_v26  ;;  %v3378_v40 = vunpack.c.l.b16 %v3282_v52  ;;  %v3314_v12 = vpack.c.bf16 %v3243_v61, %v3243_v61 }
 0x244   : > { %v13863_v14 = vadd.f32 %v2673_v30, %v2541_v19  ;;  %v13867_v27 = vrot.slane %v3768_v22, 7  ;;  %v2973_v51 = vmul.f32 1.442695, %v13849_v54  ;;  %v18639_v30 = vld [vmem:[#allocation13_spill] sm:$0xff]  ;;  %v13888_v29 = vsub.f32 0.0, %v13849_v54 }
 0x245   : > { %v2969_v39 = vmul.f32 1.442695, %v13858_v36  ;;  %v13872_v59 = vsub.f32 0.0, %v13858_v36  ;;  %v2176_v63 = vpop.f32.mrf.mxu2  ;;  %v3454_v6 = vsel %vm1186_vm4, %v13762_v56, %v3453_v43  ;;  %v13885_v56 = vpack.c.b16 %v3379_v3, %v3378_v40 }
 0x246   : > { %v2214_v34 = vadd.f32 %v2176_v63, %v18639_v30  ;;  %2804 = vrot.lane.b32.xlu0 %v13863_v14, %s11778_s25  ;;  %v3564_v20 = vsel %vm12035_vm6, %v3454_v6, 0  ;;  %v3773_v32 = vor.u32 %v3771_v62, %v13867_v27  ;;  %v3698_v5 = vunpack.c.l.b16 %v3314_v12 }
 0x247   : > { %10975 = vpow2.f32 %v2969_v39  ;;  %v3161_v11 = vmul.f32 1.442695, %v13872_v59  ;;  %v2676_v1 = vpop.f32.mrf.mxu1  ;;  %10346 = vmatmul.msk.bf16.gmra.mxu3 %vm1780_vm5, %v3564_v20  ;;  %v3907_v43 = vrot.slane %v3771_v62, 1  ;;  %v18468_v6 = vshrl.u32 %v13885_v56, 16 }
 0x248   : > { %v2370_v52 = vadd.f32 %v2332_v23, %v2214_v34  ;;  %v2777_v19 = vpop.permute.xlu1 %2776  ;;  %v3774_v61 = vsel %vm1186_vm4, %v13780_v33, %v3773_v32  ;;  %v13896_v30 = vpack.c.b16 %v3699_v46, %v3698_v5  ;;  %v3165_v62 = vmul.f32 1.442695, %v13888_v29 }
 0x249   : > { %v2859_v63 = vadd.f32 %v2777_v19, %v13381_v49  ;;  %v3884_v39 = vsel %vm12035_vm6, %v3774_v61, 0  ;;  %10977 = vpow2.f32 %v3161_v11  ;;  %v2334_v12 = vpop.f32.mrf.mxu3  ;;  %v13905_v49 = vrot.slane %v18468_v6, 7 }
 0x24a   : > { %v2542_v40 = vadd.f32 %v2504_v37, %v2370_v52  ;;  %10330 = vmatmul.msk.bf16.gmra.mxu2 %vm1780_vm5, %v3884_v39  ;;  %v18469_v33 = vshrl.u32 %v13896_v30, 16  ;;  %v3459_v46 = vshll.u32 %v13885_v56, 16  ;;  %v13913_v37 = vsel %vm1363_vm7, %v13822_v13, %v3907_v43  ;;  %v2506_v32 = vpop.f32.mrf.mxu0 }
 0x24b   : > { %v13900_v23 = vadd.f32 %v13428_v18, %v2859_v63  ;;  %10979 = vpow2.f32 %v2973_v51  ;;  %v3779_v5 = vshll.u32 %v13896_v30, 16  ;;  %vm2925_vm14 = vcmp.gt.f32.partialorder %v13858_v36, 0.0 }
 0x24c   : > { %v13908_v3 = vadd.f32 %v2676_v1, %v2542_v40  ;;  %v18640_v1 = vld [vmem:[#allocation14_spill] sm:$0xff]  ;;  %v3461_v13 = vor.u32 %v3459_v46, %v13905_v49  ;;  %v13928_v51 = vrot.slane %v18469_v33, 7  ;;  %vm3117_vm1 = vcmp.gt.f32.partialorder %v13872_v59, 0.0 }
 0x24d   : > { %v10976_v34 = vpop.eup %10975  ;;  %v2971_v18 = vmul.f32 1.442695, %v13900_v23  ;;  %v13917_v20 = vsub.f32 0.0, %v13900_v23  ;;  %v2178_v11 = vpop.f32.mrf.mxu2  ;;  %vm2926_vm15 = vcmp.gt.f32.partialorder %v13900_v23, 0.0  ;;  %vm2927_vm3 = vcmp.gt.f32.partialorder %v13849_v54, 0.0 }
 0x24e   : > { %v10274_v52 = vadd.f32 -1.0, %v10976_v34  ;;  %v2215_v19 = vadd.f32 %v2178_v11, %v18640_v1  ;;  %2806 = vrot.lane.b32.xlu1 %v13908_v3, %s11778_s25  ;;  %v3781_v34 = vor.u32 %v3779_v5, %v13928_v51  ;;  %vm3119_vm9 = vcmp.gt.f32.partialorder %v13888_v29, 0.0 }
 0x24f   : > { %10981 = vpow2.f32 %v2971_v18  ;;  %v3163_v61 = vmul.f32 1.442695, %v13917_v20  ;;  %v2678_v63 = vpop.f32.mrf.mxu1  ;;  %10363 = vmatmul.msk.bf16.gmra.mxu0 %vm1780_vm5, %v13885_v56  ;;  %v10978_v39 = vpop.eup %10977  ;;  %v3462_v18 = vsel %vm1186_vm4, %v13845_v26, %v3461_v13  ;;  %vm3118_vm2 = vcmp.gt.f32.partialorder %v13917_v20, 0.0 }
 0x250   : > { %v2371_v40 = vadd.f32 %v2334_v12, %v2215_v19  ;;  %10983 = vpow2.f32 %v3165_v62  ;;  %v2785_v11 = vpop.permute.xlu2 %2784  ;;  %v10306_v1 = vadd.f32 -1.0, %v10978_v39  ;;  %v3053_v58 = vsel %vm2925_vm14, %v13858_v36, %v10274_v52 }
 0x251   : > { %10985 = vpow2.f32 %v3163_v61  ;;  %v2863_v33 = vadd.f32 %v2785_v11, %v13442_v2  ;;  %10379 = vmatmul.msk.bf16.gmra.mxu1 %vm1780_vm5, %v13896_v30  ;;  %v10980_v12 = vpop.eup %10979  ;;  %v3782_v62 = vsel %vm1186_vm4, %v13867_v27, %v3781_v34  ;;  %v13949_v2 = vld [vmem:[%s18385_s4] ss:$0 sm:$0xff]  ;;  %v3587_v52 = vrot.slane %v3451_v48, 1  ;;  %v2337_v19 = vpop.f32.mrf.mxu3 }
 0x252   : > { %v2543_v6 = vadd.f32 %v2506_v32, %v2371_v40  ;;  %v3245_v36 = vsel %vm3117_vm1, %v13872_v59, %v10306_v1  ;;  %v3565_v61 = vsel %vm12035_vm6, %v3462_v18, 0  ;;  %v3284_v39 = vpack.c.bf16 %v3053_v58, %v3053_v58  ;;  %v2509_v11 = vpop.f32.mrf.mxu0 }
 0x253   : > { %v13952_v32 = vadd.f32 %v13949_v2, %v2863_v33  ;;  %v3909_v40 = vor.u32 %v3907_v43, %v3768_v22  ;;  %v3910_v34 = vrot.slane %v3779_v5, 1  ;;  %v3885_v48 = vsel %vm12035_vm6, %v3782_v62, 0 }
 0x254   : > { %v13954_v26 = vadd.f32 %v2678_v63, %v2543_v6  ;;  %v3316_v43 = vpack.c.bf16 %v3245_v36, %v3245_v36  ;;  %v13976_v5 = vsel %vm1363_vm7, %v13826_v17, %v3587_v52  ;;  %v10276_v47 = vadd.f32 -1.0, %v10980_v12 }
 0x255   : > { %v10982_v27 = vpop.eup %10981  ;;  %v2181_v13 = vpop.f32.mrf.mxu2  ;;  %v2979_v59 = vmul.f32 1.442695, %v13952_v32  ;;  %v13966_v63 = vsub.f32 0.0, %v13952_v32  ;;  %18642 = vst [vmem:[#allocation4_spill] sm:$0xff] %v13976_v5  ;;  %v13979_v1 = vsel %vm1363_vm7, %v3909_v40, %v3910_v34  ;;  %v3380_v40 = vunpack.c.l.b16 %v3284_v39 }
 0x256   : > { %v10984_v33 = vpop.eup %10983  ;;  %v10275_v6 = vadd.f32 -1.0, %v10982_v27  ;;  %2808 = vrot.lane.b32.xlu2 %v13954_v26, %s11778_s25  ;;  %v2216_v22 = vadd.f32 %v2181_v13, %v18641_v45  ;;  %18643 = vst [vmem:[#allocation5_spill] sm:$0xff] %v13979_v1  ;;  %v3590_v13 = vrot.slane %v3459_v46, 1  ;;  %v3700_v5 = vunpack.c.l.b16 %v3316_v43 }
 0x257   : > { %v10986_v58 = vpop.eup %10985  ;;  %10347 = vmatmul.msk.bf16.gmra.mxu3 %vm1780_vm5, %v3565_v61  ;;  %10987 = vpow2.f32 %v2979_v59  ;;  %v3171_v61 = vmul.f32 1.442695, %v13966_v63  ;;  %v2681_v36 = vpop.f32.mrf.mxu1  ;;  %v18645_v12 = vshrl.u32 %v13896_v30, 16  ;;  %v18646_v39 = vshrl.u32 %v13885_v56, 16 }
 0x258   : > { %v2781_v18 = vpop.permute.xlu0 %2780  ;;  %v3054_v62 = vsel %vm2926_vm15, %v13900_v23, %v10275_v6  ;;  %v10307_v27 = vadd.f32 -1.0, %v10986_v58  ;;  %v2372_v45 = vadd.f32 %v2337_v19, %v2216_v22  ;;  %v10308_v23 = vadd.f32 -1.0, %v10984_v33 }
 0x259   : > { %v2861_v17 = vadd.f32 %v2781_v18, %v13414_v16  ;;  %v3285_v60 = vpack.c.bf16 %v3054_v62, %v3054_v62  ;;  %v18644_v19 = vshrl.u32 %v13828_v50, 16  ;;  %v13999_v22 = vor.u32 %v3910_v34, %v18645_v12  ;;  %v18647_v18 = vld [vmem:[#allocation16_spill] sm:$0xff]  ;;  %v2339_v62 = vpop.f32.mrf.mxu3 }
 0x25a   : > { %10331 = vmatmul.msk.bf16.gmra.mxu2 %vm1780_vm5, %v3885_v48  ;;  %v3246_v59 = vsel %vm3118_vm2, %v13917_v20, %v10307_v27  ;;  %v2544_v6 = vadd.f32 %v2509_v11, %v2372_v45  ;;  %v14003_v48 = vor.u32 %v3590_v13, %v18646_v39  ;;  %10989 = vpow2.f32 %v3171_v61 }
 0x25b   : > { %v13993_v58 = vadd.f32 %v13949_v2, %v2861_v17  ;;  %v3381_v46 = vunpack.c.l.b16 %v3285_v60  ;;  %v3317_v1 = vpack.c.bf16 %v3246_v59, %v3246_v59  ;;  %v3589_v16 = vor.u32 %v3587_v52, %v18644_v19 }
 0x25c   : > { %v2716_v60 = vadd.f32 %v2681_v36, %v2544_v6  ;;  %v3055_v27 = vsel %vm2927_vm3, %v13849_v54, %v10276_v47  ;;  %v3247_v45 = vsel %vm3119_vm9, %v13888_v29, %v10308_v23  ;;  %vm2930_vm10 = vcmp.gt.f32.partialorder %v13952_v32, 0.0 }
 0x25d   : > { %v2975_v20 = vmul.f32 1.442695, %v13993_v58  ;;  %v14007_v33 = vsub.f32 0.0, %v13993_v58  ;;  %v2183_v11 = vpop.f32.mrf.mxu2  ;;  %v10988_v43 = vpop.eup %10987  ;;  %v14010_v52 = vpack.c.b16 %v3381_v46, %v3380_v40  ;;  %v3701_v30 = vunpack.c.l.b16 %v3317_v1 }
 0x25e   : > { %v2217_v50 = vadd.f32 %v2183_v11, %v18647_v18  ;;  %v14013_v34 = vsel %vm1363_vm7, %v3589_v16, %v3590_v13  ;;  %2810 = vrot.lane.b32.xlu0 %v2716_v60, %s11778_s25  ;;  %v10279_v17 = vadd.f32 -1.0, %v10988_v43  ;;  %v2511_v40 = vpop.f32.mrf.mxu0  ;;  %v3286_v29 = vpack.c.bf16 %v3055_v27, %v3055_v27 }
 0x25f   : > { %10991 = vpow2.f32 %v2975_v20  ;;  %v3167_v56 = vmul.f32 1.442695, %v14007_v33  ;;  %v3464_v36 = vshrl.u32 %v14010_v52, 16  ;;  %10364 = vmatmul.msk.bf16.gmra.mxu0 %vm1780_vm5, %v14010_v52  ;;  %v3726_v13 = vpack.c.b16 %v3701_v30, %v3700_v5  ;;  %v2683_v16 = vpop.f32.mrf.mxu1 }
 0x260   : > { %v2373_v61 = vadd.f32 %v2339_v62, %v2217_v50  ;;  %v2783_v1 = vpop.permute.xlu1 %2782  ;;  %v3467_v54 = vshll.u32 %v14010_v52, 16  ;;  %v10990_v19 = vpop.eup %10989  ;;  %v3318_v23 = vpack.c.bf16 %v3247_v45, %v3247_v45  ;;  %vm2928_vm12 = vcmp.gt.f32.partialorder %v13993_v58, 0.0 }
 0x261   : > { %v2862_v59 = vadd.f32 %v2783_v1, %v13423_v8  ;;  %10993 = vpow2.f32 %v3167_v56  ;;  %v3784_v46 = vshrl.u32 %v3726_v13, 16  ;;  %10380 = vmatmul.msk.bf16.gmra.mxu1 %vm1780_vm5, %v3726_v13  ;;  %v14027_v47 = vrot.slane %v3464_v36, 7 }
 0x262   : > { %v2545_v6 = vadd.f32 %v2511_v40, %v2373_v61  ;;  %v3787_v20 = vshll.u32 %v3726_v13, 16  ;;  %vm3120_vm14 = vcmp.gt.f32.partialorder %v14007_v33, 0.0  ;;  %v3058_v30 = vsel %vm2930_vm10, %v13952_v32, %v10279_v17 }
 0x263   : > { %v2897_v5 = vadd.f32 %v13949_v2, %v2862_v59  ;;  %v3469_v8 = vor.u32 %v3467_v54, %v14027_v47  ;;  %v14033_v39 = vrot.slane %v3784_v46, 7  ;;  %v10311_v61 = vadd.f32 -1.0, %v10990_v19 }
 0x264   : > { %v2717_v12 = vadd.f32 %v2683_v16, %v2545_v6  ;;  %v3913_v40 = vrot.slane %v3787_v20, 1  ;;  %v3382_v16 = vunpack.c.l.b16 %v3286_v29  ;;  %vm3122_vm15 = vcmp.gt.f32.partialorder %v13966_v63, 0.0 }
 0x265   : > { %v10992_v11 = vpop.eup %10991  ;;  %v2977_v60 = vmul.f32 1.442695, %v2897_v5  ;;  %v3089_v43 = vsub.f32 0.0, %v2897_v5  ;;  %v3470_v50 = vsel %vm1186_vm4, %v13905_v49, %v3469_v8  ;;  %v3789_v52 = vor.u32 %v3787_v20, %v14033_v39 }
 0x266   : > { %v10277_v18 = vadd.f32 -1.0, %v10992_v11  ;;  %2812 = vrot.lane.b32.xlu1 %v2717_v12, %s11778_s25  ;;  %v3566_v27 = vsel %vm12035_vm6, %v3470_v50, 0  ;;  %v3915_v19 = vor.u32 %v3913_v40, %v3784_v46  ;;  %v3289_v8 = vpack.c.bf16 %v3058_v30, %v3058_v30 }
 0x267   : > { %v10994_v56 = vpop.eup %10993  ;;  %10995 = vpow2.f32 %v2977_v60  ;;  %v3169_v62 = vmul.f32 1.442695, %v3089_v43  ;;  %10348 = vmatmul.msk.bf16.gmra.mxu3 %vm1780_vm5, %v3566_v27  ;;  %v3790_v13 = vsel %vm1186_vm4, %v13928_v51, %v3789_v52  ;;  %v14061_v51 = vsel %vm1363_vm7, %v13999_v22, %v3913_v40 }
 0x268   : > { %v2791_v1 = vpop.permute.xlu2 %2790  ;;  %v3056_v49 = vsel %vm2928_vm12, %v13993_v58, %v10277_v18  ;;  %v10309_v45 = vadd.f32 -1.0, %v10994_v56  ;;  %v3886_v17 = vsel %vm12035_vm6, %v3790_v13, 0  ;;  %v3593_v58 = vrot.slane %v3467_v54, 1 }
 0x269   : > { %v2866_v32 = vadd.f32 %v2791_v1, %v13511_v9  ;;  %v3287_v59 = vpack.c.bf16 %v3056_v49, %v3056_v49  ;;  %10997 = vpow2.f32 %v3169_v62  ;;  %v3250_v20 = vsel %vm3122_vm15, %v13966_v63, %v10311_v61 }
 0x26a   : > { %10332 = vmatmul.msk.bf16.gmra.mxu2 %vm1780_vm5, %v3886_v17  ;;  %v3248_v6 = vsel %vm3120_vm14, %v14007_v33, %v10309_v45  ;;  %v14067_v11 = vsel %vm1363_vm7, %v14003_v48, %v3593_v58  ;;  %v3595_v60 = vor.u32 %v3593_v58, %v3464_v36  ;;  %v3702_v46 = vunpack.c.l.b16 %v3318_v23 }
 0x26b   : > { %v3383_v12 = vunpack.c.l.b16 %v3287_v59  ;;  %v3319_v9 = vpack.c.bf16 %v3248_v6, %v3248_v6  ;;  %v14070_v22 = vadd.f32 %v13949_v2, %v2866_v32  ;;  %vm2929_vm1 = vcmp.gt.f32.partialorder %v2897_v5, 0.0 }
 0x26c   : > { %v3321_v30 = vpack.c.bf16 %v3250_v20, %v3250_v20  ;;  %v3385_v48 = vunpack.c.l.b16 %v3289_v8  ;;  %vm3121_vm2 = vcmp.gt.f32.partialorder %v3089_v43, 0.0 }
 0x26d   : > { %v10996_v33 = vpop.eup %10995  ;;  %v3407_v18 = vpack.c.b16 %v3383_v12, %v3382_v16  ;;  %v3703_v54 = vunpack.c.l.b16 %v3319_v9  ;;  %v2985_v13 = vmul.f32 1.442695, %v14070_v22  ;;  %vm2933_vm9 = vcmp.gt.f32.partialorder %v14070_v22, 0.0 }
 0x26e   : > { %v10278_v50 = vadd.f32 -1.0, %v10996_v33 }
 0x26f   : > { %v10998_v29 = vpop.eup %10997  ;;  %v3472_v52 = vshrl.u32 %v3407_v18, 16  ;;  %v3475_v56 = vshll.u32 %v3407_v18, 16  ;;  %10365 = vmatmul.msk.bf16.gmra.mxu0 %vm1780_vm5, %v3407_v18  ;;  %v3727_v63 = vpack.c.b16 %v3703_v54, %v3702_v46  ;;  %v3705_v18 = vunpack.c.l.b16 %v3321_v30 }
 0x270   : > { %v3057_v62 = vsel %vm2929_vm1, %v2897_v5, %v10278_v50  ;;  %v10310_v27 = vadd.f32 -1.0, %v10998_v29  ;;  %v2787_v23 = vpop.permute.xlu0 %2786  ;;  %10999 = vpow2.f32 %v2985_v13 }
 0x271   : > { %v14073_v36 = vrot.slane %v3472_v52, 7  ;;  %v3288_v61 = vpack.c.bf16 %v3057_v62, %v3057_v62  ;;  %v3596_v1 = vrot.slane %v3475_v56, 1  ;;  %v3792_v49 = vshrl.u32 %v3727_v63, 16  ;;  %10381 = vmatmul.msk.bf16.gmra.mxu1 %vm1780_vm5, %v3727_v63 }
 0x272   : > { %v3795_v45 = vshll.u32 %v3727_v63, 16  ;;  %v3249_v40 = vsel %vm3121_vm2, %v3089_v43, %v10310_v27  ;;  %v2864_v32 = vadd.f32 %v2787_v23, %v13449_v28 }
 0x273   : > { %v3477_v17 = vor.u32 %v3475_v56, %v14073_v36  ;;  %v3384_v5 = vunpack.c.l.b16 %v3288_v61  ;;  %v3320_v59 = vpack.c.bf16 %v3249_v40, %v3249_v40  ;;  %v14079_v6 = vrot.slane %v3792_v49, 7 }
 0x274   : > { %v3916_v58 = vrot.slane %v3795_v45, 1  ;;  %v14082_v16 = vsel %vm1363_vm7, %v3595_v60, %v3596_v1  ;;  %v3598_v12 = vor.u32 %v3596_v1, %v3472_v52  ;;  %v2899_v9 = vadd.f32 %v13949_v2, %v2864_v32 }
 0x275   : > { %v3478_v8 = vsel %vm1186_vm4, %v14027_v47, %v3477_v17  ;;  %v3408_v20 = vpack.c.b16 %v3385_v48, %v3384_v5  ;;  %v3704_v43 = vunpack.c.l.b16 %v3320_v59  ;;  %v3797_v33 = vor.u32 %v3795_v45, %v14079_v6 }
 0x276   : > { %v3567_v28 = vsel %vm12035_vm6, %v3478_v8, 0  ;;  %v14091_v50 = vsel %vm1363_vm7, %v3915_v19, %v3916_v58  ;;  %v14094_v60 = vsub.f32 0.0, %v14070_v22  ;;  %v2981_v46 = vmul.f32 1.442695, %v2899_v9  ;;  %v11000_v40 = vpop.eup %10999 }
 0x277   : > { %v14096_v54 = vsub.f32 0.0, %v2899_v9  ;;  %10349 = vmatmul.msk.bf16.gmra.mxu3 %vm1780_vm5, %v3567_v28  ;;  %v3798_v29 = vsel %vm1186_vm4, %v14033_v39, %v3797_v33  ;;  %v3480_v52 = vshrl.u32 %v3408_v20, 16  ;;  %v3728_v56 = vpack.c.b16 %v3705_v18, %v3704_v43 }
 0x278   : > { %v2789_v47 = vpop.permute.xlu1 %2788  ;;  %11001 = vpow2.f32 %v2981_v46  ;;  %v3887_v63 = vsel %vm12035_vm6, %v3798_v29, 0  ;;  %v3177_v39 = vmul.f32 1.442695, %v14094_v60  ;;  %v3918_v17 = vor.u32 %v3916_v58, %v3792_v49 }
 0x279   : > { %v3173_v30 = vmul.f32 1.442695, %v14096_v54  ;;  %v2865_v19 = vadd.f32 %v2789_v47, %v13471_v7  ;;  %v3800_v48 = vshrl.u32 %v3728_v56, 16  ;;  %v14110_v61 = vrot.slane %v3480_v52, 7 }
 0x27a   : > { %10333 = vmatmul.msk.bf16.gmra.mxu2 %vm1780_vm5, %v3887_v63  ;;  %v14106_v62 = vpop.f32.mrf.mxu0  ;;  %v3803_v1 = vshll.u32 %v3728_v56, 16  ;;  %v3483_v7 = vshll.u32 %v3408_v20, 16  ;;  %v10282_v29 = vadd.f32 -1.0, %v11000_v40  ;;  %vm2931_vm3 = vcmp.gt.f32.partialorder %v2899_v9, 0.0 }
 0x27b   : > { %v2900_v27 = vadd.f32 %v13949_v2, %v2865_v19  ;;  %11003 = vpow2.f32 %v3173_v30  ;;  %v14114_v32 = vrot.slane %v3800_v48, 7  ;;  %vm3123_vm10 = vcmp.gt.f32.partialorder %v14096_v54, 0.0 }
 0x27c   : > { %v14112_v45 = vpop.f32.mrf.mxu1  ;;  %v3485_v28 = vor.u32 %v3483_v7, %v14110_v61  ;;  %v3919_v33 = vrot.slane %v3803_v1, 1  ;;  %v3599_v47 = vrot.slane %v3483_v7, 1  ;;  %vm3125_vm15 = vcmp.gt.f32.partialorder %v14094_v60, 0.0 }
 0x27d   : > { %v2983_v13 = vmul.f32 1.442695, %v2900_v27  ;;  %v3092_v23 = vsub.f32 0.0, %v2900_v27  ;;  %v3805_v49 = vor.u32 %v3803_v1, %v14114_v32  ;;  %vm2932_vm12 = vcmp.gt.f32.partialorder %v2900_v27, 0.0 }
 0x27e   : > { %v11002_v5 = vpop.eup %11001  ;;  %v14122_v58 = vsel %vm1363_vm7, %v3918_v17, %v3919_v33  ;;  %v14128_v19 = vsel %vm1363_vm7, %v3598_v12, %v3599_v47  ;;  %v14136_v1 = vor.u32 %v3599_v47, %v3480_v52 }
 0x27f   : > { %11005 = vpow2.f32 %v2983_v13  ;;  %v3175_v59 = vmul.f32 1.442695, %v3092_v23  ;;  %v10280_v8 = vadd.f32 -1.0, %v11002_v5  ;;  %10366 = vmatmul.msk.bf16.gmra.mxu0 %vm1780_vm5, %v3408_v20  ;;  %18648 = vst [vmem:[#allocation7_spill] sm:$0xff] %v14128_v19  ;;  %v3806_v5 = vsel %vm1186_vm4, %v14079_v6, %v3805_v49 }
 0x280   : > { %v2797_v43 = vpop.permute.xlu2 %2796  ;;  %11007 = vpow2.f32 %v3177_v39  ;;  %v3061_v6 = vsel %vm2933_vm9, %v14070_v22, %v10282_v29  ;;  %v3888_v47 = vsel %vm12035_vm6, %v3806_v5, 0  ;;  %vm3124_vm14 = vcmp.gt.f32.partialorder %v3092_v23, 0.0 }
 0x281   : > { %v11004_v18 = vpop.eup %11003  ;;  %v2869_v46 = vadd.f32 %v2797_v43, %v13610_v31  ;;  %11009 = vpow2.f32 %v3175_v59  ;;  %10382 = vmatmul.msk.bf16.gmra.mxu1 %vm1780_vm5, %v3728_v56  ;;  %v3486_v31 = vsel %vm1186_vm4, %v14073_v36, %v3485_v28  ;;  %v3059_v39 = vsel %vm2931_vm3, %v2899_v9, %v10280_v8 }
 0x282   : > { %v10312_v30 = vadd.f32 -1.0, %v11004_v18  ;;  %v14130_v63 = vpop.f32.mrf.mxu0  ;;  %v14134_v56 = vor.u32 %v3919_v33, %v3800_v48  ;;  %v3568_v52 = vsel %vm12035_vm6, %v3486_v31, 0  ;;  %v3290_v48 = vpack.c.bf16 %v3059_v39, %v3059_v39 }
 0x283   : > { %v14125_v20 = vadd.f32 %v13949_v2, %v2869_v46 }
 0x284   : > { %v14146_v9 = vpop.f32.mrf.mxu1  ;;  %v3251_v59 = vsel %vm3123_vm10, %v14096_v54, %v10312_v30 }
 0x285   : > { %v11006_v13 = vpop.eup %11005  ;;  %v14140_v7 = vsub.f32 0.0, %v14125_v20  ;;  %v2991_v12 = vmul.f32 1.442695, %v14125_v20  ;;  %v3322_v30 = vpack.c.bf16 %v3251_v59, %v3251_v59  ;;  %vm2936_vm1 = vcmp.gt.f32.partialorder %v14125_v20, 0.0 }
 0x286   : > { %v11008_v40 = vpop.eup %11007  ;;  %v10281_v17 = vadd.f32 -1.0, %v11006_v13  ;;  %v3386_v13 = vunpack.c.l.b16 %v3290_v48 }
 0x287   : > { %v11010_v36 = vpop.eup %11009  ;;  %v3183_v8 = vmul.f32 1.442695, %v14140_v7  ;;  %10350 = vmatmul.msk.bf16.gmra.mxu3 %vm1780_vm5, %v3568_v52  ;;  %11011 = vpow2.f32 %v2991_v12  ;;  %v10314_v31 = vadd.f32 -1.0, %v11008_v40  ;;  %v3706_v52 = vunpack.c.l.b16 %v3322_v30 }
 0x288   : > { %v2793_v43 = vpop.permute.xlu0 %2792  ;;  %v3060_v28 = vsel %vm2932_vm12, %v2900_v27, %v10281_v17  ;;  %v10313_v33 = vadd.f32 -1.0, %v11010_v36  ;;  %v4176_v18 = vpop.f32.mrf.mxu3  ;;  %v3292_v36 = vpack.c.bf16 %v3061_v6, %v3061_v6  ;;  %vm3128_vm2 = vcmp.gt.f32.partialorder %v14140_v7, 0.0 }
 0x289   : > { %v2867_v46 = vadd.f32 %v2793_v43, %v13538_v57  ;;  %v3291_v49 = vpack.c.bf16 %v3060_v28, %v3060_v28  ;;  %11013 = vpow2.f32 %v3183_v8  ;;  %v14176_v59 = vsel %vm3125_vm15, %v14094_v60, %v10314_v31 }
 0x28a   : > { %10334 = vmatmul.msk.bf16.gmra.mxu2 %vm1780_vm5, %v3888_v47  ;;  %v3252_v54 = vsel %vm3124_vm14, %v3092_v23, %v10313_v33 }
 0x28b   : > { %v14161_v27 = vadd.f32 %v13949_v2, %v2867_v46  ;;  %v4036_v39 = vpop.f32.mrf.mxu2  ;;  %v3387_v22 = vunpack.c.l.b16 %v3291_v49  ;;  %v3323_v29 = vpack.c.bf16 %v3252_v54, %v3252_v54  ;;  %v3388_v46 = vunpack.c.l.b16 %v3292_v36 }
 0x28c   : > { %v4177_v17 = vadd.f32 %v4176_v18, %v4036_v39  ;;  %v14163_v57 = vpop.f32.mrf.mxu0  ;;  %v3324_v49 = vpack.c.bf16 %v14176_v59, %v14176_v59 }
 0x28d   : > { %v2987_v5 = vmul.f32 1.442695, %v14161_v27  ;;  %v14167_v12 = vsub.f32 0.0, %v14161_v27  ;;  %v14169_v23 = vpack.c.b16 %v3387_v22, %v3386_v13  ;;  %v3707_v48 = vunpack.c.l.b16 %v3323_v29  ;;  %v11012_v6 = vpop.eup %11011 }
 0x28e   : > { %v14173_v40 = vadd.f32 %v14106_v62, %v4177_v17  ;;  %v14179_v43 = vpop.f32.mrf.mxu1  ;;  %v10285_v22 = vadd.f32 -1.0, %v11012_v6  ;;  %vm2934_vm3 = vcmp.gt.f32.partialorder %v14161_v27, 0.0 }
 0x28f   : > { %11015 = vpow2.f32 %v2987_v5  ;;  %v3179_v8 = vmul.f32 1.442695, %v14167_v12  ;;  %v18474_v28 = vshrl.u32 %v14169_v23, 16  ;;  %v3491_v33 = vshll.u32 %v14169_v23, 16  ;;  %10367 = vmatmul.msk.bf16.gmra.mxu0 %vm1780_vm5, %v14169_v23  ;;  %v11014_v54 = vpop.eup %11013 }
 0x290   : > { %v2795_v62 = vpop.permute.xlu1 %2794  ;;  %v3729_v18 = vpack.c.b16 %v3707_v48, %v3706_v52  ;;  %v4178_v30 = vpop.f32.mrf.mxu3  ;;  %vm3126_vm9 = vcmp.gt.f32.partialorder %v14167_v12, 0.0 }
 0x291   : > { %v2868_v47 = vadd.f32 %v2795_v62, %v13566_v53  ;;  %v14188_v60 = vrot.slane %v18474_v28, 7  ;;  %11017 = vpow2.f32 %v3179_v8  ;;  %v3602_v13 = vrot.slane %v3491_v33, 1 }
 0x292   : > { %v3808_v31 = vshrl.u32 %v3729_v18, 16  ;;  %10383 = vmatmul.msk.bf16.gmra.mxu1 %vm1780_vm5, %v3729_v18  ;;  %v3811_v39 = vshll.u32 %v3729_v18, 16  ;;  %v10317_v18 = vadd.f32 -1.0, %v11014_v54 }
 0x293   : > { %v14195_v53 = vadd.f32 %v13949_v2, %v2868_v47  ;;  %v4038_v29 = vpop.f32.mrf.mxu2  ;;  %v3493_v17 = vor.u32 %v3491_v33, %v14188_v60  ;;  %v14205_v59 = vsel %vm1363_vm7, %v14136_v1, %v3602_v13 }
 0x294   : > { %v4179_v36 = vadd.f32 %v4178_v30, %v4038_v29  ;;  %v14199_v5 = vpop.f32.mrf.mxu0  ;;  %v14201_v52 = vrot.slane %v3808_v31, 7  ;;  %v3922_v48 = vrot.slane %v3811_v39, 1  ;;  %18649 = vst [vmem:[#allocation6_spill] sm:$0xff] %v14205_v59 }
 0x295   : > { %v11016_v8 = vpop.eup %11015  ;;  %v2989_v6 = vmul.f32 1.442695, %v14195_v53  ;;  %v14209_v62 = vsub.f32 0.0, %v14195_v53  ;;  %v3494_v33 = vsel %vm1186_vm4, %v14110_v61, %v3493_v17  ;;  %vm2935_vm10 = vcmp.gt.f32.partialorder %v14195_v53, 0.0 }
 0x296   : > { %v10283_v47 = vadd.f32 -1.0, %v11016_v8  ;;  %v4381_v30 = vadd.f32 %v14130_v63, %v4179_v36  ;;  %v3569_v29 = vsel %vm12035_vm6, %v3494_v33, 0  ;;  %v3813_v28 = vor.u32 %v3811_v39, %v14201_v52  ;;  %v14219_v19 = vpop.f32.mrf.mxu1 }
 0x297   : > { %v11018_v1 = vpop.eup %11017  ;;  %11019 = vpow2.f32 %v2989_v6  ;;  %v3181_v59 = vmul.f32 1.442695, %v14209_v62  ;;  %10351 = vmatmul.msk.bf16.gmra.mxu3 %vm1780_vm5, %v3569_v29  ;;  %v14228_v39 = vsel %vm1363_vm7, %v14134_v56, %v3922_v48  ;;  %v3256_v56 = vsel %vm3128_vm2, %v14140_v7, %v10317_v18 }
 0x298   : > { %v2803_v61 = vpop.permute.xlu2 %2802  ;;  %v3814_v63 = vsel %vm1186_vm4, %v14114_v32, %v3813_v28  ;;  %v3062_v54 = vsel %vm2934_vm3, %v14161_v27, %v10283_v47  ;;  %v10315_v17 = vadd.f32 -1.0, %v11018_v1  ;;  %18650 = vst [vmem:[#allocation8_spill] sm:$0xff] %v14228_v39  ;;  %v3064_v32 = vsel %vm2936_vm1, %v14125_v20, %v10285_v22 }
 0x299   : > { %v2872_v36 = vadd.f32 %v2803_v61, %v13732_v15  ;;  %v3889_v8 = vsel %vm12035_vm6, %v3814_v63, 0  ;;  %v3293_v6 = vpack.c.bf16 %v3062_v54, %v3062_v54  ;;  %11021 = vpow2.f32 %v3181_v59 }
 0x29a   : > { %10335 = vmatmul.msk.bf16.gmra.mxu2 %vm1780_vm5, %v3889_v8  ;;  %v4181_v33 = vpop.f32.mrf.mxu3  ;;  %v3254_v29 = vsel %vm3126_vm9, %v14167_v12, %v10315_v17  ;;  %v14243_v15 = vadd.f32 %v14112_v45, %v14173_v40  ;;  %v14249_v47 = vadd.f32 %v14146_v9, %v4381_v30  ;;  %v14253_v1 = vor.u32 %v3922_v48, %v3808_v31 }
 0x29b   : > { %v14246_v27 = vadd.f32 %v13949_v2, %v2872_v36  ;;  %v3389_v28 = vunpack.c.l.b16 %v3293_v6  ;;  %v3325_v59 = vpack.c.bf16 %v3254_v29, %v3254_v29  ;;  %v18653_v20 = vshrl.u32 %v14169_v23, 16 }
 0x29c   : > { %18651 = vst [vmem:[#allocation10_spill] sm:$0xff] %v14243_v15  ;;  %v14251_v12 = vpop.f32.mrf.mxu0  ;;  %v4041_v18 = vpop.f32.mrf.mxu2  ;;  %v3708_v40 = vunpack.c.l.b16 %v3324_v49  ;;  %v3295_v61 = vpack.c.bf16 %v3064_v32, %v3064_v32  ;;  %v3327_v63 = vpack.c.bf16 %v3256_v56, %v3256_v56  ;;  %vm3127_vm12 = vcmp.gt.f32.partialorder %v14209_v62, 0.0 }
 0x29d   : > { %18652 = vst [vmem:[#allocation9_spill] sm:$0xff] %v14249_v47  ;;  %v14257_v22 = vor.u32 %v3602_v13, %v18653_v20  ;;  %v11020_v7 = vpop.eup %11019  ;;  %v14259_v45 = vpack.c.b16 %v3389_v28, %v3388_v46  ;;  %v14262_v17 = vsub.f32 0.0, %v14246_v27  ;;  %v4182_v9 = vadd.f32 %v4181_v33, %v4041_v18 }
 0x29e   : > { %v10284_v54 = vadd.f32 -1.0, %v11020_v7  ;;  %v3709_v30 = vunpack.c.l.b16 %v3325_v59  ;;  %v2997_v23 = vmul.f32 1.442695, %v14246_v27  ;;  %v14266_v31 = vpop.f32.mrf.mxu1  ;;  %v3391_v20 = vunpack.c.l.b16 %v3295_v61 }
 0x29f   : > { %v11022_v36 = vpop.eup %11021  ;;  %v18475_v13 = vshrl.u32 %v14259_v45, 16  ;;  %v4382_v46 = vadd.f32 %v14163_v57, %v4182_v9  ;;  %10368 = vmatmul.msk.bf16.gmra.mxu0 %vm1780_vm5, %v14259_v45  ;;  %v3499_v32 = vshll.u32 %v14259_v45, 16  ;;  %v3189_v57 = vmul.f32 1.442695, %v14262_v17 }
 0x2a0   : > { %v2799_v49 = vpop.permute.xlu0 %2798  ;;  %v14273_v48 = vpack.c.b16 %v3709_v30, %v3708_v40  ;;  %v3063_v8 = vsel %vm2935_vm10, %v14195_v53, %v10284_v54  ;;  %v10316_v6 = vadd.f32 -1.0, %v11022_v36  ;;  %v3711_v61 = vunpack.c.l.b16 %v3327_v63 }
 0x2a1   : > { %v2870_v33 = vadd.f32 %v2799_v49, %v13656_v38  ;;  %v14279_v29 = vrot.slane %v18475_v13, 7  ;;  %v3294_v56 = vpack.c.bf16 %v3063_v8, %v3063_v8  ;;  %v14301_v36 = vadd.f32 %v14179_v43, %v4382_v46 }
 0x2a2   : > { %v18477_v28 = vshrl.u32 %v14273_v48, 16  ;;  %10384 = vmatmul.msk.bf16.gmra.mxu1 %vm1780_vm5, %v14273_v48  ;;  %v4183_v59 = vpop.f32.mrf.mxu3  ;;  %v3255_v38 = vsel %vm3127_vm12, %v14209_v62, %v10316_v6  ;;  %v3819_v30 = vshll.u32 %v14273_v48, 16  ;;  %11023 = vpow2.f32 %v2997_v23 }
 0x2a3   : > { %v14290_v53 = vadd.f32 %v13949_v2, %v2870_v33  ;;  %v3501_v7 = vor.u32 %v3499_v32, %v14279_v29  ;;  %v3390_v18 = vunpack.c.l.b16 %v3294_v56  ;;  %v3326_v40 = vpack.c.bf16 %v3255_v38, %v3255_v38  ;;  %18654 = vst [vmem:[#allocation11_spill] sm:$0xff] %v14301_v36 }
 0x2a4   : > { %v14293_v54 = vpop.f32.mrf.mxu0  ;;  %v14297_v9 = vrot.slane %v18477_v28, 7  ;;  %v4043_v8 = vpop.f32.mrf.mxu2  ;;  %11025 = vpow2.f32 %v3189_v57  ;;  %vm2939_vm3 = vcmp.gt.f32.partialorder %v14246_v27, 0.0  ;;  %vm3131_vm9 = vcmp.gt.f32.partialorder %v14262_v17, 0.0 }
 0x2a5   : > { %v2993_v62 = vmul.f32 1.442695, %v14290_v53  ;;  %v14305_v49 = vsub.f32 0.0, %v14290_v53  ;;  %v3502_v6 = vsel %vm1186_vm4, %v14188_v60, %v3501_v7  ;;  %v4184_v33 = vadd.f32 %v4183_v59, %v4043_v8 }
 0x2a6   : > { %v3570_v56 = vsel %vm12035_vm6, %v3502_v6, 0  ;;  %v3821_v38 = vor.u32 %v3819_v30, %v14297_v9  ;;  %v14313_v63 = vpop.f32.mrf.mxu1  ;;  %v14315_v23 = vpack.c.b16 %v3391_v20, %v3390_v18  ;;  %v3710_v46 = vunpack.c.l.b16 %v3326_v40 }
 0x2a7   : > { %11027 = vpow2.f32 %v2993_v62  ;;  %v3185_v43 = vmul.f32 1.442695, %v14305_v49  ;;  %v4383_v13 = vadd.f32 %v14199_v5, %v4184_v33  ;;  %10352 = vmatmul.msk.bf16.gmra.mxu3 %vm1780_vm5, %v3570_v56  ;;  %v3925_v7 = vrot.slane %v3819_v30, 1 }
 0x2a8   : > { %v2801_v60 = vpop.permute.xlu1 %2800  ;;  %v3822_v59 = vsel %vm1186_vm4, %v14201_v52, %v3821_v38  ;;  %v3605_v8 = vrot.slane %v3499_v32, 1  ;;  %v18476_v6 = vshrl.u32 %v14315_v23, 16  ;;  %v14325_v20 = vpack.c.b16 %v3711_v61, %v3710_v46  ;;  %v11024_v18 = vpop.eup %11023 }
 0x2a9   : > { %v2871_v57 = vadd.f32 %v2801_v60, %v13686_v21  ;;  %v3890_v62 = vsel %vm12035_vm6, %v3822_v59, 0  ;;  %11029 = vpow2.f32 %v3185_v43  ;;  %v14340_v61 = vsel %vm1363_vm7, %v14253_v1, %v3925_v7 }
 0x2aa   : > { %10336 = vmatmul.msk.bf16.gmra.mxu2 %vm1780_vm5, %v3890_v62  ;;  %v4186_v5 = vpop.f32.mrf.mxu3  ;;  %v18478_v52 = vshrl.u32 %v14325_v20, 16  ;;  %v14334_v21 = vrot.slane %v18476_v6, 7  ;;  %v11026_v32 = vpop.eup %11025  ;;  %18655 = vst [vmem:[#allocation12_spill] sm:$0xff] %v14340_v61  ;;  %v14344_v33 = vsel %vm1363_vm7, %v14257_v22, %v3605_v8  ;;  %v3507_v60 = vshll.u32 %v14315_v23, 16 }
 0x2ab   : > { %v14329_v40 = vadd.f32 %v13949_v2, %v2871_v57  ;;  %18656 = vst [vmem:[#allocation13_spill] sm:$0xff] %v14344_v33  ;;  %v3827_v1 = vshll.u32 %v14325_v20, 16  ;;  %vm2937_vm14 = vcmp.gt.f32.partialorder %v14290_v53, 0.0  ;;  %vm3129_vm15 = vcmp.gt.f32.partialorder %v14305_v49, 0.0 }
 0x2ac   : > { %v14336_v30 = vpop.f32.mrf.mxu0  ;;  %v4046_v46 = vpop.f32.mrf.mxu2  ;;  %v14353_v57 = vrot.slane %v18478_v52, 7  ;;  %v3509_v28 = vor.u32 %v3507_v60, %v14334_v21 }
 0x2ad   : > { %v11028_v56 = vpop.eup %11027  ;;  %v2995_v38 = vmul.f32 1.442695, %v14329_v40  ;;  %v14348_v43 = vsub.f32 0.0, %v14329_v40  ;;  %v4187_v59 = vadd.f32 %v4186_v5, %v4046_v46  ;;  %vm2938_vm1 = vcmp.gt.f32.partialorder %v14329_v40, 0.0 }
 0x2ae   : > { %v10286_v62 = vadd.f32 -1.0, %v11028_v56  ;;  %v14357_v6 = vpop.f32.mrf.mxu1  ;;  %v3829_v46 = vor.u32 %v3827_v1, %v14353_v57  ;;  %v3510_v47 = vsel %vm1186_vm4, %v14279_v29, %v3509_v28 }
 0x2af   : > { %11031 = vpow2.f32 %v2995_v38  ;;  %v3187_v22 = vmul.f32 1.442695, %v14348_v43  ;;  %v11030_v36 = vpop.eup %11029  ;;  %v4384_v33 = vadd.f32 %v14251_v12, %v4187_v59  ;;  %10369 = vmatmul.msk.bf16.gmra.mxu0 %vm1780_vm5, %v14315_v23  ;;  %v10288_v38 = vadd.f32 -1.0, %v11024_v18 }
 0x2b0   : > { %v2809_v5 = vpop.permute.xlu2 %2808  ;;  %v10318_v56 = vadd.f32 -1.0, %v11030_v36  ;;  %v10320_v12 = vadd.f32 -1.0, %v11026_v32  ;;  %v3065_v36 = vsel %vm2937_vm14, %v14290_v53, %v10286_v62  ;;  %v18657_v32 = vshrl.u32 %v14273_v48, 16 }
 0x2b1   : > { %v2875_v52 = vadd.f32 %v2809_v5, %v13863_v14  ;;  %11033 = vpow2.f32 %v3187_v22  ;;  %v3830_v14 = vsel %vm1186_vm4, %v14297_v9, %v3829_v46  ;;  %v14381_v5 = vadd.f32 %v14219_v19, %v4383_v13 }
 0x2b2   : > { %10385 = vmatmul.msk.bf16.gmra.mxu1 %vm1780_vm5, %v14325_v20  ;;  %v4188_v61 = vpop.f32.mrf.mxu3  ;;  %v3257_v22 = vsel %vm3129_vm15, %v14305_v49, %v10318_v56  ;;  %v3927_v15 = vor.u32 %v3925_v7, %v18657_v32  ;;  %vm3130_vm2 = vcmp.gt.f32.partialorder %v14348_v43, 0.0  ;;  %v18658_v53 = vshrl.u32 %v14259_v45, 16 }
 0x2b3   : > { %v14370_v59 = vadd.f32 %v13949_v2, %v2875_v52  ;;  %v3928_v52 = vrot.slane %v3827_v1, 1  ;;  %v3571_v19 = vsel %vm12035_vm6, %v3510_v47, 0  ;;  %v3891_v46 = vsel %vm12035_vm6, %v3830_v14, 0 }
 0x2b4   : > { %v14377_v18 = vpop.f32.mrf.mxu0  ;;  %v4048_v28 = vpop.f32.mrf.mxu2  ;;  %v3607_v9 = vor.u32 %v3605_v8, %v18658_v53  ;;  %v3296_v56 = vpack.c.bf16 %v3065_v36, %v3065_v36  ;;  %v3328_v45 = vpack.c.bf16 %v3257_v22, %v3257_v22  ;;  %v14409_v53 = vadd.f32 %v14266_v31, %v4384_v33 }
 0x2b5   : > { %v11032_v39 = vpop.eup %11031  ;;  %v3003_v29 = vmul.f32 1.442695, %v14370_v59  ;;  %v4189_v49 = vadd.f32 %v4188_v61, %v4048_v28  ;;  %v14393_v13 = vsel %vm1363_vm7, %v3927_v15, %v3928_v52  ;;  %v14396_v7 = vsub.f32 0.0, %v14370_v59 }
 0x2b6   : > { %v10287_v62 = vadd.f32 -1.0, %v11032_v39  ;;  %v14398_v1 = vpop.f32.mrf.mxu1  ;;  %v3608_v61 = vrot.slane %v3507_v60, 1  ;;  %v18659_v60 = vshrl.u32 %v14325_v20, 16  ;;  %v3392_v33 = vunpack.c.l.b16 %v3296_v56 }
 0x2b7   : > { %v11034_v48 = vpop.eup %11033  ;;  %v4385_v39 = vadd.f32 %v14293_v54, %v4189_v49  ;;  %10353 = vmatmul.msk.bf16.gmra.mxu3 %vm1780_vm5, %v3571_v19  ;;  %11035 = vpow2.f32 %v3003_v29  ;;  %v14442_v19 = vsel %vm2939_vm3, %v14246_v27, %v10288_v38  ;;  %vm2942_vm10 = vcmp.gt.f32.partialorder %v14370_v59, 0.0 }
 0x2b8   : > { %v2805_v8 = vpop.permute.xlu0 %2804  ;;  %v3066_v15 = vsel %vm2938_vm1, %v14329_v40, %v10287_v62  ;;  %v10319_v47 = vadd.f32 -1.0, %v11034_v48  ;;  %v14416_v36 = vsel %vm1363_vm7, %v3607_v9, %v3608_v61  ;;  %vm3134_vm15 = vcmp.gt.f32.partialorder %v14396_v7, 0.0 }
 0x2b9   : > { %v2873_v32 = vadd.f32 %v2805_v8, %v13778_v42  ;;  %v3297_v28 = vpack.c.bf16 %v3066_v15, %v3066_v15  ;;  %v14419_v40 = vadd.f32 %v14313_v63, %v4385_v39  ;;  %v14423_v42 = vor.u32 %v3928_v52, %v18659_v60 }
 0x2ba   : > { %10337 = vmatmul.msk.bf16.gmra.mxu2 %vm1780_vm5, %v3891_v46  ;;  %v4191_v14 = vpop.f32.mrf.mxu3  ;;  %v3258_v54 = vsel %vm3130_vm2, %v14348_v43, %v10319_v47  ;;  %v3195_v43 = vmul.f32 1.442695, %v14396_v7  ;;  %v18660_v63 = vshrl.u32 %v14315_v23, 16  ;;  %v3712_v46 = vunpack.c.l.b16 %v3328_v45 }
 0x2bb   : > { %v14426_v31 = vadd.f32 %v13949_v2, %v2873_v32  ;;  %v3393_v22 = vunpack.c.l.b16 %v3297_v28  ;;  %v3329_v29 = vpack.c.bf16 %v3258_v54, %v3258_v54  ;;  %v14445_v39 = vsel %vm3131_vm9, %v14262_v17, %v10320_v12 }
 0x2bc   : > { %v14430_v62 = vpop.f32.mrf.mxu0  ;;  %v3610_v9 = vor.u32 %v3608_v61, %v18660_v63  ;;  %v4051_v2 = vpop.f32.mrf.mxu2  ;;  %v3298_v45 = vpack.c.bf16 %v14442_v19, %v14442_v19  ;;  %v3330_v54 = vpack.c.bf16 %v14445_v39, %v14445_v39 }
 0x2bd   : > { %v2999_v20 = vmul.f32 1.442695, %v14426_v31  ;;  %v14437_v52 = vsub.f32 0.0, %v14426_v31  ;;  %v14439_v49 = vpack.c.b16 %v3393_v22, %v3392_v33  ;;  %v4192_v48 = vadd.f32 %v4191_v14, %v4051_v2  ;;  %v11036_v8 = vpop.eup %11035 }
 0x2be   : > { %v3713_v56 = vunpack.c.l.b16 %v3329_v29  ;;  %v14448_v15 = vpop.f32.mrf.mxu1  ;;  %v10291_v33 = vadd.f32 -1.0, %v11036_v8  ;;  %vm2940_vm12 = vcmp.gt.f32.partialorder %v14426_v31, 0.0 }
 0x2bf   : > { %11037 = vpow2.f32 %v2999_v20  ;;  %v3191_v23 = vmul.f32 1.442695, %v14437_v52  ;;  %v3512_v47 = vshrl.u32 %v14439_v49, 16  ;;  %v3515_v61 = vshll.u32 %v14439_v49, 16  ;;  %10370 = vmatmul.msk.bf16.gmra.mxu0 %vm1780_vm5, %v14439_v49 }
 0x2c0   : > { %v4386_v32 = vadd.f32 %v14336_v30, %v4192_v48  ;;  %v2807_v27 = vpop.permute.xlu1 %2806  ;;  %v3732_v38 = vpack.c.b16 %v3713_v56, %v3712_v46  ;;  %11039 = vpow2.f32 %v3195_v43  ;;  %vm3132_vm14 = vcmp.gt.f32.partialorder %v14437_v52, 0.0 }
 0x2c1   : > { %v2874_v17 = vadd.f32 %v2807_v27, %v13816_v10  ;;  %v14458_v12 = vrot.slane %v3512_v47, 7  ;;  %11041 = vpow2.f32 %v3191_v23  ;;  %v3611_v60 = vrot.slane %v3515_v61, 1  ;;  %v14468_v10 = vld [vmem:[%s18385_s4] ss:$0 sm:$0xff] }
 0x2c2   : > { %v3832_v28 = vshrl.u32 %v3732_v38, 16  ;;  %10386 = vmatmul.msk.bf16.gmra.mxu1 %vm1780_vm5, %v3732_v38  ;;  %v4193_v30 = vpop.f32.mrf.mxu3  ;;  %v3835_v14 = vshll.u32 %v3732_v38, 16  ;;  %v14475_v43 = vadd.f32 %v14357_v6, %v4386_v32 }
 0x2c3   : > { %v14471_v22 = vadd.f32 %v14468_v10, %v2874_v17  ;;  %v3517_v29 = vor.u32 %v3515_v61, %v14458_v12  ;;  %v14484_v2 = vsel %vm1363_vm7, %v3610_v9, %v3611_v60 }
 0x2c4   : > { %v14479_v63 = vpop.f32.mrf.mxu0  ;;  %v14481_v20 = vrot.slane %v3832_v28, 7  ;;  %v4053_v56 = vpop.f32.mrf.mxu2  ;;  %v3931_v39 = vrot.slane %v3835_v14, 1 }
 0x2c5   : > { %v11038_v19 = vpop.eup %11037  ;;  %v3001_v48 = vmul.f32 1.442695, %v14471_v22  ;;  %v14488_v46 = vsub.f32 0.0, %v14471_v22  ;;  %v3518_v6 = vsel %vm1186_vm4, %v14334_v21, %v3517_v29  ;;  %v4194_v61 = vadd.f32 %v4193_v30, %v4053_v56 }
 0x2c6   : > { %v11040_v8 = vpop.eup %11039  ;;  %v10289_v23 = vadd.f32 -1.0, %v11038_v19  ;;  %v3572_v32 = vsel %vm12035_vm6, %v3518_v6, 0  ;;  %v3837_v9 = vor.u32 %v3835_v14, %v14481_v20  ;;  %v14496_v17 = vpop.f32.mrf.mxu1  ;;  %v3070_v21 = vsel %vm2942_vm10, %v14370_v59, %v10291_v33 }
 0x2c7   : > { %v11042_v27 = vpop.eup %11041  ;;  %11043 = vpow2.f32 %v3001_v48  ;;  %v3193_v38 = vmul.f32 1.442695, %v14488_v46  ;;  %v4387_v29 = vadd.f32 %v14377_v18, %v4194_v61  ;;  %10354 = vmatmul.msk.bf16.gmra.mxu3 %vm1780_vm5, %v3572_v32  ;;  %v10323_v6 = vadd.f32 -1.0, %v11040_v8 }
 0x2c8   : > { %v3838_v30 = vsel %vm1186_vm4, %v14353_v57, %v3837_v9  ;;  %v3068_v14 = vsel %vm2940_vm12, %v14426_v31, %v10289_v23  ;;  %v10321_v19 = vadd.f32 -1.0, %v11042_v27  ;;  %v3301_v33 = vpack.c.bf16 %v3070_v21, %v3070_v21 }
 0x2c9   : > { %v3892_v48 = vsel %vm12035_vm6, %v3838_v30, 0  ;;  %v3299_v56 = vpack.c.bf16 %v3068_v14, %v3068_v14  ;;  %11045 = vpow2.f32 %v3193_v38  ;;  %v14515_v57 = vsel %vm1363_vm7, %v14423_v42, %v3931_v39 }
 0x2ca   : > { %10338 = vmatmul.msk.bf16.gmra.mxu2 %vm1780_vm5, %v3892_v48  ;;  %v4196_v59 = vpop.f32.mrf.mxu3  ;;  %v3260_v18 = vsel %vm3132_vm14, %v14437_v52, %v10321_v19  ;;  %v14518_v61 = vadd.f32 %v14398_v1, %v4387_v29  ;;  %v3394_v31 = vunpack.c.l.b16 %v3298_v45  ;;  %v14520_v9 = vor.u32 %v3931_v39, %v3832_v28 }
 0x2cb   : > { %v3395_v23 = vunpack.c.l.b16 %v3299_v56  ;;  %v3331_v32 = vpack.c.bf16 %v3260_v18, %v3260_v18  ;;  %v3613_v52 = vor.u32 %v3611_v60, %v3512_v47  ;;  %v3714_v42 = vunpack.c.l.b16 %v3330_v54 }
 0x2cc   : > { %v14522_v27 = vpop.f32.mrf.mxu0  ;;  %v3262_v1 = vsel %vm3134_vm15, %v14396_v7, %v10323_v6  ;;  %vm2941_vm1 = vcmp.gt.f32.partialorder %v14471_v22, 0.0  ;;  %v3397_v28 = vunpack.c.l.b16 %v3301_v33  ;;  %vm3133_vm2 = vcmp.gt.f32.partialorder %v14488_v46, 0.0 }
 0x2cd   : > { %v11044_v8 = vpop.eup %11043  ;;  %v4056_v38 = vpop.f32.mrf.mxu2  ;;  %v3413_v21 = vpack.c.b16 %v3395_v23, %v3394_v31  ;;  %v3715_v30 = vunpack.c.l.b16 %v3331_v32  ;;  %v3333_v54 = vpack.c.bf16 %v3262_v1, %v3262_v1 }
 0x2ce   : > { %v10290_v45 = vadd.f32 -1.0, %v11044_v8  ;;  %v4197_v29 = vadd.f32 %v4196_v59, %v4056_v38  ;;  %v14529_v14 = vpop.f32.mrf.mxu1 }
 0x2cf   : > { %v11046_v39 = vpop.eup %11045  ;;  %v3520_v19 = vshrl.u32 %v3413_v21, 16  ;;  %v3733_v48 = vpack.c.b16 %v3715_v30, %v3714_v42  ;;  %v3523_v56 = vshll.u32 %v3413_v21, 16  ;;  %10371 = vmatmul.msk.bf16.gmra.mxu0 %vm1780_vm5, %v3413_v21 }
 0x2d0   : > { %v4388_v49 = vadd.f32 %v14430_v62, %v4197_v29  ;;  %v3069_v47 = vsel %vm2941_vm1, %v14471_v22, %v10290_v45  ;;  %v10322_v7 = vadd.f32 -1.0, %v11046_v39  ;;  %v2811_v60 = vpop.permute.xlu0 %2810 }
 0x2d1   : > { %v3840_v6 = vshrl.u32 %v3733_v48, 16  ;;  %v14535_v59 = vrot.slane %v3520_v19, 7  ;;  %v3843_v18 = vshll.u32 %v3733_v48, 16  ;;  %v3300_v33 = vpack.c.bf16 %v3069_v47, %v3069_v47 }
 0x2d2   : > { %v2876_v31 = vadd.f32 %v2811_v60, %v13908_v3  ;;  %10387 = vmatmul.msk.bf16.gmra.mxu1 %vm1780_vm5, %v3733_v48  ;;  %v4198_v23 = vpop.f32.mrf.mxu3  ;;  %v3261_v32 = vsel %vm3133_vm2, %v14488_v46, %v10322_v7  ;;  %v3614_v62 = vrot.slane %v3523_v56, 1  ;;  %v14541_v8 = vadd.f32 %v14448_v15, %v4388_v49 }
 0x2d3   : > { %v3525_v22 = vor.u32 %v3523_v56, %v14535_v59  ;;  %v14544_v38 = vrot.slane %v3840_v6, 7  ;;  %v3396_v21 = vunpack.c.l.b16 %v3300_v33  ;;  %v3332_v42 = vpack.c.bf16 %v3261_v32, %v3261_v32 }
 0x2d4   : > { %v14547_v30 = vadd.f32 %v14468_v10, %v2876_v31  ;;  %v14549_v1 = vpop.f32.mrf.mxu0  ;;  %v3717_v3 = vunpack.c.l.b16 %v3333_v54  ;;  %v14552_v45 = vsel %vm1363_vm7, %v3613_v52, %v3614_v62  ;;  %v3616_v46 = vor.u32 %v3614_v62, %v3520_v19 }
 0x2d5   : > { %18661 = vst [vmem:[#allocation14_spill] sm:$0xff] %v14549_v1  ;;  %v4058_v29 = vpop.f32.mrf.mxu2  ;;  %v3526_v15 = vsel %vm1186_vm4, %v14458_v12, %v3525_v22  ;;  %v3845_v39 = vor.u32 %v3843_v18, %v14544_v38  ;;  %v3414_v48 = vpack.c.b16 %v3397_v28, %v3396_v21  ;;  %v3716_v56 = vunpack.c.l.b16 %v3332_v42 }
 0x2d6   : > { %v3005_v49 = vmul.f32 1.442695, %v14547_v30  ;;  %v3103_v47 = vsub.f32 0.0, %v14547_v30  ;;  %v14559_v7 = vadd.f32 %v4198_v23, %v4058_v29  ;;  %v3934_v60 = vrot.slane %v3843_v18, 1  ;;  %v14561_v54 = vpop.f32.mrf.mxu1 }
 0x2d7   : > { %18662 = vst [vmem:[#allocation15_spill] sm:$0xff] %v14561_v54  ;;  %v3573_v52 = vsel %vm12035_vm6, %v3526_v15, 0  ;;  %v3846_v19 = vsel %vm1186_vm4, %v14481_v20, %v3845_v39  ;;  %v3734_v12 = vpack.c.b16 %v3717_v3, %v3716_v56  ;;  %v3528_v23 = vshrl.u32 %v3414_v48, 16 }
 0x2d8   : > { %11047 = vpow2.f32 %v3005_v49  ;;  %v3197_v33 = vmul.f32 1.442695, %v3103_v47  ;;  %10355 = vmatmul.msk.bf16.gmra.mxu3 %vm1780_vm5, %v3573_v52  ;;  %v2813_v28 = vpop.permute.xlu1 %2812  ;;  %v3893_v31 = vsel %vm12035_vm6, %v3846_v19, 0  ;;  %v14574_v20 = vsel %vm1363_vm7, %v14520_v9, %v3934_v60 }
 0x2d9   : > { %v2877_v18 = vadd.f32 %v2813_v28, %v13954_v26  ;;  %v3848_v32 = vshrl.u32 %v3734_v12, 16  ;;  %v3851_v22 = vshll.u32 %v3734_v12, 16  ;;  %v14577_v42 = vrot.slane %v3528_v23, 7 }
 0x2da   : > { %10339 = vmatmul.msk.bf16.gmra.mxu2 %vm1780_vm5, %v3893_v31  ;;  %v4201_v62 = vpop.f32.mrf.mxu3  ;;  %11049 = vpow2.f32 %v3197_v33  ;;  %v3531_v3 = vshll.u32 %v3414_v48, 16  ;;  %v3936_v29 = vor.u32 %v3934_v60, %v3840_v6  ;;  %vm2943_vm3 = vcmp.gt.f32.partialorder %v14547_v30, 0.0 }
 0x2db   : > { %v2912_v21 = vadd.f32 %v14468_v10, %v2877_v18  ;;  %v3937_v15 = vrot.slane %v3851_v22, 1  ;;  %v14579_v52 = vrot.slane %v3848_v32, 7  ;;  %vm3135_vm9 = vcmp.gt.f32.partialorder %v3103_v47, 0.0 }
 0x2dc   : > { %v4330_v49 = vpop.f32.mrf.mxu0  ;;  %v3533_v6 = vor.u32 %v3531_v3, %v14577_v42  ;;  %v3617_v60 = vrot.slane %v3531_v3, 1 }
 0x2dd   : > { %v3007_v39 = vmul.f32 1.442695, %v2912_v21  ;;  %v3104_v56 = vsub.f32 0.0, %v2912_v21  ;;  %v4061_v26 = vpop.f32.mrf.mxu2  ;;  %v14582_v33 = vsel %vm1363_vm7, %v3936_v29, %v3937_v15  ;;  %v3853_v1 = vor.u32 %v3851_v22, %v14579_v52 }
 0x2de   : > { %v11048_v19 = vpop.eup %11047  ;;  %v4202_v28 = vadd.f32 %v4201_v62, %v4061_v26  ;;  %v4486_v31 = vpop.f32.mrf.mxu1  ;;  %vm2944_vm10 = vcmp.gt.f32.partialorder %v2912_v21, 0.0 }
 0x2df   : > { %11051 = vpow2.f32 %v3007_v39  ;;  %v3199_v9 = vmul.f32 1.442695, %v3104_v56  ;;  %v10292_v18 = vadd.f32 -1.0, %v11048_v19  ;;  %10372 = vmatmul.msk.bf16.gmra.mxu0 %vm1780_vm5, %v3414_v48  ;;  %v14590_v39 = vsel %vm1363_vm7, %v3616_v46, %v3617_v60 }
 0x2e0   : > { %v11050_v10 = vpop.eup %11049  ;;  %v4390_v54 = vadd.f32 %v14522_v27, %v4202_v28  ;;  %v3939_v19 = vor.u32 %v3937_v15, %v3848_v32  ;;  %v3619_v27 = vor.u32 %v3617_v60, %v3528_v23  ;;  %v3534_v48 = vsel %vm1186_vm4, %v14535_v59, %v3533_v6 }
 0x2e1   : > { %11053 = vpow2.f32 %v3199_v9  ;;  %v10324_v29 = vadd.f32 -1.0, %v11050_v10  ;;  %v3071_v22 = vsel %vm2943_vm3, %v14547_v30, %v10292_v18  ;;  %v3574_v59 = vsel %vm12035_vm6, %v3534_v48, 0 }
 0x2e2   : > { %10388 = vmatmul.msk.bf16.gmra.mxu1 %vm1780_vm5, %v3734_v12  ;;  %v4203_v62 = vpop.f32.mrf.mxu3  ;;  %v14593_v26 = vadd.f32 %v14529_v14, %v4390_v54  ;;  %v3854_v14 = vsel %vm1186_vm4, %v14544_v38, %v3853_v1  ;;  %v3302_v30 = vpack.c.bf16 %v3071_v22, %v3071_v22  ;;  %vm3136_vm12 = vcmp.gt.f32.partialorder %v3104_v56, 0.0 }
 0x2e3   : > { %v3263_v54 = vsel %vm3135_vm9, %v3103_v47, %v10324_v29  ;;  %v3894_v18 = vsel %vm12035_vm6, %v3854_v14, 0 }
 0x2e4   : > { %v14599_v12 = vpop.f32.mrf.mxu0  ;;  %v3334_v60 = vpack.c.bf16 %v3263_v54, %v3263_v54  ;;  %v3398_v47 = vunpack.c.l.b16 %v3302_v30 }
 0x2e5   : > { %v11052_v3 = vpop.eup %11051  ;;  %v4063_v28 = vpop.f32.mrf.mxu2 }
 0x2e6   : > { %v10293_v9 = vadd.f32 -1.0, %v11052_v3  ;;  %v14601_v46 = vadd.f32 %v4203_v62, %v4063_v28  ;;  %v14605_v23 = vpop.f32.mrf.mxu1  ;;  %v3718_v28 = vunpack.c.l.b16 %v3334_v60 }
 0x2e7   : > { %v11054_v32 = vpop.eup %11053  ;;  %18663 = vst [vmem:[#allocation16_spill] sm:$0xff] %v14605_v23 }
 0x2e8   : > { %10356 = vmatmul.msk.bf16.gmra.mxu3 %vm1780_vm5, %v3574_v59  ;;  %v3072_v15 = vsel %vm2944_vm10, %v2912_v21, %v10293_v9  ;;  %v10325_v10 = vadd.f32 -1.0, %v11054_v32 }
 0x2e9   : > { %v3303_v6 = vpack.c.bf16 %v3072_v15, %v3072_v15 }
 0x2ea   : > { %10340 = vmatmul.msk.bf16.gmra.mxu2 %vm1780_vm5, %v3894_v18  ;;  %v3264_v38 = vsel %vm3136_vm12, %v3104_v56, %v10325_v10  ;;  %v4206_v1 = vpop.f32.mrf.mxu3 }
 0x2eb   : > { %v3399_v62 = vunpack.c.l.b16 %v3303_v6  ;;  %v3335_v29 = vpack.c.bf16 %v3264_v38, %v3264_v38 }
 0x2ec   : > { %v4335_v48 = vpop.f32.mrf.mxu0 }
 0x2ed   : > { %v4066_v3 = vpop.f32.mrf.mxu2  ;;  %v3415_v22 = vpack.c.b16 %v3399_v62, %v3398_v47  ;;  %v3719_v59 = vunpack.c.l.b16 %v3335_v29 }
 0x2ee   : > { %v4207_v21 = vadd.f32 %v4206_v1, %v4066_v3  ;;  %v4491_v9 = vpop.f32.mrf.mxu1 }
 0x2ef   : > { %v3536_v32 = vshrl.u32 %v3415_v22, 16  ;;  %v3735_v23 = vpack.c.b16 %v3719_v59, %v3718_v28  ;;  %v3539_v14 = vshll.u32 %v3415_v22, 16  ;;  %10373 = vmatmul.msk.bf16.gmra.mxu0 %vm1780_vm5, %v3415_v22 }
 0x2f0   : > { %v4392_v15 = vadd.f32 %v4330_v49, %v4207_v21 }
 0x2f1   : > { %v3856_v54 = vshrl.u32 %v3735_v23, 16  ;;  %v3538_v18 = vrot.slane %v3536_v32, 7  ;;  %v3859_v56 = vshll.u32 %v3735_v23, 16  ;;  %v3620_v10 = vrot.slane %v3539_v14, 1 }
 0x2f2   : > { %10389 = vmatmul.msk.bf16.gmra.mxu1 %vm1780_vm5, %v3735_v23  ;;  %v14615_v30 = vadd.f32 %v4486_v31, %v4392_v15  ;;  %v4208_v6 = vpop.f32.mrf.mxu3 }
 0x2f3   : > { %v3541_v38 = vor.u32 %v3539_v14, %v3538_v18  ;;  %v3858_v60 = vrot.slane %v3856_v54, 7  ;;  %v3940_v47 = vrot.slane %v3859_v56, 1  ;;  %v14618_v1 = vsel %vm1363_vm7, %v3619_v27, %v3620_v10 }
 0x2f4   : > { %v14620_v62 = vor.u32 %v3620_v10, %v3536_v32  ;;  %v14622_v29 = vpop.f32.mrf.mxu0 }
 0x2f5   : > { %v4068_v49 = vpop.f32.mrf.mxu2  ;;  %v3542_v3 = vsel %vm1186_vm4, %v14577_v42, %v3541_v38  ;;  %v3861_v22 = vor.u32 %v3859_v56, %v3858_v60  ;;  %v14627_v23 = vsel %vm1363_vm7, %v3939_v19, %v3940_v47  ;;  %v14629_v31 = vor.u32 %v3940_v47, %v3856_v54 }
 0x2f6   : > { %v14631_v28 = vadd.f32 %v4208_v6, %v4068_v49  ;;  %v3575_v27 = vsel %vm12035_vm6, %v3542_v3, 0  ;;  %v14635_v59 = vpop.f32.mrf.mxu1  ;;  %v3960_v47 = vsel %vm12952_vm11, %v13636_v4, 0 }
 0x2f7   : > { %v3862_v21 = vsel %vm1186_vm4, %v14579_v52, %v3861_v22 }
 0x2f8   : > { %10357 = vmatmul.msk.bf16.gmra.mxu3 %vm1780_vm5, %v3575_v27  ;;  %v3895_v42 = vsel %vm12035_vm6, %v3862_v21, 0 }
 0x2fa   : > { %10341 = vmatmul.msk.bf16.gmra.mxu2 %vm1780_vm5, %v3895_v42  ;;  %v4211_v19 = vpop.f32.mrf.mxu3 }
 0x2fc   : > { %v4340_v14 = vpop.f32.mrf.mxu0 }
 0x2fd   : > { %v4071_v32 = vpop.f32.mrf.mxu2 }
 0x2fe   : > { %v4212_v15 = vadd.f32 %v4211_v19, %v4071_v32  ;;  %v4496_v54 = vpop.f32.mrf.mxu1 }
 0x300   : > { %v4394_v18 = vadd.f32 %v4335_v48, %v4212_v15  ;;  %v3640_v48 = vsel %vm12952_vm11, %v13652_v0, 0  ;;  %v3961_v0 = vsel %vm12952_vm11, %v13690_v25, 0 }
 0x302   : > { %v14643_v56 = vadd.f32 %v4491_v9, %v4394_v18  ;;  %v4213_v10 = vpop.f32.mrf.mxu3 }
 0x304   : > { %v14645_v38 = vpop.f32.mrf.mxu0 }
 0x305   : > { %v4073_v6 = vpop.f32.mrf.mxu2  ;;  %18664 = vst [vmem:[#allocation18_spill] sm:$0xff] %v14645_v38  ;;  %v650_v38 = vld [vmem:[%s14763_s28 + $0x30] sm:$0xff] }
 0x306   : > { %v14647_v52 = vadd.f32 %v4213_v10, %v4073_v6  ;;  %v14649_v60 = vpop.f32.mrf.mxu1 }
 0x307   : > { %18665 = vst [vmem:[#allocation19_spill] sm:$0xff] %v14649_v60 }
 0x308   : > { %10406 = vmatmul.msk.bf16.vlgmr.msrb.gmra.mxu3 %vm1780_vm5, %v3960_v47 }
 0x30a   : > { %10390 = vmatmul.msk.bf16.vlgmr.msrb.gmra.mxu2 %vm1780_vm5, %v3640_v48  ;;  %v4216_v9 = vpop.f32.mrf.mxu3 }
 0x30c   : > { %v4345_v3 = vpop.f32.mrf.mxu0 }
 0x30d   : > { %v4076_v49 = vpop.f32.mrf.mxu2 }
 0x30e   : > { %v4217_v22 = vadd.f32 %v4216_v9, %v4076_v49 }
 0x30f   : > { %v4501_v27 = vpop.f32.mrf.mxu1 }
 0x310   : > { %v4396_v21 = vadd.f32 %v4340_v14, %v4217_v22  ;;  %v3641_v14 = vsel %vm12952_vm11, %v13693_v41, 0  ;;  %v3962_v41 = vsel %vm12952_vm11, %v13811_v44, 0 }
 0x312   : > { %v14659_v42 = vadd.f32 %v4496_v54, %v4396_v21  ;;  %v4218_v19 = vpop.f32.mrf.mxu3 }
 0x314   : > { %18666 = vst [vmem:[#allocation20_spill] sm:$0xff] %v14659_v42  ;;  %v14661_v15 = vpop.f32.mrf.mxu0 }
 0x315   : > { %v4078_v32 = vpop.f32.mrf.mxu2  ;;  %18667 = vst [vmem:[#allocation21_spill] sm:$0xff] %v14661_v15 }
 0x316   : > { %v14663_v4 = vadd.f32 %v4218_v19, %v4078_v32 }
 0x317   : > { %v14665_v18 = vpop.f32.mrf.mxu1 }
 0x318   : > { %18668 = vst [vmem:[#allocation22_spill] sm:$0xff] %v14665_v18  ;;  %10407 = vmatmul.msk.bf16.gmra.mxu3 %vm1780_vm5, %v3961_v0 }
 0x31a   : > { %10391 = vmatmul.msk.bf16.gmra.mxu2 %vm1780_vm5, %v3641_v14  ;;  %v4221_v54 = vpop.f32.mrf.mxu3 }
 0x31c   : > { %v4350_v6 = vpop.f32.mrf.mxu0 }
 0x31d   : > { %v4081_v10 = vpop.f32.mrf.mxu2 }
 0x31e   : > { %v4222_v47 = vadd.f32 %v4221_v54, %v4081_v10 }
 0x31f   : > { %v4506_v48 = vpop.f32.mrf.mxu1 }
 0x320   : > { %v4398_v9 = vadd.f32 %v4345_v3, %v4222_v47  ;;  %v3642_v3 = vsel %vm12952_vm11, %v13820_v24, 0 }
 0x322   : > { %v14675_v49 = vadd.f32 %v4501_v27, %v4398_v9  ;;  %v4223_v22 = vpop.f32.mrf.mxu3 }
 0x324   : > { %18669 = vst [vmem:[#allocation23_spill] sm:$0xff] %v14675_v49  ;;  %v14677_v19 = vpop.f32.mrf.mxu0 }
 0x325   : > { %v4083_v21 = vpop.f32.mrf.mxu2  ;;  %18670 = vst [vmem:[#allocation24_spill] sm:$0xff] %v14677_v19 }
 0x326   : > { %v14679_v25 = vadd.f32 %v4223_v22, %v4083_v21 }
 0x327   : > { %v14684_v32 = vpop.f32.mrf.mxu1 }
 0x328   : > { %18671 = vst [vmem:[#allocation25_spill] sm:$0xff] %v14679_v25  ;;  %10408 = vmatmul.msk.bf16.gmra.mxu3 %vm1780_vm5, %v3962_v41  ;;  %v3963_v41 = vsel %vm12952_vm11, %v13913_v37, 0 }
 0x329   : > { %18672 = vst [vmem:[#allocation26_spill] sm:$0xff] %v14684_v32 }
 0x32a   : > { %10392 = vmatmul.msk.bf16.gmra.mxu2 %vm1780_vm5, %v3642_v3  ;;  %v4226_v27 = vpop.f32.mrf.mxu3  ;;  %v18676_v3 = vld [vmem:[#allocation4_spill] sm:$0xff] }
 0x32c   : > { %v4355_v54 = vpop.f32.mrf.mxu0 }
 0x32d   : > { %v4086_v0 = vpop.f32.mrf.mxu2 }
 0x32e   : > { %v4227_v14 = vadd.f32 %v4226_v27, %v4086_v0  ;;  %v3643_v27 = vsel %vm12952_vm11, %v18676_v3, 0 }
 0x32f   : > { %v4511_v47 = vpop.f32.mrf.mxu1 }
 0x330   : > { %v4400_v10 = vadd.f32 %v4350_v6, %v4227_v14 }
 0x332   : > { %v14691_v9 = vadd.f32 %v4506_v48, %v4400_v10  ;;  %v4228_v22 = vpop.f32.mrf.mxu3 }
 0x334   : > { %18673 = vst [vmem:[#allocation27_spill] sm:$0xff] %v14691_v9  ;;  %v14699_v24 = vpop.f32.mrf.mxu0 }
 0x335   : > { %v4088_v44 = vpop.f32.mrf.mxu2  ;;  %18675 = vst [vmem:[#allocation29_spill] sm:$0xff] %v14699_v24  ;;  %v18680_v24 = vld [vmem:[#allocation5_spill] sm:$0xff] }
 0x336   : > { %v14693_v21 = vadd.f32 %v4228_v22, %v4088_v44  ;;  %v3964_v3 = vsel %vm12952_vm11, %v18680_v24, 0 }
 0x337   : > { %v14705_v48 = vpop.f32.mrf.mxu1 }
 0x338   : > { %18674 = vst [vmem:[#allocation28_spill] sm:$0xff] %v14693_v21  ;;  %10409 = vmatmul.msk.bf16.gmra.mxu3 %vm1780_vm5, %v3963_v41 }
 0x339   : > { %18677 = vst [vmem:[#allocation4_spill] sm:$0xff] %v14705_v48 }
 0x33a   : > { %10393 = vmatmul.msk.bf16.gmra.mxu2 %vm1780_vm5, %v3643_v27  ;;  %v4231_v6 = vpop.f32.mrf.mxu3  ;;  %v3644_v27 = vsel %vm12952_vm11, %v14013_v34, 0  ;;  %v3965_v34 = vsel %vm12952_vm11, %v14061_v51, 0 }
 0x33c   : > { %v4360_v44 = vpop.f32.mrf.mxu0 }
 0x33d   : > { %v4091_v0 = vpop.f32.mrf.mxu2 }
 0x33e   : > { %v4232_v14 = vadd.f32 %v4231_v6, %v4091_v0 }
 0x33f   : > { %v4516_v41 = vpop.f32.mrf.mxu1 }
 0x340   : > { %v4402_v10 = vadd.f32 %v4355_v54, %v4232_v14 }
 0x342   : > { %v14707_v22 = vadd.f32 %v4511_v47, %v4402_v10  ;;  %v4233_v37 = vpop.f32.mrf.mxu3 }
 0x344   : > { %18678 = vst [vmem:[#allocation30_spill] sm:$0xff] %v14707_v22  ;;  %v14719_v47 = vpop.f32.mrf.mxu0 }
 0x345   : > { %v4093_v32 = vpop.f32.mrf.mxu2  ;;  %18681 = vst [vmem:[#allocation5_spill] sm:$0xff] %v14719_v47 }
 0x346   : > { %v14709_v19 = vadd.f32 %v4233_v37, %v4093_v32 }
 0x347   : > { %v14721_v14 = vpop.f32.mrf.mxu1 }
 0x348   : > { %18679 = vst [vmem:[#allocation31_spill] sm:$0xff] %v14709_v19  ;;  %10410 = vmatmul.msk.bf16.gmra.mxu3 %vm1780_vm5, %v3964_v3 }
 0x349   : > { %18682 = vst [vmem:[#allocation32_spill] sm:$0xff] %v14721_v14 }
 0x34a   : > { %10394 = vmatmul.msk.bf16.gmra.mxu2 %vm1780_vm5, %v3644_v27  ;;  %v4236_v54 = vpop.f32.mrf.mxu3  ;;  %v5845_v27 = vld [vmem:[%s18390_s9] sm:$0xf] }
 0x34c   : > { %v4365_v3 = vpop.f32.mrf.mxu0 }
 0x34d   : > { %v4096_v6 = vpop.f32.mrf.mxu2 }
 0x34e   : > { %v4237_v0 = vadd.f32 %v4236_v54, %v4096_v6  ;;  %v6441_v54 = vsel %vm1829_vm0, %v5845_v27, 0 }
 0x34f   : > { %6450 = vmatpush.bf16.msrb.mxu0 %v6441_v54 }
 0x350   : > { %v4404_v32 = vadd.f32 %v4360_v44, %v4237_v0  ;;  %v5843_v44 = vld [vmem:[%s18389_s8] sm:$0xf]  ;;  %v4521_v0 = vpop.f32.mrf.mxu1 }
 0x351   : > { %v6581_v6 = vsel %vm1829_vm0, %v5843_v44, 0  ;;  %v3966_v44 = vsel %vm12952_vm11, %v14091_v50, 0 }
 0x352   : > { %v14723_v10 = vadd.f32 %v4516_v41, %v4404_v32  ;;  %v4238_v37 = vpop.f32.mrf.mxu3  ;;  %v3645_v41 = vsel %vm12952_vm11, %v14067_v11, 0  ;;  %6590 = vmatpush.bf16.msrb.mxu1 %v6581_v6 }
 0x354   : > { %18683 = vst [vmem:[#allocation33_spill] sm:$0xff] %v14723_v10 }
 0x355   : > { %v4098_v24 = vpop.f32.mrf.mxu2 }
 0x356   : > { %v14725_v48 = vadd.f32 %v4238_v37, %v4098_v24 }
 0x358   : > { %18684 = vst [vmem:[#allocation34_spill] sm:$0xff] %v14725_v48  ;;  %10411 = vmatmul.msk.bf16.gmra.mxu3 %vm1780_vm5, %v3965_v34  ;;  %v14743_v34 = vpop.f32.mrf.mxu0  ;;  %v14747_v11 = vpop.f32.mrf.mxu1 }
 0x359   : > { %18685 = vst [vmem:[#allocation35_spill] sm:$0xff] %v14743_v34 }
 0x35a   : > { %10395 = vmatmul.msk.bf16.gmra.mxu2 %vm1780_vm5, %v3645_v41  ;;  %18687 = vst [vmem:[#allocation37_spill] sm:$0xff] %v14747_v11 }
 0x35b   : > { %v4241_v51 = vpop.f32.mrf.mxu3 }
 0x35d   : > { %v4101_v32 = vpop.f32.mrf.mxu2 }
 0x35e   : > { %v4242_v37 = vadd.f32 %v4241_v51, %v4101_v32  ;;  %v644_v51 = vld [vmem:[%s14763_s28] sm:$0xff]  ;;  %v645_v32 = vld [vmem:[%s14763_s28 + $0x8] sm:$0xff] }
 0x35f   : > { %vm5491_vm7 = vcmp.gt.f32.partialorder %v644_v51, 0.0  ;;  %vm5492_vm14 = vcmp.gt.f32.partialorder %v645_v32, 0.0 }
 0x360   : > { %v4406_v24 = vadd.f32 %v4365_v3, %v4242_v37  ;;  %v3646_v3 = vsel %vm12952_vm11, %v14082_v16, 0  ;;  %v4370_v41 = vpop.f32.mrf.mxu0  ;;  %v5523_v37 = vmul.f32 1.442695, %v644_v51  ;;  %v5651_v16 = vsub.f32 0.0, %v644_v51 }
 0x362   : > { %v14745_v14 = vadd.f32 %v4521_v0, %v4406_v24  ;;  %v5525_v24 = vmul.f32 1.442695, %v645_v32  ;;  %11055 = vpow2.f32 %v5523_v37  ;;  %vm5683_vm15 = vcmp.gt.f32.partialorder %v5651_v16, 0.0 }
 0x363   : > { %v4243_v47 = vpop.f32.mrf.mxu3 }
 0x364   : > { %18686 = vst [vmem:[#allocation36_spill] sm:$0xff] %v14745_v14  ;;  %11057 = vpow2.f32 %v5525_v24  ;;  %v5715_v14 = vmul.f32 1.442695, %v5651_v16 }
 0x365   : > { %v4103_v27 = vpop.f32.mrf.mxu2 }
 0x366   : > { %v14749_v48 = vadd.f32 %v4243_v47, %v4103_v27  ;;  %v4526_v47 = vpop.f32.mrf.mxu1  ;;  %v5652_v27 = vsub.f32 0.0, %v645_v32  ;;  %11059 = vpow2.f32 %v5715_v14 }
 0x368   : > { %18688 = vst [vmem:[#allocation38_spill] sm:$0xff] %v14749_v48  ;;  %10412 = vmatmul.msk.bf16.gmra.mxu3 %vm1780_vm5, %v3966_v44  ;;  %v14769_v10 = vpop.f32.mrf.mxu0  ;;  %v5717_v34 = vmul.f32 1.442695, %v5652_v27  ;;  %vm5684_vm1 = vcmp.gt.f32.partialorder %v5652_v27, 0.0 }
 0x369   : > { %18691 = vst [vmem:[#allocation40_spill] sm:$0xff] %v14769_v10 }
 0x36a   : > { %10396 = vmatmul.msk.bf16.gmra.mxu2 %vm1780_vm5, %v3646_v3  ;;  %11061 = vpow2.f32 %v5717_v34 }
 0x36b   : > { %v4246_v54 = vpop.f32.mrf.mxu3 }
 0x36d   : > { %v4106_v6 = vpop.f32.mrf.mxu2 }
 0x36e   : > { %v4247_v50 = vadd.f32 %v4246_v54, %v4106_v6  ;;  %v14776_v54 = vpop.f32.mrf.mxu1  ;;  %v11056_v6 = vpop.eup %11055 }
 0x36f   : > { %18693 = vst [vmem:[#allocation42_spill] sm:$0xff] %v14776_v54  ;;  %v10422_v14 = vadd.f32 -1.0, %v11056_v6 }
 0x370   : > { %v4408_v0 = vadd.f32 %v4370_v41, %v4247_v50  ;;  %v3967_v41 = vsel %vm12952_vm11, %v14122_v58, 0  ;;  %v4375_v19 = vpop.f32.mrf.mxu0 }
 0x371   : > { %v5619_v58 = vsel %vm5491_vm7, %v644_v51, %v10422_v14  ;;  %v646_v51 = vld [vmem:[%s14763_s28 + $0x10] sm:$0xff]  ;;  %v647_v14 = vld [vmem:[%s14763_s28 + $0x18] sm:$0xff] }
 0x372   : > { %v14767_v44 = vadd.f32 %v4526_v47, %v4408_v0  ;;  %v18694_v47 = vld [vmem:[#allocation7_spill] sm:$0xff]  ;;  %v11058_v0 = vpop.eup %11057  ;;  %v5848_v54 = vpack.c.bf16 %v5619_v58, %v5619_v58  ;;  %v5527_v15 = vmul.f32 1.442695, %v646_v51  ;;  %vm5493_vm2 = vcmp.gt.f32.partialorder %v646_v51, 0.0 }
 0x373   : > { %v4248_v3 = vpop.f32.mrf.mxu3  ;;  %v3647_v50 = vsel %vm12952_vm11, %v18694_v47, 0  ;;  %v10423_v37 = vadd.f32 -1.0, %v11058_v0  ;;  %v11060_v24 = vpop.eup %11059  ;;  %vm5494_vm3 = vcmp.gt.f32.partialorder %v647_v14, 0.0 }
 0x374   : > { %18690 = vst [vmem:[#allocation39_spill] sm:$0xff] %v14767_v44  ;;  %v11062_v34 = vpop.eup %11061  ;;  %v10454_v10 = vadd.f32 -1.0, %v11060_v24  ;;  %v5653_v24 = vsub.f32 0.0, %v646_v51  ;;  %11063 = vpow2.f32 %v5527_v15 }
 0x375   : > { %v4108_v11 = vpop.f32.mrf.mxu2  ;;  %v10455_v44 = vadd.f32 -1.0, %v11062_v34  ;;  %v5654_v34 = vsub.f32 0.0, %v647_v14 }
 0x376   : > { %v14771_v48 = vadd.f32 %v4248_v3, %v4108_v11  ;;  %v5811_v22 = vsel %vm5683_vm15, %v5651_v16, %v10454_v10  ;;  %v4531_v25 = vpop.f32.mrf.mxu1  ;;  %v5719_v16 = vmul.f32 1.442695, %v5653_v24  ;;  %vm5685_vm9 = vcmp.gt.f32.partialorder %v5653_v24, 0.0 }
 0x377   : > { %v5812_v0 = vsel %vm5684_vm1, %v5652_v27, %v10455_v44  ;;  %v5880_v9 = vpack.c.bf16 %v5811_v22, %v5811_v22  ;;  %v18697_v44 = vld [vmem:[#allocation8_spill] sm:$0xff]  ;;  %vm5686_vm10 = vcmp.gt.f32.partialorder %v5654_v34, 0.0  ;;  %vm5497_vm1 = vcmp.gt.f32.partialorder %v650_v38, 0.0 }
 0x378   : > { %18692 = vst [vmem:[#allocation41_spill] sm:$0xff] %v14771_v48  ;;  %10413 = vmatmul.msk.bf16.gmra.mxu3 %vm1780_vm5, %v3967_v41  ;;  %v5620_v41 = vsel %vm5492_vm14, %v645_v32, %v10423_v37  ;;  %v5881_v18 = vpack.c.bf16 %v5812_v0, %v5812_v0  ;;  %v5529_v37 = vmul.f32 1.442695, %v647_v14  ;;  %v3968_v15 = vsel %vm12952_vm11, %v18697_v44, 0 }
 0x379   : > { %v5849_v48 = vpack.c.bf16 %v5620_v41, %v5620_v41  ;;  %v6184_v32 = vunpack.c.l.b16 %v5880_v9 }
 0x37a   : > { %10397 = vmatmul.msk.bf16.gmra.mxu2 %vm1780_vm5, %v3647_v50  ;;  %v5944_v50 = vunpack.c.l.b16 %v5848_v54  ;;  %v6185_v58 = vunpack.c.l.b16 %v5881_v18  ;;  %11065 = vpow2.f32 %v5529_v37  ;;  %v11064_v41 = vpop.eup %11063 }
 0x37b   : > { %v4251_v11 = vpop.f32.mrf.mxu3  ;;  %v5945_v21 = vunpack.c.l.b16 %v5849_v48  ;;  %11067 = vpow2.f32 %v5719_v16 }
 0x37c   : > { %v14791_v10 = vpack.c.b16 %v6185_v58, %v6184_v32 }
 0x37d   : > { %v4111_v3 = vpop.f32.mrf.mxu2  ;;  %v14785_v49 = vpack.c.b16 %v5945_v21, %v5944_v50  ;;  %v5721_v21 = vmul.f32 1.442695, %v5654_v34 }
 0x37e   : > { %v4252_v47 = vadd.f32 %v4251_v11, %v4111_v3  ;;  %v6233_v18 = vshrl.u32 %v14791_v10, 16 }
 0x37f   : > { %v5996_v48 = vshll.u32 %v14785_v49, 16  ;;  %11069 = vpow2.f32 %v5721_v21 }
 0x380   : > { %v4410_v6 = vadd.f32 %v4375_v19, %v4252_v47  ;;  %v5993_v19 = vshrl.u32 %v14785_v49, 16  ;;  %v18698_v47 = vld [vmem:[#allocation6_spill] sm:$0xff]  ;;  %v11066_v0 = vpop.eup %11065 }
 0x381   : > { %v3648_v50 = vsel %vm12952_vm11, %v18698_v47, 0  ;;  %v11068_v21 = vpop.eup %11067  ;;  %v18700_v47 = vld [vmem:[#allocation10_spill] sm:$0xff] }
 0x382   : > { %v14787_v54 = vadd.f32 %v4531_v25, %v4410_v6  ;;  %v14795_v9 = vrot.slane %v5993_v19, 7  ;;  %v6236_v25 = vshll.u32 %v14791_v10, 16  ;;  %v14807_v6 = vrot.slane %v6233_v18, 7 }
 0x383   : > { %v4253_v11 = vpop.f32.mrf.mxu3 }
 0x384   : > { %18695 = vst [vmem:[#allocation7_spill] sm:$0xff] %v14787_v54  ;;  %v5998_v3 = vor.u32 %v5996_v48, %v14795_v9  ;;  %v6238_v48 = vor.u32 %v6236_v25, %v14807_v6 }
 0x385   : > { %v4113_v22 = vpop.f32.mrf.mxu2 }
 0x386   : > { %v14793_v27 = vadd.f32 %v4253_v11, %v4113_v22  ;;  %v6135_v37 = vsel %vm12095_vm8, 0, %v5998_v3  ;;  %v10424_v11 = vadd.f32 -1.0, %v11064_v41  ;;  %v10425_v22 = vadd.f32 -1.0, %v11066_v0  ;;  %v11070_v41 = vpop.eup %11069 }
 0x387   : > { %v6136_v19 = vsel %vm12035_vm6, %v6135_v37, 0  ;;  %v10456_v37 = vadd.f32 -1.0, %v11068_v21 }
 0x388   : > { %18696 = vst [vmem:[#allocation43_spill] sm:$0xff] %v14793_v27  ;;  %10414 = vmatmul.msk.bf16.gmra.mxu3 %vm1780_vm5, %v3968_v15  ;;  %10502 = vmatmul.msk.bf16.vlgmr.msrb.gmra.mxu1 %vm1780_vm5, %v6136_v19  ;;  %v5621_v16 = vsel %vm5493_vm2, %v646_v51, %v10424_v11  ;;  %v6375_v15 = vsel %vm12095_vm8, 0, %v6238_v48  ;;  %v5622_v18 = vsel %vm5494_vm3, %v647_v14, %v10425_v22  ;;  %v10457_v11 = vadd.f32 -1.0, %v11070_v41  ;;  %v648_v14 = vld [vmem:[%s14763_s28 + $0x20] sm:$0xff]  ;;  %v649_v22 = vld [vmem:[%s14763_s28 + $0x28] sm:$0xff] }
 0x389   : > { %v5850_v3 = vpack.c.bf16 %v5621_v16, %v5621_v16  ;;  %v6376_v25 = vsel %vm12035_vm6, %v6375_v15, 0  ;;  %v5851_v0 = vpack.c.bf16 %v5622_v18, %v5622_v18  ;;  %v5813_v48 = vsel %vm5685_vm9, %v5653_v24, %v10456_v37  ;;  %v18701_v37 = vld [vmem:[#allocation9_spill] sm:$0xff] }
 0x38a   : > { %10398 = vmatmul.msk.bf16.gmra.mxu2 %vm1780_vm5, %v3648_v50  ;;  %10486 = vmatmul.msk.bf16.vlgmr.msrb.gmra.mxu0 %vm1780_vm5, %v6376_v25  ;;  %v5814_v16 = vsel %vm5686_vm10, %v5654_v34, %v10457_v11  ;;  %v5882_v27 = vpack.c.bf16 %v5813_v48, %v5813_v48  ;;  %v5531_v15 = vmul.f32 1.442695, %v648_v14  ;;  %v5533_v18 = vmul.f32 1.442695, %v649_v22 }
 0x38b   : > { %v4800_v58 = vpop.f32.mrf.mxu3  ;;  %v5946_v51 = vunpack.c.l.b16 %v5850_v3  ;;  %v5947_v32 = vunpack.c.l.b16 %v5851_v0  ;;  %v5883_v21 = vpack.c.bf16 %v5814_v16, %v5814_v16  ;;  %v18702_v16 = vld [vmem:[#allocation12_spill] sm:$0xff]  ;;  %vm5495_vm12 = vcmp.gt.f32.partialorder %v648_v14, 0.0 }
 0x38c   : > { %v6186_v41 = vunpack.c.l.b16 %v5882_v27  ;;  %11071 = vpow2.f32 %v5531_v15  ;;  %v3969_v27 = vsel %vm12952_vm11, %v18702_v16, 0  ;;  %vm5496_vm7 = vcmp.gt.f32.partialorder %v649_v22, 0.0 }
 0x38d   : > { %v4628_v44 = vpop.f32.mrf.mxu2  ;;  %v6187_v25 = vunpack.c.l.b16 %v5883_v21  ;;  %11073 = vpow2.f32 %v5533_v18 }
 0x38e   : > { %v4708_v50 = vadd.f32 %v4628_v44, %v18700_v47  ;;  %v14829_v44 = vpack.c.b16 %v5947_v32, %v5946_v51  ;;  %v5656_v47 = vsub.f32 0.0, %v649_v22 }
 0x38f   : > { %v14836_v51 = vpack.c.b16 %v6187_v25, %v6186_v41 }
 0x390   : > { %v14822_v19 = vadd.f32 %v4800_v58, %v4708_v50  ;;  %v5655_v58 = vsub.f32 0.0, %v648_v14  ;;  %v6000_v50 = vshrl.u32 %v14829_v44, 16  ;;  %v6003_v24 = vshll.u32 %v14829_v44, 16 }
 0x391   : > { %v5725_v48 = vmul.f32 1.442695, %v5656_v47  ;;  %v6240_v15 = vshrl.u32 %v14836_v51, 16  ;;  %v6243_v18 = vshll.u32 %v14836_v51, 16  ;;  %vm5688_vm15 = vcmp.gt.f32.partialorder %v5656_v47, 0.0 }
 0x392   : > { %4944 = vrot.lane.b32.xlu2 %v14822_v19, %s11779_s29  ;;  %v5723_v0 = vmul.f32 1.442695, %v5655_v58  ;;  %v14834_v32 = vrot.slane %v6000_v50, 7  ;;  %v18703_v50 = vld [vmem:[#allocation13_spill] sm:$0xff]  ;;  %v11072_v25 = vpop.eup %11071  ;;  %vm5687_vm14 = vcmp.gt.f32.partialorder %v5655_v58, 0.0 }
 0x393   : > { %v4802_v3 = vpop.f32.mrf.mxu3  ;;  %v3649_v41 = vsel %vm12952_vm11, %v18703_v50, 0 }
 0x394   : > { %11075 = vpow2.f32 %v5723_v0  ;;  %v6005_v21 = vor.u32 %v6003_v24, %v14834_v32  ;;  %v11074_v24 = vpop.eup %11073 }
 0x395   : > { %v4630_v34 = vpop.f32.mrf.mxu2  ;;  %11077 = vpow2.f32 %v5725_v48  ;;  %v10427_v16 = vadd.f32 -1.0, %v11074_v24 }
 0x396   : > { %v4709_v11 = vadd.f32 %v4630_v34, %v18701_v37  ;;  %v14855_v34 = vrot.slane %v6240_v15, 7 }
 0x397   : > { %v5624_v60 = vsel %vm5496_vm7, %v649_v22, %v10427_v16  ;;  %v5535_v16 = vmul.f32 1.442695, %v650_v38 }
 0x398   : > { %v14841_v54 = vadd.f32 %v4802_v3, %v4709_v11  ;;  %10415 = vmatmul.msk.bf16.gmra.mxu3 %vm1780_vm5, %v3969_v27  ;;  %v6006_v3 = vsel %vm1186_vm4, %v14795_v9, %v6005_v21  ;;  %v10426_v11 = vadd.f32 -1.0, %v11072_v25  ;;  %v6245_v48 = vor.u32 %v6243_v18, %v14855_v34  ;;  %v18704_v9 = vld [vmem:[#allocation11_spill] sm:$0xff] }
 0x399   : > { %v6137_v37 = vsel %vm12035_vm6, %v6006_v3, 0  ;;  %11079 = vpow2.f32 %v5535_v16 }
 0x39a   : > { %10399 = vmatmul.msk.bf16.gmra.mxu2 %vm1780_vm5, %v3649_v41  ;;  %4946 = vrot.lane.b32.xlu0 %v14841_v54, %s11779_s29  ;;  %v11076_v27 = vpop.eup %11075  ;;  %v5623_v41 = vsel %vm5495_vm12, %v648_v14, %v10426_v11  ;;  %v6246_v15 = vsel %vm1186_vm4, %v14807_v6, %v6245_v48 }
 0x39b   : > { %v4805_v0 = vpop.f32.mrf.mxu3  ;;  %10503 = vmatmul.msk.bf16.gmra.mxu1 %vm1780_vm5, %v6137_v37  ;;  %v5852_v3 = vpack.c.bf16 %v5623_v41, %v5623_v41  ;;  %v11078_v42 = vpop.eup %11077  ;;  %v6377_v25 = vsel %vm12035_vm6, %v6246_v15, 0  ;;  %v5853_v37 = vpack.c.bf16 %v5624_v60, %v5624_v60  ;;  %v10458_v18 = vadd.f32 -1.0, %v11076_v27 }
 0x39c   : > { %10487 = vmatmul.msk.bf16.gmra.mxu0 %vm1780_vm5, %v6377_v25  ;;  %v10459_v11 = vadd.f32 -1.0, %v11078_v42 }
 0x39d   : > { %v4633_v50 = vpop.f32.mrf.mxu2  ;;  %v5948_v14 = vunpack.c.l.b16 %v5852_v3  ;;  %v5815_v6 = vsel %vm5687_vm14, %v5655_v58, %v10458_v18 }
 0x39e   : > { %v4710_v21 = vadd.f32 %v4633_v50, %v18704_v9  ;;  %v651_v50 = vld [vmem:[%s14763_s28 + $0x38] sm:$0xff]  ;;  %v5949_v9 = vunpack.c.l.b16 %v5853_v37  ;;  %v5816_v22 = vsel %vm5688_vm15, %v5656_v47, %v10459_v11  ;;  %v5884_v48 = vpack.c.bf16 %v5815_v6, %v5815_v6 }
 0x39f   : > { %v5537_v60 = vmul.f32 1.442695, %v651_v50  ;;  %v5658_v15 = vsub.f32 0.0, %v651_v50  ;;  %vm5498_vm2 = vcmp.gt.f32.partialorder %v651_v50, 0.0 }
 0x3a0   : > { %v14866_v24 = vadd.f32 %v4805_v0, %v4710_v21  ;;  %v14874_v27 = vpack.c.b16 %v5949_v9, %v5948_v14  ;;  %v5885_v0 = vpack.c.bf16 %v5816_v22, %v5816_v22  ;;  %v5657_v21 = vsub.f32 0.0, %v650_v38 }
 0x3a1   : > { %v6188_v3 = vunpack.c.l.b16 %v5884_v48  ;;  %11081 = vpow2.f32 %v5537_v60  ;;  %v3970_v14 = vsel %vm12952_vm11, %v14393_v13, 0  ;;  %v5729_v6 = vmul.f32 1.442695, %v5658_v15  ;;  %v11080_v60 = vpop.eup %11079 }
 0x3a2   : > { %4948 = vrot.lane.b32.xlu1 %v14866_v24, %s11779_s29  ;;  %v6008_v25 = vshrl.u32 %v14874_v27, 16  ;;  %v6011_v58 = vshll.u32 %v14874_v27, 16  ;;  %v6189_v37 = vunpack.c.l.b16 %v5885_v0  ;;  %v5727_v18 = vmul.f32 1.442695, %v5657_v21 }
 0x3a3   : > { %v4807_v41 = vpop.f32.mrf.mxu3  ;;  %v3650_v48 = vsel %vm12952_vm11, %v14416_v36, 0  ;;  %vm5689_vm3 = vcmp.gt.f32.partialorder %v5657_v21, 0.0  ;;  %vm5690_vm9 = vcmp.gt.f32.partialorder %v5658_v15, 0.0 }
 0x3a4   : > { %v14882_v11 = vrot.slane %v6008_v25, 7  ;;  %v14884_v9 = vpack.c.b16 %v6189_v37, %v6188_v3  ;;  %11083 = vpow2.f32 %v5727_v18 }
 0x3a5   : > { %v4635_v42 = vpop.f32.mrf.mxu2  ;;  %11085 = vpow2.f32 %v5729_v6 }
 0x3a6   : > { %v4711_v47 = vadd.f32 %v4635_v42, %v14381_v5  ;;  %18705 = vst [vmem:[#allocation8_spill] sm:$0xff] %v14884_v9  ;;  %v6013_v5 = vor.u32 %v6011_v58, %v14882_v11  ;;  %v6248_v16 = vshrl.u32 %v14884_v9, 16  ;;  %v6251_v13 = vshll.u32 %v14884_v9, 16  ;;  %v653_v9 = vld [vmem:[%s14763_s28 + $0x48] sm:$0xff] }
 0x3a7   : > { %v10428_v42 = vadd.f32 -1.0, %v11080_v60  ;;  %vm5500_vm12 = vcmp.gt.f32.partialorder %v653_v9, 0.0 }
 0x3a8   : > { %v14886_v22 = vadd.f32 %v4807_v41, %v4711_v47  ;;  %10416 = vmatmul.msk.bf16.gmra.mxu3 %vm1780_vm5, %v3970_v14  ;;  %v11082_v41 = vpop.eup %11081  ;;  %v6014_v36 = vsel %vm1186_vm4, %v14834_v32, %v6013_v5  ;;  %v14900_v3 = vrot.slane %v6248_v16, 7 }
 0x3a9   : > { %v6138_v25 = vsel %vm12035_vm6, %v6014_v36, 0  ;;  %v10429_v58 = vadd.f32 -1.0, %v11082_v41  ;;  %v5625_v18 = vsel %vm5497_vm1, %v650_v38, %v10428_v42 }
 0x3aa   : > { %10400 = vmatmul.msk.bf16.gmra.mxu2 %vm1780_vm5, %v3650_v48  ;;  %4950 = vrot.lane.b32.xlu2 %v14886_v22, %s11779_s29  ;;  %v6253_v47 = vor.u32 %v6251_v13, %v14900_v3  ;;  %v11084_v14 = vpop.eup %11083  ;;  %v5854_v48 = vpack.c.bf16 %v5625_v18, %v5625_v18 }
 0x3ab   : > { %v4810_v0 = vpop.f32.mrf.mxu3  ;;  %10504 = vmatmul.msk.bf16.gmra.mxu1 %vm1780_vm5, %v6138_v25  ;;  %v5626_v32 = vsel %vm5498_vm2, %v651_v50, %v10429_v58  ;;  %v11086_v5 = vpop.eup %11085  ;;  %v10460_v41 = vadd.f32 -1.0, %v11084_v14  ;;  %v652_v25 = vld [vmem:[%s14763_s28 + $0x40] sm:$0xff] }
 0x3ac   : > { %v6254_v16 = vsel %vm1186_vm4, %v14855_v34, %v6253_v47  ;;  %v5855_v60 = vpack.c.bf16 %v5626_v32, %v5626_v32  ;;  %v5950_v38 = vunpack.c.l.b16 %v5854_v48  ;;  %v10461_v42 = vadd.f32 -1.0, %v11086_v5 }
 0x3ad   : > { %v4638_v37 = vpop.f32.mrf.mxu2  ;;  %v6378_v13 = vsel %vm12035_vm6, %v6254_v16, 0  ;;  %v5817_v50 = vsel %vm5689_vm3, %v5657_v21, %v10460_v41  ;;  %v5541_v47 = vmul.f32 1.442695, %v653_v9  ;;  %v5660_v32 = vsub.f32 0.0, %v653_v9 }
 0x3ae   : > { %v4712_v6 = vadd.f32 %v4638_v37, %v14409_v53  ;;  %10488 = vmatmul.msk.bf16.gmra.mxu0 %vm1780_vm5, %v6378_v13  ;;  %v5951_v53 = vunpack.c.l.b16 %v5855_v60  ;;  %v5818_v34 = vsel %vm5690_vm9, %v5658_v15, %v10461_v42  ;;  %v5886_v58 = vpack.c.bf16 %v5817_v50, %v5817_v50 }
 0x3af   : > { %v5539_v37 = vmul.f32 1.442695, %v652_v25  ;;  %v5887_v14 = vpack.c.bf16 %v5818_v34, %v5818_v34  ;;  %v3971_v13 = vsel %vm12952_vm11, %v14515_v57, 0  ;;  %v3651_v34 = vsel %vm12952_vm11, %v14484_v2, 0 }
 0x3b0   : > { %v14909_v36 = vadd.f32 %v4810_v0, %v4712_v6  ;;  %v14918_v18 = vpack.c.b16 %v5951_v53, %v5950_v38  ;;  %v5659_v6 = vsub.f32 0.0, %v652_v25  ;;  %v6190_v48 = vunpack.c.l.b16 %v5886_v58 }
 0x3b1   : > { %11087 = vpow2.f32 %v5539_v37  ;;  %v6191_v60 = vunpack.c.l.b16 %v5887_v14  ;;  %v5733_v53 = vmul.f32 1.442695, %v5660_v32  ;;  %vm5499_vm10 = vcmp.gt.f32.partialorder %v652_v25, 0.0 }
 0x3b2   : > { %4952 = vrot.lane.b32.xlu0 %v14909_v36, %s11779_s29  ;;  %v6016_v16 = vshrl.u32 %v14918_v18, 16  ;;  %v6019_v21 = vshll.u32 %v14918_v18, 16  ;;  %11089 = vpow2.f32 %v5541_v47  ;;  %v5731_v41 = vmul.f32 1.442695, %v5659_v6 }
 0x3b3   : > { %v4812_v0 = vpop.f32.mrf.mxu3  ;;  %v14928_v42 = vpack.c.b16 %v6191_v60, %v6190_v48  ;;  %vm5691_vm7 = vcmp.gt.f32.partialorder %v5659_v6, 0.0  ;;  %vm5692_vm14 = vcmp.gt.f32.partialorder %v5660_v32, 0.0 }
 0x3b4   : > { %v14926_v38 = vrot.slane %v6016_v16, 7  ;;  %11091 = vpow2.f32 %v5731_v41 }
 0x3b5   : > { %v4640_v5 = vpop.f32.mrf.mxu2  ;;  %v6256_v58 = vshrl.u32 %v14928_v42, 16  ;;  %v6259_v57 = vshll.u32 %v14928_v42, 16  ;;  %11093 = vpow2.f32 %v5733_v53 }
 0x3b6   : > { %v4713_v15 = vadd.f32 %v4640_v5, %v14419_v40  ;;  %v6021_v40 = vor.u32 %v6019_v21, %v14926_v38 }
 0x3b7   : > { %v11088_v37 = vpop.eup %11087  ;;  %v14944_v14 = vrot.slane %v6256_v58, 7 }
 0x3b8   : > { %v14930_v50 = vadd.f32 %v4812_v0, %v4713_v15  ;;  %10417 = vmatmul.msk.bf16.gmra.mxu3 %vm1780_vm5, %v3971_v13  ;;  %v11090_v47 = vpop.eup %11089  ;;  %v6022_v2 = vsel %vm1186_vm4, %v14882_v11, %v6021_v40  ;;  %v10430_v48 = vadd.f32 -1.0, %v11088_v37 }
 0x3b9   : > { %v6139_v5 = vsel %vm12035_vm6, %v6022_v2, 0  ;;  %v10431_v16 = vadd.f32 -1.0, %v11090_v47  ;;  %v6261_v60 = vor.u32 %v6259_v57, %v14944_v14 }
 0x3ba   : > { %10401 = vmatmul.msk.bf16.gmra.mxu2 %vm1780_vm5, %v3651_v34  ;;  %4954 = vrot.lane.b32.xlu1 %v14930_v50, %s11779_s29  ;;  %v5627_v15 = vsel %vm5499_vm10, %v652_v25, %v10430_v48  ;;  %v11092_v41 = vpop.eup %11091  ;;  %v654_v48 = vld [vmem:[%s14763_s28 + $0x50] sm:$0xff] }
 0x3bb   : > { %v4815_v0 = vpop.f32.mrf.mxu3  ;;  %10505 = vmatmul.msk.bf16.gmra.mxu1 %vm1780_vm5, %v6139_v5  ;;  %v5628_v11 = vsel %vm5500_vm12, %v653_v9, %v10431_v16  ;;  %v5856_v53 = vpack.c.bf16 %v5627_v15, %v5627_v15  ;;  %v11094_v34 = vpop.eup %11093  ;;  %v6262_v40 = vsel %vm1186_vm4, %v14900_v3, %v6261_v60  ;;  %v10462_v37 = vadd.f32 -1.0, %v11092_v41  ;;  %v655_v5 = vld [vmem:[%s14763_s28 + $0x58] sm:$0xff] }
 0x3bc   : > { %v5857_v58 = vpack.c.bf16 %v5628_v11, %v5628_v11  ;;  %v6379_v57 = vsel %vm12035_vm6, %v6262_v40, 0  ;;  %v10463_v2 = vadd.f32 -1.0, %v11094_v34  ;;  %v5545_v60 = vmul.f32 1.442695, %v655_v5 }
 0x3bd   : > { %v4643_v21 = vpop.f32.mrf.mxu2  ;;  %v5952_v25 = vunpack.c.l.b16 %v5856_v53  ;;  %v5819_v9 = vsel %vm5691_vm7, %v5659_v6, %v10462_v37  ;;  %v5662_v11 = vsub.f32 0.0, %v655_v5  ;;  %vm5501_vm15 = vcmp.gt.f32.partialorder %v654_v48, 0.0 }
 0x3be   : > { %v4714_v13 = vadd.f32 %v4643_v21, %v14475_v43  ;;  %10489 = vmatmul.msk.bf16.gmra.mxu0 %vm1780_vm5, %v6379_v57  ;;  %v5953_v43 = vunpack.c.l.b16 %v5857_v58  ;;  %v5820_v3 = vsel %vm5692_vm14, %v5660_v32, %v10463_v2  ;;  %v5888_v16 = vpack.c.bf16 %v5819_v9, %v5819_v9 }
 0x3bf   : > { %v5543_v21 = vmul.f32 1.442695, %v654_v48  ;;  %v5889_v41 = vpack.c.bf16 %v5820_v3, %v5820_v3  ;;  %v3972_v57 = vsel %vm12952_vm11, %v14574_v20, 0  ;;  %v3652_v3 = vsel %vm12952_vm11, %v14552_v45, 0 }
 0x3c0   : > { %v14953_v47 = vadd.f32 %v4815_v0, %v4714_v13  ;;  %v14962_v15 = vpack.c.b16 %v5953_v43, %v5952_v25  ;;  %v5661_v13 = vsub.f32 0.0, %v654_v48  ;;  %v6192_v53 = vunpack.c.l.b16 %v5888_v16 }
 0x3c1   : > { %11095 = vpow2.f32 %v5543_v21  ;;  %v6193_v58 = vunpack.c.l.b16 %v5889_v41  ;;  %v5737_v43 = vmul.f32 1.442695, %v5662_v11  ;;  %vm5502_vm1 = vcmp.gt.f32.partialorder %v655_v5, 0.0 }
 0x3c2   : > { %4956 = vrot.lane.b32.xlu2 %v14953_v47, %s11779_s29  ;;  %18706 = vst [vmem:[#allocation6_spill] sm:$0xff] %v14962_v15  ;;  %v6024_v40 = vshrl.u32 %v14962_v15, 16  ;;  %v6027_v6 = vshll.u32 %v14962_v15, 16  ;;  %11097 = vpow2.f32 %v5545_v60  ;;  %v5735_v37 = vmul.f32 1.442695, %v5661_v13  ;;  %v660_v15 = vld [vmem:[%s14763_s28 + $0x80] sm:$0xff] }
 0x3c3   : > { %v4817_v0 = vpop.f32.mrf.mxu3  ;;  %v14972_v2 = vpack.c.b16 %v6193_v58, %v6192_v53  ;;  %vm5693_vm2 = vcmp.gt.f32.partialorder %v5661_v13, 0.0  ;;  %vm5694_vm3 = vcmp.gt.f32.partialorder %v5662_v11, 0.0 }
 0x3c4   : > { %v14970_v25 = vrot.slane %v6024_v40, 7  ;;  %11099 = vpow2.f32 %v5735_v37 }
 0x3c5   : > { %v4645_v34 = vpop.f32.mrf.mxu2  ;;  %18707 = vst [vmem:[#allocation10_spill] sm:$0xff] %v14972_v2  ;;  %v6264_v16 = vshrl.u32 %v14972_v2, 16  ;;  %v6267_v20 = vshll.u32 %v14972_v2, 16  ;;  %11101 = vpow2.f32 %v5737_v43 }
 0x3c6   : > { %v4715_v32 = vadd.f32 %v4645_v34, %v14518_v61  ;;  %v6029_v61 = vor.u32 %v6027_v6, %v14970_v25 }
 0x3c7   : > { %v11096_v21 = vpop.eup %11095  ;;  %v14988_v41 = vrot.slane %v6264_v16, 7 }
 0x3c8   : > { %v14974_v9 = vadd.f32 %v4817_v0, %v4715_v32  ;;  %10418 = vmatmul.msk.bf16.gmra.mxu3 %vm1780_vm5, %v3972_v57  ;;  %v11098_v60 = vpop.eup %11097  ;;  %v6030_v45 = vsel %vm1186_vm4, %v14926_v38, %v6029_v61  ;;  %v10432_v53 = vadd.f32 -1.0, %v11096_v21 }
 0x3c9   : > { %v6140_v34 = vsel %vm12035_vm6, %v6030_v45, 0  ;;  %v10433_v40 = vadd.f32 -1.0, %v11098_v60  ;;  %v6269_v58 = vor.u32 %v6267_v20, %v14988_v41 }
 0x3ca   : > { %18708 = vst [vmem:[#allocation9_spill] sm:$0xff] %v14974_v9  ;;  %10402 = vmatmul.msk.bf16.gmra.mxu2 %vm1780_vm5, %v3652_v3  ;;  %4958 = vrot.lane.b32.xlu0 %v14974_v9, %s11779_s29  ;;  %v5629_v32 = vsel %vm5501_vm15, %v654_v48, %v10432_v53  ;;  %v11100_v37 = vpop.eup %11099  ;;  %v656_v53 = vld [vmem:[%s14763_s28 + $0x60] sm:$0xff] }
 0x3cb   : > { %v4820_v0 = vpop.f32.mrf.mxu3  ;;  %10506 = vmatmul.msk.bf16.gmra.mxu1 %vm1780_vm5, %v6140_v34  ;;  %v5630_v43 = vsel %vm5502_vm1, %v655_v5, %v10433_v40  ;;  %v5858_v38 = vpack.c.bf16 %v5629_v32, %v5629_v32  ;;  %v11102_v3 = vpop.eup %11101  ;;  %v6270_v61 = vsel %vm1186_vm4, %v14944_v14, %v6269_v58  ;;  %v10464_v21 = vadd.f32 -1.0, %v11100_v37  ;;  %v657_v34 = vld [vmem:[%s14763_s28 + $0x68] sm:$0xff] }
 0x3cc   : > { %v5859_v16 = vpack.c.bf16 %v5630_v43, %v5630_v43  ;;  %v6380_v48 = vsel %vm12035_vm6, %v6270_v61, 0  ;;  %v10465_v45 = vadd.f32 -1.0, %v11102_v3  ;;  %v5549_v58 = vmul.f32 1.442695, %v657_v34 }
 0x3cd   : > { %v4648_v6 = vpop.f32.mrf.mxu2  ;;  %v5954_v20 = vunpack.c.l.b16 %v5858_v38  ;;  %v5821_v5 = vsel %vm5693_vm2, %v5661_v13, %v10464_v21  ;;  %v5664_v43 = vsub.f32 0.0, %v657_v34  ;;  %vm5503_vm9 = vcmp.gt.f32.partialorder %v656_v53, 0.0 }
 0x3ce   : > { %v4716_v57 = vadd.f32 %v4648_v6, %v14541_v8  ;;  %10490 = vmatmul.msk.bf16.gmra.mxu0 %vm1780_vm5, %v6380_v48  ;;  %v5955_v8 = vunpack.c.l.b16 %v5859_v16  ;;  %v5822_v14 = vsel %vm5694_vm3, %v5662_v11, %v10465_v45  ;;  %v5890_v40 = vpack.c.bf16 %v5821_v5, %v5821_v5 }
 0x3cf   : > { %v5547_v6 = vmul.f32 1.442695, %v656_v53  ;;  %v5891_v37 = vpack.c.bf16 %v5822_v14, %v5822_v14  ;;  %v5741_v21 = vmul.f32 1.442695, %v5664_v43  ;;  %v3973_v48 = vsel %vm12952_vm11, %v14582_v33, 0 }
 0x3d0   : > { %v14997_v60 = vadd.f32 %v4820_v0, %v4716_v57  ;;  %v15008_v32 = vpack.c.b16 %v5955_v8, %v5954_v20  ;;  %v5663_v57 = vsub.f32 0.0, %v656_v53  ;;  %v6194_v38 = vunpack.c.l.b16 %v5890_v40 }
 0x3d1   : > { %11103 = vpow2.f32 %v5547_v6  ;;  %v6195_v16 = vunpack.c.l.b16 %v5891_v37  ;;  %v3653_v8 = vsel %vm12952_vm11, %v14590_v39, 0  ;;  %vm5504_vm10 = vcmp.gt.f32.partialorder %v657_v34, 0.0 }
 0x3d2   : > { %18709 = vst [vmem:[#allocation12_spill] sm:$0xff] %v14997_v60  ;;  %4960 = vrot.lane.b32.xlu0 %v14997_v60, %s11779_s29  ;;  %v6032_v13 = vshrl.u32 %v15008_v32, 16  ;;  %v6035_v61 = vshll.u32 %v15008_v32, 16  ;;  %11105 = vpow2.f32 %v5549_v58  ;;  %v5739_v11 = vmul.f32 1.442695, %v5663_v57  ;;  %v659_v60 = vld [vmem:[%s14763_s28 + $0x78] sm:$0xff] }
 0x3d3   : > { %v15006_v0 = vpop.f32.mrf.mxu3  ;;  %18710 = vst [vmem:[#allocation13_spill] sm:$0xff] %v15008_v32  ;;  %v15019_v45 = vpack.c.b16 %v6195_v16, %v6194_v38  ;;  %vm5695_vm12 = vcmp.gt.f32.partialorder %v5663_v57, 0.0  ;;  %vm5696_vm7 = vcmp.gt.f32.partialorder %v5664_v43, 0.0  ;;  %v658_v32 = vld [vmem:[%s14763_s28 + $0x70] sm:$0xff]  ;;  %vm5506_vm15 = vcmp.gt.f32.partialorder %v659_v60, 0.0 }
 0x3d4   : > { %v15017_v20 = vrot.slane %v6032_v13, 7  ;;  %11107 = vpow2.f32 %v5739_v11  ;;  %vm5505_vm14 = vcmp.gt.f32.partialorder %v658_v32, 0.0 }
 0x3d5   : > { %v15010_v3 = vpop.f32.mrf.mxu2  ;;  %18711 = vst [vmem:[#allocation11_spill] sm:$0xff] %v15019_v45  ;;  %v6272_v14 = vshrl.u32 %v15019_v45, 16  ;;  %v6275_v40 = vshll.u32 %v15019_v45, 16  ;;  %11109 = vpow2.f32 %v5741_v21 }
 0x3d6   : > { %v6037_v5 = vor.u32 %v6035_v61, %v15017_v20 }
 0x3d7   : > { %v11104_v6 = vpop.eup %11103  ;;  %v15033_v38 = vrot.slane %v6272_v14, 7 }
 0x3d8   : > { %10419 = vmatmul.msk.bf16.gmra.mxu3 %vm1780_vm5, %v3973_v48  ;;  %v11106_v33 = vpop.eup %11105  ;;  %v6038_v37 = vsel %vm1186_vm4, %v14970_v25, %v6037_v5  ;;  %v10434_v39 = vadd.f32 -1.0, %v11104_v6 }
 0x3d9   : > { %v6141_v13 = vsel %vm12035_vm6, %v6038_v37, 0  ;;  %v10435_v61 = vadd.f32 -1.0, %v11106_v33  ;;  %v6277_v11 = vor.u32 %v6275_v40, %v15033_v38 }
 0x3da   : > { %10403 = vmatmul.msk.bf16.gmra.mxu2 %vm1780_vm5, %v3653_v8  ;;  %v5631_v21 = vsel %vm5503_vm9, %v656_v53, %v10434_v39  ;;  %v11108_v48 = vpop.eup %11107 }
 0x3db   : > { %v15029_v58 = vpop.f32.mrf.mxu3  ;;  %10507 = vmatmul.msk.bf16.gmra.mxu1 %vm1780_vm5, %v6141_v13  ;;  %v5632_v25 = vsel %vm5504_vm10, %v657_v34, %v10435_v61  ;;  %v5860_v8 = vpack.c.bf16 %v5631_v21, %v5631_v21  ;;  %v11110_v5 = vpop.eup %11109  ;;  %v6278_v14 = vsel %vm1186_vm4, %v14988_v41, %v6277_v11  ;;  %v10466_v33 = vadd.f32 -1.0, %v11108_v48 }
 0x3dc   : > { %v5861_v6 = vpack.c.bf16 %v5632_v25, %v5632_v25  ;;  %v6381_v37 = vsel %vm12035_vm6, %v6278_v14, 0  ;;  %v10467_v13 = vadd.f32 -1.0, %v11110_v5  ;;  %v5551_v61 = vmul.f32 1.442695, %v658_v32 }
 0x3dd   : > { %v15037_v16 = vpop.f32.mrf.mxu2  ;;  %v5956_v45 = vunpack.c.l.b16 %v5860_v8  ;;  %v5823_v34 = vsel %vm5695_vm12, %v5663_v57, %v10466_v33  ;;  %v5553_v21 = vmul.f32 1.442695, %v659_v60  ;;  %v5665_v48 = vsub.f32 0.0, %v658_v32 }
 0x3de   : > { %10491 = vmatmul.msk.bf16.gmra.mxu0 %vm1780_vm5, %v6381_v37  ;;  %v5957_v53 = vunpack.c.l.b16 %v5861_v6  ;;  %v5824_v40 = vsel %vm5696_vm7, %v5664_v43, %v10467_v13  ;;  %v5892_v39 = vpack.c.bf16 %v5823_v34, %v5823_v34  ;;  %v5666_v25 = vsub.f32 0.0, %v659_v60  ;;  %v15070_v34 = vld [vmem:[%s18388_s7] ss:$0 sm:$0xff] }
 0x3df   : > { %v5893_v11 = vpack.c.bf16 %v5824_v40, %v5824_v40  ;;  %11111 = vpow2.f32 %v5551_v61  ;;  %v5743_v43 = vmul.f32 1.442695, %v5665_v48  ;;  %v3974_v33 = vsel %vm12952_vm11, %v14627_v23, 0 }
 0x3e0   : > { %v15050_v41 = vpack.c.b16 %v5957_v53, %v5956_v45  ;;  %v6196_v14 = vunpack.c.l.b16 %v5892_v39  ;;  %11113 = vpow2.f32 %v5553_v21  ;;  %v5745_v13 = vmul.f32 1.442695, %v5666_v25 }
 0x3e1   : > { %v6197_v57 = vunpack.c.l.b16 %v5893_v11  ;;  %v3654_v53 = vsel %vm12952_vm11, %v14618_v1, 0  ;;  %11115 = vpow2.f32 %v5743_v43  ;;  %vm5697_vm1 = vcmp.gt.f32.partialorder %v5665_v48, 0.0 }
 0x3e2   : > { %18712 = vst [vmem:[#allocation44_spill] sm:$0xff] %v15050_v41  ;;  %v6040_v5 = vshrl.u32 %v15050_v41, 16  ;;  %v6043_v6 = vshll.u32 %v15050_v41, 16  ;;  %11117 = vpow2.f32 %v5745_v13  ;;  %vm5698_vm2 = vcmp.gt.f32.partialorder %v5666_v25, 0.0 }
 0x3e3   : > { %v15048_v9 = vpop.f32.mrf.mxu3  ;;  %v15061_v37 = vpack.c.b16 %v6197_v57, %v6196_v14 }
 0x3e4   : > { %v15059_v45 = vrot.slane %v6040_v5, 7 }
 0x3e5   : > { %v15052_v8 = vpop.f32.mrf.mxu2  ;;  %18713 = vst [vmem:[#allocation45_spill] sm:$0xff] %v15061_v37  ;;  %v6280_v23 = vshrl.u32 %v15061_v37, 16  ;;  %v6283_v39 = vshll.u32 %v15061_v37, 16  ;;  %v11112_v61 = vpop.eup %11111 }
 0x3e6   : > { %v6045_v40 = vor.u32 %v6043_v6, %v15059_v45  ;;  %v11114_v21 = vpop.eup %11113  ;;  %v10436_v5 = vadd.f32 -1.0, %v11112_v61 }
 0x3e7   : > { %v15080_v14 = vrot.slane %v6280_v23, 7  ;;  %v10437_v43 = vadd.f32 -1.0, %v11114_v21 }
 0x3e8   : > { %10420 = vmatmul.msk.bf16.gmra.mxu3 %vm1780_vm5, %v3974_v33  ;;  %v6046_v1 = vsel %vm1186_vm4, %v15017_v20, %v6045_v40  ;;  %v5633_v37 = vsel %vm5505_vm14, %v658_v32, %v10436_v5  ;;  %v11116_v20 = vpop.eup %11115 }
 0x3e9   : > { %v6142_v57 = vsel %vm12035_vm6, %v6046_v1, 0  ;;  %v5634_v40 = vsel %vm5506_vm15, %v659_v60, %v10437_v43  ;;  %v5862_v23 = vpack.c.bf16 %v5633_v37, %v5633_v37  ;;  %v11118_v61 = vpop.eup %11117  ;;  %v10468_v41 = vadd.f32 -1.0, %v11116_v20 }
 0x3ea   : > { %10404 = vmatmul.msk.bf16.gmra.mxu2 %vm1780_vm5, %v3654_v53  ;;  %v6285_v53 = vor.u32 %v6283_v39, %v15080_v14  ;;  %v10469_v32 = vadd.f32 -1.0, %v11118_v61  ;;  %v3639_v37 = vsel %vm13395_vm13, %v14620_v62, 0  ;;  %v5555_v20 = vmul.f32 1.442695, %v660_v15 }
 0x3eb   : > { %v15076_v11 = vpop.f32.mrf.mxu3  ;;  %10508 = vmatmul.msk.bf16.gmra.mxu1 %vm1780_vm5, %v6142_v57  ;;  %v5958_v39 = vunpack.c.l.b16 %v5862_v23  ;;  %v5825_v2 = vsel %vm5697_vm1, %v5665_v48, %v10468_v41  ;;  %v3959_v62 = vsel %vm13395_vm13, %v14629_v31, 0 }
 0x3ec   : > { %v4945_v6 = vpop.permute.xlu2 %4944  ;;  %v6286_v1 = vsel %vm1186_vm4, %v15033_v38, %v6285_v53  ;;  %v5826_v38 = vsel %vm5698_vm2, %v5666_v25, %v10469_v32  ;;  %v5894_v53 = vpack.c.bf16 %v5825_v2, %v5825_v2 }
 0x3ed   : > { %v15085_v33 = vadd.f32 %v15070_v34, %v4945_v6  ;;  %v15087_v13 = vpop.f32.mrf.mxu2  ;;  %v5863_v6 = vpack.c.bf16 %v5634_v40, %v5634_v40  ;;  %v6382_v57 = vsel %vm12035_vm6, %v6286_v1, 0  ;;  %v5895_v61 = vpack.c.bf16 %v5826_v38, %v5826_v38 }
 0x3ee   : > { %10492 = vmatmul.msk.bf16.gmra.mxu0 %vm1780_vm5, %v6382_v57 }
 0x3ef   : > { %18714 = vst [vmem:[#allocation46_spill] sm:$0xff] %v15085_v33  ;;  %v5107_v21 = vsub.f32 0.0, %v15085_v33  ;;  %v5959_v43 = vunpack.c.l.b16 %v5863_v6  ;;  %v661_v33 = vld [vmem:[%s14763_s28 + $0x88] sm:$0xff]  ;;  %v6198_v6 = vunpack.c.l.b16 %v5894_v53  ;;  %v6199_v57 = vunpack.c.l.b16 %v5895_v61 }
 0x3f0   : > { %v5557_v40 = vmul.f32 1.442695, %v661_v33  ;;  %v15110_v41 = vsub.f32 0.0, %v661_v33  ;;  %vm5508_vm13 = vcmp.gt.f32.partialorder %v661_v33, 0.0 }
 0x3f1   : > { %v5139_v5 = vmul.f32 1.442695, %v5107_v21  ;;  %v15105_v23 = vpack.c.b16 %v5959_v43, %v5958_v39  ;;  %v5667_v21 = vsub.f32 0.0, %v660_v15  ;;  %v15121_v31 = vpack.c.b16 %v6199_v57, %v6198_v6 }
 0x3f2   : > { %v5749_v32 = vmul.f32 1.442695, %v15110_v41  ;;  %v3655_v43 = vsel %vm12952_vm11, %v3639_v37, 0  ;;  %vm5700_vm9 = vcmp.gt.f32.partialorder %v15110_v41, 0.0 }
 0x3f3   : > { %11119 = vpow2.f32 %v5139_v5  ;;  %v15103_v1 = vpop.f32.mrf.mxu3  ;;  %18716 = vst [vmem:[#allocation17_spill] sm:$0xff] %v15105_v23  ;;  %v6048_v2 = vshrl.u32 %v15105_v23, 16  ;;  %v6051_v25 = vshll.u32 %v15105_v23, 16  ;;  %v5747_v39 = vmul.f32 1.442695, %v5667_v21 }
 0x3f4   : > { %11121 = vpow2.f32 %v5555_v20  ;;  %v3975_v5 = vsel %vm12952_vm11, %v3959_v62, 0  ;;  %18717 = vst [vmem:[#allocation47_spill] sm:$0xff] %v15121_v31  ;;  %v6288_v20 = vshrl.u32 %v15121_v31, 16  ;;  %vm5507_vm11 = vcmp.gt.f32.partialorder %v660_v15, 0.0 }
 0x3f5   : > { %v15112_v48 = vpop.f32.mrf.mxu2  ;;  %11123 = vpow2.f32 %v5557_v40  ;;  %v15119_v60 = vrot.slane %v6048_v2, 7  ;;  %v6291_v40 = vshll.u32 %v15121_v31, 16  ;;  %vm5699_vm3 = vcmp.gt.f32.partialorder %v5667_v21, 0.0  ;;  %v15155_v31 = vld [vmem:[%s14763_s28 + $0x98] sm:$0xff] }
 0x3f6   : > { %11125 = vpow2.f32 %v5747_v39  ;;  %v15134_v37 = vrot.slane %v6288_v20, 7  ;;  %v4389_v39 = vadd.f32 %v14479_v63, %v14559_v7  ;;  %vm5510_vm12 = vcmp.gt.f32.partialorder %v15155_v31, 0.0 }
 0x3f7   : > { %v6053_v53 = vor.u32 %v6051_v25, %v15119_v60  ;;  %11127 = vpow2.f32 %v5749_v32 }
 0x3f8   : > { %10421 = vmatmul.msk.bf16.gmra.mxu3 %vm1780_vm5, %v3975_v5  ;;  %v6293_v5 = vor.u32 %v6291_v40, %v15134_v37  ;;  %v15149_v40 = vpop.f32.mrf.mxu1 }
 0x3f9   : > { %v11120_v38 = vpop.eup %11119  ;;  %v6054_v55 = vsel %vm1186_vm4, %v15059_v45, %v6053_v53  ;;  %18718 = vst [vmem:[#allocation48_spill] sm:$0xff] %v15149_v40 }
 0x3fa   : > { %v11122_v61 = vpop.eup %11121  ;;  %v5203_v62 = vadd.f32 1.0, %v11120_v38  ;;  %10405 = vmatmul.msk.bf16.gmra.mxu2 %vm1780_vm5, %v3655_v43  ;;  %v6143_v25 = vsel %vm12035_vm6, %v6054_v55, 0 }
 0x3fb   : > { %v11124_v6 = vpop.eup %11123  ;;  %v15130_v2 = vpop.f32.mrf.mxu3  ;;  %v10438_v57 = vadd.f32 -1.0, %v11122_v61  ;;  %10509 = vmatmul.msk.bf16.gmra.mxu1 %vm1780_vm5, %v6143_v25  ;;  %v6294_v61 = vsel %vm1186_vm4, %v15080_v14, %v6293_v5 }
 0x3fc   : > { %11129 = vrcp.f32 %v5203_v62  ;;  %v10439_v43 = vadd.f32 -1.0, %v11124_v6  ;;  %v11126_v38 = vpop.eup %11125  ;;  %v6383_v63 = vsel %vm12035_vm6, %v6294_v61, 0 }
 0x3fd   : > { %v15140_v32 = vpop.f32.mrf.mxu2  ;;  %v5635_v45 = vsel %vm5507_vm11, %v660_v15, %v10438_v57  ;;  %v11128_v20 = vpop.eup %11127  ;;  %v10470_v55 = vadd.f32 -1.0, %v11126_v38  ;;  %v4545_v15 = vadd.f32 %v14496_v17, %v4389_v39  ;;  %v5561_v38 = vmul.f32 1.442695, %v15155_v31 }
 0x3fe   : > { %v5864_v53 = vpack.c.bf16 %v5635_v45, %v5635_v45  ;;  %v5636_v62 = vsel %vm5508_vm13, %v661_v33, %v10439_v43  ;;  %10493 = vmatmul.msk.bf16.gmra.mxu0 %vm1780_vm5, %v6383_v63  ;;  %v10471_v6 = vadd.f32 -1.0, %v11128_v20  ;;  %v662_v45 = vld [vmem:[%s14763_s28 + $0x90] sm:$0xff]  ;;  %v15168_v39 = vsub.f32 0.0, %v15155_v31  ;;  %v15170_v20 = vpop.f32.mrf.mxu0 }
 0x3ff   : > { %v5865_v7 = vpack.c.bf16 %v5636_v62, %v5636_v62  ;;  %v5827_v57 = vsel %vm5699_vm3, %v5667_v21, %v10470_v55  ;;  %v5559_v43 = vmul.f32 1.442695, %v662_v45  ;;  %v15165_v21 = vsub.f32 0.0, %v662_v45  ;;  %18719 = vst [vmem:[#allocation49_spill] sm:$0xff] %v15170_v20 }
 0x400   : > { %v5960_v25 = vunpack.c.l.b16 %v5864_v53  ;;  %v5896_v5 = vpack.c.bf16 %v5827_v57, %v5827_v57  ;;  %v4717_v53 = vadd.f32 %v15010_v3, %v4545_v15  ;;  %v5828_v17 = vsel %vm5700_vm9, %v15110_v41, %v10471_v6 }
 0x401   : > { %v5961_v33 = vunpack.c.l.b16 %v5865_v7  ;;  %v5897_v63 = vpack.c.bf16 %v5828_v17, %v5828_v17  ;;  %11131 = vpow2.f32 %v5559_v43  ;;  %v5751_v41 = vmul.f32 1.442695, %v15165_v21 }
 0x402   : > { %v11130_v14 = vpop.eup %11129  ;;  %v6200_v3 = vunpack.c.l.b16 %v5896_v5  ;;  %11133 = vpow2.f32 %v5561_v38  ;;  %v5753_v6 = vmul.f32 1.442695, %v15168_v39  ;;  %vm5509_vm10 = vcmp.gt.f32.partialorder %v662_v45, 0.0 }
 0x403   : > { %v15159_v61 = vpop.f32.mrf.mxu3  ;;  %5299 = vrot.lane.b32.xlu1 %v11130_v14, %s11778_s25  ;;  %v15172_v55 = vpack.c.b16 %v5961_v33, %v5960_v25  ;;  %v6201_v40 = vunpack.c.l.b16 %v5897_v63  ;;  %11135 = vpow2.f32 %v5751_v41  ;;  %v4718_v41 = vadd.f32 %v15037_v16, %v14593_v26 }
 0x404   : > { %v4951_v62 = vpop.permute.xlu2 %4950  ;;  %11137 = vpow2.f32 %v5753_v6  ;;  %vm5701_vm7 = vcmp.gt.f32.partialorder %v15165_v21, 0.0  ;;  %vm5702_vm14 = vcmp.gt.f32.partialorder %v15168_v39, 0.0 }
 0x405   : > { %18720 = vst [vmem:[#allocation50_spill] sm:$0xff] %v15172_v55  ;;  %v5043_v7 = vadd.f32 %v4951_v62, %v14841_v54  ;;  %v15175_v15 = vpop.f32.mrf.mxu2  ;;  %v6056_v57 = vshrl.u32 %v15172_v55, 16  ;;  %v6059_v14 = vshll.u32 %v15172_v55, 16  ;;  %v15186_v5 = vpack.c.b16 %v6201_v40, %v6200_v3  ;;  %v6592_v38 = vpop.f32.mrf.mxu1 }
 0x406   : > { %v15189_v54 = vadd.f32 %v15006_v0, %v4717_v53 }
 0x407   : > { %v15182_v25 = vadd.f32 %v15070_v34, %v5043_v7  ;;  %v15184_v33 = vrot.slane %v6056_v57, 7  ;;  %18722 = vst [vmem:[#allocation52_spill] sm:$0xff] %v15186_v5  ;;  %v11132_v17 = vpop.eup %11131  ;;  %v6296_v63 = vshrl.u32 %v15186_v5, 16  ;;  %v6299_v7 = vshll.u32 %v15186_v5, 16  ;;  %v6452_v6 = vpop.f32.mrf.mxu0 }
 0x408   : > { %18723 = vst [vmem:[#allocation53_spill] sm:$0xff] %v15189_v54  ;;  %v11134_v20 = vpop.eup %11133  ;;  %v10440_v0 = vadd.f32 -1.0, %v11132_v17 }
 0x409   : > { %18721 = vst [vmem:[#allocation51_spill] sm:$0xff] %v15182_v25  ;;  %v5110_v43 = vsub.f32 0.0, %v15182_v25  ;;  %v6061_v62 = vor.u32 %v6059_v14, %v15184_v33  ;;  %v15203_v14 = vrot.slane %v6296_v63, 7  ;;  %v11136_v5 = vpop.eup %11135 }
 0x40a   : > { %v5637_v63 = vsel %vm5509_vm10, %v662_v45, %v10440_v0  ;;  %v11138_v55 = vpop.eup %11137  ;;  %v10472_v45 = vadd.f32 -1.0, %v11136_v5 }
 0x40b   : > { %v5145_v40 = vmul.f32 1.442695, %v5110_v43  ;;  %v15197_v3 = vpop.f32.mrf.mxu3  ;;  %4962 = vrot.lane.b32.xlu1 %v15189_v54, %s11779_s29  ;;  %v6062_v57 = vsel %vm1186_vm4, %v15119_v60, %v6061_v62  ;;  %v15211_v43 = vadd.f32 %v6592_v38, %v6452_v6  ;;  %v6301_v60 = vor.u32 %v6299_v7, %v15203_v14 }
 0x40c   : > { %v4947_v53 = vpop.permute.xlu0 %4946  ;;  %v6144_v17 = vsel %vm12035_vm6, %v6062_v57, 0  ;;  %v10441_v62 = vadd.f32 -1.0, %v11134_v20  ;;  %v5866_v23 = vpack.c.bf16 %v5637_v63, %v5637_v63  ;;  %v664_v57 = vld [vmem:[%s14763_s28 + $0xa0] sm:$0xff] }
 0x40d   : > { %11139 = vpow2.f32 %v5145_v40  ;;  %v15207_v26 = vadd.f32 %v15070_v34, %v4947_v53  ;;  %v15209_v16 = vpop.f32.mrf.mxu2  ;;  %18725 = vst [vmem:[#allocation55_spill] sm:$0xff] %v15211_v43  ;;  %10510 = vmatmul.msk.bf16.gmra.mxu1 %vm1780_vm5, %v6144_v17  ;;  %v15218_v40 = vadd.f32 %v15029_v58, %v4718_v41  ;;  %v6302_v38 = vsel %vm1186_vm4, %v15134_v37, %v6301_v60  ;;  %v15230_v41 = vpop.f32.mrf.mxu1  ;;  %v15234_v17 = vld [vmem:[%s14763_s28 + $0xa8] sm:$0xff] }
 0x40e   : > { %v5638_v7 = vsel %vm5510_vm12, %v15155_v31, %v10441_v62  ;;  %v6384_v58 = vsel %vm12035_vm6, %v6302_v38, 0  ;;  %18727 = vst [vmem:[#allocation57_spill] sm:$0xff] %v15230_v41  ;;  %v5962_v6 = vunpack.c.l.b16 %v5866_v23  ;;  %v10473_v37 = vadd.f32 -1.0, %v11138_v55 }
 0x40f   : > { %18724 = vst [vmem:[#allocation54_spill] sm:$0xff] %v15207_v26  ;;  %v5108_v53 = vsub.f32 0.0, %v15207_v26  ;;  %v5867_v0 = vpack.c.bf16 %v5638_v7, %v5638_v7  ;;  %10494 = vmatmul.msk.bf16.gmra.mxu0 %vm1780_vm5, %v6384_v58  ;;  %v5829_v60 = vsel %vm5701_vm7, %v15165_v21, %v10472_v45  ;;  %v5563_v31 = vmul.f32 1.442695, %v664_v57  ;;  %v15245_v58 = vpop.f32.mrf.mxu0 }
 0x410   : > { %18726 = vst [vmem:[#allocation56_spill] sm:$0xff] %v15218_v40  ;;  %v5565_v62 = vmul.f32 1.442695, %v15234_v17  ;;  %v5898_v23 = vpack.c.bf16 %v5829_v60, %v5829_v60  ;;  %v15243_v38 = vsub.f32 0.0, %v664_v57  ;;  %v5830_v21 = vsel %vm5702_vm14, %v15168_v39, %v10473_v37 }
 0x411   : > { %v5141_v20 = vmul.f32 1.442695, %v5108_v53  ;;  %v5963_v53 = vunpack.c.l.b16 %v5867_v0  ;;  %18728 = vst [vmem:[#allocation58_spill] sm:$0xff] %v15245_v58  ;;  %v15251_v55 = vsub.f32 0.0, %v15234_v17  ;;  %v5899_v60 = vpack.c.bf16 %v5830_v21, %v5830_v21 }
 0x412   : > { %v5755_v43 = vmul.f32 1.442695, %v15243_v38  ;;  %vm5511_vm15 = vcmp.gt.f32.partialorder %v664_v57, 0.0  ;;  %vm5512_vm1 = vcmp.gt.f32.partialorder %v15234_v17, 0.0  ;;  %vm5703_vm2 = vcmp.gt.f32.partialorder %v15243_v38, 0.0 }
 0x413   : > { %v11140_v5 = vpop.eup %11139  ;;  %11141 = vpow2.f32 %v5141_v20  ;;  %v15239_v63 = vpop.f32.mrf.mxu3  ;;  %4964 = vrot.lane.b32.xlu1 %v15218_v40, %s11779_s29  ;;  %v15256_v0 = vpack.c.b16 %v5963_v53, %v5962_v6  ;;  %vm5704_vm11 = vcmp.gt.f32.partialorder %v15251_v55, 0.0 }
 0x414   : > { %v5206_v7 = vadd.f32 1.0, %v11140_v5  ;;  %v4949_v41 = vpop.permute.xlu1 %4948  ;;  %11143 = vpow2.f32 %v5563_v31  ;;  %v6202_v5 = vunpack.c.l.b16 %v5898_v23  ;;  %v6203_v31 = vunpack.c.l.b16 %v5899_v60 }
 0x415   : > { %v5042_v45 = vadd.f32 %v4949_v41, %v14822_v19  ;;  %v15254_v20 = vpop.f32.mrf.mxu2  ;;  %18729 = vst [vmem:[#allocation59_spill] sm:$0xff] %v15256_v0  ;;  %v6064_v39 = vshrl.u32 %v15256_v0, 16  ;;  %v6067_v37 = vshll.u32 %v15256_v0, 16  ;;  %v5757_v19 = vmul.f32 1.442695, %v15251_v55 }
 0x416   : > { %11145 = vrcp.f32 %v5206_v7  ;;  %v15268_v23 = vpack.c.b16 %v6203_v31, %v6202_v5 }
 0x417   : > { %v15260_v58 = vadd.f32 %v15070_v34, %v5042_v45  ;;  %11147 = vpow2.f32 %v5565_v62  ;;  %v15266_v21 = vrot.slane %v6064_v39, 7 }
 0x418   : > { %v6597_v53 = vpop.f32.mrf.mxu1  ;;  %18731 = vst [vmem:[#allocation61_spill] sm:$0xff] %v15268_v23  ;;  %11149 = vpow2.f32 %v5755_v43  ;;  %v6304_v62 = vshrl.u32 %v15268_v23, 16  ;;  %v6307_v0 = vshll.u32 %v15268_v23, 16 }
 0x419   : > { %18730 = vst [vmem:[#allocation60_spill] sm:$0xff] %v15260_v58  ;;  %v11142_v41 = vpop.eup %11141  ;;  %v5109_v6 = vsub.f32 0.0, %v15260_v58  ;;  %11151 = vpow2.f32 %v5757_v19  ;;  %v6069_v60 = vor.u32 %v6067_v37, %v15266_v21  ;;  %v6457_v43 = vpop.f32.mrf.mxu0 }
 0x41a   : > { %v11144_v7 = vpop.eup %11143  ;;  %v5204_v45 = vadd.f32 1.0, %v11142_v41  ;;  %v15280_v19 = vrot.slane %v6304_v62, 7  ;;  %v15282_v41 = vadd.f32 %v6597_v53, %v6457_v43 }
 0x41b   : > { %v5143_v40 = vmul.f32 1.442695, %v5109_v6  ;;  %v15270_v54 = vpop.f32.mrf.mxu3  ;;  %v10442_v39 = vadd.f32 -1.0, %v11144_v7  ;;  %v6070_v31 = vsel %vm1186_vm4, %v15184_v33, %v6069_v60 }
 0x41c   : > { %v11146_v25 = vpop.eup %11145  ;;  %11153 = vrcp.f32 %v5204_v45  ;;  %18732 = vst [vmem:[#allocation62_spill] sm:$0xff] %v15282_v41  ;;  %v6145_v6 = vsel %vm12035_vm6, %v6070_v31, 0  ;;  %v4957_v62 = vpop.permute.xlu2 %4956 }
 0x41d   : > { %11155 = vpow2.f32 %v5143_v40  ;;  %v15275_v5 = vpop.f32.mrf.mxu2  ;;  %5305 = vrot.lane.b32.xlu0 %v11146_v25, %s11778_s25  ;;  %v11148_v37 = vpop.eup %11147  ;;  %v5639_v40 = vsel %vm5511_vm15, %v664_v57, %v10442_v39  ;;  %10511 = vmatmul.msk.bf16.gmra.mxu1 %vm1780_vm5, %v6145_v6  ;;  %v6309_v25 = vor.u32 %v6307_v0, %v15280_v19  ;;  %v15297_v6 = vld [vmem:[%s14763_s28 + $0xb0] sm:$0xff]  ;;  %v15300_v0 = vld [vmem:[%s14763_s28 + $0xb8] sm:$0xff] }
 0x41e   : > { %v11150_v7 = vpop.eup %11149  ;;  %v10443_v45 = vadd.f32 -1.0, %v11148_v37  ;;  %v5868_v33 = vpack.c.bf16 %v5639_v40, %v5639_v40  ;;  %vm5513_vm13 = vcmp.gt.f32.partialorder %v15297_v6, 0.0  ;;  %vm5514_vm3 = vcmp.gt.f32.partialorder %v15300_v0, 0.0 }
 0x41f   : > { %v11152_v60 = vpop.eup %11151  ;;  %v10474_v53 = vadd.f32 -1.0, %v11150_v7  ;;  %v6310_v43 = vsel %vm1186_vm4, %v15203_v14, %v6309_v25  ;;  %v5046_v25 = vadd.f32 %v4957_v62, %v14909_v36 }
 0x420   : > { %v15292_v31 = vpop.f32.mrf.mxu1  ;;  %v5640_v57 = vsel %vm5512_vm1, %v15234_v17, %v10443_v45  ;;  %v5964_v39 = vunpack.c.l.b16 %v5868_v33  ;;  %v6385_v40 = vsel %vm12035_vm6, %v6310_v43, 0  ;;  %v10475_v7 = vadd.f32 -1.0, %v11152_v60 }
 0x421   : > { %18733 = vst [vmem:[#allocation63_spill] sm:$0xff] %v15292_v31  ;;  %v5869_v41 = vpack.c.bf16 %v5640_v57, %v5640_v57  ;;  %v5831_v23 = vsel %vm5703_vm2, %v15243_v38, %v10474_v53  ;;  %10495 = vmatmul.msk.bf16.gmra.mxu0 %vm1780_vm5, %v6385_v40  ;;  %v5567_v33 = vmul.f32 1.442695, %v15297_v6  ;;  %v5569_v38 = vmul.f32 1.442695, %v15300_v0  ;;  %v15318_v53 = vpop.f32.mrf.mxu0 }
 0x422   : > { %v11154_v37 = vpop.eup %11153  ;;  %v5900_v45 = vpack.c.bf16 %v5831_v23, %v5831_v23  ;;  %v5832_v60 = vsel %vm5704_vm11, %v15251_v55, %v10475_v7  ;;  %18734 = vst [vmem:[#allocation64_spill] sm:$0xff] %v15318_v53  ;;  %v15321_v23 = vsub.f32 0.0, %v15297_v6 }
 0x423   : > { %v11156_v14 = vpop.eup %11155  ;;  %v15307_v17 = vpop.f32.mrf.mxu3  ;;  %5301 = vrot.lane.b32.xlu2 %v11154_v37, %s11778_s25  ;;  %v5965_v26 = vunpack.c.l.b16 %v5869_v41  ;;  %v5901_v43 = vpack.c.bf16 %v5832_v60, %v5832_v60  ;;  %v18735_v37 = vld [vmem:[#allocation14_spill] sm:$0xff] }
 0x424   : > { %v5205_v31 = vadd.f32 1.0, %v11156_v14  ;;  %v4953_v58 = vpop.permute.xlu0 %4952  ;;  %v6204_v57 = vunpack.c.l.b16 %v5900_v45  ;;  %v4391_v41 = vadd.f32 %v18735_v37, %v14601_v46  ;;  %v5759_v46 = vmul.f32 1.442695, %v15321_v23 }
 0x425   : > { %v5044_v36 = vadd.f32 %v4953_v58, %v14866_v24  ;;  %v15316_v62 = vpop.f32.mrf.mxu2  ;;  %v15325_v40 = vpack.c.b16 %v5965_v26, %v5964_v39  ;;  %v6205_v7 = vunpack.c.l.b16 %v5901_v43  ;;  %v15331_v24 = vadd.f32 %v15070_v34, %v5046_v25  ;;  %v18740_v26 = vld [vmem:[#allocation15_spill] sm:$0xff] }
 0x426   : > { %11157 = vrcp.f32 %v5205_v31  ;;  %v4547_v31 = vadd.f32 %v18740_v26, %v4391_v41  ;;  %vm5705_vm9 = vcmp.gt.f32.partialorder %v15321_v23, 0.0 }
 0x427   : > { %18736 = vst [vmem:[#allocation14_spill] sm:$0xff] %v15325_v40  ;;  %v15328_v55 = vadd.f32 %v15070_v34, %v5044_v36  ;;  %11159 = vpow2.f32 %v5567_v33  ;;  %v6072_v58 = vshrl.u32 %v15325_v40, 16  ;;  %v6075_v14 = vshll.u32 %v15325_v40, 16 }
 0x428   : > { %18738 = vst [vmem:[#allocation66_spill] sm:$0xff] %v15331_v24  ;;  %11161 = vpow2.f32 %v5569_v38  ;;  %v15336_v60 = vpack.c.b16 %v6205_v7, %v6204_v57  ;;  %v6602_v39 = vpop.f32.mrf.mxu1  ;;  %v15343_v33 = vsub.f32 0.0, %v15300_v0  ;;  %v4719_v7 = vadd.f32 %v15052_v8, %v4547_v31 }
 0x429   : > { %18737 = vst [vmem:[#allocation65_spill] sm:$0xff] %v15328_v55  ;;  %v5111_v45 = vsub.f32 0.0, %v15328_v55  ;;  %v15340_v36 = vrot.slane %v6072_v58, 7  ;;  %11163 = vpow2.f32 %v5759_v46  ;;  %v5113_v53 = vsub.f32 0.0, %v15331_v24 }
 0x42a   : > { %18739 = vst [vmem:[#allocation67_spill] sm:$0xff] %v15336_v60  ;;  %v6312_v37 = vshrl.u32 %v15336_v60, 16  ;;  %v6315_v38 = vshll.u32 %v15336_v60, 16  ;;  %v5761_v31 = vmul.f32 1.442695, %v15343_v33  ;;  %vm5706_vm10 = vcmp.gt.f32.partialorder %v15343_v33, 0.0 }
 0x42b   : > { %v5147_v25 = vmul.f32 1.442695, %v5111_v45  ;;  %v15345_v43 = vpop.f32.mrf.mxu3  ;;  %v6077_v58 = vor.u32 %v6075_v14, %v15340_v36  ;;  %v6462_v60 = vpop.f32.mrf.mxu0 }
 0x42c   : > { %v11158_v57 = vpop.eup %11157  ;;  %v4955_v41 = vpop.permute.xlu1 %4954  ;;  %v15356_v55 = vrot.slane %v6312_v37, 7 }
 0x42d   : > { %v11160_v26 = vpop.eup %11159  ;;  %11165 = vpow2.f32 %v5147_v25  ;;  %v5045_v40 = vadd.f32 %v4955_v41, %v14886_v22  ;;  %v15353_v45 = vpop.f32.mrf.mxu2  ;;  %5303 = vrot.lane.b32.xlu2 %v11158_v57, %s11778_s25  ;;  %v6078_v8 = vsel %vm1186_vm4, %v15266_v21, %v6077_v58  ;;  %v15366_v25 = vadd.f32 %v6602_v39, %v6462_v60 }
 0x42e   : > { %v11162_v46 = vpop.eup %11161  ;;  %v10444_v14 = vadd.f32 -1.0, %v11160_v26  ;;  %v6146_v37 = vsel %vm12035_vm6, %v6078_v8, 0  ;;  %v6317_v57 = vor.u32 %v6315_v38, %v15356_v55  ;;  %v4393_v41 = vadd.f32 %v14599_v12, %v14631_v28  ;;  %v15380_v38 = vld [vmem:[%s14763_s28 + $0xc0] sm:$0xff] }
 0x42f   : > { %v15364_v22 = vadd.f32 %v15070_v34, %v5045_v40  ;;  %18741 = vst [vmem:[#allocation15_spill] sm:$0xff] %v15366_v25  ;;  %v5151_v21 = vmul.f32 1.442695, %v5113_v53  ;;  %10512 = vmatmul.msk.bf16.gmra.mxu1 %vm1780_vm5, %v6146_v37  ;;  %v10445_v58 = vadd.f32 -1.0, %v11162_v46  ;;  %v11164_v24 = vpop.eup %11163  ;;  %11167 = vpow2.f32 %v5761_v31  ;;  %v15390_v46 = vld [vmem:[%s14763_s28 + $0xc8] sm:$0xff] }
 0x430   : > { %v5641_v26 = vsel %vm5513_vm13, %v15297_v6, %v10444_v14  ;;  %v6318_v60 = vsel %vm1186_vm4, %v15280_v19, %v6317_v57  ;;  %v15384_v28 = vpop.f32.mrf.mxu1  ;;  %v10476_v53 = vadd.f32 -1.0, %v11164_v24  ;;  %v15393_v19 = vadd.f32 %v15048_v9, %v4719_v7 }
 0x431   : > { %v5112_v40 = vsub.f32 0.0, %v15364_v22  ;;  %v5870_v39 = vpack.c.bf16 %v5641_v26, %v5641_v26  ;;  %v6386_v12 = vsel %vm12035_vm6, %v6318_v60, 0  ;;  %18742 = vst [vmem:[#allocation68_spill] sm:$0xff] %v15384_v28  ;;  %v5642_v6 = vsel %vm5514_vm3, %v15300_v0, %v10445_v58  ;;  %v5846_v58 = vld [vmem:[%s18390_s9 + $0x4] sm:$0xf] }
 0x432   : > { %18743 = vst [vmem:[#allocation69_spill] sm:$0xff] %v15393_v19  ;;  %10496 = vmatmul.msk.bf16.gmra.mxu0 %vm1780_vm5, %v6386_v12  ;;  %v5871_v57 = vpack.c.bf16 %v5642_v6, %v5642_v6  ;;  %11169 = vpow2.f32 %v5151_v21  ;;  %v5571_v28 = vmul.f32 1.442695, %v15380_v38  ;;  %v5833_v9 = vsel %vm5705_vm9, %v15321_v23, %v10476_v53  ;;  %v5844_v21 = vld [vmem:[%s18389_s8 + $0x4] sm:$0xf]  ;;  %v18745_v12 = vld [vmem:[#allocation16_spill] sm:$0xff] }
 0x433   : > { %v11166_v8 = vpop.eup %11165  ;;  %v5149_v14 = vmul.f32 1.442695, %v5112_v40  ;;  %v15396_v37 = vpop.f32.mrf.mxu3  ;;  %v5966_v26 = vunpack.c.l.b16 %v5870_v39  ;;  %v5573_v7 = vmul.f32 1.442695, %v15390_v46  ;;  %v15416_v40 = vsub.f32 0.0, %v15380_v38 }
 0x434   : > { %v5207_v60 = vadd.f32 1.0, %v11166_v8  ;;  %v5967_v24 = vunpack.c.l.b16 %v5871_v57  ;;  %v15407_v31 = vpop.f32.mrf.mxu0  ;;  %v15419_v39 = vsub.f32 0.0, %v15390_v46  ;;  %v4720_v23 = vadd.f32 %v15087_v13, %v14615_v30 }
 0x435   : > { %11171 = vpow2.f32 %v5149_v14  ;;  %v15399_v0 = vpop.f32.mrf.mxu2  ;;  %4966 = vrot.lane.b32.xlu2 %v15393_v19, %s11779_s29  ;;  %18744 = vst [vmem:[#allocation70_spill] sm:$0xff] %v15407_v31  ;;  %v4549_v6 = vadd.f32 %v18745_v12, %v4393_v41  ;;  %v6705_v8 = vsel %vm1829_vm0, %v5844_v21, 0  ;;  %v11168_v14 = vpop.eup %11167  ;;  %v5902_v57 = vpack.c.bf16 %v5833_v9, %v5833_v9 }
 0x436   : > { %11173 = vrcp.f32 %v5207_v60  ;;  %v15424_v53 = vpack.c.b16 %v5967_v24, %v5966_v26  ;;  %6714 = vmatpush.bf16.msra.mxu2 %v6705_v8  ;;  %v6861_v60 = vsel %vm1829_vm0, %v5846_v58, 0  ;;  %v10477_v19 = vadd.f32 -1.0, %v11168_v14 }
 0x437   : > { %11175 = vpow2.f32 %v5571_v28  ;;  %6870 = vmatpush.bf16.msra.mxu3 %v6861_v60  ;;  %v15433_v13 = vadd.f32 %v14622_v29, %v14647_v52  ;;  %v5763_v26 = vmul.f32 1.442695, %v15416_v40  ;;  %v5765_v24 = vmul.f32 1.442695, %v15419_v39 }
 0x438   : > { %v6080_v31 = vshrl.u32 %v15424_v53, 16  ;;  %v6083_v25 = vshll.u32 %v15424_v53, 16  ;;  %11177 = vpow2.f32 %v5573_v7  ;;  %v11170_v30 = vpop.eup %11169  ;;  %v6607_v41 = vpop.f32.mrf.mxu1  ;;  %v15438_v28 = vadd.f32 %v15076_v11, %v4720_v23 }
 0x439   : > { %v4721_v21 = vadd.f32 %v15112_v48, %v4549_v6  ;;  %v5834_v29 = vsel %vm5706_vm10, %v15343_v33, %v10477_v19  ;;  %10518 = vmatmul.msk.bf16.vlgmr.msra.gmra.mxu2 %vm1780_vm5, %v14785_v49  ;;  %v6206_v60 = vunpack.c.l.b16 %v5902_v57  ;;  %11179 = vpow2.f32 %v5763_v26 }
 0x43a   : > { %v15443_v12 = vrot.slane %v6080_v31, 7  ;;  %v5903_v14 = vpack.c.bf16 %v5834_v29, %v5834_v29  ;;  %10534 = vmatmul.msk.bf16.vlgmr.msra.gmra.mxu3 %vm1780_vm5, %v14791_v10  ;;  %v5209_v11 = vadd.f32 1.0, %v11170_v30  ;;  %11181 = vpow2.f32 %v5765_v24 }
 0x43b   : > { %v11172_v9 = vpop.eup %11171  ;;  %v15441_v58 = vpop.f32.mrf.mxu3  ;;  %vm5515_vm12 = vcmp.gt.f32.partialorder %v15380_v38, 0.0  ;;  %vm5516_vm7 = vcmp.gt.f32.partialorder %v15390_v46, 0.0  ;;  %v15469_v30 = vadd.f32 %v15103_v1, %v4721_v21  ;;  %vm5707_vm14 = vcmp.gt.f32.partialorder %v15416_v40, 0.0 }
 0x43c   : > { %v11174_v52 = vpop.eup %11173  ;;  %v5208_v7 = vadd.f32 1.0, %v11172_v9  ;;  %v4959_v8 = vpop.permute.xlu0 %4958  ;;  %v6085_v49 = vor.u32 %v6083_v25, %v15443_v12  ;;  %v6207_v23 = vunpack.c.l.b16 %v5903_v14  ;;  %vm5708_vm15 = vcmp.gt.f32.partialorder %v15419_v39, 0.0 }
 0x43d   : > { %v5047_v48 = vadd.f32 %v4959_v8, %v14930_v50  ;;  %v15453_v31 = vpop.f32.mrf.mxu2  ;;  %4968 = vrot.lane.b32.xlu2 %v15438_v28, %s11779_s29  ;;  %5307 = vrot.lane.b32.xlu0 %v11174_v52, %s11778_s25  ;;  %v11176_v33 = vpop.eup %11175 }
 0x43e   : > { %11183 = vrcp.f32 %v5208_v7  ;;  %v6467_v19 = vpop.f32.mrf.mxu0  ;;  %v11178_v10 = vpop.eup %11177  ;;  %v6086_v57 = vsel %vm1186_vm4, %v15340_v36, %v6085_v49  ;;  %v10446_v25 = vadd.f32 -1.0, %v11176_v33  ;;  %v15473_v24 = vpack.c.b16 %v6207_v23, %v6206_v60  ;;  %v15480_v36 = vld [vmem:[%s14763_s28 + $0xd0] sm:$0xff]  ;;  %v15493_v33 = vld [vmem:[%s14763_s28 + $0xd8] sm:$0xff] }
 0x43f   : > { %v15462_v50 = vadd.f32 %v15070_v34, %v5047_v48  ;;  %v15464_v6 = vadd.f32 %v6607_v41, %v6467_v19  ;;  %v6147_v26 = vsel %vm12035_vm6, %v6086_v57, 0  ;;  %v10447_v9 = vadd.f32 -1.0, %v11178_v10  ;;  %v11180_v1 = vpop.eup %11179 }
 0x440   : > { %11185 = vrcp.f32 %v5209_v11  ;;  %10513 = vmatmul.msk.bf16.gmra.mxu1 %vm1780_vm5, %v6147_v26  ;;  %v5643_v41 = vsel %vm5515_vm12, %v15380_v38, %v10446_v25  ;;  %v6320_v21 = vshrl.u32 %v15473_v24, 16  ;;  %v6323_v52 = vshll.u32 %v15473_v24, 16  ;;  %v15484_v7 = vpop.f32.mrf.mxu1  ;;  %v11182_v60 = vpop.eup %11181 }
 0x441   : > { %v5114_v29 = vsub.f32 0.0, %v15462_v50  ;;  %18746 = vst [vmem:[#allocation16_spill] sm:$0xff] %v15484_v7  ;;  %v5644_v8 = vsel %vm5516_vm7, %v15390_v46, %v10447_v9  ;;  %v5872_v14 = vpack.c.bf16 %v5643_v41, %v5643_v41  ;;  %v10478_v49 = vadd.f32 -1.0, %v11180_v1 }
 0x442   : > { %v5873_v38 = vpack.c.bf16 %v5644_v8, %v5644_v8  ;;  %v15495_v23 = vrot.slane %v6320_v21, 7  ;;  %v10479_v25 = vadd.f32 -1.0, %v11182_v60  ;;  %v5575_v26 = vmul.f32 1.442695, %v15480_v36 }
 0x443   : > { %v5153_v11 = vmul.f32 1.442695, %v5114_v29  ;;  %v15489_v48 = vpop.f32.mrf.mxu3  ;;  %v5968_v57 = vunpack.c.l.b16 %v5872_v14  ;;  %v5835_v41 = vsel %vm5707_vm14, %v15416_v40, %v10478_v49  ;;  %v5577_v14 = vmul.f32 1.442695, %v15493_v33 }
 0x444   : > { %v11184_v19 = vpop.eup %11183  ;;  %v4961_v10 = vpop.permute.xlu0 %4960  ;;  %v5969_v29 = vunpack.c.l.b16 %v5873_v38  ;;  %v6325_v1 = vor.u32 %v6323_v52, %v15495_v23  ;;  %v5904_v8 = vpack.c.bf16 %v5835_v41, %v5835_v41  ;;  %v4551_v52 = vadd.f32 %v14635_v59, %v15433_v13 }
 0x445   : > { %11187 = vpow2.f32 %v5153_v11  ;;  %v5048_v46 = vadd.f32 %v4961_v10, %v14953_v47  ;;  %v15499_v9 = vpop.f32.mrf.mxu2  ;;  %5309 = vrot.lane.b32.xlu1 %v11184_v19, %s11778_s25  ;;  %4970 = vrot.lane.b32.xlu0 %v15469_v30, %s11779_s29  ;;  %v5836_v47 = vsel %vm5708_vm15, %v15419_v39, %v10479_v25  ;;  %v4722_v11 = vadd.f32 %v15140_v32, %v14643_v56 }
 0x446   : > { %v15508_v21 = vpop.f32.mrf.mxu0  ;;  %v11186_v60 = vpop.eup %11185  ;;  %v15519_v19 = vpack.c.b16 %v5969_v29, %v5968_v57  ;;  %v5905_v40 = vpack.c.bf16 %v5836_v47, %v5836_v47  ;;  %v6326_v49 = vsel %vm1186_vm4, %v15356_v55, %v6325_v1  ;;  %v6208_v39 = vunpack.c.l.b16 %v5904_v8 }
 0x447   : > { %18747 = vst [vmem:[#allocation71_spill] sm:$0xff] %v15508_v21  ;;  %v15517_v38 = vadd.f32 %v15070_v34, %v5048_v46  ;;  %11189 = vpow2.f32 %v5575_v26  ;;  %v6387_v10 = vsel %vm12035_vm6, %v6326_v49, 0  ;;  %v15532_v59 = vsub.f32 0.0, %v15480_v36 }
 0x448   : > { %v6088_v56 = vshrl.u32 %v15519_v19, 16  ;;  %v6091_v34 = vshll.u32 %v15519_v19, 16  ;;  %10497 = vmatmul.msk.bf16.gmra.mxu0 %vm1780_vm5, %v6387_v10  ;;  %v6612_v32 = vpop.f32.mrf.mxu1  ;;  %v6209_v57 = vunpack.c.l.b16 %v5905_v40  ;;  %11191 = vpow2.f32 %v5577_v14 }
 0x449   : > { %v5115_v25 = vsub.f32 0.0, %v15517_v38  ;;  %v15535_v55 = vsub.f32 0.0, %v15493_v33  ;;  %v15538_v26 = vadd.f32 %v15130_v2, %v4722_v11  ;;  %10519 = vmatmul.msk.bf16.gmra.mxu2 %vm1780_vm5, %v14829_v44  ;;  %v4723_v1 = vadd.f32 %v15175_v15, %v4551_v52 }
 0x44a   : > { %v15542_v41 = vrot.slane %v6088_v56, 7  ;;  %v15547_v8 = vpack.c.b16 %v6209_v57, %v6208_v39  ;;  %10535 = vmatmul.msk.bf16.gmra.mxu3 %vm1780_vm5, %v14836_v51  ;;  %v5767_v44 = vmul.f32 1.442695, %v15532_v59  ;;  %vm5517_vm1 = vcmp.gt.f32.partialorder %v15480_v36, 0.0  ;;  %v15575_v57 = vld [vmem:[%s14763_s28 + $0xe8] sm:$0xff] }
 0x44b   : > { %v11188_v13 = vpop.eup %11187  ;;  %v5155_v46 = vmul.f32 1.442695, %v5115_v25  ;;  %v15540_v29 = vpop.f32.mrf.mxu3  ;;  %v5769_v15 = vmul.f32 1.442695, %v15535_v55  ;;  %vm5518_vm2 = vcmp.gt.f32.partialorder %v15493_v33, 0.0  ;;  %vm5709_vm11 = vcmp.gt.f32.partialorder %v15532_v59, 0.0 }
 0x44c   : > { %v5210_v47 = vadd.f32 1.0, %v11188_v13  ;;  %v6093_v2 = vor.u32 %v6091_v34, %v15542_v41  ;;  %v6328_v51 = vshrl.u32 %v15547_v8, 16  ;;  %v6331_v52 = vshll.u32 %v15547_v8, 16  ;;  %v15572_v34 = vld [vmem:[%s14763_s28 + $0xe0] sm:$0xff] }
 0x44d   : > { %11193 = vpow2.f32 %v5155_v46  ;;  %v15551_v14 = vpop.f32.mrf.mxu2  ;;  %5311 = vrot.lane.b32.xlu1 %v11186_v60, %s11778_s25  ;;  %4972 = vrot.lane.b32.xlu0 %v15538_v26, %s11779_s29  ;;  %v11190_v11 = vpop.eup %11189  ;;  %v15580_v13 = vadd.f32 %v15159_v61, %v4723_v1  ;;  %v15594_v61 = vsub.f32 0.0, %v15575_v57  ;;  %vm5710_vm13 = vcmp.gt.f32.partialorder %v15535_v55, 0.0 }
 0x44e   : > { %11195 = vrcp.f32 %v5210_v47  ;;  %v6472_v40 = vpop.f32.mrf.mxu0  ;;  %v6094_v49 = vsel %vm1186_vm4, %v15443_v12, %v6093_v2  ;;  %v10448_v39 = vadd.f32 -1.0, %v11190_v11  ;;  %v11192_v10 = vpop.eup %11191  ;;  %v15568_v56 = vrot.slane %v6328_v51, 7 }
 0x44f   : > { %v15562_v60 = vadd.f32 %v6612_v32, %v6472_v40  ;;  %11197 = vpow2.f32 %v5767_v44  ;;  %v6148_v25 = vsel %vm12035_vm6, %v6094_v49, 0  ;;  %v10449_v32 = vadd.f32 -1.0, %v11192_v10 }
 0x450   : > { %11199 = vpow2.f32 %v5769_v15  ;;  %10514 = vmatmul.msk.bf16.gmra.mxu1 %vm1780_vm5, %v6148_v25  ;;  %v5645_v12 = vsel %vm5517_vm1, %v15480_v36, %v10448_v39  ;;  %v6333_v46 = vor.u32 %v6331_v52, %v15568_v56  ;;  %v15583_v47 = vpop.f32.mrf.mxu1  ;;  %v5579_v44 = vmul.f32 1.442695, %v15572_v34 }
 0x451   : > { %18748 = vst [vmem:[#allocation72_spill] sm:$0xff] %v15562_v60  ;;  %v5874_v2 = vpack.c.bf16 %v5645_v12, %v5645_v12  ;;  %v5646_v40 = vsel %vm5518_vm2, %v15493_v33, %v10449_v32  ;;  %v5581_v51 = vmul.f32 1.442695, %v15575_v57  ;;  %v15591_v49 = vsub.f32 0.0, %v15572_v34  ;;  %v18750_v12 = vld [vmem:[#allocation18_spill] sm:$0xff]  ;;  %v18751_v33 = vld [vmem:[#allocation20_spill] sm:$0xff] }
 0x452   : > { %18749 = vst [vmem:[#allocation73_spill] sm:$0xff] %v15583_v47  ;;  %v6334_v52 = vsel %vm1186_vm4, %v15495_v23, %v6333_v46  ;;  %v5875_v39 = vpack.c.bf16 %v5646_v40, %v5646_v40  ;;  %v4397_v47 = vadd.f32 %v18750_v12, %v14663_v4  ;;  %v4724_v32 = vadd.f32 %v15209_v16, %v18751_v33 }
 0x453   : > { %v11194_v15 = vpop.eup %11193  ;;  %v15586_v11 = vpop.f32.mrf.mxu3  ;;  %v5970_v10 = vunpack.c.l.b16 %v5874_v2  ;;  %11201 = vpow2.f32 %v5579_v44  ;;  %v6388_v16 = vsel %vm12035_vm6, %v6334_v52, 0  ;;  %v5771_v40 = vmul.f32 1.442695, %v15591_v49 }
 0x454   : > { %v11196_v36 = vpop.eup %11195  ;;  %v5211_v1 = vadd.f32 1.0, %v11194_v15  ;;  %v5971_v2 = vunpack.c.l.b16 %v5875_v39  ;;  %v5773_v44 = vmul.f32 1.442695, %v15594_v61  ;;  %vm5519_vm3 = vcmp.gt.f32.partialorder %v15572_v34, 0.0 }
 0x455   : > { %v11198_v25 = vpop.eup %11197  ;;  %v15602_v60 = vpop.f32.mrf.mxu2  ;;  %5313 = vrot.lane.b32.xlu2 %v11196_v36, %s11778_s25  ;;  %4974 = vrot.lane.b32.xlu1 %v15580_v13, %s11779_s29  ;;  %vm5520_vm9 = vcmp.gt.f32.partialorder %v15575_v57, 0.0  ;;  %vm5711_vm10 = vcmp.gt.f32.partialorder %v15591_v49, 0.0  ;;  %vm5712_vm12 = vcmp.gt.f32.partialorder %v15594_v61, 0.0 }
 0x456   : > { %v11200_v23 = vpop.eup %11199  ;;  %11203 = vrcp.f32 %v5211_v1  ;;  %v15608_v46 = vpop.f32.mrf.mxu0  ;;  %v10480_v4 = vadd.f32 -1.0, %v11198_v25  ;;  %v15614_v36 = vpack.c.b16 %v5971_v2, %v5970_v10  ;;  %v18753_v1 = vld [vmem:[#allocation19_spill] sm:$0xff] }
 0x457   : > { %18752 = vst [vmem:[#allocation18_spill] sm:$0xff] %v15608_v46  ;;  %v10481_v15 = vadd.f32 -1.0, %v11200_v23  ;;  %11205 = vpow2.f32 %v5581_v51  ;;  %v4553_v33 = vadd.f32 %v18753_v1, %v4397_v47  ;;  %v15627_v47 = vadd.f32 %v15197_v3, %v4724_v32  ;;  %v18754_v3 = vld [vmem:[#allocation8_spill] sm:$0xff] }
 0x458   : > { %v5837_v12 = vsel %vm5709_vm11, %v15532_v59, %v10480_v4  ;;  %11207 = vpow2.f32 %v5771_v40  ;;  %10498 = vmatmul.msk.bf16.gmra.mxu0 %vm1780_vm5, %v6388_v16  ;;  %v6617_v25 = vpop.f32.mrf.mxu1  ;;  %v6096_v52 = vshrl.u32 %v15614_v36, 16  ;;  %v6099_v51 = vshll.u32 %v15614_v36, 16  ;;  %v7564_v59 = vld [vmem:[%s18393_s12] sm:$0xf] }
 0x459   : > { %v5838_v39 = vsel %vm5710_vm13, %v15535_v55, %v10481_v15  ;;  %v5906_v46 = vpack.c.bf16 %v5837_v12, %v5837_v12  ;;  %11209 = vpow2.f32 %v5773_v44  ;;  %v11202_v10 = vpop.eup %11201  ;;  %v4725_v55 = vadd.f32 %v15254_v20, %v4553_v33  ;;  %10520 = vmatmul.msk.bf16.gmra.mxu2 %vm1780_vm5, %v14874_v27 }
 0x45a   : > { %v5907_v23 = vpack.c.bf16 %v5838_v39, %v5838_v39  ;;  %v7614_v16 = vsel %vm1829_vm0, %v7564_v59, 0  ;;  %v15635_v40 = vrot.slane %v6096_v52, 7  ;;  %v10450_v44 = vadd.f32 -1.0, %v11202_v10  ;;  %10536 = vmatmul.msk.bf16.gmra.mxu3 %vm1780_vm5, %v18754_v3 }
 0x45b   : > { %v15630_v2 = vpop.f32.mrf.mxu3  ;;  %v6210_v4 = vunpack.c.l.b16 %v5906_v46  ;;  %7623 = vmatpush.bf16.msra.mxu0 %v7614_v16  ;;  %v15650_v52 = vadd.f32 %v15239_v63, %v4725_v55 }
 0x45c   : > { %v11204_v15 = vpop.eup %11203  ;;  %v6211_v12 = vunpack.c.l.b16 %v5907_v23  ;;  %v6101_v46 = vor.u32 %v6099_v51, %v15635_v40  ;;  %v5647_v59 = vsel %vm5519_vm3, %v15572_v34, %v10450_v44  ;;  %v674_v34 = vld [vmem:[%s14763_s28 + $0xf0] sm:$0xff] }
 0x45d   : > { %v11206_v20 = vpop.eup %11205  ;;  %v15640_v32 = vpop.f32.mrf.mxu2  ;;  %5315 = vrot.lane.b32.xlu2 %v11204_v15, %s11778_s25  ;;  %4976 = vrot.lane.b32.xlu1 %v15627_v47, %s11779_s29  ;;  %18755 = vst [vmem:[#allocation20_spill] sm:$0xff] %v15650_v52  ;;  %v5876_v55 = vpack.c.bf16 %v5647_v59, %v5647_v59  ;;  %vm5521_vm7 = vcmp.gt.f32.partialorder %v674_v34, 0.0 }
 0x45e   : > { %v6477_v27 = vpop.f32.mrf.mxu0  ;;  %v15646_v1 = vpack.c.b16 %v6211_v12, %v6210_v4  ;;  %v10451_v33 = vadd.f32 -1.0, %v11206_v20  ;;  %v11208_v39 = vpop.eup %11207  ;;  %v6102_v10 = vsel %vm1186_vm4, %v15542_v41, %v6101_v46  ;;  %v15668_v12 = vld [vmem:[%s14763_s28 + $0xf8] sm:$0xff] }
 0x45f   : > { %v15652_v23 = vadd.f32 %v6617_v25, %v6477_v27  ;;  %v11210_v51 = vpop.eup %11209  ;;  %v6149_v63 = vsel %vm12035_vm6, %v6102_v10, 0  ;;  %v10482_v15 = vadd.f32 -1.0, %v11208_v39  ;;  %v5583_v27 = vmul.f32 1.442695, %v674_v34 }
 0x460   : > { %v6336_v4 = vshrl.u32 %v15646_v1, 16  ;;  %v6339_v16 = vshll.u32 %v15646_v1, 16  ;;  %v5648_v25 = vsel %vm5520_vm9, %v15575_v57, %v10451_v33  ;;  %10515 = vmatmul.msk.bf16.gmra.mxu1 %vm1780_vm5, %v6149_v63  ;;  %v15673_v41 = vpop.f32.mrf.mxu1  ;;  %v10483_v20 = vadd.f32 -1.0, %v11210_v51 }
 0x461   : > { %18756 = vst [vmem:[#allocation19_spill] sm:$0xff] %v15652_v23  ;;  %v5877_v3 = vpack.c.bf16 %v5648_v25, %v5648_v25  ;;  %v5972_v23 = vunpack.c.l.b16 %v5876_v55  ;;  %v5839_v57 = vsel %vm5711_vm10, %v15591_v49, %v10482_v15  ;;  %v5585_v33 = vmul.f32 1.442695, %v15668_v12  ;;  %v7563_v49 = vld [vmem:[%s18392_s11] sm:$0xf] }
 0x462   : > { %v15671_v44 = vrot.slane %v6336_v4, 7  ;;  %18757 = vst [vmem:[#allocation8_spill] sm:$0xff] %v15673_v41  ;;  %v15681_v39 = vsub.f32 0.0, %v674_v34  ;;  %v5840_v4 = vsel %vm5712_vm12, %v15594_v61, %v10483_v20  ;;  %v5908_v51 = vpack.c.bf16 %v5839_v57, %v5839_v57  ;;  %v18759_v57 = vld [vmem:[#allocation23_spill] sm:$0xff] }
 0x463   : > { %v15675_v46 = vpop.f32.mrf.mxu3  ;;  %v5973_v10 = vunpack.c.l.b16 %v5877_v3  ;;  %v5909_v25 = vpack.c.bf16 %v5840_v4, %v5840_v4  ;;  %11211 = vpow2.f32 %v5583_v27  ;;  %v5682_v55 = vsub.f32 0.0, %v15668_v12 }
 0x464   : > { %v6341_v59 = vor.u32 %v6339_v16, %v15671_v44  ;;  %v5775_v16 = vmul.f32 1.442695, %v15681_v39  ;;  %v6212_v20 = vunpack.c.l.b16 %v5908_v51  ;;  %v4726_v4 = vadd.f32 %v15275_v5, %v18759_v57 }
 0x465   : > { %v15687_v63 = vpop.f32.mrf.mxu2  ;;  %4978 = vrot.lane.b32.xlu2 %v15650_v52, %s11779_s29  ;;  %v15700_v3 = vpack.c.b16 %v5973_v10, %v5972_v23  ;;  %v6213_v52 = vunpack.c.l.b16 %v5909_v25  ;;  %v7754_v27 = vsel %vm1829_vm0, %v7563_v49, 0  ;;  %11213 = vpow2.f32 %v5585_v33 }
 0x466   : > { %v6342_v15 = vsel %vm1186_vm4, %v15568_v56, %v6341_v59  ;;  %v15698_v61 = vpop.f32.mrf.mxu0  ;;  %7763 = vmatpush.bf16.msra.mxu1 %v7754_v27  ;;  %11215 = vpow2.f32 %v5775_v16  ;;  %v5777_v23 = vmul.f32 1.442695, %v5682_v55  ;;  %v15715_v51 = vadd.f32 %v15270_v54, %v4726_v4 }
 0x467   : > { %18758 = vst [vmem:[#allocation74_spill] sm:$0xff] %v15698_v61  ;;  %v6389_v41 = vsel %vm12035_vm6, %v6342_v15, 0  ;;  %v6104_v7 = vshrl.u32 %v15700_v3, 16  ;;  %v6107_v21 = vshll.u32 %v15700_v3, 16  ;;  %v15709_v56 = vpack.c.b16 %v6213_v52, %v6212_v20 }
 0x468   : > { %10499 = vmatmul.msk.bf16.gmra.mxu0 %vm1780_vm5, %v6389_v41  ;;  %v6622_v59 = vpop.f32.mrf.mxu1  ;;  %18761 = vst [vmem:[#allocation75_spill] sm:$0xff] %v15715_v51  ;;  %11217 = vpow2.f32 %v5777_v23  ;;  %vm5522_vm14 = vcmp.gt.f32.partialorder %v15668_v12, 0.0  ;;  %vm5713_vm15 = vcmp.gt.f32.partialorder %v15681_v39, 0.0  ;;  %vm5714_vm1 = vcmp.gt.f32.partialorder %v5682_v55, 0.0 }
 0x469   : > { %18760 = vst [vmem:[#allocation23_spill] sm:$0xff] %v15709_v56  ;;  %v15712_v5 = vrot.slane %v6104_v7, 7  ;;  %v11212_v10 = vpop.eup %11211  ;;  %v6344_v49 = vshrl.u32 %v15709_v56, 16  ;;  %10521 = vmatmul.msk.bf16.gmra.mxu2 %vm1780_vm5, %v14918_v18  ;;  %v6347_v33 = vshll.u32 %v15709_v56, 16  ;;  %v18790_v56 = vld [vmem:[#allocation21_spill] sm:$0xff] }
 0x46a   : > { %v10452_v41 = vadd.f32 -1.0, %v11212_v10  ;;  %10537 = vmatmul.msk.bf16.gmra.mxu3 %vm1780_vm5, %v14928_v42 }
 0x46b   : > { %v15717_v25 = vpop.f32.mrf.mxu3  ;;  %v6109_v52 = vor.u32 %v6107_v21, %v15712_v5  ;;  %v15730_v54 = vrot.slane %v6344_v49, 7  ;;  %v11214_v16 = vpop.eup %11213 }
 0x46c   : > { %v5649_v21 = vsel %vm5521_vm7, %v674_v34, %v10452_v41  ;;  %v11216_v20 = vpop.eup %11215  ;;  %v10453_v4 = vadd.f32 -1.0, %v11214_v16 }
 0x46d   : > { %v15726_v7 = vpop.f32.mrf.mxu2  ;;  %4980 = vrot.lane.b32.xlu2 %v15715_v51, %s11779_s29  ;;  %v6110_v18 = vsel %vm1186_vm4, %v15635_v40, %v6109_v52  ;;  %v6349_v27 = vor.u32 %v6347_v33, %v15730_v54  ;;  %v5878_v23 = vpack.c.bf16 %v5649_v21, %v5649_v21  ;;  %v10484_v10 = vadd.f32 -1.0, %v11216_v20 }
 0x46e   : > { %v6482_v15 = vpop.f32.mrf.mxu0  ;;  %v6150_v42 = vsel %vm12035_vm6, %v6110_v18, 0  ;;  %v11218_v49 = vpop.eup %11217  ;;  %v5650_v61 = vsel %vm5522_vm14, %v15668_v12, %v10453_v4  ;;  %v18766_v4 = vld [vmem:[#allocation46_spill] sm:$0xff] }
 0x46f   : > { %v15735_v57 = vadd.f32 %v6622_v59, %v6482_v15  ;;  %v5879_v34 = vpack.c.bf16 %v5650_v61, %v5650_v61  ;;  %v5974_v59 = vunpack.c.l.b16 %v5878_v23  ;;  %v10485_v52 = vadd.f32 -1.0, %v11218_v49 }
 0x470   : > { %10516 = vmatmul.msk.bf16.gmra.mxu1 %vm1780_vm5, %v6150_v42  ;;  %v15743_v40 = vpop.f32.mrf.mxu1  ;;  %v5841_v41 = vsel %vm5713_vm15, %v15681_v39, %v10484_v10  ;;  %v6350_v33 = vsel %vm1186_vm4, %v15671_v44, %v6349_v27 }
 0x471   : > { %18762 = vst [vmem:[#allocation76_spill] sm:$0xff] %v15735_v57  ;;  %v5975_v15 = vunpack.c.l.b16 %v5879_v34  ;;  %v5842_v18 = vsel %vm5714_vm1, %v5682_v55, %v10485_v52  ;;  %v5910_v12 = vpack.c.bf16 %v5841_v41, %v5841_v41  ;;  %v6390_v10 = vsel %vm12035_vm6, %v6350_v33, 0  ;;  %v11697_v55 = vld [vmem:[%s11901_s23] sm:$0xff]  ;;  %v18774_v57 = vld [vmem:[#allocation9_spill] sm:$0xff] }
 0x472   : > { %18763 = vst [vmem:[#allocation77_spill] sm:$0xff] %v15743_v40  ;;  %v5911_v42 = vpack.c.bf16 %v5842_v18, %v5842_v18  ;;  %v18770_v18 = vld [vmem:[#allocation6_spill] sm:$0xff] }
 0x473   : > { %v15748_v16 = vpop.f32.mrf.mxu3  ;;  %v15755_v49 = vpack.c.b16 %v5975_v15, %v5974_v59  ;;  %v6214_v39 = vunpack.c.l.b16 %v5910_v12 }
 0x474   : > { %18764 = vst [vmem:[#allocation78_spill] sm:$0xff] %v15748_v16  ;;  %v6215_v44 = vunpack.c.l.b16 %v5911_v42 }
 0x475   : > { %v15750_v21 = vpop.f32.mrf.mxu2  ;;  %v5300_v20 = vpop.permute.xlu1 %5299  ;;  %18768 = vst [vmem:[#allocation80_spill] sm:$0xff] %v15755_v49  ;;  %v6112_v34 = vshrl.u32 %v15755_v49, 16  ;;  %v6115_v52 = vshll.u32 %v15755_v49, 16 }
 0x476   : > { %18765 = vst [vmem:[#allocation79_spill] sm:$0xff] %v15750_v21  ;;  %v5395_v61 = vmul.f32 %v5300_v20, %v18766_v4  ;;  %v15753_v23 = vpop.f32.mrf.mxu0  ;;  %v15770_v59 = vpack.c.b16 %v6215_v44, %v6214_v39  ;;  %v18771_v4 = vld [vmem:[#allocation10_spill] sm:$0xff]  ;;  %v18772_v44 = vld [vmem:[#allocation7_spill] sm:$0xff] }
 0x477   : > { %18767 = vst [vmem:[#allocation46_spill] sm:$0xff] %v15753_v23  ;;  %v6114_v33 = vrot.slane %v6112_v34, 7  ;;  %v18773_v34 = vld [vmem:[#allocation54_spill] sm:$0xff] }
 0x478   : > { %v15766_v27 = vadd.f32 %v11697_v55, %v5395_v61  ;;  %18769 = vst [vmem:[#allocation81_spill] sm:$0xff] %v15770_v59  ;;  %10500 = vmatmul.msk.bf16.gmra.mxu0 %vm1780_vm5, %v6390_v10  ;;  %v6627_v41 = vpop.f32.mrf.mxu1  ;;  %v6352_v15 = vshrl.u32 %v15770_v59, 16  ;;  %v6355_v42 = vshll.u32 %v15770_v59, 16 }
 0x479   : > { %10522 = vmatmul.msk.bf16.gmra.mxu2 %vm1780_vm5, %v18770_v18  ;;  %v6117_v20 = vor.u32 %v6115_v52, %v6114_v33 }
 0x47a   : > { %5459 = vst.msk [vmem:[%s15763_s22] sm:$0xff] %vm1780_vm5, %v15766_v27  ;;  %v7211_v12 = vmul.f32 1.442695, %v15766_v27  ;;  %10538 = vmatmul.msk.bf16.gmra.mxu3 %vm1780_vm5, %v18771_v4  ;;  %v6354_v10 = vrot.slane %v6352_v15, 7  ;;  %v15788_v52 = vsub.f32 0.0, %v15766_v27  ;;  %vm7179_vm2 = vcmp.gt.f32.partialorder %v15766_v27, 0.0 }
 0x47b   : > { %v6118_v18 = vsel %vm1186_vm4, %v15712_v5, %v6117_v20  ;;  %v4875_v33 = vpop.f32.mrf.mxu3  ;;  %v15801_v5 = vld [vmem:[%s18388_s7] ss:$0 sm:$0xff] }
 0x47c   : > { %v6151_v15 = vsel %vm12035_vm6, %v6118_v18, 0  ;;  %11219 = vpow2.f32 %v7211_v12  ;;  %vm7387_vm3 = vcmp.gt.f32.partialorder %v15788_v52, 0.0 }
 0x47d   : > { %v4703_v61 = vpop.f32.mrf.mxu2  ;;  %v5302_v39 = vpop.permute.xlu2 %5301 }
 0x47e   : > { %v4738_v55 = vadd.f32 %v4703_v61, %v18772_v44  ;;  %v5396_v40 = vmul.f32 %v5302_v39, %v18773_v34  ;;  %v4963_v23 = vpop.permute.xlu1 %4962  ;;  %v6487_v16 = vpop.f32.mrf.mxu0  ;;  %v11698_v39 = vld [vmem:[%s11901_s23 + $0x8] sm:$0xff]  ;;  %v6357_v34 = vor.u32 %v6355_v42, %v6354_v10 }
 0x47f   : > { %v5049_v4 = vadd.f32 %v4963_v23, %v18774_v57  ;;  %v15791_v21 = vadd.f32 %v6627_v41, %v6487_v16 }
 0x480   : > { %v15795_v61 = vadd.f32 %v4875_v33, %v4738_v55  ;;  %v5428_v44 = vadd.f32 %v11698_v39, %v5396_v40  ;;  %10517 = vmatmul.msk.bf16.gmra.mxu1 %vm1780_vm5, %v6151_v15  ;;  %v15809_v23 = vpop.f32.mrf.mxu1  ;;  %v7419_v40 = vmul.f32 1.442695, %v15788_v52  ;;  %v6358_v42 = vsel %vm1186_vm4, %v15730_v54, %v6357_v34  ;;  %v18779_v15 = vld [vmem:[#allocation12_spill] sm:$0xff] }
 0x481   : > { %18775 = vst [vmem:[#allocation6_spill] sm:$0xff] %v15791_v21  ;;  %v15804_v20 = vadd.f32 %v15801_v5, %v5049_v4  ;;  %v6391_v4 = vsel %vm12035_vm6, %v6358_v42, 0 }
 0x482   : > { %18776 = vst [vmem:[#allocation10_spill] sm:$0xff] %v15795_v61  ;;  %v7213_v57 = vmul.f32 1.442695, %v5428_v44  ;;  %v7356_v16 = vsub.f32 0.0, %v5428_v44  ;;  %v11220_v55 = vpop.eup %11219  ;;  %vm7180_vm11 = vcmp.gt.f32.partialorder %v5428_v44, 0.0 }
 0x483   : > { %5460 = vst.msk [vmem:[%s15763_s22 + $0x8] sm:$0xff] %vm1780_vm5, %v5428_v44  ;;  %v5116_v41 = vsub.f32 0.0, %v15804_v20  ;;  %v10550_v61 = vadd.f32 -1.0, %v11220_v55 }
 0x484   : > { %18777 = vst [vmem:[#allocation7_spill] sm:$0xff] %v15809_v23  ;;  %11221 = vpow2.f32 %v7213_v57  ;;  %v7421_v12 = vmul.f32 1.442695, %v7356_v16  ;;  %v18780_v57 = vld [vmem:[#allocation60_spill] sm:$0xff]  ;;  %vm7388_vm13 = vcmp.gt.f32.partialorder %v7356_v16, 0.0 }
 0x485   : > { %v5157_v10 = vmul.f32 1.442695, %v5116_v41  ;;  %v11700_v41 = vld [vmem:[%s11901_s23 + $0x10] sm:$0xff] }
 0x486   : > { %11223 = vpow2.f32 %v7421_v12  ;;  %v4965_v18 = vpop.permute.xlu1 %4964  ;;  %v15815_v33 = vpop.f32.mrf.mxu0 }
 0x487   : > { %18778 = vst [vmem:[#allocation54_spill] sm:$0xff] %v15815_v33  ;;  %11225 = vpow2.f32 %v5157_v10  ;;  %v5050_v39 = vadd.f32 %v4965_v18, %v18779_v15  ;;  %v5304_v23 = vpop.permute.xlu2 %5303  ;;  %v18781_v18 = vld [vmem:[#allocation13_spill] sm:$0xff] }
 0x488   : > { %11227 = vpow2.f32 %v7419_v40  ;;  %v5397_v21 = vmul.f32 %v5304_v23, %v18780_v57  ;;  %10501 = vmatmul.msk.bf16.gmra.mxu0 %vm1780_vm5, %v6391_v4  ;;  %v18782_v23 = vld [vmem:[#allocation11_spill] sm:$0xff] }
 0x489   : > { %v15822_v54 = vadd.f32 %v15801_v5, %v5050_v39  ;;  %10523 = vmatmul.msk.bf16.gmra.mxu2 %vm1780_vm5, %v18781_v18 }
 0x48a   : > { %v11222_v34 = vpop.eup %11221  ;;  %v15826_v12 = vadd.f32 %v11700_v41, %v5397_v21  ;;  %v6632_v35 = vpop.f32.mrf.mxu1  ;;  %10539 = vmatmul.msk.bf16.gmra.mxu3 %vm1780_vm5, %v18782_v23  ;;  %v7307_v21 = vsel %vm7179_vm2, %v15766_v27, %v10550_v61  ;;  %v18784_v27 = vld [vmem:[#allocation51_spill] sm:$0xff] }
 0x48b   : > { %v10551_v10 = vadd.f32 -1.0, %v11222_v34  ;;  %v5117_v42 = vsub.f32 0.0, %v15822_v54 }
 0x48c   : > { %v11224_v40 = vpop.eup %11223  ;;  %5461 = vst.msk [vmem:[%s15763_s22 + $0x10] sm:$0xff] %vm1780_vm5, %v15826_v12  ;;  %v7215_v41 = vmul.f32 1.442695, %v15826_v12  ;;  %v15840_v49 = vsub.f32 0.0, %v15826_v12  ;;  %vm7181_vm9 = vcmp.gt.f32.partialorder %v15826_v12, 0.0 }
 0x48d   : > { %v11226_v55 = vpop.eup %11225  ;;  %v7308_v4 = vsel %vm7180_vm11, %v5428_v44, %v10551_v10  ;;  %v5159_v15 = vmul.f32 1.442695, %v5117_v42  ;;  %v10583_v59 = vadd.f32 -1.0, %v11224_v40  ;;  %v18785_v10 = vld [vmem:[#allocation53_spill] sm:$0xff] }
 0x48e   : > { %v11228_v39 = vpop.eup %11227  ;;  %v7339_v57 = vpack.c.bf16 %v7308_v4, %v7307_v21  ;;  %v5212_v34 = vadd.f32 1.0, %v11226_v55  ;;  %v6492_v18 = vpop.f32.mrf.mxu0  ;;  %v11701_v55 = vld [vmem:[%s11901_s23 + $0x18] sm:$0xff]  ;;  %vm7389_vm7 = vcmp.gt.f32.partialorder %v15840_v49, 0.0 }
 0x48f   : > { %11229 = vpow2.f32 %v5159_v15  ;;  %v5306_v33 = vpop.permute.xlu0 %5305  ;;  %v15842_v23 = vadd.f32 %v6632_v35, %v6492_v18  ;;  %v4967_v44 = vpop.permute.xlu2 %4966  ;;  %v10582_v21 = vadd.f32 -1.0, %v11228_v39  ;;  %v7516_v15 = vsel %vm7388_vm13, %v7356_v16, %v10583_v59 }
 0x490   : > { %11231 = vrcp.f32 %v5212_v34  ;;  %v5398_v61 = vmul.f32 %v5306_v33, %v18784_v27  ;;  %v5051_v42 = vadd.f32 %v4967_v44, %v18785_v10  ;;  %10630 = vmatmul.msk.bf16.vlgmr.msra.gmra.mxu1 %vm1780_vm5, %v7339_v57  ;;  %v7423_v35 = vmul.f32 1.442695, %v15840_v49 }
 0x491   : > { %18783 = vst [vmem:[#allocation9_spill] sm:$0xff] %v15842_v23  ;;  %11233 = vpow2.f32 %v7215_v41  ;;  %v7515_v57 = vsel %vm7387_vm3, %v15788_v52, %v10582_v21  ;;  %v18789_v23 = vld [vmem:[#allocation25_spill] sm:$0xff] }
 0x492   : > { %v5430_v4 = vadd.f32 %v11701_v55, %v5398_v61  ;;  %v15849_v40 = vadd.f32 %v15801_v5, %v5051_v42  ;;  %v15851_v51 = vpop.f32.mrf.mxu1  ;;  %v7547_v61 = vpack.c.bf16 %v7516_v15, %v7515_v57  ;;  %v18788_v55 = vld [vmem:[#allocation56_spill] sm:$0xff]  ;;  %v4399_v52 = vadd.f32 %v18790_v56, %v18789_v23  ;;  %v18793_v23 = vld [vmem:[#allocation22_spill] sm:$0xff] }
 0x493   : > { %18786 = vst [vmem:[#allocation12_spill] sm:$0xff] %v15851_v51 }
 0x494   : > { %5462 = vst.msk [vmem:[%s15763_s22 + $0x18] sm:$0xff] %vm1780_vm5, %v5430_v4  ;;  %v7217_v33 = vmul.f32 1.442695, %v5430_v4  ;;  %v7358_v39 = vsub.f32 0.0, %v5430_v4  ;;  %v5118_v18 = vsub.f32 0.0, %v15849_v40  ;;  %vm7182_vm10 = vcmp.gt.f32.partialorder %v5430_v4, 0.0 }
 0x495   : > { %v11230_v34 = vpop.eup %11229 }
 0x496   : > { %v11232_v41 = vpop.eup %11231  ;;  %v5213_v27 = vadd.f32 1.0, %v11230_v34  ;;  %11235 = vpow2.f32 %v7217_v33  ;;  %v7425_v59 = vmul.f32 1.442695, %v7358_v39  ;;  %v5161_v16 = vmul.f32 1.442695, %v5118_v18  ;;  %v15860_v44 = vpop.f32.mrf.mxu0  ;;  %v18791_v33 = vld [vmem:[#allocation44_spill] sm:$0xff] }
 0x497   : > { %5317 = vrot.lane.b32.xlu0 %v11232_v41, %s11778_s25  ;;  %18787 = vst [vmem:[#allocation60_spill] sm:$0xff] %v15860_v44  ;;  %11237 = vpow2.f32 %v7423_v35  ;;  %v11234_v10 = vpop.eup %11233  ;;  %v4969_v42 = vpop.permute.xlu2 %4968  ;;  %v18792_v18 = vld [vmem:[#allocation45_spill] sm:$0xff]  ;;  %vm7390_vm12 = vcmp.gt.f32.partialorder %v7358_v39, 0.0 }
 0x498   : > { %11239 = vrcp.f32 %v5213_v27  ;;  %v5052_v51 = vadd.f32 %v4969_v42, %v18788_v55  ;;  %10614 = vmatmul.msk.bf16.vlgmr.msra.gmra.mxu0 %vm1780_vm5, %v7547_v61  ;;  %v10552_v15 = vadd.f32 -1.0, %v11234_v10  ;;  %v4555_v61 = vadd.f32 %v18793_v23, %v4399_v52 }
 0x499   : > { %11241 = vpow2.f32 %v5161_v16  ;;  %10524 = vmatmul.msk.bf16.gmra.mxu2 %vm1780_vm5, %v18791_v33 }
 0x49a   : > { %11243 = vpow2.f32 %v7425_v59  ;;  %v15867_v21 = vadd.f32 %v15801_v5, %v5052_v51  ;;  %v6637_v34 = vpop.f32.mrf.mxu1  ;;  %10540 = vmatmul.msk.bf16.gmra.mxu3 %vm1780_vm5, %v18792_v18  ;;  %v7309_v16 = vsel %vm7181_vm9, %v15826_v12, %v10552_v15  ;;  %v4727_v55 = vadd.f32 %v15316_v62, %v4555_v61  ;;  %v18800_v61 = vld [vmem:[#allocation28_spill] sm:$0xff] }
 0x49c   : > { %v11236_v35 = vpop.eup %11235  ;;  %v5119_v41 = vsub.f32 0.0, %v15867_v21 }
 0x49d   : > { %v11238_v57 = vpop.eup %11237  ;;  %v10553_v27 = vadd.f32 -1.0, %v11236_v35 }
 0x49e   : > { %v11240_v56 = vpop.eup %11239  ;;  %v5163_v59 = vmul.f32 1.442695, %v5119_v41  ;;  %v6497_v18 = vpop.f32.mrf.mxu0  ;;  %v10584_v52 = vadd.f32 -1.0, %v11238_v57 }
 0x49f   : > { %v11242_v51 = vpop.eup %11241  ;;  %5319 = vrot.lane.b32.xlu0 %v11240_v56, %s11778_s25  ;;  %v7310_v10 = vsel %vm7182_vm10, %v5430_v4, %v10553_v27  ;;  %v15879_v35 = vadd.f32 %v6637_v34, %v6497_v18  ;;  %v15886_v4 = vadd.f32 %v15307_v17, %v4727_v55  ;;  %v18798_v17 = vld [vmem:[#allocation17_spill] sm:$0xff] }
 0x4a0   : > { %v11244_v42 = vpop.eup %11243  ;;  %v5214_v33 = vadd.f32 1.0, %v11242_v51  ;;  %v7340_v44 = vpack.c.bf16 %v7310_v10, %v7309_v16  ;;  %11245 = vpow2.f32 %v5163_v59  ;;  %v7517_v62 = vsel %vm7389_vm7, %v15840_v49, %v10584_v52  ;;  %v18799_v49 = vld [vmem:[#allocation47_spill] sm:$0xff]  ;;  %v18801_v51 = vld [vmem:[#allocation24_spill] sm:$0xff]  ;;  %v18802_v52 = vld [vmem:[#allocation65_spill] sm:$0xff] }
 0x4a1   : > { %18794 = vst [vmem:[#allocation13_spill] sm:$0xff] %v15879_v35  ;;  %v10585_v23 = vadd.f32 -1.0, %v11244_v42  ;;  %v4401_v59 = vadd.f32 %v18801_v51, %v18800_v61  ;;  %v16002_v35 = vpop.f32.mrf.mxu2 }
 0x4a2   : > { %11247 = vrcp.f32 %v5214_v33  ;;  %10631 = vmatmul.msk.bf16.gmra.mxu1 %vm1780_vm5, %v7340_v44  ;;  %v15883_v12 = vpop.f32.mrf.mxu1  ;;  %v18797_v44 = vld [vmem:[#allocation27_spill] sm:$0xff] }
 0x4a3   : > { %v7518_v41 = vsel %vm7390_vm12, %v7358_v39, %v10585_v23  ;;  %18795 = vst [vmem:[#allocation11_spill] sm:$0xff] %v15883_v12  ;;  %v4728_v39 = vadd.f32 %v15353_v45, %v18797_v44 }
 0x4a4   : > { %v7548_v15 = vpack.c.bf16 %v7518_v41, %v7517_v62  ;;  %v18803_v41 = vld [vmem:[#allocation26_spill] sm:$0xff] }
 0x4a5   : > { %v15904_v16 = vadd.f32 %v15345_v43, %v4728_v39  ;;  %v4557_v62 = vadd.f32 %v18803_v41, %v4401_v59  ;;  %v11702_v43 = vld [vmem:[%s11901_s23 + $0x38] sm:$0xff]  ;;  %v18808_v41 = vld [vmem:[#allocation50_spill] sm:$0xff] }
 0x4a6   : > { %v11246_v27 = vpop.eup %11245  ;;  %v15891_v56 = vpop.f32.mrf.mxu0 }
 0x4a7   : > { %4982 = vrot.lane.b32.xlu0 %v15886_v4, %s11779_s29  ;;  %v5215_v57 = vadd.f32 1.0, %v11246_v27  ;;  %18796 = vst [vmem:[#allocation51_spill] sm:$0xff] %v15891_v56  ;;  %v4729_v44 = vadd.f32 %v15399_v0, %v4557_v62 }
 0x4a8   : > { %v11248_v34 = vpop.eup %11247  ;;  %10615 = vmatmul.msk.bf16.gmra.mxu0 %vm1780_vm5, %v7548_v15 }
 0x4a9   : > { %5321 = vrot.lane.b32.xlu1 %v11248_v34, %s11778_s25  ;;  %11249 = vrcp.f32 %v5215_v57  ;;  %10525 = vmatmul.msk.bf16.gmra.mxu2 %vm1780_vm5, %v18798_v17  ;;  %v11703_v34 = vld [vmem:[%s11901_s23 + $0x20] sm:$0xff] }
 0x4aa   : > { %10541 = vmatmul.msk.bf16.gmra.mxu3 %vm1780_vm5, %v18799_v49  ;;  %v15934_v49 = vadd.f32 %v15396_v37, %v4729_v44 }
 0x4ac   : > { %v6642_v45 = vpop.f32.mrf.mxu1 }
 0x4af   : > { %4984 = vrot.lane.b32.xlu0 %v15904_v16, %s11779_s29  ;;  %v5314_v10 = vpop.permute.xlu2 %5313  ;;  %v5308_v42 = vpop.permute.xlu0 %5307 }
 0x4b0   : > { %v11250_v55 = vpop.eup %11249  ;;  %v6502_v33 = vpop.f32.mrf.mxu0  ;;  %v5402_v18 = vmul.f32 %v5314_v10, %v15462_v50  ;;  %v5399_v23 = vmul.f32 %v5308_v42, %v18802_v52  ;;  %v18806_v10 = vld [vmem:[#allocation69_spill] sm:$0xff] }
 0x4b1   : > { %v15911_v15 = vadd.f32 %v6642_v45, %v6502_v33  ;;  %5323 = vrot.lane.b32.xlu1 %v11250_v55, %s11778_s25  ;;  %v11704_v33 = vld [vmem:[%s11901_s23 + $0x40] sm:$0xff] }
 0x4b2   : > { %v15915_v27 = vadd.f32 %v11702_v43, %v5402_v18  ;;  %v15918_v57 = vadd.f32 %v11703_v34, %v5399_v23  ;;  %v11705_v18 = vld [vmem:[%s11901_s23 + $0x28] sm:$0xff]  ;;  %v18807_v23 = vld [vmem:[#allocation30_spill] sm:$0xff]  ;;  %v18809_v43 = vld [vmem:[#allocation52_spill] sm:$0xff] }
 0x4b3   : > { %18804 = vst [vmem:[#allocation53_spill] sm:$0xff] %v15911_v15 }
 0x4b4   : > { %5466 = vst.msk [vmem:[%s15763_s22 + $0x38] sm:$0xff] %vm1780_vm5, %v15915_v27  ;;  %v7219_v50 = vmul.f32 1.442695, %v15918_v57  ;;  %v15928_v39 = vpop.f32.mrf.mxu1  ;;  %v15931_v17 = vsub.f32 0.0, %v15918_v57  ;;  %vm7183_vm14 = vcmp.gt.f32.partialorder %v15918_v57, 0.0  ;;  %vm7186_vm13 = vcmp.gt.f32.partialorder %v15915_v27, 0.0 }
 0x4b5   : > { %5463 = vst.msk [vmem:[%s15763_s22 + $0x20] sm:$0xff] %vm1780_vm5, %v15918_v57 }
 0x4b6   : > { %18805 = vst [vmem:[#allocation56_spill] sm:$0xff] %v15928_v39  ;;  %11251 = vpow2.f32 %v7219_v50  ;;  %v7427_v55 = vmul.f32 1.442695, %v15931_v17  ;;  %vm7391_vm15 = vcmp.gt.f32.partialorder %v15931_v17, 0.0 }
 0x4b7   : > { %v5316_v61 = vpop.permute.xlu2 %5315  ;;  %v5310_v0 = vpop.permute.xlu1 %5309 }
 0x4b8   : > { %v5403_v51 = vmul.f32 %v5316_v61, %v15517_v38  ;;  %v5400_v59 = vmul.f32 %v5310_v0, %v15364_v22  ;;  %v4971_v45 = vpop.permute.xlu0 %4970  ;;  %v4730_v38 = vadd.f32 %v15453_v31, %v18807_v23  ;;  %v15958_v34 = vpop.f32.mrf.mxu0  ;;  %11253 = vpow2.f32 %v7427_v55 }
 0x4b9   : > { %v5053_v42 = vadd.f32 %v4971_v45, %v18806_v10  ;;  %4986 = vrot.lane.b32.xlu1 %v15934_v49, %s11779_s29  ;;  %10526 = vmatmul.msk.bf16.gmra.mxu2 %vm1780_vm5, %v18808_v41  ;;  %18810 = vst [vmem:[#allocation25_spill] sm:$0xff] %v15958_v34 }
 0x4ba   : > { %v15943_v37 = vadd.f32 %v11704_v33, %v5403_v51  ;;  %v5432_v52 = vadd.f32 %v11705_v18, %v5400_v59  ;;  %10542 = vmatmul.msk.bf16.gmra.mxu3 %vm1780_vm5, %v18809_v43  ;;  %v15966_v0 = vadd.f32 %v15441_v58, %v4730_v38  ;;  %v18812_v33 = vld [vmem:[#allocation66_spill] sm:$0xff]  ;;  %v11706_v38 = vld [vmem:[%s11901_s23 + $0x30] sm:$0xff] }
 0x4bb   : > { %v15949_v22 = vadd.f32 %v15801_v5, %v5053_v42 }
 0x4bc   : > { %5467 = vst.msk [vmem:[%s15763_s22 + $0x40] sm:$0xff] %vm1780_vm5, %v15943_v37  ;;  %v7221_v62 = vmul.f32 1.442695, %v5432_v52  ;;  %v15963_v31 = vsub.f32 0.0, %v5432_v52  ;;  %v11252_v61 = vpop.eup %11251  ;;  %vm7184_vm1 = vcmp.gt.f32.partialorder %v5432_v52, 0.0  ;;  %vm7187_vm10 = vcmp.gt.f32.partialorder %v15943_v37, 0.0 }
 0x4bd   : > { %5464 = vst.msk [vmem:[%s15763_s22 + $0x28] sm:$0xff] %vm1780_vm5, %v5432_v52  ;;  %v5120_v44 = vsub.f32 0.0, %v15949_v22  ;;  %v6647_v50 = vpop.f32.mrf.mxu1 }
 0x4be   : > { %11255 = vpow2.f32 %v7221_v62  ;;  %18811 = vst [vmem:[#allocation21_spill] sm:$0xff] %v15966_v0  ;;  %v7429_v10 = vmul.f32 1.442695, %v15963_v31  ;;  %v10554_v62 = vadd.f32 -1.0, %v11252_v61  ;;  %v11254_v43 = vpop.eup %11253  ;;  %vm7392_vm2 = vcmp.gt.f32.partialorder %v15963_v31, 0.0 }
 0x4bf   : > { %v5165_v51 = vmul.f32 1.442695, %v5120_v44  ;;  %v4979_v59 = vpop.permute.xlu2 %4978  ;;  %v5312_v45 = vpop.permute.xlu1 %5311 }
 0x4c0   : > { %v5057_v42 = vadd.f32 %v4979_v59, %v15580_v13  ;;  %v5401_v18 = vmul.f32 %v5312_v45, %v18812_v33  ;;  %v4973_v23 = vpop.permute.xlu0 %4972  ;;  %v7225_v13 = vmul.f32 1.442695, %v15915_v27 }
 0x4c1   : > { %11257 = vpow2.f32 %v5165_v51  ;;  %v5054_v55 = vadd.f32 %v4973_v23, %v15438_v28  ;;  %4988 = vrot.lane.b32.xlu1 %v15966_v0, %s11779_s29  ;;  %v7311_v23 = vsel %vm7183_vm14, %v15918_v57, %v10554_v62  ;;  %v16007_v57 = vpop.f32.mrf.mxu3 }
 0x4c2   : > { %v15975_v58 = vadd.f32 %v15801_v5, %v5057_v42  ;;  %v15978_v41 = vadd.f32 %v11706_v38, %v5401_v18  ;;  %11259 = vpow2.f32 %v7429_v10  ;;  %v15996_v42 = vsub.f32 0.0, %v15915_v27 }
 0x4c3   : > { %v15982_v44 = vadd.f32 %v15801_v5, %v5054_v55  ;;  %v10586_v55 = vadd.f32 -1.0, %v11254_v43 }
 0x4c4   : > { %18813 = vst [vmem:[#allocation44_spill] sm:$0xff] %v15975_v58  ;;  %v11256_v51 = vpop.eup %11255  ;;  %v5124_v28 = vsub.f32 0.0, %v15975_v58  ;;  %v7223_v59 = vmul.f32 1.442695, %v15978_v41  ;;  %v15991_v45 = vsub.f32 0.0, %v15978_v41  ;;  %vm7185_vm11 = vcmp.gt.f32.partialorder %v15978_v41, 0.0 }
 0x4c5   : > { %5465 = vst.msk [vmem:[%s15763_s22 + $0x30] sm:$0xff] %vm1780_vm5, %v15978_v41  ;;  %v5121_v61 = vsub.f32 0.0, %v15982_v44  ;;  %v10555_v10 = vadd.f32 -1.0, %v11256_v51  ;;  %v15998_v18 = vpop.f32.mrf.mxu1  ;;  %v6507_v12 = vpop.f32.mrf.mxu0  ;;  %vm7394_vm9 = vcmp.gt.f32.partialorder %v15996_v42, 0.0 }
 0x4c6   : > { %v5173_v33 = vmul.f32 1.442695, %v5124_v28  ;;  %18814 = vst [vmem:[#allocation45_spill] sm:$0xff] %v15998_v18  ;;  %11261 = vpow2.f32 %v7223_v59  ;;  %v7431_v51 = vmul.f32 1.442695, %v15991_v45  ;;  %v16004_v0 = vadd.f32 %v6647_v50, %v6507_v12 }
 0x4c7   : > { %v11258_v38 = vpop.eup %11257  ;;  %v5167_v56 = vmul.f32 1.442695, %v5121_v61  ;;  %v4981_v39 = vpop.permute.xlu2 %4980  ;;  %v7312_v34 = vsel %vm7184_vm1, %v5432_v52, %v10555_v10  ;;  %v7433_v12 = vmul.f32 1.442695, %v15996_v42  ;;  %vm7393_vm3 = vcmp.gt.f32.partialorder %v15991_v45, 0.0 }
 0x4c8   : > { %v11260_v15 = vpop.eup %11259  ;;  %v5216_v58 = vadd.f32 1.0, %v11258_v38  ;;  %11263 = vpow2.f32 %v5173_v33  ;;  %v5058_v28 = vadd.f32 %v4981_v39, %v15627_v47  ;;  %v4975_v18 = vpop.permute.xlu1 %4974  ;;  %v7341_v43 = vpack.c.bf16 %v7312_v34, %v7311_v23  ;;  %v18816_v34 = vld [vmem:[#allocation61_spill] sm:$0xff] }
 0x4c9   : > { %11265 = vpow2.f32 %v5167_v56  ;;  %v5055_v62 = vadd.f32 %v4975_v18, %v15469_v30  ;;  %v10587_v52 = vadd.f32 -1.0, %v11260_v15  ;;  %v7519_v47 = vsel %vm7391_vm15, %v15931_v17, %v10586_v55  ;;  %v18815_v56 = vld [vmem:[#allocation59_spill] sm:$0xff] }
 0x4ca   : > { %11267 = vrcp.f32 %v5216_v58  ;;  %v16011_v59 = vadd.f32 %v15801_v5, %v5058_v28  ;;  %10632 = vmatmul.msk.bf16.gmra.mxu1 %vm1780_vm5, %v7341_v43  ;;  %10527 = vmatmul.msk.bf16.gmra.mxu2 %vm1780_vm5, %v18815_v56  ;;  %v6716_v28 = vpop.f32.mrf.mxu2 }
 0x4cb   : > { %v16016_v50 = vadd.f32 %v15801_v5, %v5055_v62  ;;  %v7520_v30 = vsel %vm7392_vm2, %v15963_v31, %v10587_v52  ;;  %11269 = vpow2.f32 %v7225_v13  ;;  %10543 = vmatmul.msk.bf16.gmra.mxu3 %vm1780_vm5, %v18816_v34  ;;  %v18818_v52 = vld [vmem:[#allocation55_spill] sm:$0xff] }
 0x4cc   : > { %v5125_v15 = vsub.f32 0.0, %v16011_v59  ;;  %v7549_v39 = vpack.c.bf16 %v7520_v30, %v7519_v47  ;;  %11271 = vpow2.f32 %v7431_v51  ;;  %v11262_v58 = vpop.eup %11261  ;;  %v6796_v47 = vadd.f32 %v6716_v28, %v18818_v52 }
 0x4cd   : > { %v5122_v61 = vsub.f32 0.0, %v16016_v50  ;;  %11273 = vpow2.f32 %v7433_v12  ;;  %v16030_v13 = vpop.f32.mrf.mxu0  ;;  %v6652_v23 = vpop.f32.mrf.mxu1  ;;  %v10556_v56 = vadd.f32 -1.0, %v11262_v58 }
 0x4ce   : > { %v11264_v10 = vpop.eup %11263  ;;  %v5175_v33 = vmul.f32 1.442695, %v5125_v15  ;;  %10616 = vmatmul.msk.bf16.gmra.mxu0 %vm1780_vm5, %v7549_v39  ;;  %18817 = vst [vmem:[#allocation22_spill] sm:$0xff] %v16030_v13  ;;  %v6872_v12 = vpop.f32.mrf.mxu3 }
 0x4cf   : > { %v11266_v17 = vpop.eup %11265  ;;  %v5220_v31 = vadd.f32 1.0, %v11264_v10  ;;  %v5169_v18 = vmul.f32 1.442695, %v5122_v61  ;;  %v16038_v39 = vadd.f32 %v6872_v12, %v6796_v47  ;;  %v18820_v61 = vld [vmem:[#allocation31_spill] sm:$0xff]  ;;  %v18821_v10 = vld [vmem:[#allocation29_spill] sm:$0xff] }
 0x4d0   : > { %v11268_v55 = vpop.eup %11267  ;;  %v5217_v38 = vadd.f32 1.0, %v11266_v17  ;;  %11275 = vpow2.f32 %v5175_v33  ;;  %v4977_v51 = vpop.permute.xlu1 %4976  ;;  %v4403_v33 = vadd.f32 %v18821_v10, %v18820_v61 }
 0x4d1   : > { %v11270_v62 = vpop.eup %11269  ;;  %11277 = vrcp.f32 %v5220_v31  ;;  %v5056_v43 = vadd.f32 %v4977_v51, %v15538_v26  ;;  %5325 = vrot.lane.b32.xlu2 %v11268_v55, %s11778_s25  ;;  %18819 = vst [vmem:[#allocation27_spill] sm:$0xff] %v16038_v39  ;;  %v18822_v26 = vld [vmem:[#allocation58_spill] sm:$0xff]  ;;  %v18823_v31 = vld [vmem:[#allocation57_spill] sm:$0xff] }
 0x4d2   : > { %v11272_v30 = vpop.eup %11271  ;;  %11279 = vrcp.f32 %v5217_v38  ;;  %v10557_v17 = vadd.f32 -1.0, %v11270_v62  ;;  %v6595_v55 = vadd.f32 %v18823_v31, %v18822_v26  ;;  %v18824_v62 = vld [vmem:[#allocation4_spill] sm:$0xff] }
 0x4d3   : > { %11281 = vpow2.f32 %v5169_v18  ;;  %v16036_v15 = vadd.f32 %v15801_v5, %v5056_v43  ;;  %v11274_v34 = vpop.eup %11273  ;;  %v10588_v38 = vadd.f32 -1.0, %v11272_v30  ;;  %v7313_v18 = vsel %vm7185_vm11, %v15978_v41, %v10556_v56  ;;  %v6718_v30 = vpop.f32.mrf.mxu2 }
 0x4d4   : > { %v10589_v12 = vadd.f32 -1.0, %v11274_v34  ;;  %v4559_v10 = vadd.f32 %v18824_v62, %v4403_v33  ;;  %v7314_v26 = vsel %vm7186_vm13, %v15915_v27, %v10557_v17 }
 0x4d5   : > { %v5123_v51 = vsub.f32 0.0, %v16036_v15  ;;  %v6512_v52 = vpop.f32.mrf.mxu0  ;;  %v16054_v56 = vpop.f32.mrf.mxu1  ;;  %v7342_v31 = vpack.c.bf16 %v7314_v26, %v7313_v18  ;;  %v7521_v34 = vsel %vm7393_vm3, %v15991_v45, %v10588_v38  ;;  %v18828_v18 = vld [vmem:[#allocation38_spill] sm:$0xff]  ;;  %v18830_v38 = vld [vmem:[#allocation67_spill] sm:$0xff] }
 0x4d6   : > { %v11276_v58 = vpop.eup %11275  ;;  %v16049_v13 = vadd.f32 %v6652_v23, %v6512_v52  ;;  %18825 = vst [vmem:[#allocation17_spill] sm:$0xff] %v16054_v56  ;;  %v6874_v33 = vpop.f32.mrf.mxu3  ;;  %v4731_v27 = vadd.f32 %v15499_v9, %v4559_v10  ;;  %v7522_v17 = vsel %vm7394_vm9, %v15996_v42, %v10589_v12  ;;  %v18832_v12 = vld [vmem:[#allocation37_spill] sm:$0xff]  ;;  %v18833_v26 = vld [vmem:[#allocation62_spill] sm:$0xff] }
 0x4d7   : > { %v11278_v28 = vpop.eup %11277  ;;  %v5221_v43 = vadd.f32 1.0, %v11276_v58  ;;  %v5171_v47 = vmul.f32 1.442695, %v5123_v51  ;;  %v6797_v51 = vadd.f32 %v6718_v30, %v6595_v55  ;;  %v7550_v55 = vpack.c.bf16 %v7522_v17, %v7521_v34  ;;  %v18837_v17 = vld [vmem:[#allocation63_spill] sm:$0xff] }
 0x4d8   : > { %v11280_v61 = vpop.eup %11279  ;;  %5333 = vrot.lane.b32.xlu1 %v11278_v28, %s11778_s25  ;;  %v18827_v28 = vld [vmem:[#allocation14_spill] sm:$0xff]  ;;  %v16072_v52 = vadd.f32 %v15489_v48, %v4731_v27  ;;  %v18834_v48 = vld [vmem:[#allocation33_spill] sm:$0xff]  ;;  %v18836_v27 = vld [vmem:[#allocation64_spill] sm:$0xff] }
 0x4d9   : > { %v11282_v41 = vpop.eup %11281  ;;  %11283 = vrcp.f32 %v5221_v43  ;;  %5327 = vrot.lane.b32.xlu2 %v11280_v61, %s11778_s25  ;;  %v16062_v58 = vadd.f32 %v6874_v33, %v6797_v51  ;;  %v18829_v43 = vld [vmem:[#allocation35_spill] sm:$0xff]  ;;  %v4732_v51 = vadd.f32 %v15551_v14, %v18834_v48 }
 0x4da   : > { %v5218_v23 = vadd.f32 1.0, %v11282_v41  ;;  %11285 = vpow2.f32 %v5171_v47  ;;  %10633 = vmatmul.msk.bf16.gmra.mxu1 %vm1780_vm5, %v7342_v31  ;;  %10528 = vmatmul.msk.bf16.gmra.mxu2 %vm1780_vm5, %v18827_v28  ;;  %v4407_v45 = vadd.f32 %v18829_v43, %v18828_v18  ;;  %v6600_v28 = vadd.f32 %v18837_v17, %v18836_v27  ;;  %v18838_v43 = vld [vmem:[#allocation34_spill] sm:$0xff]  ;;  %v18848_v17 = vld [vmem:[#allocation68_spill] sm:$0xff] }
 0x4db   : > { %18826 = vst [vmem:[#allocation47_spill] sm:$0xff] %v16062_v58  ;;  %10544 = vmatmul.msk.bf16.gmra.mxu3 %vm1780_vm5, %v18830_v38  ;;  %v6721_v62 = vpop.f32.mrf.mxu2  ;;  %v18847_v27 = vld [vmem:[#allocation70_spill] sm:$0xff] }
 0x4dc   : > { %11287 = vrcp.f32 %v5218_v23  ;;  %v4563_v61 = vadd.f32 %v18832_v12, %v4407_v45  ;;  %v6798_v30 = vadd.f32 %v6721_v62, %v18833_v26  ;;  %v18839_v45 = vld [vmem:[#allocation5_spill] sm:$0xff]  ;;  %v18841_v62 = vld [vmem:[#allocation32_spill] sm:$0xff] }
 0x4dd   : > { %v16074_v42 = vpop.f32.mrf.mxu0  ;;  %v16084_v33 = vpop.f32.mrf.mxu1 }
 0x4de   : > { %10617 = vmatmul.msk.bf16.gmra.mxu0 %vm1780_vm5, %v7550_v55  ;;  %18831 = vst [vmem:[#allocation28_spill] sm:$0xff] %v16074_v42  ;;  %v6877_v41 = vpop.f32.mrf.mxu3  ;;  %v4735_v34 = vadd.f32 %v15687_v63, %v4563_v61  ;;  %v4405_v55 = vadd.f32 %v18839_v45, %v18838_v43  ;;  %v16097_v63 = vadd.f32 %v15540_v29, %v4732_v51  ;;  %v18865_v42 = vld [vmem:[#allocation81_spill] sm:$0xff] }
 0x4df   : > { %v11284_v9 = vpop.eup %11283  ;;  %v16087_v23 = vadd.f32 %v6877_v41, %v6798_v30 }
 0x4e0   : > { %v11286_v47 = vpop.eup %11285  ;;  %5335 = vrot.lane.b32.xlu1 %v11284_v9, %s11778_s25  ;;  %v16092_v18 = vadd.f32 %v15675_v46, %v4735_v34  ;;  %v18840_v46 = vld [vmem:[#allocation39_spill] sm:$0xff] }
 0x4e1   : > { %v5219_v10 = vadd.f32 1.0, %v11286_v47  ;;  %4990 = vrot.lane.b32.xlu2 %v16072_v52, %s11779_s29  ;;  %18835 = vst [vmem:[#allocation24_spill] sm:$0xff] %v16087_v23  ;;  %v4736_v61 = vadd.f32 %v15726_v7, %v18840_v46  ;;  %v7227_v46 = vmul.f32 1.442695, %v15943_v37 }
 0x4e2   : > { %v11288_v31 = vpop.eup %11287 }
 0x4e3   : > { %11289 = vrcp.f32 %v5219_v10  ;;  %5329 = vrot.lane.b32.xlu0 %v11288_v31, %s11778_s25  ;;  %v6723_v38 = vpop.f32.mrf.mxu2  ;;  %v4561_v10 = vadd.f32 %v18841_v62, %v4405_v55  ;;  %v16119_v41 = vadd.f32 %v15717_v25, %v4736_v61 }
 0x4e4   : > { %v6799_v47 = vadd.f32 %v6723_v38, %v6600_v28  ;;  %v6605_v28 = vadd.f32 %v18848_v17, %v18847_v27  ;;  %11291 = vpow2.f32 %v7227_v46  ;;  %v18851_v27 = vld [vmem:[#allocation16_spill] sm:$0xff] }
 0x4e5   : > { %v16099_v14 = vpop.f32.mrf.mxu0  ;;  %v4733_v26 = vadd.f32 %v15602_v60, %v4561_v10  ;;  %v16116_v30 = vpop.f32.mrf.mxu1  ;;  %v18846_v60 = vld [vmem:[#allocation36_spill] sm:$0xff] }
 0x4e6   : > { %v6879_v12 = vpop.f32.mrf.mxu3  ;;  %18842 = vst [vmem:[#allocation65_spill] sm:$0xff] %v16116_v30  ;;  %v4734_v25 = vadd.f32 %v15640_v32, %v18846_v60  ;;  %v11708_v46 = vld [vmem:[%s11901_s23 + $0x50] sm:$0xff] }
 0x4e7   : > { %v16109_v29 = vadd.f32 %v6879_v12, %v6799_v47  ;;  %v16126_v34 = vadd.f32 %v15586_v11, %v4733_v26 }
 0x4e8   : > { %4998 = vrot.lane.b32.xlu1 %v16092_v18, %s11779_s29  ;;  %v16140_v11 = vadd.f32 %v15630_v2, %v4734_v25  ;;  %v7363_v2 = vsub.f32 0.0, %v15943_v37  ;;  %v18850_v25 = vld [vmem:[#allocation71_spill] sm:$0xff] }
 0x4e9   : > { %v11290_v9 = vpop.eup %11289  ;;  %4992 = vrot.lane.b32.xlu2 %v16097_v63, %s11779_s29  ;;  %v6610_v17 = vadd.f32 %v18851_v27, %v18850_v25 }
 0x4ea   : > { %10529 = vmatmul.msk.bf16.gmra.mxu2 %vm1780_vm5, %v15424_v53  ;;  %v18844_v53 = vld [vmem:[#allocation15_spill] sm:$0xff]  ;;  %v7435_v26 = vmul.f32 1.442695, %v7363_v2  ;;  %vm7395_vm7 = vcmp.gt.f32.partialorder %v7363_v2, 0.0 }
 0x4eb   : > { %5331 = vrot.lane.b32.xlu0 %v11290_v9, %s11778_s25  ;;  %10545 = vmatmul.msk.bf16.gmra.mxu3 %vm1780_vm5, %v15473_v24  ;;  %v6726_v31 = vpop.f32.mrf.mxu2 }
 0x4ec   : > { %v6800_v48 = vadd.f32 %v6726_v31, %v18844_v53  ;;  %11293 = vpow2.f32 %v7435_v26 }
 0x4ed   : > { %v16121_v7 = vpop.f32.mrf.mxu0  ;;  %v6662_v43 = vpop.f32.mrf.mxu1 }
 0x4ee   : > { %18843 = vst [vmem:[#allocation26_spill] sm:$0xff] %v16121_v7  ;;  %v6882_v51 = vpop.f32.mrf.mxu3 }
 0x4ef   : > { %v16131_v24 = vadd.f32 %v6882_v51, %v6800_v48 }
 0x4f0   : > { %5000 = vrot.lane.b32.xlu1 %v16119_v41, %s11779_s29 }
 0x4f1   : > { %18845 = vst [vmem:[#allocation69_spill] sm:$0xff] %v16131_v24 }
 0x4f3   : > { %4994 = vrot.lane.b32.xlu0 %v16126_v34, %s11779_s29  ;;  %v6728_v38 = vpop.f32.mrf.mxu2 }
 0x4f4   : > { %v6801_v47 = vadd.f32 %v6728_v38, %v6605_v28 }
 0x4f5   : > { %v6522_v45 = vpop.f32.mrf.mxu0  ;;  %v16150_v12 = vpop.f32.mrf.mxu1 }
 0x4f6   : > { %v16137_v55 = vadd.f32 %v6662_v43, %v6522_v45  ;;  %v6884_v9 = vpop.f32.mrf.mxu3  ;;  %v11292_v43 = vpop.eup %11291 }
 0x4f7   : > { %v16148_v32 = vadd.f32 %v6884_v9, %v6801_v47  ;;  %v11294_v47 = vpop.eup %11293  ;;  %v10558_v26 = vadd.f32 -1.0, %v11292_v43 }
 0x4f9   : > { %18849 = vst [vmem:[#allocation30_spill] sm:$0xff] %v16148_v32  ;;  %v7315_v27 = vsel %vm7187_vm10, %v15943_v37, %v10558_v26 }
 0x4fa   : > { %10530 = vmatmul.msk.bf16.gmra.mxu2 %vm1780_vm5, %v15519_v19 }
 0x4fb   : > { %4996 = vrot.lane.b32.xlu0 %v16140_v11, %s11779_s29  ;;  %10546 = vmatmul.msk.bf16.gmra.mxu3 %vm1780_vm5, %v15547_v8  ;;  %v6731_v31 = vpop.f32.mrf.mxu2  ;;  %v11707_v8 = vld [vmem:[%s11901_s23 + $0x48] sm:$0xff] }
 0x4fc   : > { %v6802_v48 = vadd.f32 %v6731_v31, %v15464_v6 }
 0x4fd   : > { %v16154_v61 = vpop.f32.mrf.mxu0 }
 0x4fe   : > { %v6887_v19 = vpop.f32.mrf.mxu3 }
 0x503   : > { %v6733_v38 = vpop.f32.mrf.mxu2 }
 0x505   : > { %v16171_v45 = vpop.f32.mrf.mxu0 }
 0x506   : > { %18853 = vst [vmem:[#allocation52_spill] sm:$0xff] %v16171_v45  ;;  %v6889_v9 = vpop.f32.mrf.mxu3 }
 0x509   : > { %v5318_v62 = vpop.permute.xlu0 %5317 }
 0x50a   : > { %v5404_v10 = vmul.f32 %v5318_v62, %v15804_v20  ;;  %10531 = vmatmul.msk.bf16.gmra.mxu2 %vm1780_vm5, %v15614_v36  ;;  %v16165_v20 = vadd.f32 %v6887_v19, %v6802_v48  ;;  %v16169_v36 = vpop.f32.mrf.mxu1  ;;  %v10590_v48 = vadd.f32 -1.0, %v11294_v47 }
 0x50b   : > { %10547 = vmatmul.msk.bf16.gmra.mxu3 %vm1780_vm5, %v15646_v1  ;;  %18852 = vst [vmem:[#allocation50_spill] sm:$0xff] %v16169_v36 }
 0x50c   : > { %v5436_v53 = vadd.f32 %v11707_v8, %v5404_v10  ;;  %v6803_v10 = vadd.f32 %v6733_v38, %v6610_v17 }
 0x50e   : > { %5468 = vst.msk [vmem:[%s15763_s22 + $0x48] sm:$0xff] %vm1780_vm5, %v5436_v53  ;;  %v7229_v51 = vmul.f32 1.442695, %v5436_v53  ;;  %v7364_v60 = vsub.f32 0.0, %v5436_v53  ;;  %v16180_v19 = vadd.f32 %v6889_v9, %v6803_v10  ;;  %vm7188_vm12 = vcmp.gt.f32.partialorder %v5436_v53, 0.0 }
 0x510   : > { %11295 = vpow2.f32 %v7229_v51  ;;  %v7437_v28 = vmul.f32 1.442695, %v7364_v60  ;;  %18854 = vst [vmem:[#allocation66_spill] sm:$0xff] %v16180_v19  ;;  %vm7396_vm14 = vcmp.gt.f32.partialorder %v7364_v60, 0.0 }
 0x511   : > { %v5320_v6 = vpop.permute.xlu0 %5319 }
 0x512   : > { %v5405_v1 = vmul.f32 %v5320_v6, %v15822_v54  ;;  %11297 = vpow2.f32 %v7437_v28  ;;  %v16187_v6 = vpop.f32.mrf.mxu1 }
 0x513   : > { %18855 = vst [vmem:[#allocation59_spill] sm:$0xff] %v16187_v6 }
 0x514   : > { %v16175_v62 = vadd.f32 %v11708_v46, %v5405_v1  ;;  %v18856_v1 = vld [vmem:[#allocation20_spill] sm:$0xff]  ;;  %v7523_v46 = vsel %vm7395_vm7, %v7363_v2, %v10590_v48  ;;  %v6736_v2 = vpop.f32.mrf.mxu2  ;;  %v11709_v48 = vld [vmem:[%s11901_s23 + $0x58] sm:$0xff] }
 0x516   : > { %v11296_v31 = vpop.eup %11295  ;;  %5469 = vst.msk [vmem:[%s15763_s22 + $0x50] sm:$0xff] %vm1780_vm5, %v16175_v62  ;;  %v16184_v54 = vsub.f32 0.0, %v16175_v62  ;;  %v7231_v43 = vmul.f32 1.442695, %v16175_v62  ;;  %vm7189_vm15 = vcmp.gt.f32.partialorder %v16175_v62, 0.0 }
 0x517   : > { %v10559_v8 = vadd.f32 -1.0, %v11296_v31  ;;  %v16193_v31 = vpop.f32.mrf.mxu0 }
 0x518   : > { %v11298_v51 = vpop.eup %11297  ;;  %18857 = vst [vmem:[#allocation61_spill] sm:$0xff] %v16193_v31  ;;  %11299 = vpow2.f32 %v7231_v43  ;;  %vm7397_vm1 = vcmp.gt.f32.partialorder %v16184_v54, 0.0 }
 0x519   : > { %v4983_v25 = vpop.permute.xlu0 %4982  ;;  %v7316_v17 = vsel %vm7188_vm12, %v5436_v53, %v10559_v8  ;;  %v10591_v28 = vadd.f32 -1.0, %v11298_v51  ;;  %v7439_v8 = vmul.f32 1.442695, %v16184_v54  ;;  %v18858_v51 = vld [vmem:[#allocation23_spill] sm:$0xff] }
 0x51a   : > { %v5059_v38 = vadd.f32 %v4983_v25, %v18856_v1  ;;  %v7343_v9 = vpack.c.bf16 %v7316_v17, %v7315_v27  ;;  %10532 = vmatmul.msk.bf16.gmra.mxu2 %vm1780_vm5, %v15700_v3  ;;  %v18859_v27 = vld [vmem:[#allocation72_spill] sm:$0xff] }
 0x51b   : > { %v5322_v47 = vpop.permute.xlu1 %5321  ;;  %v7524_v10 = vsel %vm7396_vm14, %v7364_v60, %v10591_v28  ;;  %10548 = vmatmul.msk.bf16.gmra.mxu3 %vm1780_vm5, %v18858_v51  ;;  %v6892_v60 = vpop.f32.mrf.mxu3  ;;  %v6804_v17 = vadd.f32 %v6736_v2, %v18859_v27  ;;  %11301 = vpow2.f32 %v7439_v8  ;;  %v11710_v27 = vld [vmem:[%s11901_s23 + $0x60] sm:$0xff] }
 0x51c   : > { %v16196_v37 = vadd.f32 %v15801_v5, %v5059_v38  ;;  %v5406_v53 = vmul.f32 %v5322_v47, %v15849_v40  ;;  %10634 = vmatmul.msk.bf16.gmra.mxu1 %vm1780_vm5, %v7343_v9  ;;  %v7551_v26 = vpack.c.bf16 %v7524_v10, %v7523_v46  ;;  %v18861_v47 = vld [vmem:[#allocation75_spill] sm:$0xff]  ;;  %v16212_v51 = vpop.f32.mrf.mxu1  ;;  %v16218_v2 = vpop.f32.mrf.mxu2 }
 0x51d   : > { %v16209_v38 = vadd.f32 %v6892_v60, %v6804_v17  ;;  %18862 = vst [vmem:[#allocation31_spill] sm:$0xff] %v16212_v51 }
 0x51e   : > { %v5126_v3 = vsub.f32 0.0, %v16196_v37  ;;  %v5438_v25 = vadd.f32 %v11709_v48, %v5406_v53  ;;  %10618 = vmatmul.msk.bf16.gmra.mxu0 %vm1780_vm5, %v7551_v26  ;;  %v11300_v26 = vpop.eup %11299 }
 0x51f   : > { %18860 = vst [vmem:[#allocation55_spill] sm:$0xff] %v16209_v38 }
 0x520   : > { %v5177_v40 = vmul.f32 1.442695, %v5126_v3  ;;  %5470 = vst.msk [vmem:[%s15763_s22 + $0x58] sm:$0xff] %vm1780_vm5, %v5438_v25  ;;  %v7233_v28 = vmul.f32 1.442695, %v5438_v25  ;;  %v7366_v9 = vsub.f32 0.0, %v5438_v25 }
 0x521   : > { %v4985_v1 = vpop.permute.xlu0 %4984  ;;  %v11302_v3 = vpop.eup %11301  ;;  %vm7190_vm2 = vcmp.gt.f32.partialorder %v5438_v25, 0.0 }
 0x522   : > { %11303 = vpow2.f32 %v5177_v40  ;;  %v5060_v46 = vadd.f32 %v4985_v1, %v18861_v47  ;;  %v7441_v53 = vmul.f32 1.442695, %v7366_v9  ;;  %v16226_v40 = vpop.f32.mrf.mxu0  ;;  %vm7398_vm11 = vcmp.gt.f32.partialorder %v7366_v9, 0.0 }
 0x523   : > { %v5324_v10 = vpop.permute.xlu1 %5323  ;;  %11305 = vpow2.f32 %v7233_v28  ;;  %v16220_v60 = vpop.f32.mrf.mxu3  ;;  %18863 = vst [vmem:[#allocation29_spill] sm:$0xff] %v16226_v40  ;;  %v10560_v28 = vadd.f32 -1.0, %v11300_v26 }
 0x524   : > { %v16215_v43 = vadd.f32 %v15801_v5, %v5060_v46  ;;  %v5407_v8 = vmul.f32 %v5324_v10, %v15867_v21  ;;  %11307 = vpow2.f32 %v7441_v53  ;;  %v10592_v53 = vadd.f32 -1.0, %v11302_v3  ;;  %v6741_v45 = vpop.f32.mrf.mxu2  ;;  %v16246_v30 = vpop.f32.mrf.mxu1 }
 0x525   : > { %v7317_v31 = vsel %vm7189_vm15, %v16175_v62, %v10560_v28 }
 0x526   : > { %v5127_v48 = vsub.f32 0.0, %v16215_v43  ;;  %v16224_v17 = vadd.f32 %v11710_v27, %v5407_v8  ;;  %v7525_v36 = vsel %vm7397_vm1, %v16184_v54, %v10592_v53 }
 0x528   : > { %v11304_v1 = vpop.eup %11303  ;;  %v5179_v47 = vmul.f32 1.442695, %v5127_v48  ;;  %5471 = vst.msk [vmem:[%s15763_s22 + $0x60] sm:$0xff] %vm1780_vm5, %v16224_v17  ;;  %v7235_v10 = vmul.f32 1.442695, %v16224_v17  ;;  %v16233_v6 = vsub.f32 0.0, %v16224_v17 }
 0x529   : > { %v11306_v21 = vpop.eup %11305  ;;  %v5222_v46 = vadd.f32 1.0, %v11304_v1  ;;  %v18864_v1 = vld [vmem:[#allocation80_spill] sm:$0xff]  ;;  %vm7191_vm13 = vcmp.gt.f32.partialorder %v16224_v17, 0.0 }
 0x52a   : > { %11309 = vpow2.f32 %v5179_v47  ;;  %v10561_v8 = vadd.f32 -1.0, %v11306_v21  ;;  %v11308_v26 = vpop.eup %11307  ;;  %10533 = vmatmul.msk.bf16.gmra.mxu2 %vm1780_vm5, %v18864_v1  ;;  %v7443_v28 = vmul.f32 1.442695, %v16233_v6  ;;  %vm7399_vm9 = vcmp.gt.f32.partialorder %v16233_v6, 0.0 }
 0x52b   : > { %11311 = vrcp.f32 %v5222_v46  ;;  %v4987_v48 = vpop.permute.xlu1 %4986  ;;  %v5326_v27 = vpop.permute.xlu2 %5325  ;;  %v10593_v21 = vadd.f32 -1.0, %v11308_v26  ;;  %10549 = vmatmul.msk.bf16.gmra.mxu3 %vm1780_vm5, %v18865_v42  ;;  %v18866_v26 = vld [vmem:[#allocation19_spill] sm:$0xff] }
 0x52c   : > { %v5061_v3 = vadd.f32 %v4987_v48, %v15886_v4  ;;  %v5408_v47 = vmul.f32 %v5326_v27, %v15949_v22  ;;  %v7318_v56 = vsel %vm7190_vm2, %v5438_v25, %v10561_v8  ;;  %11313 = vpow2.f32 %v7235_v10  ;;  %v6897_v62 = vpop.f32.mrf.mxu3  ;;  %v11711_v22 = vld [vmem:[%s11901_s23 + $0x68] sm:$0xff]  ;;  %v16258_v48 = vpop.f32.mrf.mxu0 }
 0x52d   : > { %v7344_v46 = vpack.c.bf16 %v7318_v56, %v7317_v31  ;;  %v7526_v8 = vsel %vm7398_vm11, %v7366_v9, %v10593_v21  ;;  %v6806_v42 = vadd.f32 %v6741_v45, %v18866_v26  ;;  %11315 = vpow2.f32 %v7443_v28  ;;  %v16268_v28 = vpop.f32.mrf.mxu2 }
 0x52e   : > { %v16249_v4 = vadd.f32 %v15801_v5, %v5061_v3  ;;  %v5440_v25 = vadd.f32 %v11711_v22, %v5408_v47  ;;  %v7552_v56 = vpack.c.bf16 %v7526_v8, %v7525_v36  ;;  %v18869_v22 = vld [vmem:[#allocation40_spill] sm:$0xff] }
 0x52f   : > { %10635 = vmatmul.msk.bf16.gmra.mxu1 %vm1780_vm5, %v7344_v46  ;;  %v16261_v27 = vadd.f32 %v6897_v62, %v6806_v42  ;;  %v18868_v62 = vld [vmem:[#allocation41_spill] sm:$0xff]  ;;  %v16272_v42 = vpop.f32.mrf.mxu1 }
 0x530   : > { %v11310_v54 = vpop.eup %11309  ;;  %v5128_v31 = vsub.f32 0.0, %v16249_v4  ;;  %5472 = vst.msk [vmem:[%s15763_s22 + $0x68] sm:$0xff] %vm1780_vm5, %v5440_v25  ;;  %v7237_v10 = vmul.f32 1.442695, %v5440_v25  ;;  %10619 = vmatmul.msk.bf16.gmra.mxu0 %vm1780_vm5, %v7552_v56  ;;  %v7368_v9 = vsub.f32 0.0, %v5440_v25  ;;  %v4409_v8 = vadd.f32 %v18869_v22, %v18868_v62 }
 0x531   : > { %v11312_v53 = vpop.eup %11311  ;;  %v5223_v5 = vadd.f32 1.0, %v11310_v54  ;;  %18867 = vst [vmem:[#allocation58_spill] sm:$0xff] %v16261_v27  ;;  %v16277_v56 = vld [vmem:[%s18388_s7] ss:$0 sm:$0xff]  ;;  %vm7192_vm3 = vcmp.gt.f32.partialorder %v5440_v25, 0.0 }
 0x532   : > { %v5181_v45 = vmul.f32 1.442695, %v5128_v31  ;;  %5337 = vrot.lane.b32.xlu2 %v11312_v53, %s11778_s25  ;;  %11317 = vpow2.f32 %v7237_v10  ;;  %v11314_v36 = vpop.eup %11313  ;;  %v7445_v47 = vmul.f32 1.442695, %v7368_v9  ;;  %18870 = vst [vmem:[#allocation57_spill] sm:$0xff] %v16272_v42  ;;  %vm7400_vm10 = vcmp.gt.f32.partialorder %v7368_v9, 0.0 }
 0x533   : > { %11319 = vrcp.f32 %v5223_v5  ;;  %v4989_v1 = vpop.permute.xlu1 %4988  ;;  %v5328_v3 = vpop.permute.xlu2 %5327  ;;  %v10562_v10 = vadd.f32 -1.0, %v11314_v36 }
 0x534   : > { %11321 = vpow2.f32 %v5181_v45  ;;  %v5062_v21 = vadd.f32 %v4989_v1, %v15904_v16  ;;  %v5409_v46 = vmul.f32 %v5328_v3, %v15982_v44  ;;  %v16270_v26 = vpop.f32.mrf.mxu3  ;;  %v11713_v16 = vld [vmem:[%s11901_s23 + $0x70] sm:$0xff]  ;;  %v11316_v31 = vpop.eup %11315  ;;  %v18871_v1 = vld [vmem:[#allocation42_spill] sm:$0xff] }
 0x535   : > { %11323 = vpow2.f32 %v7445_v47  ;;  %v4565_v3 = vadd.f32 %v18871_v1, %v4409_v8  ;;  %v16290_v47 = vpop.f32.mrf.mxu0  ;;  %v10594_v36 = vadd.f32 -1.0, %v11316_v31  ;;  %v7319_v19 = vsel %vm7191_vm13, %v16224_v17, %v10562_v10 }
 0x536   : > { %v16280_v54 = vadd.f32 %v16277_v56, %v5062_v21  ;;  %v16283_v44 = vadd.f32 %v11713_v16, %v5409_v46  ;;  %18872 = vst [vmem:[#allocation4_spill] sm:$0xff] %v16290_v47  ;;  %v18873_v16 = vld [vmem:[#allocation79_spill] sm:$0xff]  ;;  %v18887_v47 = vld [vmem:[#allocation6_spill] sm:$0xff] }
 0x537   : > { %v4737_v42 = vadd.f32 %v18873_v16, %v4565_v3  ;;  %v7527_v3 = vsel %vm7399_vm9, %v16233_v6, %v10594_v36  ;;  %v18874_v16 = vld [vmem:[#allocation76_spill] sm:$0xff] }
 0x538   : > { %v11318_v53 = vpop.eup %11317  ;;  %v5129_v5 = vsub.f32 0.0, %v16280_v54  ;;  %5473 = vst.msk [vmem:[%s15763_s22 + $0x70] sm:$0xff] %vm1780_vm5, %v16283_v44  ;;  %vm7193_vm12 = vcmp.gt.f32.partialorder %v16283_v44, 0.0 }
 0x539   : > { %v11320_v45 = vpop.eup %11319  ;;  %v10563_v62 = vadd.f32 -1.0, %v11318_v53 }
 0x53a   : > { %v11322_v22 = vpop.eup %11321  ;;  %v5183_v21 = vmul.f32 1.442695, %v5129_v5  ;;  %5339 = vrot.lane.b32.xlu2 %v11320_v45, %s11778_s25  ;;  %v6746_v5 = vpop.f32.mrf.mxu2 }
 0x53b   : > { %v11324_v46 = vpop.eup %11323  ;;  %v5224_v7 = vadd.f32 1.0, %v11322_v22  ;;  %v4991_v27 = vpop.permute.xlu2 %4990  ;;  %v7320_v51 = vsel %vm7192_vm3, %v5440_v25, %v10563_v62  ;;  %v6808_v17 = vadd.f32 %v6746_v5, %v18874_v16  ;;  %v18881_v5 = vld [vmem:[#allocation43_spill] sm:$0xff] }
 0x53c   : > { %11325 = vpow2.f32 %v5183_v21  ;;  %v5063_v8 = vadd.f32 %v4991_v27, %v15934_v49  ;;  %v7345_v53 = vpack.c.bf16 %v7320_v51, %v7319_v19  ;;  %v10595_v1 = vadd.f32 -1.0, %v11324_v46  ;;  %v6902_v45 = vpop.f32.mrf.mxu3  ;;  %v18875_v49 = vld [vmem:[#allocation78_spill] sm:$0xff] }
 0x53d   : > { %11327 = vrcp.f32 %v5224_v7  ;;  %v16305_v19 = vadd.f32 %v18875_v49, %v4737_v42  ;;  %v16307_v7 = vpop.f32.mrf.mxu1  ;;  %v16310_v27 = vadd.f32 %v6902_v45, %v6808_v17  ;;  %v18878_v42 = vld [vmem:[#allocation21_spill] sm:$0xff]  ;;  %v18883_v49 = vld [vmem:[#allocation10_spill] sm:$0xff] }
 0x53e   : > { %v16299_v31 = vadd.f32 %v16277_v56, %v5063_v8  ;;  %v7528_v22 = vsel %vm7400_vm10, %v7368_v9, %v10595_v1  ;;  %18876 = vst [vmem:[#allocation14_spill] sm:$0xff] %v16307_v7  ;;  %v16315_v9 = vpop.f32.mrf.mxu0  ;;  %v18882_v45 = vld [vmem:[#allocation49_spill] sm:$0xff] }
 0x53f   : > { %10636 = vmatmul.msk.bf16.gmra.mxu1 %vm1780_vm5, %v7345_v53  ;;  %v7553_v25 = vpack.c.bf16 %v7528_v22, %v7527_v3  ;;  %18877 = vst [vmem:[#allocation38_spill] sm:$0xff] %v16315_v9  ;;  %v4411_v3 = vadd.f32 %v18882_v45, %v18881_v5  ;;  %v11714_v45 = vld [vmem:[%s11901_s23 + $0x88] sm:$0xff] }
 0x540   : > { %v5130_v51 = vsub.f32 0.0, %v16299_v31 }
 0x541   : > { %10620 = vmatmul.msk.bf16.gmra.mxu0 %vm1780_vm5, %v7553_v25 }
 0x542   : > { %v11326_v10 = vpop.eup %11325  ;;  %v5185_v62 = vmul.f32 1.442695, %v5130_v51  ;;  %5002 = vrot.lane.b32.xlu2 %v16305_v19, %s11779_s29  ;;  %v16319_v8 = vpop.f32.mrf.mxu2 }
 0x543   : > { %v11328_v6 = vpop.eup %11327  ;;  %v5225_v21 = vadd.f32 1.0, %v11326_v10  ;;  %v4993_v36 = vpop.permute.xlu2 %4992  ;;  %18879 = vst [vmem:[#allocation35_spill] sm:$0xff] %v16319_v8 }
 0x544   : > { %11329 = vpow2.f32 %v5185_v62  ;;  %v5064_v46 = vadd.f32 %v4993_v36, %v18878_v42  ;;  %5341 = vrot.lane.b32.xlu0 %v11328_v6, %s11778_s25  ;;  %v16321_v53 = vpop.f32.mrf.mxu3  ;;  %v18885_v42 = vld [vmem:[#allocation48_spill] sm:$0xff] }
 0x545   : > { %11331 = vrcp.f32 %v5225_v21  ;;  %18880 = vst [vmem:[#allocation67_spill] sm:$0xff] %v16321_v53  ;;  %v18884_v21 = vld [vmem:[#allocation44_spill] sm:$0xff] }
 0x546   : > { %v16324_v1 = vadd.f32 %v16277_v56, %v5064_v46  ;;  %v4567_v46 = vadd.f32 %v18885_v42, %v4411_v3 }
 0x547   : > { %v7775_v16 = vpop.f32.mrf.mxu1 }
 0x548   : > { %v5131_v22 = vsub.f32 0.0, %v16324_v1  ;;  %v4739_v9 = vadd.f32 %v16002_v35, %v4567_v46 }
 0x54a   : > { %v11330_v17 = vpop.eup %11329  ;;  %v5187_v25 = vmul.f32 1.442695, %v5131_v22  ;;  %5004 = vrot.lane.b32.xlu2 %v18883_v49, %s11779_s29  ;;  %v5334_v51 = vpop.permute.xlu1 %5333 }
 0x54b   : > { %v11332_v10 = vpop.eup %11331  ;;  %v5226_v62 = vadd.f32 1.0, %v11330_v17  ;;  %v7635_v6 = vpop.f32.mrf.mxu0  ;;  %v5412_v36 = vmul.f32 %v5334_v51, %v18884_v21 }
 0x54c   : > { %11333 = vpow2.f32 %v5187_v25  ;;  %v16333_v5 = vadd.f32 %v7775_v16, %v7635_v6  ;;  %5343 = vrot.lane.b32.xlu0 %v11332_v10, %s11778_s25  ;;  %v6751_v7 = vpop.f32.mrf.mxu2  ;;  %v6907_v49 = vpop.f32.mrf.mxu3  ;;  %v16349_v25 = vsub.f32 0.0, %v16283_v44  ;;  %v4911_v10 = vadd.f32 %v16007_v57, %v4739_v9 }
 0x54d   : > { %11335 = vrcp.f32 %v5226_v62  ;;  %v16337_v22 = vadd.f32 %v11714_v45, %v5412_v36  ;;  %v6810_v17 = vadd.f32 %v6751_v7, %v18887_v47  ;;  %v7239_v62 = vmul.f32 1.442695, %v16283_v44  ;;  %v11715_v36 = vld [vmem:[%s11901_s23 + $0x90] sm:$0xff] }
 0x54e   : > { %18886 = vst [vmem:[#allocation37_spill] sm:$0xff] %v16333_v5  ;;  %v7447_v9 = vmul.f32 1.442695, %v16349_v25  ;;  %vm7401_vm7 = vcmp.gt.f32.partialorder %v16349_v25, 0.0 }
 0x54f   : > { %5476 = vst.msk [vmem:[%s15763_s22 + $0x88] sm:$0xff] %vm1780_vm5, %v16337_v22  ;;  %v16344_v3 = vadd.f32 %v6907_v49, %v6810_v17  ;;  %v16346_v16 = vpop.f32.mrf.mxu1  ;;  %v11716_v49 = vld [vmem:[%s11901_s23 + $0x78] sm:$0xff]  ;;  %vm7196_vm1 = vcmp.gt.f32.partialorder %v16337_v22, 0.0 }
 0x550   : > { %18889 = vst [vmem:[#allocation33_spill] sm:$0xff] %v16346_v16  ;;  %v8266_v16 = vld [vmem:[%s18395_s14 + $0x4] sm:$0xf] }
 0x551   : > { %18888 = vst [vmem:[#allocation62_spill] sm:$0xff] %v16344_v3 }
 0x552   : > { %v11334_v51 = vpop.eup %11333  ;;  %v5336_v35 = vpop.permute.xlu1 %5335 }
 0x553   : > { %v11336_v6 = vpop.eup %11335  ;;  %v5227_v47 = vadd.f32 1.0, %v11334_v51  ;;  %v16353_v7 = vpop.f32.mrf.mxu0  ;;  %v5413_v21 = vmul.f32 %v5336_v35, %v16011_v59 }
 0x554   : > { %18890 = vst [vmem:[#allocation64_spill] sm:$0xff] %v16353_v7  ;;  %5006 = vrot.lane.b32.xlu0 %v4911_v10, %s11779_s29  ;;  %5345 = vrot.lane.b32.xlu1 %v11336_v6, %s11778_s25  ;;  %v16366_v45 = vpop.f32.mrf.mxu2  ;;  %v16368_v59 = vpop.f32.mrf.mxu3  ;;  %v8268_v7 = vld [vmem:[%s18396_s15 + $0x4] sm:$0xf] }
 0x555   : > { %11337 = vrcp.f32 %v5227_v47  ;;  %v16359_v42 = vadd.f32 %v11715_v36, %v5413_v21  ;;  %v5330_v57 = vpop.permute.xlu0 %5329 }
 0x556   : > { %v5410_v46 = vmul.f32 %v5330_v57, %v16016_v50  ;;  %11339 = vpow2.f32 %v7239_v62 }
 0x557   : > { %5477 = vst.msk [vmem:[%s15763_s22 + $0x90] sm:$0xff] %vm1780_vm5, %v16359_v42  ;;  %11341 = vpow2.f32 %v7447_v9  ;;  %v7780_v47 = vpop.f32.mrf.mxu1  ;;  %vm7197_vm13 = vcmp.gt.f32.partialorder %v16359_v42, 0.0 }
 0x558   : > { %v5442_v17 = vadd.f32 %v11716_v49, %v5410_v46 }
 0x55a   : > { %5474 = vst.msk [vmem:[%s15763_s22 + $0x78] sm:$0xff] %vm1780_vm5, %v5442_v17  ;;  %v7241_v51 = vmul.f32 1.442695, %v5442_v17  ;;  %v4999_v10 = vpop.permute.xlu1 %4998  ;;  %v16373_v35 = vsub.f32 0.0, %v5442_v17 }
 0x55b   : > { %v11338_v6 = vpop.eup %11337  ;;  %v7640_v50 = vpop.f32.mrf.mxu0  ;;  %v5067_v62 = vadd.f32 %v4999_v10, %v16126_v34 }
 0x55c   : > { %v11340_v21 = vpop.eup %11339  ;;  %v16376_v36 = vadd.f32 %v7780_v47, %v7640_v50  ;;  %5347 = vrot.lane.b32.xlu1 %v11338_v6, %s11778_s25  ;;  %11343 = vpow2.f32 %v7241_v51  ;;  %v7449_v57 = vmul.f32 1.442695, %v16373_v35  ;;  %v6756_v47 = vpop.f32.mrf.mxu2  ;;  %v8267_v51 = vld [vmem:[%s18396_s15] sm:$0xf]  ;;  %vm7402_vm14 = vcmp.gt.f32.partialorder %v16373_v35, 0.0 }
 0x55d   : > { %v16381_v9 = vadd.f32 %v16277_v56, %v5067_v62  ;;  %v5332_v46 = vpop.permute.xlu0 %5331  ;;  %v11342_v5 = vpop.eup %11341  ;;  %v10564_v10 = vadd.f32 -1.0, %v11340_v21  ;;  %v8265_v6 = vld [vmem:[%s18395_s14] sm:$0xf] }
 0x55e   : > { %18891 = vst [vmem:[#allocation63_spill] sm:$0xff] %v16376_v36  ;;  %v5411_v49 = vmul.f32 %v5332_v46, %v16036_v15  ;;  %11345 = vpow2.f32 %v7449_v57  ;;  %v6912_v50 = vpop.f32.mrf.mxu3  ;;  %v11717_v62 = vld [vmem:[%s11901_s23 + $0x80] sm:$0xff]  ;;  %v18892_v46 = vld [vmem:[#allocation9_spill] sm:$0xff]  ;;  %v8863_v36 = vsel %vm1829_vm0, %v8267_v51, 0  ;;  %v9003_v21 = vsel %vm1829_vm0, %v8265_v6, 0 }
 0x55f   : > { %v5134_v34 = vsub.f32 0.0, %v16381_v9  ;;  %v6812_v57 = vadd.f32 %v6756_v47, %v18892_v46  ;;  %8872 = vmatpush.bf16.msrb.mxu2 %v8863_v36  ;;  %9012 = vmatpush.bf16.msrb.mxu3 %v9003_v21  ;;  %v9283_v47 = vsel %vm1829_vm0, %v8268_v7, 0  ;;  %v10596_v8 = vadd.f32 -1.0, %v11342_v5 }
 0x560   : > { %v16393_v15 = vadd.f32 %v11717_v62, %v5411_v49  ;;  %v9127_v49 = vsel %vm1829_vm0, %v8266_v16, 0  ;;  %v16406_v62 = vsub.f32 0.0, %v16337_v22  ;;  %9292 = vmatpush.bf16.msrb.mxu1 %v9283_v47  ;;  %v7245_v16 = vmul.f32 1.442695, %v16337_v22 }
 0x561   : > { %v5193_v53 = vmul.f32 1.442695, %v5134_v34  ;;  %v16413_v40 = vadd.f32 %v6912_v50, %v6812_v57  ;;  %9136 = vmatpush.bf16.msrb.mxu0 %v9127_v49  ;;  %vm7194_vm0 = vcmp.gt.f32.partialorder %v5442_v17, 0.0  ;;  %v7321_v24 = vsel %vm7193_vm12, %v16283_v44, %v10564_v10 }
 0x562   : > { %v11344_v51 = vpop.eup %11343  ;;  %5475 = vst.msk [vmem:[%s15763_s22 + $0x80] sm:$0xff] %vm1780_vm5, %v16393_v15  ;;  %v7243_v6 = vmul.f32 1.442695, %v16393_v15  ;;  %v5001_v46 = vpop.permute.xlu1 %5000  ;;  %v16416_v36 = vsub.f32 0.0, %v16393_v15  ;;  %v7529_v44 = vsel %vm7401_vm7, %v16349_v25, %v10596_v8  ;;  %vm7195_vm15 = vcmp.gt.f32.partialorder %v16393_v15, 0.0 }
 0x563   : > { %11347 = vpow2.f32 %v5193_v53  ;;  %v5068_v7 = vadd.f32 %v5001_v46, %v16140_v11  ;;  %v10565_v34 = vadd.f32 -1.0, %v11344_v51  ;;  %v7453_v53 = vmul.f32 1.442695, %v16406_v62 }
 0x564   : > { %v11346_v21 = vpop.eup %11345  ;;  %v7451_v5 = vmul.f32 1.442695, %v16416_v36  ;;  %11349 = vpow2.f32 %v7243_v6  ;;  %v16433_v46 = vpop.f32.mrf.mxu2  ;;  %vm7403_vm2 = vcmp.gt.f32.partialorder %v16416_v36, 0.0  ;;  %vm7404_vm11 = vcmp.gt.f32.partialorder %v16406_v62, 0.0 }
 0x565   : > { %v16426_v50 = vadd.f32 %v16277_v56, %v5068_v7  ;;  %v4995_v57 = vpop.permute.xlu0 %4994  ;;  %v7322_v49 = vsel %vm7194_vm0, %v5442_v17, %v10565_v34  ;;  %v10597_v47 = vadd.f32 -1.0, %v11346_v21  ;;  %11351 = vpow2.f32 %v7245_v16 }
 0x566   : > { %v5065_v11 = vadd.f32 %v4995_v57, %v16072_v52  ;;  %v7346_v51 = vpack.c.bf16 %v7322_v49, %v7321_v24  ;;  %v16435_v7 = vpop.f32.mrf.mxu3  ;;  %11353 = vpow2.f32 %v7451_v5 }
 0x567   : > { %v7530_v10 = vsel %vm7402_vm14, %v16373_v35, %v10597_v47  ;;  %v5135_v24 = vsub.f32 0.0, %v16426_v50  ;;  %11355 = vpow2.f32 %v7453_v53 }
 0x568   : > { %v16438_v17 = vadd.f32 %v16277_v56, %v5065_v11  ;;  %10637 = vmatmul.msk.bf16.gmra.mxu1 %vm1780_vm5, %v7346_v51  ;;  %v7554_v34 = vpack.c.bf16 %v7530_v10, %v7529_v44 }
 0x569   : > { %v11348_v52 = vpop.eup %11347  ;;  %v5195_v21 = vmul.f32 1.442695, %v5135_v24 }
 0x56a   : > { %v5230_v6 = vadd.f32 1.0, %v11348_v52  ;;  %v5132_v8 = vsub.f32 0.0, %v16438_v17  ;;  %10621 = vmatmul.msk.bf16.gmra.mxu0 %vm1780_vm5, %v7554_v34  ;;  %v11350_v25 = vpop.eup %11349  ;;  %v18893_v52 = vld [vmem:[#allocation13_spill] sm:$0xff] }
 0x56b   : > { %v11352_v16 = vpop.eup %11351  ;;  %v10566_v5 = vadd.f32 -1.0, %v11350_v25 }
 0x56c   : > { %11357 = vrcp.f32 %v5230_v6  ;;  %v5189_v35 = vmul.f32 1.442695, %v5132_v8  ;;  %v11354_v49 = vpop.eup %11353  ;;  %v6761_v11 = vpop.f32.mrf.mxu2  ;;  %v10567_v53 = vadd.f32 -1.0, %v11352_v16 }
 0x56d   : > { %v4997_v57 = vpop.permute.xlu0 %4996  ;;  %v11356_v44 = vpop.eup %11355  ;;  %v6814_v34 = vadd.f32 %v6761_v11, %v18893_v52  ;;  %v10598_v6 = vadd.f32 -1.0, %v11354_v49 }
 0x56e   : > { %11359 = vpow2.f32 %v5189_v35  ;;  %v5066_v47 = vadd.f32 %v4997_v57, %v16097_v63  ;;  %v6917_v51 = vpop.f32.mrf.mxu3  ;;  %v7323_v63 = vsel %vm7195_vm15, %v16393_v15, %v10566_v5  ;;  %v10599_v25 = vadd.f32 -1.0, %v11356_v44 }
 0x56f   : > { %11361 = vpow2.f32 %v5195_v21  ;;  %v16451_v35 = vadd.f32 %v6917_v51, %v6814_v34  ;;  %v7324_v21 = vsel %vm7196_vm1, %v16337_v22, %v10567_v53  ;;  %v7531_v49 = vsel %vm7403_vm2, %v16416_v36, %v10598_v6 }
 0x570   : > { %v16446_v10 = vadd.f32 %v16277_v56, %v5066_v47  ;;  %v7347_v11 = vpack.c.bf16 %v7324_v21, %v7323_v63  ;;  %v7532_v15 = vsel %vm7404_vm11, %v16406_v62, %v10599_v25 }
 0x571   : > { %v7555_v52 = vpack.c.bf16 %v7532_v15, %v7531_v49 }
 0x572   : > { %v11358_v8 = vpop.eup %11357  ;;  %v5133_v24 = vsub.f32 0.0, %v16446_v10 }
 0x573   : > { %5353 = vrot.lane.b32.xlu1 %v11358_v8, %s11778_s25 }
 0x574   : > { %v11360_v57 = vpop.eup %11359  ;;  %v5191_v47 = vmul.f32 1.442695, %v5133_v24  ;;  %v16461_v5 = vpop.f32.mrf.mxu2 }
 0x575   : > { %v5228_v16 = vadd.f32 1.0, %v11360_v57  ;;  %v11362_v51 = vpop.eup %11361  ;;  %v7373_v57 = vsub.f32 0.0, %v16359_v42 }
 0x576   : > { %11363 = vpow2.f32 %v5191_v47  ;;  %v16463_v44 = vpop.f32.mrf.mxu3  ;;  %v5231_v34 = vadd.f32 1.0, %v11362_v51  ;;  %v7247_v47 = vmul.f32 1.442695, %v16359_v42 }
 0x577   : > { %11365 = vrcp.f32 %v5228_v16  ;;  %18894 = vst [vmem:[#allocation34_spill] sm:$0xff] %v16463_v44  ;;  %v7455_v49 = vmul.f32 1.442695, %v7373_v57  ;;  %vm7405_vm9 = vcmp.gt.f32.partialorder %v7373_v57, 0.0 }
 0x578   : > { %10638 = vmatmul.msk.bf16.gmra.mxu1 %vm1780_vm5, %v7347_v11  ;;  %11367 = vrcp.f32 %v5231_v34  ;;  %v11718_v11 = vld [vmem:[%s11901_s23 + $0x98] sm:$0xff] }
 0x57a   : > { %10622 = vmatmul.msk.bf16.gmra.mxu0 %vm1780_vm5, %v7555_v52 }
 0x57b   : > { %7016 = vrot.lane.b32.xlu1 %v16038_v39, %s11778_s25 }
 0x57c   : > { %v11364_v22 = vpop.eup %11363  ;;  %v16470_v62 = vpop.f32.mrf.mxu2 }
 0x57d   : > { %v11366_v36 = vpop.eup %11365  ;;  %v5229_v53 = vadd.f32 1.0, %v11364_v22 }
 0x57e   : > { %5349 = vrot.lane.b32.xlu2 %v11366_v36, %s11778_s25  ;;  %v16472_v6 = vpop.f32.mrf.mxu3  ;;  %v11368_v8 = vpop.eup %11367 }
 0x57f   : > { %11369 = vrcp.f32 %v5229_v53  ;;  %v16489_v53 = vpop.f32.mrf.mxu1 }
 0x580   : > { %11371 = vpow2.f32 %v7247_v47  ;;  %18895 = vst [vmem:[#allocation5_spill] sm:$0xff] %v16489_v53 }
 0x581   : > { %11373 = vpow2.f32 %v7455_v49 }
 0x584   : > { %v16476_v63 = vpop.f32.mrf.mxu2 }
 0x585   : > { %v11370_v24 = vpop.eup %11369 }
 0x586   : > { %5355 = vrot.lane.b32.xlu2 %v11368_v8, %s11778_s25  ;;  %5351 = vrot.lane.b32.xlu0 %v11370_v24, %s11778_s25  ;;  %v16478_v25 = vpop.f32.mrf.mxu3  ;;  %v16493_v8 = vpop.f32.mrf.mxu0 }
 0x587   : > { %18897 = vst [vmem:[#allocation32_spill] sm:$0xff] %v16493_v8 }
 0x58c   : > { %v5338_v16 = vpop.permute.xlu2 %5337  ;;  %v6771_v15 = vpop.f32.mrf.mxu2 }
 0x58d   : > { %v5414_v21 = vmul.f32 %v5338_v16, %v16196_v37  ;;  %v6818_v34 = vadd.f32 %v6771_v15, %v16004_v0 }
 0x58e   : > { %7018 = vrot.lane.b32.xlu2 %v16062_v58, %s11778_s25  ;;  %v6927_v52 = vpop.f32.mrf.mxu3 }
 0x58f   : > { %v5446_v51 = vadd.f32 %v11718_v11, %v5414_v21  ;;  %v16491_v37 = vadd.f32 %v6927_v52, %v6818_v34  ;;  %v11372_v21 = vpop.eup %11371  ;;  %v11719_v11 = vld [vmem:[%s11901_s23 + $0xa0] sm:$0xff] }
 0x590   : > { %v11374_v0 = vpop.eup %11373  ;;  %v10568_v34 = vadd.f32 -1.0, %v11372_v21 }
 0x591   : > { %5478 = vst.msk [vmem:[%s15763_s22 + $0x98] sm:$0xff] %vm1780_vm5, %v5446_v51  ;;  %v7249_v22 = vmul.f32 1.442695, %v5446_v51  ;;  %v7374_v36 = vsub.f32 0.0, %v5446_v51  ;;  %vm7198_vm3 = vcmp.gt.f32.partialorder %v5446_v51, 0.0 }
 0x592   : > { %18896 = vst [vmem:[#allocation39_spill] sm:$0xff] %v16491_v37 }
 0x593   : > { %11375 = vpow2.f32 %v7249_v22  ;;  %v7457_v24 = vmul.f32 1.442695, %v7374_v36  ;;  %vm7406_vm10 = vcmp.gt.f32.partialorder %v7374_v36, 0.0 }
 0x594   : > { %v5340_v16 = vpop.permute.xlu2 %5339  ;;  %v16501_v15 = vpop.f32.mrf.mxu2 }
 0x595   : > { %v5415_v47 = vmul.f32 %v5340_v16, %v16215_v43  ;;  %11377 = vpow2.f32 %v7457_v24  ;;  %v10600_v43 = vadd.f32 -1.0, %v11374_v0 }
 0x596   : > { %7020 = vrot.lane.b32.xlu2 %v16087_v23, %s11778_s25  ;;  %v16503_v52 = vpop.f32.mrf.mxu3 }
 0x597   : > { %v16499_v49 = vadd.f32 %v11719_v11, %v5415_v47  ;;  %v7325_v11 = vsel %vm7197_vm13, %v16359_v42, %v10568_v34  ;;  %v18898_v34 = vld [vmem:[#allocation74_spill] sm:$0xff] }
 0x599   : > { %v11376_v53 = vpop.eup %11375  ;;  %5479 = vst.msk [vmem:[%s15763_s22 + $0xa0] sm:$0xff] %vm1780_vm5, %v16499_v49  ;;  %v7785_v22 = vpop.f32.mrf.mxu1  ;;  %vm7199_vm12 = vcmp.gt.f32.partialorder %v16499_v49, 0.0 }
 0x59a   : > { %v10569_v8 = vadd.f32 -1.0, %v11376_v53  ;;  %v7533_v53 = vsel %vm7405_vm9, %v7373_v57, %v10600_v43  ;;  %v18899_v57 = vld [vmem:[#allocation8_spill] sm:$0xff] }
 0x59b   : > { %v11378_v24 = vpop.eup %11377  ;;  %v7645_v16 = vpop.f32.mrf.mxu0 }
 0x59c   : > { %v16509_v23 = vadd.f32 %v7785_v22, %v7645_v16  ;;  %v5003_v47 = vpop.permute.xlu2 %5002  ;;  %v7326_v58 = vsel %vm7198_vm3, %v5446_v51, %v10569_v8  ;;  %v10601_v39 = vadd.f32 -1.0, %v11378_v24  ;;  %v6776_v16 = vpop.f32.mrf.mxu2 }
 0x59d   : > { %v5069_v21 = vadd.f32 %v5003_v47, %v16092_v18  ;;  %v7348_v37 = vpack.c.bf16 %v7326_v58, %v7325_v11  ;;  %v6820_v51 = vadd.f32 %v6776_v16, %v16049_v13 }
 0x59e   : > { %7026 = vrot.lane.b32.xlu2 %v16148_v32, %s11778_s25  ;;  %v7534_v0 = vsel %vm7406_vm10, %v7374_v36, %v10601_v39  ;;  %v6932_v42 = vpop.f32.mrf.mxu3  ;;  %v6620_v39 = vadd.f32 %v18899_v57, %v18898_v34  ;;  %v16554_v57 = vsub.f32 0.0, %v16499_v49 }
 0x59f   : > { %v16516_v44 = vadd.f32 %v16277_v56, %v5069_v21  ;;  %10639 = vmatmul.msk.bf16.gmra.mxu1 %vm1780_vm5, %v7348_v37  ;;  %v7556_v22 = vpack.c.bf16 %v7534_v0, %v7533_v53  ;;  %v16522_v58 = vadd.f32 %v6932_v42, %v6820_v51 }
 0x5a0   : > { %v6807_v21 = vadd.f32 %v16268_v28, %v6620_v39  ;;  %v18904_v39 = vld [vmem:[#allocation60_spill] sm:$0xff]  ;;  %vm7407_vm7 = vcmp.gt.f32.partialorder %v16554_v57, 0.0 }
 0x5a1   : > { %v5136_v18 = vsub.f32 0.0, %v16516_v44  ;;  %10623 = vmatmul.msk.bf16.gmra.mxu0 %vm1780_vm5, %v7556_v22  ;;  %v16526_v36 = vpop.f32.mrf.mxu1 }
 0x5a2   : > { %18900 = vst [vmem:[#allocation15_spill] sm:$0xff] %v16526_v36 }
 0x5a3   : > { %v5197_v8 = vmul.f32 1.442695, %v5136_v18  ;;  %v16529_v24 = vpop.f32.mrf.mxu0 }
 0x5a4   : > { %v5005_v43 = vpop.permute.xlu2 %5004  ;;  %18901 = vst [vmem:[#allocation36_spill] sm:$0xff] %v16529_v24  ;;  %v16536_v47 = vpop.f32.mrf.mxu2 }
 0x5a5   : > { %11379 = vpow2.f32 %v5197_v8  ;;  %v5070_v37 = vadd.f32 %v5005_v43, %v16119_v41  ;;  %v16543_v41 = vadd.f32 %v16270_v26, %v6807_v21  ;;  %v18905_v43 = vld [vmem:[#allocation12_spill] sm:$0xff] }
 0x5a6   : > { %7032 = vrot.lane.b32.xlu2 %v16209_v38, %s11778_s25  ;;  %v16538_v11 = vpop.f32.mrf.mxu3 }
 0x5a7   : > { %v16534_v13 = vadd.f32 %v16277_v56, %v5070_v37  ;;  %18902 = vst [vmem:[#allocation70_spill] sm:$0xff] %v16543_v41  ;;  %v6635_v37 = vadd.f32 %v18905_v43, %v18904_v39  ;;  %v11720_v43 = vld [vmem:[%s11901_s23 + $0xa8] sm:$0xff] }
 0x5a9   : > { %v5137_v53 = vsub.f32 0.0, %v16534_v13  ;;  %v6813_v39 = vadd.f32 %v16433_v46, %v6635_v37 }
 0x5ab   : > { %v11380_v0 = vpop.eup %11379  ;;  %v5199_v22 = vmul.f32 1.442695, %v5137_v53  ;;  %v16577_v32 = vadd.f32 %v16435_v7, %v6813_v39  ;;  %v18909_v39 = vld [vmem:[#allocation53_spill] sm:$0xff] }
 0x5ac   : > { %v5232_v16 = vadd.f32 1.0, %v11380_v0  ;;  %v7790_v42 = vpop.f32.mrf.mxu1  ;;  %v16549_v8 = vpop.f32.mrf.mxu2  ;;  %v7251_v0 = vmul.f32 1.442695, %v16499_v49 }
 0x5ad   : > { %11381 = vpow2.f32 %v5199_v22  ;;  %v7650_v51 = vpop.f32.mrf.mxu0  ;;  %18908 = vst [vmem:[#allocation20_spill] sm:$0xff] %v16577_v32 }
 0x5ae   : > { %11383 = vrcp.f32 %v5232_v16  ;;  %7038 = vrot.lane.b32.xlu2 %v16543_v41, %s11778_s25  ;;  %v16547_v18 = vadd.f32 %v7790_v42, %v7650_v51  ;;  %v16551_v28 = vpop.f32.mrf.mxu3 }
 0x5b0   : > { %18903 = vst [vmem:[#allocation68_spill] sm:$0xff] %v16547_v18  ;;  %v11721_v18 = vld [vmem:[%s11901_s23 + $0xb0] sm:$0xff] }
 0x5b3   : > { %v11382_v34 = vpop.eup %11381 }
 0x5b4   : > { %v11384_v26 = vpop.eup %11383  ;;  %v5233_v21 = vadd.f32 1.0, %v11382_v34  ;;  %v16558_v53 = vpop.f32.mrf.mxu1  ;;  %v7459_v34 = vmul.f32 1.442695, %v16554_v57 }
 0x5b5   : > { %18906 = vst [vmem:[#allocation71_spill] sm:$0xff] %v16558_v53  ;;  %5357 = vrot.lane.b32.xlu0 %v11384_v26, %s11778_s25  ;;  %v16564_v22 = vpop.f32.mrf.mxu0  ;;  %v16567_v51 = vpop.f32.mrf.mxu2 }
 0x5b6   : > { %11385 = vrcp.f32 %v5233_v21  ;;  %7044 = vrot.lane.b32.xlu2 %v16344_v3, %s11778_s25  ;;  %18907 = vst [vmem:[#allocation16_spill] sm:$0xff] %v16564_v22  ;;  %v5342_v16 = vpop.permute.xlu0 %5341  ;;  %v16572_v38 = vpop.f32.mrf.mxu3 }
 0x5b7   : > { %v5416_v42 = vmul.f32 %v5342_v16, %v16249_v4  ;;  %11387 = vpow2.f32 %v7251_v0 }
 0x5b8   : > { %11389 = vpow2.f32 %v7459_v34 }
 0x5b9   : > { %v5448_v41 = vadd.f32 %v11720_v43, %v5416_v42  ;;  %v6816_v43 = vadd.f32 %v16470_v62, %v18909_v39 }
 0x5bb   : > { %5480 = vst.msk [vmem:[%s15763_s22 + $0xa8] sm:$0xff] %vm1780_vm5, %v5448_v41  ;;  %v7253_v26 = vmul.f32 1.442695, %v5448_v41  ;;  %v7376_v21 = vsub.f32 0.0, %v5448_v41  ;;  %vm7200_vm0 = vcmp.gt.f32.partialorder %v5448_v41, 0.0 }
 0x5bc   : > { %v11386_v3 = vpop.eup %11385  ;;  %v7795_v4 = vpop.f32.mrf.mxu1 }
 0x5bd   : > { %5359 = vrot.lane.b32.xlu0 %v11386_v3, %s11778_s25  ;;  %11391 = vpow2.f32 %v7253_v26  ;;  %v7461_v46 = vmul.f32 1.442695, %v7376_v21  ;;  %v11388_v16 = vpop.eup %11387  ;;  %v6786_v7 = vpop.f32.mrf.mxu2  ;;  %vm7408_vm14 = vcmp.gt.f32.partialorder %v7376_v21, 0.0 }
 0x5be   : > { %7050 = vrot.lane.b32.xlu2 %v16577_v32, %s11778_s25  ;;  %v7655_v37 = vpop.f32.mrf.mxu0  ;;  %v5344_v0 = vpop.permute.xlu0 %5343  ;;  %v6824_v3 = vadd.f32 %v6786_v7, %v16137_v55  ;;  %v10570_v24 = vadd.f32 -1.0, %v11388_v16  ;;  %v16602_v55 = vadd.f32 %v16472_v6, %v6816_v43 }
 0x5bf   : > { %v16582_v42 = vadd.f32 %v7795_v4, %v7655_v37  ;;  %v5417_v34 = vmul.f32 %v5344_v0, %v16280_v54  ;;  %11393 = vpow2.f32 %v7461_v46  ;;  %v11390_v26 = vpop.eup %11389  ;;  %v6942_v32 = vpop.f32.mrf.mxu3  ;;  %v18911_v4 = vld [vmem:[#allocation22_spill] sm:$0xff]  ;;  %v18912_v46 = vld [vmem:[#allocation45_spill] sm:$0xff] }
 0x5c0   : > { %v16591_v53 = vadd.f32 %v6942_v32, %v6824_v3  ;;  %v6650_v62 = vadd.f32 %v18912_v46, %v18911_v4  ;;  %18913 = vst [vmem:[#allocation72_spill] sm:$0xff] %v16602_v55 }
 0x5c1   : > { %v16589_v36 = vadd.f32 %v11721_v18, %v5417_v34  ;;  %v10602_v18 = vadd.f32 -1.0, %v11390_v26  ;;  %v7327_v34 = vsel %vm7199_vm12, %v16499_v49, %v10570_v24  ;;  %v11722_v49 = vld [vmem:[%s11901_s23 + $0xb8] sm:$0xff] }
 0x5c2   : > { %18910 = vst [vmem:[#allocation23_spill] sm:$0xff] %v16591_v53  ;;  %v6819_v26 = vadd.f32 %v16501_v15, %v6650_v62 }
 0x5c3   : > { %v11392_v22 = vpop.eup %11391  ;;  %5481 = vst.msk [vmem:[%s15763_s22 + $0xb0] sm:$0xff] %vm1780_vm5, %v16589_v36  ;;  %v16597_v54 = vsub.f32 0.0, %v16589_v36  ;;  %v7255_v16 = vmul.f32 1.442695, %v16589_v36  ;;  %v7535_v46 = vsel %vm7407_vm7, %v16554_v57, %v10602_v18  ;;  %v6658_v57 = vadd.f32 %v16084_v33, %v16099_v14 }
 0x5c4   : > { %v10571_v37 = vadd.f32 -1.0, %v11392_v22  ;;  %vm7201_vm15 = vcmp.gt.f32.partialorder %v16589_v36, 0.0 }
 0x5c5   : > { %v11394_v0 = vpop.eup %11393  ;;  %7022 = vrot.lane.b32.xlu0 %v16109_v29, %s11778_s25  ;;  %v7463_v3 = vmul.f32 1.442695, %v16597_v54  ;;  %11395 = vpow2.f32 %v7255_v16  ;;  %vm7409_vm2 = vcmp.gt.f32.partialorder %v16597_v54, 0.0 }
 0x5c6   : > { %7056 = vrot.lane.b32.xlu2 %v16602_v55, %s11778_s25  ;;  %v5346_v32 = vpop.permute.xlu1 %5345  ;;  %v7328_v6 = vsel %vm7200_vm0, %v5448_v41, %v10571_v37  ;;  %v10603_v22 = vadd.f32 -1.0, %v11394_v0  ;;  %v5007_v39 = vpop.permute.xlu0 %5006  ;;  %v18914_v37 = vld [vmem:[#allocation18_spill] sm:$0xff]  ;;  %v18915_v0 = vld [vmem:[#allocation73_spill] sm:$0xff] }
 0x5c7   : > { %v5418_v7 = vmul.f32 %v5346_v32, %v16299_v31  ;;  %v7349_v43 = vpack.c.bf16 %v7328_v6, %v7327_v34  ;;  %v5071_v4 = vadd.f32 %v5007_v39, %v16305_v19  ;;  %v6615_v32 = vadd.f32 %v18915_v0, %v18914_v37  ;;  %v11723_v6 = vld [vmem:[%s11901_s23 + $0xc0] sm:$0xff] }
 0x5c8   : > { %v7536_v55 = vsel %vm7408_vm14, %v7376_v21, %v10603_v22  ;;  %11397 = vpow2.f32 %v7463_v3  ;;  %v16630_v21 = vadd.f32 %v16503_v52, %v6819_v26  ;;  %v6822_v52 = vadd.f32 %v16549_v8, %v6658_v57 }
 0x5c9   : > { %v5450_v24 = vadd.f32 %v11722_v49, %v5418_v7  ;;  %10640 = vmatmul.msk.bf16.gmra.mxu1 %vm1780_vm5, %v7349_v43  ;;  %v7557_v41 = vpack.c.bf16 %v7536_v55, %v7535_v46  ;;  %v16620_v31 = vadd.f32 %v16277_v56, %v5071_v4  ;;  %v6805_v33 = vadd.f32 %v16218_v2, %v6615_v32  ;;  %v6788_v4 = vpop.f32.mrf.mxu2 }
 0x5ca   : > { %18916 = vst [vmem:[#allocation75_spill] sm:$0xff] %v16630_v21  ;;  %v6665_v2 = vadd.f32 %v16150_v12, %v16154_v61 }
 0x5cb   : > { %5482 = vst.msk [vmem:[%s15763_s22 + $0xb8] sm:$0xff] %vm1780_vm5, %v5450_v24  ;;  %v7257_v15 = vmul.f32 1.442695, %v5450_v24  ;;  %10624 = vmatmul.msk.bf16.gmra.mxu0 %vm1780_vm5, %v7557_v41  ;;  %v7378_v19 = vsub.f32 0.0, %v5450_v24  ;;  %v5138_v56 = vsub.f32 0.0, %v16620_v31  ;;  %v11396_v16 = vpop.eup %11395  ;;  %v16644_v43 = vadd.f32 %v16220_v60, %v6805_v33  ;;  %v11724_v33 = vld [vmem:[%s11901_s23 + $0xc8] sm:$0xff] }
 0x5cc   : > { %v10572_v7 = vadd.f32 -1.0, %v11396_v16  ;;  %vm7202_vm1 = vcmp.gt.f32.partialorder %v5450_v24, 0.0  ;;  %v6825_v0 = vadd.f32 %v6788_v4, %v6665_v2  ;;  %v7768_v4 = vadd.f32 %v16246_v30, %v16258_v48  ;;  %v16709_v48 = vld [vmem:[%s18391_s10] ss:$0 sm:$0xff] }
 0x5cd   : > { %7028 = vrot.lane.b32.xlu0 %v16165_v20, %s11778_s25  ;;  %11399 = vpow2.f32 %v7257_v15  ;;  %v7465_v62 = vmul.f32 1.442695, %v7378_v19  ;;  %v5201_v55 = vmul.f32 1.442695, %v5138_v56  ;;  %vm7410_vm11 = vcmp.gt.f32.partialorder %v7378_v19, 0.0 }
 0x5ce   : > { %7062 = vrot.lane.b32.xlu2 %v16630_v21, %s11778_s25  ;;  %v5348_v18 = vpop.permute.xlu1 %5347  ;;  %v11398_v34 = vpop.eup %11397  ;;  %v7329_v12 = vsel %vm7201_vm15, %v16589_v36, %v10572_v7 }
 0x5cf   : > { %v5419_v14 = vmul.f32 %v5348_v18, %v16324_v1  ;;  %11401 = vpow2.f32 %v7465_v62  ;;  %v16652_v1 = vadd.f32 %v16551_v28, %v6822_v52  ;;  %v10604_v3 = vadd.f32 -1.0, %v11398_v34  ;;  %v6944_v62 = vpop.f32.mrf.mxu3  ;;  %v18919_v18 = vld [vmem:[#allocation7_spill] sm:$0xff]  ;;  %v16684_v7 = vpop.f32.mrf.mxu0 }
 0x5d0   : > { %11403 = vpow2.f32 %v5201_v55  ;;  %v18918_v55 = vld [vmem:[#allocation54_spill] sm:$0xff]  ;;  %v16673_v52 = vadd.f32 %v6944_v62, %v6825_v0  ;;  %v11726_v62 = vld [vmem:[%s11901_s23 + $0xd8] sm:$0xff] }
 0x5d1   : > { %v16641_v22 = vadd.f32 %v11723_v6, %v5419_v14  ;;  %18917 = vst [vmem:[#allocation80_spill] sm:$0xff] %v16652_v1  ;;  %v7537_v15 = vsel %vm7409_vm2, %v16597_v54, %v10604_v3  ;;  %v6630_v16 = vadd.f32 %v18919_v18, %v18918_v55  ;;  %v16675_v54 = vpop.f32.mrf.mxu1 }
 0x5d2   : > { %18920 = vst [vmem:[#allocation81_spill] sm:$0xff] %v16673_v52 }
 0x5d3   : > { %v11400_v39 = vpop.eup %11399  ;;  %5483 = vst.msk [vmem:[%s15763_s22 + $0xc0] sm:$0xff] %vm1780_vm5, %v16641_v22  ;;  %v16658_v60 = vsub.f32 0.0, %v16641_v22  ;;  %v7259_v49 = vmul.f32 1.442695, %v16641_v22  ;;  %v6811_v6 = vadd.f32 %v16366_v45, %v6630_v16  ;;  %v11725_v45 = vld [vmem:[%s11901_s23 + $0xe0] sm:$0xff]  ;;  %vm7203_vm13 = vcmp.gt.f32.partialorder %v16641_v22, 0.0 }
 0x5d4   : > { %v10573_v8 = vadd.f32 -1.0, %v11400_v39 }
 0x5d5   : > { %v11402_v26 = vpop.eup %11401  ;;  %7034 = vrot.lane.b32.xlu0 %v16644_v43, %s11778_s25  ;;  %vm7411_vm9 = vcmp.gt.f32.partialorder %v16658_v60, 0.0 }
 0x5d6   : > { %v11404_v46 = vpop.eup %11403  ;;  %7068 = vrot.lane.b32.xlu2 %v16652_v1, %s11778_s25  ;;  %v7330_v61 = vsel %vm7202_vm1, %v5450_v24, %v10573_v8  ;;  %v10605_v28 = vadd.f32 -1.0, %v11402_v26  ;;  %v7467_v24 = vmul.f32 1.442695, %v16658_v60 }
 0x5d7   : > { %v5234_v41 = vadd.f32 1.0, %v11404_v46  ;;  %v7350_v37 = vpack.c.bf16 %v7330_v61, %v7329_v12  ;;  %v16691_v46 = vadd.f32 %v16368_v59, %v6811_v6 }
 0x5d8   : > { %v5350_v32 = vpop.permute.xlu2 %5349  ;;  %v7538_v57 = vsel %vm7410_vm11, %v7378_v19, %v10605_v28  ;;  %v16699_v28 = vld [vmem:[%s18394_s13] ss:$0 sm:$0xff] }
 0x5d9   : > { %11405 = vrcp.f32 %v5234_v41  ;;  %v5420_v56 = vmul.f32 %v5350_v32, %v16438_v17  ;;  %10641 = vmatmul.msk.bf16.gmra.mxu1 %vm1780_vm5, %v7350_v37  ;;  %v7558_v36 = vpack.c.bf16 %v7538_v57, %v7537_v15  ;;  %v7850_v32 = vadd.f32 %v16699_v28, %v7768_v4 }
 0x5da   : > { %11407 = vpow2.f32 %v7259_v49 }
 0x5db   : > { %v5452_v14 = vadd.f32 %v11724_v33, %v5420_v56  ;;  %10625 = vmatmul.msk.bf16.gmra.mxu0 %vm1780_vm5, %v7558_v36  ;;  %11409 = vpow2.f32 %v7467_v24 }
 0x5dd   : > { %5484 = vst.msk [vmem:[%s15763_s22 + $0xc8] sm:$0xff] %vm1780_vm5, %v5452_v14  ;;  %v7261_v17 = vmul.f32 1.442695, %v5452_v14  ;;  %7040 = vrot.lane.b32.xlu0 %v16310_v27, %s11778_s25  ;;  %v7380_v19 = vsub.f32 0.0, %v5452_v14  ;;  %vm7204_vm3 = vcmp.gt.f32.partialorder %v5452_v14, 0.0 }
 0x5de   : > { %7074 = vrot.lane.b32.xlu2 %v16673_v52, %s11778_s25  ;;  %v18956_v52 = vld [vmem:[#allocation33_spill] sm:$0xff] }
 0x5df   : > { %v11406_v34 = vpop.eup %11405  ;;  %11411 = vpow2.f32 %v7261_v17  ;;  %v7469_v39 = vmul.f32 1.442695, %v7380_v19  ;;  %vm7412_vm10 = vcmp.gt.f32.partialorder %v7380_v19, 0.0  ;;  %v18922_v17 = vld [vmem:[#allocation29_spill] sm:$0xff] }
 0x5e0   : > { %v11408_v2 = vpop.eup %11407  ;;  %v5356_v8 = vpop.permute.xlu2 %5355  ;;  %5361 = vrot.lane.b32.xlu1 %v11406_v34, %s11778_s25  ;;  %v18923_v34 = vld [vmem:[#allocation31_spill] sm:$0xff] }
 0x5e1   : > { %v5423_v3 = vmul.f32 %v5356_v8, %v16426_v50  ;;  %11413 = vpow2.f32 %v7469_v39  ;;  %v11410_v26 = vpop.eup %11409  ;;  %v10574_v12 = vadd.f32 -1.0, %v11408_v2  ;;  %v18924_v2 = vld [vmem:[#allocation25_spill] sm:$0xff]  ;;  %v18925_v8 = vld [vmem:[#allocation56_spill] sm:$0xff] }
 0x5e2   : > { %v10606_v37 = vadd.f32 -1.0, %v11410_v26 }
 0x5e3   : > { %v16694_v49 = vadd.f32 %v11725_v45, %v5423_v3  ;;  %v7331_v57 = vsel %vm7203_vm13, %v16641_v22, %v10574_v12  ;;  %v7766_v22 = vadd.f32 %v18923_v34, %v18922_v17  ;;  %v6645_v3 = vadd.f32 %v18925_v8, %v18924_v2  ;;  %v18929_v2 = vld [vmem:[#allocation58_spill] sm:$0xff] }
 0x5e4   : > { %v7539_v6 = vsel %vm7411_vm9, %v16658_v60, %v10606_v37 }
 0x5e5   : > { %v11412_v61 = vpop.eup %11411  ;;  %5487 = vst.msk [vmem:[%s15763_s22 + $0xe0] sm:$0xff] %vm1780_vm5, %v16694_v49  ;;  %v7800_v50 = vpop.f32.mrf.mxu1  ;;  %7046 = vrot.lane.b32.xlu0 %v16691_v46, %s11778_s25  ;;  %v7849_v60 = vadd.f32 %v16699_v28, %v7766_v22  ;;  %vm7207_vm11 = vcmp.gt.f32.partialorder %v16694_v49, 0.0 }
 0x5e6   : > { %v5354_v30 = vpop.permute.xlu1 %5353  ;;  %v10575_v41 = vadd.f32 -1.0, %v11412_v61 }
 0x5e7   : > { %v5422_v59 = vmul.f32 %v5354_v30, %v16381_v9  ;;  %v11414_v0 = vpop.eup %11413  ;;  %v7660_v15 = vpop.f32.mrf.mxu0  ;;  %v18921_v9 = vld [vmem:[#allocation69_spill] sm:$0xff] }
 0x5e8   : > { %v16715_v56 = vadd.f32 %v7800_v50, %v7660_v15  ;;  %v7019_v24 = vpop.permute.xlu2 %7018  ;;  %7024 = vrot.lane.b32.xlu1 %v18921_v9, %s11778_s25  ;;  %v7332_v55 = vsel %vm7204_vm3, %v5452_v14, %v10575_v41  ;;  %v10607_v18 = vadd.f32 -1.0, %v11414_v0  ;;  %v6817_v50 = vadd.f32 %v16476_v63, %v6645_v3  ;;  %v18926_v0 = vld [vmem:[#allocation66_spill] sm:$0xff] }
 0x5e9   : > { %v16718_v36 = vadd.f32 %v11726_v62, %v5422_v59  ;;  %v7148_v16 = vadd.f32 %v16709_v48, %v7019_v24  ;;  %v7351_v33 = vpack.c.bf16 %v7332_v55, %v7331_v57  ;;  %v18927_v63 = vld [vmem:[#allocation46_spill] sm:$0xff]  ;;  %v18928_v55 = vld [vmem:[#allocation77_spill] sm:$0xff] }
 0x5ea   : > { %v7540_v39 = vsel %vm7412_vm10, %v7380_v19, %v10607_v18  ;;  %v16748_v57 = vadd.f32 %v16478_v25, %v6817_v50  ;;  %v6625_v18 = vadd.f32 %v18928_v55, %v18927_v63  ;;  %v18932_v50 = vld [vmem:[#allocation65_spill] sm:$0xff]  ;;  %v11727_v63 = vld [vmem:[%s11901_s23 + $0xd0] sm:$0xff] }
 0x5eb   : > { %5486 = vst.msk [vmem:[%s15763_s22 + $0xd8] sm:$0xff] %vm1780_vm5, %v16718_v36  ;;  %v7882_v14 = vadd.f32 %v7850_v32, %v7148_v16  ;;  %10642 = vmatmul.msk.bf16.gmra.mxu1 %vm1780_vm5, %v7351_v33  ;;  %v7559_v26 = vpack.c.bf16 %v7540_v39, %v7539_v6  ;;  %vm7206_vm1 = vcmp.gt.f32.partialorder %v16718_v36, 0.0 }
 0x5ed   : > { %v7947_v4 = vmul.f32 1.442695, %v7882_v14  ;;  %v8074_v45 = vsub.f32 0.0, %v7882_v14  ;;  %10626 = vmatmul.msk.bf16.gmra.mxu0 %vm1780_vm5, %v7559_v26  ;;  %v16734_v12 = vpop.f32.mrf.mxu1  ;;  %7052 = vrot.lane.b32.xlu0 %v16451_v35, %s11778_s25  ;;  %vm7914_vm12 = vcmp.gt.f32.partialorder %v7882_v14, 0.0  ;;  %v18930_v26 = vld [vmem:[#allocation35_spill] sm:$0xff] }
 0x5ee   : > { %v7017_v61 = vpop.permute.xlu1 %7016 }
 0x5ef   : > { %v7147_v19 = vadd.f32 %v16709_v48, %v7017_v61  ;;  %11415 = vpow2.f32 %v7947_v4  ;;  %v8139_v30 = vmul.f32 1.442695, %v8074_v45  ;;  %v16741_v59 = vpop.f32.mrf.mxu0  ;;  %vm8106_vm0 = vcmp.gt.f32.partialorder %v8074_v45, 0.0 }
 0x5f0   : > { %v16743_v37 = vpop.permute.xlu2 %7020  ;;  %7030 = vrot.lane.b32.xlu1 %v18926_v0, %s11778_s25  ;;  %v6809_v4 = vadd.f32 %v18930_v26, %v6625_v18 }
 0x5f1   : > { %v7881_v41 = vadd.f32 %v7849_v60, %v7147_v19  ;;  %11417 = vpow2.f32 %v8139_v30  ;;  %v18931_v19 = vld [vmem:[#allocation26_spill] sm:$0xff] }
 0x5f2   : > { %v6660_v30 = vadd.f32 %v18932_v50, %v18931_v19 }
 0x5f3   : > { %v7945_v32 = vmul.f32 1.442695, %v7881_v41  ;;  %v8073_v15 = vsub.f32 0.0, %v7881_v41  ;;  %vm7913_vm7 = vcmp.gt.f32.partialorder %v7881_v41, 0.0 }
 0x5f5   : > { %11419 = vpow2.f32 %v7945_v32  ;;  %v8137_v62 = vmul.f32 1.442695, %v8073_v15  ;;  %v11416_v24 = vpop.eup %11415  ;;  %7058 = vrot.lane.b32.xlu0 %v16748_v57, %s11778_s25  ;;  %v7805_v17 = vpop.f32.mrf.mxu1  ;;  %vm8105_vm14 = vcmp.gt.f32.partialorder %v8073_v15, 0.0 }
 0x5f6   : > { %v10647_v16 = vadd.f32 -1.0, %v11416_v24 }
 0x5f7   : > { %11421 = vpow2.f32 %v8137_v62  ;;  %v11418_v33 = vpop.eup %11417  ;;  %v7665_v34 = vpop.f32.mrf.mxu0 }
 0x5f8   : > { %v10679_v22 = vadd.f32 -1.0, %v11418_v33  ;;  %v16754_v6 = vadd.f32 %v7805_v17, %v7665_v34  ;;  %v16756_v25 = vpop.permute.xlu2 %7026  ;;  %v5352_v39 = vpop.permute.xlu0 %5351  ;;  %7036 = vrot.lane.b32.xlu1 %v18929_v2, %s11778_s25  ;;  %v8042_v8 = vsel %vm7914_vm12, %v7882_v14, %v10647_v16  ;;  %v6823_v34 = vadd.f32 %v16567_v51, %v6660_v30 }
 0x5f9   : > { %v5421_v60 = vmul.f32 %v5352_v39, %v16446_v10  ;;  %v8271_v24 = vpack.c.bf16 %v8042_v8, %v8042_v8  ;;  %v18933_v10 = vld [vmem:[#allocation67_spill] sm:$0xff] }
 0x5fa   : > { %v8234_v61 = vsel %vm8106_vm0, %v8074_v45, %v10679_v22  ;;  %v16770_v45 = vsub.f32 0.0, %v16718_v36  ;;  %v16773_v18 = vadd.f32 %v18933_v10, %v6809_v4  ;;  %v7265_v22 = vmul.f32 1.442695, %v16718_v36 }
 0x5fb   : > { %v11420_v3 = vpop.eup %11419  ;;  %v16765_v55 = vadd.f32 %v11727_v63, %v5421_v60  ;;  %v8303_v33 = vpack.c.bf16 %v8234_v61, %v8234_v61  ;;  %v8367_v39 = vunpack.c.l.b16 %v8271_v24  ;;  %v16791_v24 = vadd.f32 %v16572_v38, %v6823_v34 }
 0x5fc   : > { %v10646_v32 = vadd.f32 -1.0, %v11420_v3  ;;  %v7473_v60 = vmul.f32 1.442695, %v16770_v45  ;;  %11423 = vpow2.f32 %v7265_v22  ;;  %v7857_v63 = vadd.f32 %v16699_v28, %v16509_v23 }
 0x5fd   : > { %v11422_v62 = vpop.eup %11421  ;;  %7064 = vrot.lane.b32.xlu0 %v16522_v58, %s11778_s25  ;;  %5485 = vst.msk [vmem:[%s15763_s22 + $0xd0] sm:$0xff] %vm1780_vm5, %v16765_v55  ;;  %v8607_v61 = vunpack.c.l.b16 %v8303_v33  ;;  %v7263_v51 = vmul.f32 1.442695, %v16765_v55  ;;  %v7381_v30 = vsub.f32 0.0, %v16765_v55  ;;  %vm7205_vm15 = vcmp.gt.f32.partialorder %v16765_v55, 0.0 }
 0x5fe   : > { %v8041_v14 = vsel %vm7913_vm7, %v7881_v41, %v10646_v32  ;;  %v10678_v16 = vadd.f32 -1.0, %v11422_v62  ;;  %v18935_v32 = vld [vmem:[#allocation50_spill] sm:$0xff]  ;;  %18936 = vst [vmem:[#allocation19_spill] sm:$0xff] %v16791_v24  ;;  %11425 = vpow2.f32 %v7473_v60  ;;  %vm7414_vm2 = vcmp.gt.f32.partialorder %v16770_v45, 0.0 }
 0x5ff   : > { %v8270_v17 = vpack.c.bf16 %v8041_v14, %v8041_v14  ;;  %v18937_v14 = vld [vmem:[#allocation51_spill] sm:$0xff]  ;;  %11427 = vpow2.f32 %v7263_v51  ;;  %v7471_v38 = vmul.f32 1.442695, %v7381_v30 }
 0x600   : > { %v8233_v41 = vsel %vm8105_vm14, %v8073_v15, %v10678_v16  ;;  %v7033_v26 = vpop.permute.xlu2 %7032  ;;  %7042 = vrot.lane.b32.xlu1 %v16773_v18, %s11778_s25  ;;  %v18934_v15 = vld [vmem:[#allocation52_spill] sm:$0xff]  ;;  %v18938_v16 = vld [vmem:[#allocation11_spill] sm:$0xff] }
 0x601   : > { %v8302_v8 = vpack.c.bf16 %v8233_v41, %v8233_v41  ;;  %v8366_v3 = vunpack.c.l.b16 %v8270_v17  ;;  %v7120_v4 = vadd.f32 %v7033_v26, %v16165_v20  ;;  %v6668_v62 = vadd.f32 %v18935_v32, %v18934_v15  ;;  %v6791_v17 = vpop.f32.mrf.mxu2 }
 0x602   : > { %v6640_v10 = vadd.f32 %v18938_v16, %v18937_v14  ;;  %11429 = vpow2.f32 %v7471_v38  ;;  %v18942_v16 = vld [vmem:[#allocation28_spill] sm:$0xff] }
 0x603   : > { %v16784_v19 = vpack.c.b16 %v8367_v39, %v8366_v3  ;;  %v8606_v50 = vunpack.c.l.b16 %v8302_v8  ;;  %v7155_v33 = vadd.f32 %v16709_v48, %v7120_v4  ;;  %v6826_v22 = vadd.f32 %v6791_v17, %v6668_v62  ;;  %v11424_v8 = vpop.eup %11423 }
 0x604   : > { %v6815_v60 = vadd.f32 %v16461_v5, %v6640_v10  ;;  %v11426_v51 = vpop.eup %11425 }
 0x605   : > { %v16795_v20 = vpack.c.b16 %v8607_v61, %v8606_v50  ;;  %7070 = vrot.lane.b32.xlu0 %v16791_v24, %s11778_s25  ;;  %v16802_v41 = vadd.f32 %v7857_v63, %v7155_v33  ;;  %v8415_v34 = vshrl.u32 %v16784_v19, 16  ;;  %v8418_v26 = vshll.u32 %v16784_v19, 16  ;;  %v6947_v50 = vpop.f32.mrf.mxu3  ;;  %v11428_v63 = vpop.eup %11427  ;;  %v18966_v24 = vld [vmem:[#allocation36_spill] sm:$0xff] }
 0x606   : > { %v6982_v15 = vadd.f32 %v6947_v50, %v6826_v22  ;;  %v10577_v33 = vadd.f32 -1.0, %v11424_v8  ;;  %v10576_v14 = vadd.f32 -1.0, %v11428_v63  ;;  %v10609_v5 = vadd.f32 -1.0, %v11426_v51 }
 0x607   : > { %v8655_v23 = vshrl.u32 %v16795_v20, 16  ;;  %v16810_v3 = vrot.slane %v8415_v34, 7  ;;  %v8658_v4 = vshll.u32 %v16795_v20, 16  ;;  %v18940_v34 = vld [vmem:[#allocation34_spill] sm:$0xff] }
 0x608   : > { %v16806_v39 = vpop.permute.xlu2 %7038  ;;  %7048 = vrot.lane.b32.xlu1 %v16413_v40, %s11778_s25  ;;  %v11430_v38 = vpop.eup %11429  ;;  %v7333_v8 = vsel %vm7205_vm15, %v16765_v55, %v10576_v14  ;;  %v7542_v55 = vsel %vm7414_vm2, %v16770_v45, %v10609_v5  ;;  %v18944_v45 = vld [vmem:[#allocation39_spill] sm:$0xff] }
 0x609   : > { %v16813_v61 = vrot.slane %v8655_v23, 7  ;;  %v8420_v32 = vor.u32 %v8418_v26, %v16810_v3  ;;  %v16823_v23 = vadd.f32 %v18940_v34, %v6815_v60  ;;  %v10608_v50 = vadd.f32 -1.0, %v11430_v38  ;;  %v16851_v38 = vpop.f32.mrf.mxu1 }
 0x60b   : > { %v8660_v62 = vor.u32 %v8658_v4, %v16813_v61  ;;  %v8557_v17 = vsel %vm12095_vm8, 0, %v8420_v32  ;;  %v7334_v4 = vsel %vm7206_vm1, %v16718_v36, %v10577_v33  ;;  %v7863_v36 = vadd.f32 %v16699_v28, %v16715_v56 }
 0x60c   : > { %v8558_v22 = vsel %vm12035_vm6, %v8557_v17, 0  ;;  %v18943_v17 = vld [vmem:[#allocation17_spill] sm:$0xff] }
 0x60d   : > { %7076 = vrot.lane.b32.xlu0 %v6982_v15, %s11778_s25  ;;  %v8797_v26 = vsel %vm12095_vm8, 0, %v8660_v62  ;;  %10726 = vmatmul.msk.bf16.vlgmr.msrb.gmra.mxu3 %vm1780_vm5, %v8558_v22  ;;  %v7352_v15 = vpack.c.bf16 %v7334_v4, %v7333_v8  ;;  %vm7413_vm8 = vcmp.gt.f32.partialorder %v7381_v30, 0.0  ;;  %v7383_v8 = vsub.f32 0.0, %v16694_v49  ;;  %v18947_v4 = vld [vmem:[#allocation61_spill] sm:$0xff] }
 0x60e   : > { %v8798_v51 = vsel %vm12035_vm6, %v8797_v26, 0  ;;  %v7541_v62 = vsel %vm7413_vm8, %v7381_v30, %v10608_v50  ;;  %v16853_v30 = vpop.f32.mrf.mxu0  ;;  %v18948_v50 = vld [vmem:[#allocation59_spill] sm:$0xff] }
 0x60f   : > { %10710 = vmatmul.msk.bf16.vlgmr.msrb.gmra.mxu2 %vm1780_vm5, %v8798_v51  ;;  %10643 = vmatmul.msk.bf16.gmra.mxu1 %vm1780_vm5, %v7352_v15  ;;  %v7560_v63 = vpack.c.bf16 %v7542_v55, %v7541_v62  ;;  %v7267_v51 = vmul.f32 1.442695, %v16694_v49  ;;  %v18949_v62 = vld [vmem:[#allocation27_spill] sm:$0xff]  ;;  %vm7415_vm3 = vcmp.gt.f32.partialorder %v7383_v8, 0.0 }
 0x610   : > { %v7045_v60 = vpop.permute.xlu2 %7044  ;;  %7054 = vrot.lane.b32.xlu1 %v16823_v23, %s11778_s25  ;;  %v7114_v55 = vadd.f32 %v16743_v37, %v18949_v62  ;;  %v11729_v62 = vld [vmem:[%s11901_s23 + $0xf0] sm:$0xff] }
 0x611   : > { %v7126_v32 = vadd.f32 %v7045_v60, %v16310_v27  ;;  %10627 = vmatmul.msk.bf16.gmra.mxu0 %vm1780_vm5, %v7560_v63  ;;  %v6655_v27 = vadd.f32 %v18943_v17, %v18942_v16  ;;  %v6670_v60 = vadd.f32 %v18948_v50, %v18947_v4  ;;  %v11728_v63 = vld [vmem:[%s11901_s23 + $0xe8] sm:$0xff]  ;;  %11431 = vpow2.f32 %v7267_v51  ;;  %v18950_v16 = vld [vmem:[#allocation4_spill] sm:$0xff]  ;;  %v18951_v17 = vld [vmem:[#allocation57_spill] sm:$0xff] }
 0x613   : > { %v7161_v33 = vadd.f32 %v16709_v48, %v7126_v32  ;;  %v6821_v56 = vadd.f32 %v16536_v47, %v6655_v27  ;;  %v6793_v47 = vpop.f32.mrf.mxu2  ;;  %v7475_v32 = vmul.f32 1.442695, %v7383_v8  ;;  %v7771_v27 = vadd.f32 %v18951_v17, %v18950_v16 }
 0x615   : > { %v16847_v14 = vadd.f32 %v7863_v36, %v7161_v33  ;;  %v16859_v34 = vadd.f32 %v16538_v11, %v6821_v56  ;;  %v6827_v36 = vadd.f32 %v6793_v47, %v6670_v60  ;;  %v6949_v56 = vpop.f32.mrf.mxu3  ;;  %11433 = vpow2.f32 %v7475_v32 }
 0x616   : > { %v7851_v50 = vadd.f32 %v16699_v28, %v7771_v27 }
 0x617   : > { %18945 = vst [vmem:[#allocation41_spill] sm:$0xff] %v16859_v34  ;;  %v6983_v4 = vadd.f32 %v6949_v56, %v6827_v36  ;;  %v11432_v51 = vpop.eup %11431  ;;  %v18952_v56 = vld [vmem:[#allocation38_spill] sm:$0xff] }
 0x618   : > { %7060 = vrot.lane.b32.xlu1 %v18944_v45, %s11778_s25  ;;  %v10578_v32 = vadd.f32 -1.0, %v11432_v51 }
 0x61c   : > { %v7810_v5 = vpop.f32.mrf.mxu1 }
 0x61e   : > { %v7670_v22 = vpop.f32.mrf.mxu0 }
 0x61f   : > { %v16861_v26 = vadd.f32 %v7810_v5, %v7670_v22 }
 0x620   : > { %7066 = vrot.lane.b32.xlu1 %v16859_v34, %s11778_s25  ;;  %v18967_v34 = vld [vmem:[#allocation15_spill] sm:$0xff] }
 0x621   : > { %18946 = vst [vmem:[#allocation40_spill] sm:$0xff] %v16861_v26 }
 0x627   : > { %v5358_v15 = vpop.permute.xlu0 %5357 }
 0x628   : > { %7072 = vrot.lane.b32.xlu1 %v16591_v53, %s11778_s25  ;;  %v5424_v11 = vmul.f32 %v5358_v15, %v16516_v44  ;;  %v7149_v44 = vadd.f32 %v16709_v48, %v7114_v55  ;;  %v16895_v53 = vpop.permute.xlu2 %7050 }
 0x62a   : > { %v5456_v33 = vadd.f32 %v11728_v63, %v5424_v11  ;;  %v7883_v15 = vadd.f32 %v7851_v50, %v7149_v44  ;;  %v11434_v11 = vpop.eup %11433  ;;  %v7335_v44 = vsel %vm7207_vm11, %v16694_v49, %v10578_v32  ;;  %vm7921_vm11 = vcmp.gt.f32.partialorder %v16802_v41, 0.0 }
 0x62b   : > { %v10610_v17 = vadd.f32 -1.0, %v11434_v11 }
 0x62c   : > { %5488 = vst.msk [vmem:[%s15763_s22 + $0xe8] sm:$0xff] %vm1780_vm5, %v5456_v33  ;;  %v7269_v5 = vmul.f32 1.442695, %v5456_v33  ;;  %v7384_v22 = vsub.f32 0.0, %v5456_v33  ;;  %v7949_v36 = vmul.f32 1.442695, %v7883_v15 }
 0x62d   : > { %vm7208_vm13 = vcmp.gt.f32.partialorder %v5456_v33, 0.0  ;;  %vm7915_vm10 = vcmp.gt.f32.partialorder %v7883_v15, 0.0 }
 0x62e   : > { %11435 = vpow2.f32 %v7269_v5  ;;  %v7477_v37 = vmul.f32 1.442695, %v7384_v22  ;;  %v18953_v5 = vld [vmem:[#allocation14_spill] sm:$0xff]  ;;  %vm7416_vm9 = vcmp.gt.f32.partialorder %v7384_v22, 0.0 }
 0x62f   : > { %v5360_v60 = vpop.permute.xlu0 %5359 }
 0x630   : > { %7078 = vrot.lane.b32.xlu1 %v6983_v4, %s11778_s25  ;;  %v5425_v47 = vmul.f32 %v5360_v60, %v16534_v13  ;;  %11437 = vpow2.f32 %v7477_v37  ;;  %v7773_v4 = vadd.f32 %v18953_v5, %v18952_v56  ;;  %v18954_v60 = vld [vmem:[#allocation47_spill] sm:$0xff] }
 0x631   : > { %11439 = vpow2.f32 %v7949_v36  ;;  %v8075_v36 = vsub.f32 0.0, %v7883_v15 }
 0x632   : > { %v16884_v63 = vadd.f32 %v11729_v62, %v5425_v47  ;;  %v7543_v62 = vsel %vm7415_vm3, %v7383_v8, %v10610_v17  ;;  %v16902_v8 = vpop.f32.mrf.mxu0 }
 0x633   : > { %vm8107_vm7 = vcmp.gt.f32.partialorder %v8075_v36, 0.0 }
 0x634   : > { %v11436_v55 = vpop.eup %11435  ;;  %5489 = vst.msk [vmem:[%s15763_s22 + $0xf0] sm:$0xff] %vm1780_vm5, %v16884_v63  ;;  %vm7209_vm8 = vcmp.gt.f32.partialorder %v16884_v63, 0.0 }
 0x635   : > { %v10579_v16 = vadd.f32 -1.0, %v11436_v55  ;;  %v7852_v55 = vadd.f32 %v16699_v28, %v7773_v4  ;;  %v8141_v4 = vmul.f32 1.442695, %v8075_v36 }
 0x636   : > { %v11438_v27 = vpop.eup %11437 }
 0x637   : > { %v7023_v13 = vpop.permute.xlu0 %7022  ;;  %v7336_v37 = vsel %vm7208_vm13, %v5456_v33, %v10579_v16  ;;  %v10611_v50 = vadd.f32 -1.0, %v11438_v27  ;;  %v16900_v33 = vpop.f32.mrf.mxu1 }
 0x638   : > { %v7115_v51 = vadd.f32 %v7023_v13, %v18954_v60  ;;  %v7353_v47 = vpack.c.bf16 %v7336_v37, %v7335_v44  ;;  %v11440_v27 = vpop.eup %11439  ;;  %v7057_v13 = vpop.permute.xlu2 %7056 }
 0x639   : > { %v7544_v11 = vsel %vm7416_vm9, %v7384_v22, %v10611_v50  ;;  %v10648_v22 = vadd.f32 -1.0, %v11440_v27  ;;  %v7132_v60 = vadd.f32 %v7057_v13, %v16451_v35 }
 0x63a   : > { %v7150_v56 = vadd.f32 %v16709_v48, %v7115_v51  ;;  %10644 = vmatmul.msk.bf16.gmra.mxu1 %vm1780_vm5, %v7353_v47  ;;  %v7561_v5 = vpack.c.bf16 %v7544_v11, %v7543_v62 }
 0x63b   : > { %v8043_v37 = vsel %vm7915_vm10, %v7883_v15, %v10648_v22 }
 0x63c   : > { %v7884_v49 = vadd.f32 %v7852_v55, %v7150_v56  ;;  %10628 = vmatmul.msk.bf16.gmra.mxu0 %vm1780_vm5, %v7561_v5  ;;  %v8272_v62 = vpack.c.bf16 %v8043_v37, %v8043_v37  ;;  %v7117_v5 = vadd.f32 %v16756_v25, %v16109_v29 }
 0x63e   : > { %v7951_v32 = vmul.f32 1.442695, %v7884_v49  ;;  %v8076_v16 = vsub.f32 0.0, %v7884_v49  ;;  %vm7916_vm12 = vcmp.gt.f32.partialorder %v7884_v49, 0.0  ;;  %v8368_v13 = vunpack.c.l.b16 %v8272_v62 }
 0x63f   : > { %v7152_v37 = vadd.f32 %v16709_v48, %v7117_v5  ;;  %v11730_v5 = vld [vmem:[%s11901_s23 + $0xf8] sm:$0xff] }
 0x640   : > { %11441 = vpow2.f32 %v7951_v32  ;;  %v8143_v17 = vmul.f32 1.442695, %v8076_v16  ;;  %v7167_v32 = vadd.f32 %v16709_v48, %v7132_v60  ;;  %vm8108_vm0 = vcmp.gt.f32.partialorder %v8076_v16, 0.0 }
 0x642   : > { %11443 = vpow2.f32 %v8143_v17  ;;  %v18955_v17 = vld [vmem:[#allocation64_spill] sm:$0xff] }
 0x643   : > { %11445 = vpow2.f32 %v8141_v4  ;;  %v7778_v35 = vadd.f32 %v18956_v52, %v18955_v17 }
 0x645   : > { %v7854_v60 = vadd.f32 %v16699_v28, %v7778_v35 }
 0x646   : > { %v11442_v44 = vpop.eup %11441  ;;  %v7815_v50 = vpop.f32.mrf.mxu1 }
 0x647   : > { %v10649_v51 = vadd.f32 -1.0, %v11442_v44 }
 0x648   : > { %v7675_v47 = vpop.f32.mrf.mxu0  ;;  %v11444_v15 = vpop.eup %11443 }
 0x649   : > { %v8044_v11 = vsel %vm7916_vm12, %v7884_v49, %v10649_v51  ;;  %v7816_v55 = vadd.f32 %v7815_v50, %v7675_v47  ;;  %v11446_v44 = vpop.eup %11445  ;;  %v10681_v50 = vadd.f32 -1.0, %v11444_v15  ;;  %v16921_v47 = vadd.f32 %v7854_v60, %v7152_v37 }
 0x64a   : > { %v8273_v56 = vpack.c.bf16 %v8044_v11, %v8044_v11  ;;  %v10680_v51 = vadd.f32 -1.0, %v11446_v44 }
 0x64b   : > { %v7869_v27 = vadd.f32 %v16699_v28, %v7816_v55  ;;  %v8236_v62 = vsel %vm8108_vm0, %v8076_v16, %v10681_v50  ;;  %v7955_v17 = vmul.f32 1.442695, %v16921_v47  ;;  %vm7918_vm14 = vcmp.gt.f32.partialorder %v16921_v47, 0.0 }
 0x64c   : > { %v8369_v22 = vunpack.c.l.b16 %v8273_v56  ;;  %v8235_v56 = vsel %vm8107_vm7, %v8075_v36, %v10680_v51  ;;  %v16937_v36 = vsub.f32 0.0, %v16921_v47 }
 0x64d   : > { %v16911_v4 = vadd.f32 %v7869_v27, %v7167_v32  ;;  %11447 = vpow2.f32 %v7955_v17 }
 0x64e   : > { %v16913_v49 = vpop.f32.mrf.mxu1  ;;  %v16916_v29 = vpack.c.b16 %v8369_v22, %v8368_v13  ;;  %v8305_v22 = vpack.c.bf16 %v8236_v62, %v8236_v62  ;;  %vm8110_vm15 = vcmp.gt.f32.partialorder %v16937_v36, 0.0 }
 0x64f   : > { %18957 = vst [vmem:[#allocation42_spill] sm:$0xff] %v16911_v4 }
 0x650   : > { %18958 = vst [vmem:[#allocation79_spill] sm:$0xff] %v16913_v49  ;;  %v16918_v25 = vpop.f32.mrf.mxu0  ;;  %v8422_v55 = vshrl.u32 %v16916_v29, 16  ;;  %v8425_v15 = vshll.u32 %v16916_v29, 16  ;;  %v8609_v60 = vunpack.c.l.b16 %v8305_v22  ;;  %v18961_v22 = vld [vmem:[#allocation37_spill] sm:$0xff]  ;;  %v18971_v49 = vld [vmem:[#allocation55_spill] sm:$0xff] }
 0x651   : > { %18959 = vst [vmem:[#allocation76_spill] sm:$0xff] %v16918_v25  ;;  %v7853_v17 = vadd.f32 %v16699_v28, %v18961_v22  ;;  %v7961_v22 = vmul.f32 1.442695, %v16802_v41 }
 0x652   : > { %v5362_v52 = vpop.permute.xlu1 %5361  ;;  %v16928_v27 = vrot.slane %v8422_v55, 7  ;;  %v7123_v55 = vadd.f32 %v16806_v39, %v16644_v43  ;;  %v7788_v43 = vadd.f32 %v18967_v34, %v18966_v24 }
 0x653   : > { %v5426_v11 = vmul.f32 %v5362_v52, %v16620_v31  ;;  %v8304_v31 = vpack.c.bf16 %v8235_v56, %v8235_v56  ;;  %v18960_v56 = vld [vmem:[#allocation24_spill] sm:$0xff] }
 0x654   : > { %v8427_v16 = vor.u32 %v8425_v15, %v16928_v27 }
 0x655   : > { %v16926_v32 = vadd.f32 %v11730_v5, %v5426_v11  ;;  %v8608_v62 = vunpack.c.l.b16 %v8304_v31  ;;  %v8147_v11 = vmul.f32 1.442695, %v16937_v36  ;;  %v18964_v31 = vld [vmem:[#allocation16_spill] sm:$0xff] }
 0x656   : > { %v7820_v35 = vpop.f32.mrf.mxu1  ;;  %v8428_v37 = vsel %vm1186_vm4, %v16810_v3, %v8427_v16  ;;  %v7271_v3 = vmul.f32 1.442695, %v16884_v63  ;;  %v18962_v16 = vld [vmem:[#allocation32_spill] sm:$0xff] }
 0x657   : > { %5490 = vst.msk [vmem:[%s15763_s22 + $0xf8] sm:$0xff] %vm1780_vm5, %v16926_v32  ;;  %v7273_v51 = vmul.f32 1.442695, %v16926_v32  ;;  %v8559_v52 = vsel %vm12035_vm6, %v8428_v37, 0  ;;  %v16952_v15 = vpack.c.b16 %v8609_v60, %v8608_v62  ;;  %v18965_v37 = vld [vmem:[#allocation71_spill] sm:$0xff]  ;;  %vm7210_vm1 = vcmp.gt.f32.partialorder %v16926_v32, 0.0 }
 0x658   : > { %v7680_v13 = vpop.f32.mrf.mxu0  ;;  %10727 = vmatmul.msk.bf16.gmra.mxu3 %vm1780_vm5, %v8559_v52  ;;  %v7793_v1 = vadd.f32 %v18965_v37, %v18964_v31  ;;  %v11448_v52 = vpop.eup %11447  ;;  %v18968_v60 = vld [vmem:[#allocation63_spill] sm:$0xff]  ;;  %v18969_v37 = vld [vmem:[#allocation68_spill] sm:$0xff] }
 0x659   : > { %v16939_v44 = vadd.f32 %v7820_v35, %v7680_v13  ;;  %v18963_v35 = vld [vmem:[#allocation5_spill] sm:$0xff]  ;;  %11449 = vpow2.f32 %v7273_v51  ;;  %v7855_v62 = vadd.f32 %v16699_v28, %v18968_v60 }
 0x65a   : > { %v7025_v50 = vpop.permute.xlu1 %7024  ;;  %v7783_v13 = vadd.f32 %v18963_v35, %v18962_v16  ;;  %11451 = vpow2.f32 %v8147_v11  ;;  %v7029_v16 = vpop.permute.xlu0 %7028  ;;  %v7860_v51 = vadd.f32 %v16699_v28, %v7793_v1  ;;  %v8665_v11 = vshll.u32 %v16952_v15, 16 }
 0x65b   : > { %v7116_v5 = vadd.f32 %v7025_v50, %v18960_v56  ;;  %v8662_v50 = vshrl.u32 %v16952_v15, 16  ;;  %v7158_v56 = vadd.f32 %v16709_v48, %v7123_v55  ;;  %11453 = vpow2.f32 %v7271_v3 }
 0x65c   : > { %v7856_v34 = vadd.f32 %v16699_v28, %v7783_v13  ;;  %v16979_v55 = vadd.f32 %v16699_v28, %v7788_v43  ;;  %v7118_v13 = vadd.f32 %v7029_v16, %v18921_v9  ;;  %v7808_v43 = vadd.f32 %v16851_v38, %v16853_v30 }
 0x65d   : > { %v7151_v39 = vadd.f32 %v16709_v48, %v7116_v5  ;;  %v16970_v31 = vrot.slane %v8662_v50, 7  ;;  %v16975_v5 = vsub.f32 0.0, %v16802_v41  ;;  %v18970_v50 = vld [vmem:[#allocation30_spill] sm:$0xff]  ;;  %v16986_v3 = vadd.f32 %v7860_v51, %v7158_v56 }
 0x65e   : > { %11455 = vpow2.f32 %v7961_v22  ;;  %v7798_v30 = vadd.f32 %v16675_v54, %v16684_v7  ;;  %v7866_v54 = vadd.f32 %v16699_v28, %v7808_v43 }
 0x65f   : > { %v16968_v35 = vadd.f32 %v7853_v17, %v7151_v39  ;;  %v16983_v17 = vadd.f32 %v16699_v28, %v18969_v37  ;;  %v10651_v39 = vadd.f32 -1.0, %v11448_v52  ;;  %v8667_v21 = vor.u32 %v8665_v11, %v16970_v31  ;;  %v11450_v45 = vpop.eup %11449 }
 0x660   : > { %v7129_v37 = vadd.f32 %v16895_v53, %v16691_v46  ;;  %v16995_v4 = vpop.f32.mrf.mxu0  ;;  %v16998_v52 = vsub.f32 0.0, %v16884_v63  ;;  %v11452_v56 = vpop.eup %11451  ;;  %v8153_v9 = vmul.f32 1.442695, %v16975_v5  ;;  %v7967_v11 = vmul.f32 1.442695, %v16986_v3 }
 0x661   : > { %v7953_v1 = vmul.f32 1.442695, %v16968_v35  ;;  %v17002_v16 = vsub.f32 0.0, %v16968_v35  ;;  %v11454_v38 = vpop.eup %11453  ;;  %v17011_v46 = vpop.f32.mrf.mxu1  ;;  %v8046_v51 = vsel %vm7918_vm14, %v16921_v47, %v10651_v39  ;;  %vm7917_vm2 = vcmp.gt.f32.partialorder %v16968_v35, 0.0 }
 0x662   : > { %v7031_v24 = vpop.permute.xlu1 %7030  ;;  %v7164_v7 = vadd.f32 %v16709_v48, %v7129_v37  ;;  %v10580_v39 = vadd.f32 -1.0, %v11454_v38  ;;  %v8275_v26 = vpack.c.bf16 %v8046_v51, %v8046_v51  ;;  %v17030_v37 = vsub.f32 0.0, %v16986_v3  ;;  %v7035_v38 = vpop.permute.xlu0 %7034 }
 0x663   : > { %v7119_v60 = vadd.f32 %v7031_v24, %v18970_v50  ;;  %11457 = vpow2.f32 %v7953_v1  ;;  %v8668_v24 = vsel %vm1186_vm4, %v16813_v61, %v8667_v21  ;;  %v7153_v50 = vadd.f32 %v16709_v48, %v7118_v13 }
 0x664   : > { %v8799_v53 = vsel %vm12035_vm6, %v8668_v24, 0  ;;  %v10581_v21 = vadd.f32 -1.0, %v11450_v45  ;;  %v7479_v61 = vmul.f32 1.442695, %v16998_v52  ;;  %v10683_v24 = vadd.f32 -1.0, %v11452_v56 }
 0x665   : > { %v7154_v22 = vadd.f32 %v16709_v48, %v7119_v60  ;;  %10711 = vmatmul.msk.bf16.gmra.mxu2 %vm1780_vm5, %v8799_v53  ;;  %11459 = vpow2.f32 %v8153_v9  ;;  %v8145_v47 = vmul.f32 1.442695, %v17002_v16  ;;  %v11456_v60 = vpop.eup %11455  ;;  %v17027_v45 = vsub.f32 0.0, %v16926_v32 }
 0x666   : > { %11461 = vpow2.f32 %v7967_v11  ;;  %v17032_v53 = vadd.f32 %v7855_v62, %v7153_v50  ;;  %v7338_v56 = vsel %vm7210_vm1, %v16926_v32, %v10581_v21  ;;  %v17035_v9 = vadd.f32 %v7866_v54, %v7164_v7 }
 0x667   : > { %v17023_v13 = vadd.f32 %v7856_v34, %v7154_v22  ;;  %11463 = vpow2.f32 %v7479_v61  ;;  %v10654_v34 = vadd.f32 -1.0, %v11456_v60  ;;  %v7337_v22 = vsel %vm7209_vm8, %v16884_v63, %v10580_v39 }
 0x668   : > { %11465 = vpow2.f32 %v8145_v47  ;;  %v7354_v50 = vpack.c.bf16 %v7338_v56, %v7337_v22  ;;  %v7481_v32 = vmul.f32 1.442695, %v17027_v45  ;;  %v17045_v7 = vadd.f32 %v16699_v28, %v16582_v42 }
 0x669   : > { %v11458_v43 = vpop.eup %11457  ;;  %v7959_v62 = vmul.f32 1.442695, %v17023_v13  ;;  %v8238_v61 = vsel %vm8110_vm15, %v16937_v36, %v10683_v24  ;;  %v7957_v47 = vmul.f32 1.442695, %v17032_v53  ;;  %v7803_v39 = vadd.f32 %v16734_v12, %v16741_v59  ;;  %v7825_v42 = vpop.f32.mrf.mxu1 }
 0x66a   : > { %v7037_v1 = vpop.permute.xlu1 %7036  ;;  %v10650_v51 = vadd.f32 -1.0, %v11458_v43  ;;  %v7685_v21 = vpop.f32.mrf.mxu0  ;;  %v7979_v60 = vmul.f32 1.442695, %v17035_v9  ;;  %10645 = vmatmul.msk.bf16.gmra.mxu1 %vm1780_vm5, %v7354_v50  ;;  %11467 = vpow2.f32 %v7481_v32  ;;  %v8307_v22 = vpack.c.bf16 %v8238_v61, %v8238_v61 }
 0x66b   : > { %v11460_v54 = vpop.eup %11459  ;;  %v17061_v24 = vadd.f32 %v7825_v42, %v7685_v21  ;;  %v8159_v12 = vmul.f32 1.442695, %v17030_v37  ;;  %11469 = vpow2.f32 %v7959_v62  ;;  %v7121_v50 = vadd.f32 %v7035_v38, %v18926_v0 }
 0x66c   : > { %v8045_v11 = vsel %vm7917_vm2, %v16968_v35, %v10650_v51  ;;  %v17052_v35 = vadd.f32 %v16699_v28, %v7798_v30  ;;  %v11462_v56 = vpop.eup %11461  ;;  %v8371_v51 = vunpack.c.l.b16 %v8275_v26  ;;  %11471 = vpow2.f32 %v7957_v47 }
 0x66d   : > { %v8274_v63 = vpack.c.bf16 %v8045_v11, %v8045_v11  ;;  %v11464_v30 = vpop.eup %11463  ;;  %v8049_v11 = vsel %vm7921_vm11, %v16802_v41, %v10654_v34  ;;  %v7122_v26 = vadd.f32 %v7037_v1, %v18971_v49  ;;  %v17070_v25 = vadd.f32 %v16699_v28, %v7803_v39  ;;  %v7041_v1 = vpop.permute.xlu0 %7040 }
 0x66e   : > { %v11466_v59 = vpop.eup %11465  ;;  %v17074_v21 = vadd.f32 %v16699_v28, %v16754_v6  ;;  %vm8113_vm13 = vcmp.gt.f32.partialorder %v16975_v5, 0.0  ;;  %11473 = vpow2.f32 %v7979_v60  ;;  %v10686_v41 = vadd.f32 -1.0, %v11460_v54 }
 0x66f   : > { %v8370_v36 = vunpack.c.l.b16 %v8274_v63  ;;  %v8278_v34 = vpack.c.bf16 %v8049_v11, %v8049_v11  ;;  %v10612_v62 = vadd.f32 -1.0, %v11464_v30  ;;  %v7157_v61 = vadd.f32 %v16709_v48, %v7122_v26 }
 0x670   : > { %v11468_v0 = vpop.eup %11467  ;;  %vm7924_vm3 = vcmp.gt.f32.partialorder %v16986_v3, 0.0  ;;  %v10657_v38 = vadd.f32 -1.0, %v11462_v56  ;;  %v17080_v49 = vsub.f32 0.0, %v17032_v53  ;;  %v17082_v47 = vunpack.c.l.b16 %v8307_v22 }
 0x671   : > { %v17066_v32 = vpack.c.b16 %v8371_v51, %v8370_v36  ;;  %11475 = vpow2.f32 %v8159_v12  ;;  %v7156_v6 = vadd.f32 %v16709_v48, %v7121_v50  ;;  %v10682_v63 = vadd.f32 -1.0, %v11466_v59  ;;  %v11470_v54 = vpop.eup %11469 }
 0x672   : > { %v17058_v43 = vpop.permute.xlu1 %7042  ;;  %v10613_v39 = vadd.f32 -1.0, %v11468_v0  ;;  %v7973_v60 = vmul.f32 1.442695, %v16847_v14  ;;  %vm7417_vm9 = vcmp.gt.f32.partialorder %v16998_v52, 0.0  ;;  %vm7418_vm10 = vcmp.gt.f32.partialorder %v17027_v45, 0.0  ;;  %v11472_v51 = vpop.eup %11471 }
 0x673   : > { %v17089_v42 = vadd.f32 %v16983_v17, %v7157_v61  ;;  %v17094_v36 = vsel %vm8113_vm13, %v16975_v5, %v10686_v41  ;;  %v17096_v30 = vunpack.c.l.b16 %v8278_v34  ;;  %v7545_v22 = vsel %vm7417_vm9, %v16998_v52, %v10612_v62 }
 0x674   : > { %v7546_v11 = vsel %vm7418_vm10, %v17027_v45, %v10613_v39  ;;  %v11474_v12 = vpop.eup %11473  ;;  %v17103_v59 = vsel %vm7924_vm3, %v16986_v3, %v10657_v38  ;;  %v8149_v17 = vmul.f32 1.442695, %v17080_v49  ;;  %vm8109_vm12 = vcmp.gt.f32.partialorder %v17002_v16, 0.0  ;;  %v18972_v39 = vld [vmem:[#allocation62_spill] sm:$0xff] }
 0x675   : > { %v7562_v50 = vpack.c.bf16 %v7546_v11, %v7545_v22  ;;  %v17108_v5 = vadd.f32 %v16979_v55, %v7156_v6  ;;  %v8237_v26 = vsel %vm8109_vm12, %v17002_v16, %v10682_v63  ;;  %v10653_v41 = vadd.f32 -1.0, %v11470_v54  ;;  %v7063_v16 = vpop.permute.xlu2 %7062  ;;  %v7047_v22 = vpop.permute.xlu0 %7046 }
 0x676   : > { %v7965_v52 = vmul.f32 1.442695, %v17089_v42  ;;  %11477 = vpow2.f32 %v7973_v60  ;;  %v17113_v45 = vsub.f32 0.0, %v16847_v14  ;;  %v10652_v34 = vadd.f32 -1.0, %v11472_v51 }
 0x677   : > { %v17116_v3 = vsub.f32 0.0, %v17023_v13  ;;  %10629 = vmatmul.msk.bf16.gmra.mxu0 %vm1780_vm5, %v7562_v50  ;;  %v17119_v62 = vpop.eup %11475  ;;  %v8281_v55 = vpack.c.bf16 %v17103_v59, %v17103_v59  ;;  %v10663_v61 = vadd.f32 -1.0, %v11474_v12  ;;  %vm7919_vm0 = vcmp.gt.f32.partialorder %v17032_v53, 0.0 }
 0x678   : > { %11479 = vpow2.f32 %v7965_v52  ;;  %v7124_v0 = vadd.f32 %v7041_v1, %v18929_v2  ;;  %v8306_v38 = vpack.c.bf16 %v8237_v26, %v8237_v26  ;;  %vm7920_vm7 = vcmp.gt.f32.partialorder %v17023_v13, 0.0 }
 0x679   : > { %11481 = vpow2.f32 %v8149_v17  ;;  %v7963_v6 = vmul.f32 1.442695, %v17108_v5  ;;  %v8048_v63 = vsel %vm7920_vm7, %v17023_v13, %v10653_v41  ;;  %v8430_v60 = vshrl.u32 %v17066_v32, 16 }
 0x67a   : > { %v7049_v56 = vpop.permute.xlu1 %7048  ;;  %vm7930_vm14 = vcmp.gt.f32.partialorder %v17035_v9, 0.0  ;;  %v8047_v51 = vsel %vm7919_vm0, %v17032_v53, %v10652_v34  ;;  %v7823_v11 = vadd.f32 %v17011_v46, %v16995_v4  ;;  %v8151_v2 = vmul.f32 1.442695, %v17116_v3  ;;  %10758 = vmatmul.msk.bf16.vlgmr.msrb.gmra.mxu1 %vm1780_vm5, %v16795_v20 }
 0x67b   : > { %v7128_v54 = vadd.f32 %v7049_v56, %v18972_v39  ;;  %v17138_v1 = vsel %vm7930_vm14, %v17035_v9, %v10663_v61  ;;  %v7135_v13 = vadd.f32 %v7063_v16, %v16748_v57  ;;  %v18973_v56 = vld [vmem:[#allocation70_spill] sm:$0xff]  ;;  %v17149_v4 = vsub.f32 0.0, %v17108_v5 }
 0x67c   : > { %v7125_v12 = vadd.f32 %v17058_v43, %v18973_v56  ;;  %v17146_v17 = vpop.eup %11477  ;;  %v7159_v46 = vadd.f32 %v16709_v48, %v7124_v0  ;;  %v8277_v20 = vpack.c.bf16 %v8048_v63, %v8048_v63  ;;  %v8610_v50 = vunpack.c.l.b16 %v8306_v38 }
 0x67d   : > { %v7163_v59 = vadd.f32 %v16709_v48, %v7128_v54  ;;  %v8276_v41 = vpack.c.bf16 %v8047_v51, %v8047_v51  ;;  %11483 = vpow2.f32 %v7963_v6  ;;  %v7127_v57 = vadd.f32 %v7047_v22, %v16773_v18  ;;  %v7069_v54 = vpop.permute.xlu2 %7068 }
 0x67e   : > { %v11480_v26 = vpop.eup %11479  ;;  %v17153_v52 = vrot.slane %v8430_v60, 7  ;;  %v7872_v34 = vadd.f32 %v16699_v28, %v7823_v11  ;;  %11485 = vpow2.f32 %v8151_v2  ;;  %vm7923_vm15 = vcmp.gt.f32.partialorder %v17089_v42, 0.0  ;;  %v17180_v2 = vpop.f32.mrf.mxu1 }
 0x67f   : > { %v11482_v43 = vpop.eup %11481  ;;  %v10656_v61 = vadd.f32 -1.0, %v11480_v26  ;;  %v17157_v16 = vadd.f32 %v17074_v21, %v7163_v59  ;;  %v7160_v0 = vadd.f32 %v16709_v48, %v7125_v12  ;;  %v8433_v38 = vshll.u32 %v17066_v32, 16 }
 0x680   : > { %v17163_v6 = vpack.c.b16 %v17082_v47, %v8610_v50  ;;  %v7170_v18 = vadd.f32 %v16709_v48, %v7135_v13  ;;  %v17167_v63 = vadd.f32 %v17045_v7, %v7159_v46  ;;  %v8373_v28 = vunpack.c.l.b16 %v8277_v20  ;;  %v17175_v47 = vld [vmem:[%s18391_s10] ss:$0 sm:$0xff]  ;;  %v17182_v13 = vpop.f32.mrf.mxu0 }
 0x681   : > { %v8051_v39 = vsel %vm7923_vm15, %v17089_v42, %v10656_v61  ;;  %v10684_v21 = vadd.f32 -1.0, %v11482_v43  ;;  %v8155_v60 = vmul.f32 1.442695, %v17149_v4  ;;  %v8435_v22 = vor.u32 %v8433_v38, %v17153_v52 }
 0x682   : > { %v17144_v53 = vpop.permute.xlu1 %7054  ;;  %v8280_v51 = vpack.c.bf16 %v8051_v39, %v8051_v39  ;;  %v8372_v11 = vunpack.c.l.b16 %v8276_v41  ;;  %v7162_v48 = vadd.f32 %v17175_v47, %v7127_v57  ;;  %v17178_v7 = vadd.f32 %v7872_v34, %v7170_v18  ;;  %v18974_v39 = vld [vmem:[#allocation72_spill] sm:$0xff] }
 0x683   : > { %v7977_v56 = vmul.f32 1.442695, %v17157_v16  ;;  %v11484_v12 = vpop.eup %11483  ;;  %v8377_v59 = vunpack.c.l.b16 %v8281_v55  ;;  %v8287_v46 = vpack.c.bf16 %v17138_v1, %v17138_v1  ;;  %v17188_v50 = vadd.f32 %v17052_v35, %v7160_v0 }
 0x684   : > { %v8376_v20 = vunpack.c.l.b16 %v8280_v51  ;;  %v11486_v26 = vpop.eup %11485  ;;  %v7138_v41 = vadd.f32 %v7069_v54, %v16522_v58  ;;  %vm8111_vm1 = vcmp.gt.f32.partialorder %v17080_v49, 0.0  ;;  %v7969_v57 = vmul.f32 1.442695, %v17167_v63 }
 0x685   : > { %v17193_v43 = vpack.c.b16 %v8373_v28, %v8372_v11  ;;  %vm7922_vm8 = vcmp.gt.f32.partialorder %v17108_v5, 0.0  ;;  %11487 = vpow2.f32 %v7977_v56  ;;  %v8436_v55 = vsel %vm1186_vm4, %v16928_v27, %v8435_v22 }
 0x686   : > { %v17196_v34 = vpack.c.b16 %v8377_v59, %v8376_v20  ;;  %v17201_v35 = vsel %vm8111_vm1, %v17080_v49, %v10684_v21  ;;  %11489 = vpow2.f32 %v8155_v60  ;;  %v17204_v58 = vadd.f32 %v17070_v25, %v7162_v48 }
 0x687   : > { %v7991_v0 = vmul.f32 1.442695, %v17178_v7  ;;  %10742 = vmatmul.msk.bf16.vlgmr.msrb.gmra.mxu0 %vm1780_vm5, %v16784_v19  ;;  %v10655_v38 = vadd.f32 -1.0, %v11484_v12  ;;  %v7971_v18 = vmul.f32 1.442695, %v17188_v50  ;;  %v8560_v28 = vsel %vm12035_vm6, %v8436_v55, 0 }
 0x688   : > { %v8670_v27 = vshrl.u32 %v17163_v6, 16  ;;  %11491 = vpow2.f32 %v7969_v57  ;;  %v10685_v49 = vadd.f32 -1.0, %v11486_v26  ;;  %10728 = vmatmul.msk.bf16.gmra.mxu3 %vm1780_vm5, %v8560_v28  ;;  %v8438_v54 = vshrl.u32 %v17193_v43, 16  ;;  %v17219_v19 = vld [vmem:[%s18394_s13] ss:$0 sm:$0xff] }
 0x689   : > { %v7871_v21 = vadd.f32 %v17219_v19, %v16939_v44  ;;  %v17224_v60 = vsub.f32 0.0, %v17089_v42  ;;  %v8673_v22 = vshll.u32 %v17163_v6, 16  ;;  %v7975_v11 = vmul.f32 1.442695, %v17204_v58 }
 0x68a   : > { %v7061_v61 = vpop.permute.xlu1 %7060  ;;  %v17226_v51 = vrot.slane %v8670_v27, 7  ;;  %11493 = vpow2.f32 %v7991_v0  ;;  %10759 = vmatmul.msk.bf16.gmra.mxu1 %vm1780_vm5, %v16952_v15  ;;  %v17233_v59 = vrot.slane %v8438_v54, 7  ;;  %vm8112_vm2 = vcmp.gt.f32.partialorder %v17116_v3, 0.0 }
 0x68b   : > { %v7134_v25 = vadd.f32 %v7061_v61, %v18974_v39  ;;  %v11488_v44 = vpop.eup %11487  ;;  %11495 = vpow2.f32 %v7971_v18  ;;  %v8240_v57 = vsel %vm8112_vm2, %v17116_v3, %v10685_v49  ;;  %v8441_v15 = vshll.u32 %v17193_v43, 16 }
 0x68c   : > { %v7830_v48 = vpop.f32.mrf.mxu1  ;;  %v8675_v42 = vor.u32 %v8673_v22, %v17226_v51  ;;  %v11490_v26 = vpop.eup %11489  ;;  %v10662_v55 = vadd.f32 -1.0, %v11488_v44  ;;  %v8050_v0 = vsel %vm7922_vm8, %v17108_v5, %v10655_v38  ;;  %v8157_v28 = vmul.f32 1.442695, %v17224_v60 }
 0x68d   : > { %v7169_v12 = vadd.f32 %v17175_v47, %v7134_v25  ;;  %vm7929_vm11 = vcmp.gt.f32.partialorder %v17157_v16, 0.0  ;;  %v7173_v39 = vadd.f32 %v17175_v47, %v7138_v41  ;;  %v8443_v25 = vor.u32 %v8441_v15, %v17233_v59 }
 0x68e   : > { %v7690_v56 = vpop.f32.mrf.mxu0  ;;  %v8676_v18 = vsel %vm1186_vm4, %v16970_v31, %v8675_v42  ;;  %v11492_v27 = vpop.eup %11491  ;;  %v8057_v3 = vsel %vm7929_vm11, %v17157_v16, %v10662_v55  ;;  %v8308_v5 = vpack.c.bf16 %v17201_v35, %v17201_v35  ;;  %v17256_v38 = vsub.f32 0.0, %v17167_v63 }
 0x68f   : > { %v7831_v20 = vadd.f32 %v7830_v48, %v7690_v56  ;;  %v17238_v61 = vadd.f32 %v7871_v21, %v7169_v12  ;;  %v8800_v49 = vsel %vm12035_vm6, %v8676_v18, 0  ;;  %v8309_v54 = vpack.c.bf16 %v8240_v57, %v8240_v57 }
 0x690   : > { %v8286_v21 = vpack.c.bf16 %v8057_v3, %v8057_v3  ;;  %10712 = vmatmul.msk.bf16.gmra.mxu2 %vm1780_vm5, %v8800_v49  ;;  %v11494_v31 = vpop.eup %11493  ;;  %v8279_v22 = vpack.c.bf16 %v8050_v0, %v8050_v0  ;;  %11497 = vpow2.f32 %v7975_v11  ;;  %v8383_v12 = vunpack.c.l.b16 %v8287_v46 }
 0x691   : > { %v7875_v41 = vadd.f32 %v17219_v19, %v7831_v20  ;;  %v7989_v48 = vmul.f32 1.442695, %v17238_v61  ;;  %v11496_v56 = vpop.eup %11495  ;;  %11499 = vpow2.f32 %v8157_v28  ;;  %v17265_v35 = vsub.f32 0.0, %v17188_v50 }
 0x692   : > { %v8382_v44 = vunpack.c.l.b16 %v8286_v21  ;;  %v17268_v42 = vmul.f32 1.442695, %v17113_v45  ;;  %v8444_v11 = vsel %vm1186_vm4, %v17153_v52, %v8443_v25  ;;  %vm8116_vm13 = vcmp.gt.f32.partialorder %v17030_v37, 0.0 }
 0x693   : > { %v17270_v57 = vadd.f32 %v7875_v41, %v7173_v39  ;;  %11501 = vpow2.f32 %v7989_v48  ;;  %vm7927_vm3 = vcmp.gt.f32.partialorder %v16847_v14, 0.0  ;;  %v10669_v1 = vadd.f32 -1.0, %v11494_v31 }
 0x694   : > { %v17276_v46 = vpack.c.b16 %v8383_v12, %v8382_v44  ;;  %v8612_v20 = vunpack.c.l.b16 %v8308_v5  ;;  %v8613_v55 = vunpack.c.l.b16 %v8309_v54  ;;  %v10689_v15 = vadd.f32 -1.0, %v17119_v62 }
 0x695   : > { %v8375_v0 = vunpack.c.l.b16 %v8279_v22  ;;  %v8161_v28 = vmul.f32 1.442695, %v17256_v38  ;;  %v10659_v18 = vadd.f32 -1.0, %v11496_v56  ;;  %v10660_v39 = vadd.f32 -1.0, %v17146_v17 }
 0x696   : > { %vm8114_vm9 = vcmp.gt.f32.partialorder %v17149_v4, 0.0  ;;  %v8163_v52 = vmul.f32 1.442695, %v17265_v35  ;;  %v17283_v3 = vpack.c.b16 %v8613_v55, %v8612_v20  ;;  %v11498_v49 = vpop.eup %11497  ;;  %v10687_v25 = vadd.f32 -1.0, %v11490_v26 }
 0x697   : > { %vm7925_vm10 = vcmp.gt.f32.partialorder %v17167_v63, 0.0  ;;  %v10658_v5 = vadd.f32 -1.0, %v11492_v27  ;;  %vm7936_vm12 = vcmp.gt.f32.partialorder %v17178_v7, 0.0  ;;  %10743 = vmatmul.msk.bf16.gmra.mxu0 %vm1780_vm5, %v16916_v29  ;;  %v11500_v62 = vpop.eup %11499  ;;  %vm7926_vm0 = vcmp.gt.f32.partialorder %v17188_v50, 0.0 }
 0x698   : > { %v8064_v54 = vsel %vm7936_vm12, %v17178_v7, %v10669_v1  ;;  %v8561_v17 = vsel %vm12035_vm6, %v8444_v11, 0  ;;  %v8678_v21 = vshrl.u32 %v17283_v3, 16  ;;  %v17295_v26 = vpack.c.b16 %v8375_v0, %v17096_v30 }
 0x699   : > { %v11502_v31 = vpop.eup %11501  ;;  %11503 = vpow2.f32 %v8161_v28  ;;  %v17298_v27 = vsub.f32 0.0, %v17204_v58  ;;  %v8054_v29 = vsel %vm7926_vm0, %v17188_v50, %v10659_v18  ;;  %10729 = vmatmul.msk.bf16.gmra.mxu3 %vm1780_vm5, %v8561_v17  ;;  %v8681_v48 = vshll.u32 %v17283_v3, 16 }
 0x69a   : > { %11505 = vpow2.f32 %v8163_v52  ;;  %v10668_v22 = vadd.f32 -1.0, %v11502_v31  ;;  %v17302_v41 = vrot.slane %v8678_v21, 7  ;;  %v8053_v56 = vsel %vm7925_vm10, %v17167_v63, %v10658_v5  ;;  %10760 = vmatmul.msk.bf16.gmra.mxu1 %vm1780_vm5, %v17163_v6 }
 0x69b   : > { %v10661_v30 = vadd.f32 -1.0, %v11498_v49  ;;  %v8293_v12 = vpack.c.bf16 %v8064_v54, %v8064_v54  ;;  %vm7935_vm7 = vcmp.gt.f32.partialorder %v17238_v61, 0.0  ;;  %v10688_v50 = vadd.f32 -1.0, %v11500_v62 }
 0x69c   : > { %v8283_v44 = vpack.c.bf16 %v8054_v29, %v8054_v29  ;;  %v8063_v11 = vsel %vm7935_vm7, %v17238_v61, %v10668_v22  ;;  %v8683_v1 = vor.u32 %v8681_v48, %v17302_v41  ;;  %v8244_v20 = vsel %vm8116_vm13, %v17030_v37, %v10689_v15 }
 0x69d   : > { %v8055_v63 = vsel %vm7927_vm3, %v16847_v14, %v10660_v39  ;;  %v8242_v55 = vsel %vm8114_vm9, %v17149_v4, %v10687_v25  ;;  %v8292_v0 = vpack.c.bf16 %v8063_v11, %v8063_v11  ;;  %v8282_v6 = vpack.c.bf16 %v8053_v56, %v8053_v56 }
 0x69e   : > { %vm7928_vm14 = vcmp.gt.f32.partialorder %v17204_v58, 0.0  ;;  %v8167_v28 = vmul.f32 1.442695, %v17298_v27  ;;  %v8684_v18 = vsel %vm1186_vm4, %v17226_v51, %v8683_v1  ;;  %v8389_v49 = vunpack.c.l.b16 %v8293_v12 }
 0x69f   : > { %v11504_v52 = vpop.eup %11503  ;;  %vm8115_vm15 = vcmp.gt.f32.partialorder %v17224_v60, 0.0  ;;  %v8388_v37 = vunpack.c.l.b16 %v8292_v0  ;;  %v8801_v14 = vsel %vm12035_vm6, %v8684_v18, 0  ;;  %v8056_v4 = vsel %vm7928_vm14, %v17204_v58, %v10661_v30 }
 0x6a0   : > { %v11506_v15 = vpop.eup %11505  ;;  %v8243_v39 = vsel %vm8115_vm15, %v17224_v60, %v10688_v50  ;;  %v8379_v25 = vunpack.c.l.b16 %v8283_v44  ;;  %10713 = vmatmul.msk.bf16.gmra.mxu2 %vm1780_vm5, %v8801_v14  ;;  %v8446_v5 = vshrl.u32 %v17295_v26, 16  ;;  %v8310_v51 = vpack.c.bf16 %v17094_v36, %v17094_v36 }
 0x6a1   : > { %v8313_v62 = vpack.c.bf16 %v8244_v20, %v8244_v20  ;;  %v8311_v54 = vpack.c.bf16 %v8242_v55, %v8242_v55  ;;  %v17335_v17 = vpack.c.b16 %v8389_v49, %v8388_v37  ;;  %11507 = vpow2.f32 %v17268_v42 }
 0x6a2   : > { %v10690_v21 = vadd.f32 -1.0, %v11504_v52  ;;  %v8378_v31 = vunpack.c.l.b16 %v8282_v6  ;;  %v8284_v29 = vpack.c.bf16 %v8055_v63, %v8055_v63  ;;  %v8285_v58 = vpack.c.bf16 %v8056_v4, %v8056_v4  ;;  %v17359_v4 = vpop.f32.mrf.mxu0 }
 0x6a3   : > { %v8312_v22 = vpack.c.bf16 %v8243_v39, %v8243_v39  ;;  %v10691_v60 = vadd.f32 -1.0, %v11506_v15  ;;  %11509 = vpow2.f32 %v8167_v28  ;;  %v8448_v56 = vrot.slane %v8446_v5, 7  ;;  %v17357_v15 = vpop.f32.mrf.mxu1 }
 0x6a4   : > { %v17338_v48 = vpack.c.b16 %v8379_v25, %v8378_v31  ;;  %v8449_v30 = vshll.u32 %v17295_v26, 16  ;;  %vm8117_vm1 = vcmp.gt.f32.partialorder %v17256_v38, 0.0  ;;  %v8614_v36 = vunpack.c.l.b16 %v8310_v51 }
 0x6a5   : > { %v8615_v12 = vunpack.c.l.b16 %v8311_v54  ;;  %v8617_v50 = vunpack.c.l.b16 %v8313_v62  ;;  %v8245_v44 = vsel %vm8117_vm1, %v17256_v38, %v10690_v21  ;;  %vm8118_vm8 = vcmp.gt.f32.partialorder %v17265_v35, 0.0 }
 0x6a6   : > { %v8451_v42 = vor.u32 %v8449_v30, %v8448_v56  ;;  %v8454_v11 = vshrl.u32 %v17196_v34, 16  ;;  %v8381_v1 = vunpack.c.l.b16 %v8285_v58  ;;  %v8246_v20 = vsel %vm8118_vm8, %v17265_v35, %v10691_v60 }
 0x6a7   : > { %10744 = vmatmul.msk.bf16.gmra.mxu0 %vm1780_vm5, %v17066_v32  ;;  %v17348_v63 = vpack.c.b16 %v8615_v12, %v8614_v36  ;;  %v8616_v55 = vunpack.c.l.b16 %v8312_v22  ;;  %v11508_v0 = vpop.eup %11507  ;;  %v8457_v38 = vshll.u32 %v17196_v34, 16  ;;  %v8462_v18 = vshrl.u32 %v17338_v48, 16 }
 0x6a8   : > { %v8452_v6 = vsel %vm1186_vm4, %v17233_v59, %v8451_v42  ;;  %v8456_v28 = vrot.slane %v8454_v11, 7  ;;  %v8380_v52 = vunpack.c.l.b16 %v8284_v29  ;;  %v8314_v49 = vpack.c.bf16 %v8245_v44, %v8245_v44 }
 0x6a9   : > { %v8562_v35 = vsel %vm12035_vm6, %v8452_v6, 0  ;;  %v8686_v37 = vshrl.u32 %v17348_v63, 16  ;;  %v11510_v32 = vpop.eup %11509  ;;  %v8315_v14 = vpack.c.bf16 %v8246_v20, %v8246_v20  ;;  %v17362_v39 = vpack.c.b16 %v8617_v50, %v8616_v55 }
 0x6aa   : > { %10730 = vmatmul.msk.bf16.gmra.mxu3 %vm1780_vm5, %v8562_v35  ;;  %v8459_v59 = vor.u32 %v8457_v38, %v8456_v28  ;;  %v8464_v25 = vrot.slane %v8462_v18, 7  ;;  %v17364_v5 = vpack.c.b16 %v8381_v1, %v8380_v52  ;;  %v8689_v62 = vshll.u32 %v17348_v63, 16  ;;  %10761 = vmatmul.msk.bf16.gmra.mxu1 %vm1780_vm5, %v17283_v3 }
 0x6ab   : > { %v8688_v51 = vrot.slane %v8686_v37, 7  ;;  %v8465_v54 = vshll.u32 %v17338_v48, 16  ;;  %v17371_v21 = vsub.f32 0.0, %v17035_v9  ;;  %v8694_v29 = vshrl.u32 %v17362_v39, 16 }
 0x6ac   : > { %v8460_v31 = vsel %vm1186_vm4, %v8448_v56, %v8459_v59  ;;  %v10692_v58 = vadd.f32 -1.0, %v11508_v0  ;;  %v10693_v22 = vadd.f32 -1.0, %v11510_v32  ;;  %v17376_v36 = vsub.f32 0.0, %v17157_v16 }
 0x6ad   : > { %v8691_v60 = vor.u32 %v8689_v62, %v8688_v51  ;;  %v8467_v30 = vor.u32 %v8465_v54, %v8464_v25  ;;  %v8696_v12 = vrot.slane %v8694_v29, 7  ;;  %v8697_v50 = vshll.u32 %v17362_v39, 16 }
 0x6ae   : > { %v8619_v3 = vunpack.c.l.b16 %v8315_v14  ;;  %v8618_v56 = vunpack.c.l.b16 %v8314_v49  ;;  %v8470_v42 = vshrl.u32 %v17364_v5, 16  ;;  %vm8119_vm2 = vcmp.gt.f32.partialorder %v17113_v45, 0.0  ;;  %v7053_v49 = vpop.permute.xlu0 %7052 }
 0x6af   : > { %v8692_v44 = vsel %vm1186_vm4, %v17302_v41, %v8691_v60  ;;  %v17382_v9 = vsel %vm1186_vm4, %v8456_v28, %v8467_v30  ;;  %v8699_v1 = vor.u32 %v8697_v50, %v8696_v12  ;;  %v8171_v16 = vmul.f32 1.442695, %v17371_v21 }
 0x6b0   : > { %v8802_v11 = vsel %vm12035_vm6, %v8692_v44, 0  ;;  %v17390_v20 = vpack.c.b16 %v8619_v3, %v8618_v56  ;;  %v17392_v55 = vrot.slane %v8470_v42, 7  ;;  %vm8120_vm11 = vcmp.gt.f32.partialorder %v17298_v27, 0.0 }
 0x6b1   : > { %10714 = vmatmul.msk.bf16.gmra.mxu2 %vm1780_vm5, %v8802_v11  ;;  %v8169_v41 = vmul.f32 1.442695, %v17376_v36  ;;  %v8700_v0 = vsel %vm1186_vm4, %v8688_v51, %v8699_v1  ;;  %v8473_v38 = vshll.u32 %v17364_v5, 16  ;;  %v8247_v18 = vsel %vm8119_vm2, %v17113_v45, %v10692_v58 }
 0x6b2   : > { %v8248_v52 = vsel %vm8120_vm11, %v17298_v27, %v10693_v22  ;;  %v8702_v37 = vshrl.u32 %v17390_v20, 16  ;;  %11511 = vpow2.f32 %v8171_v16  ;;  %v8705_v59 = vshll.u32 %v17390_v20, 16 }
 0x6b3   : > { %v8475_v32 = vor.u32 %v8473_v38, %v17392_v55  ;;  %v8316_v51 = vpack.c.bf16 %v8247_v18, %v8247_v18  ;;  %v8317_v62 = vpack.c.bf16 %v8248_v52, %v8248_v52  ;;  %11513 = vpow2.f32 %v8169_v41  ;;  %v18978_v52 = vld [vmem:[#allocation40_spill] sm:$0xff] }
 0x6b4   : > { %v8704_v14 = vrot.slane %v8702_v37, 7  ;;  %v8563_v27 = vsel %vm12035_vm6, %v8460_v31, 0  ;;  %v7130_v56 = vadd.f32 %v7053_v49, %v16413_v40  ;;  %vm8122_vm13 = vcmp.gt.f32.partialorder %v17371_v21, 0.0 }
 0x6b5   : > { %v17406_v54 = vsel %vm1186_vm4, %v8464_v25, %v8475_v32  ;;  %v8620_v58 = vunpack.c.l.b16 %v8316_v51  ;;  %v8621_v22 = vunpack.c.l.b16 %v8317_v62  ;;  %vm8121_vm3 = vcmp.gt.f32.partialorder %v17376_v36, 0.0 }
 0x6b6   : > { %v8707_v45 = vor.u32 %v8705_v59, %v8704_v14  ;;  %v7059_v50 = vpop.permute.xlu0 %7058  ;;  %v7867_v49 = vadd.f32 %v17219_v19, %v18978_v52  ;;  %v8478_v62 = vshrl.u32 %v17276_v46, 16 }
 0x6b7   : > { %v7835_v6 = vpop.f32.mrf.mxu1  ;;  %10745 = vmatmul.msk.bf16.gmra.mxu0 %vm1780_vm5, %v17193_v43  ;;  %v17418_v30 = vpack.c.b16 %v8621_v22, %v8620_v58  ;;  %v18975_v43 = vld [vmem:[#allocation20_spill] sm:$0xff]  ;;  %v7133_v11 = vadd.f32 %v7059_v50, %v16823_v23  ;;  %v8481_v58 = vshll.u32 %v17276_v46, 16 }
 0x6b8   : > { %v17413_v29 = vsel %vm1186_vm4, %v8696_v12, %v8707_v45  ;;  %v11512_v60 = vpop.eup %11511  ;;  %v7131_v3 = vadd.f32 %v17144_v53, %v18975_v43  ;;  %v7813_v12 = vadd.f32 %v16900_v33, %v16902_v8  ;;  %v18976_v53 = vld [vmem:[#allocation76_spill] sm:$0xff] }
 0x6b9   : > { %v7695_v28 = vpop.f32.mrf.mxu0  ;;  %v11514_v25 = vpop.eup %11513  ;;  %v8710_v31 = vshrl.u32 %v17418_v30, 16  ;;  %v10695_v44 = vadd.f32 -1.0, %v11512_v60  ;;  %v8713_v16 = vshll.u32 %v17418_v30, 16  ;;  %v7168_v38 = vadd.f32 %v17175_v47, %v7133_v11 }
 0x6ba   : > { %v17400_v35 = vadd.f32 %v7835_v6, %v7695_v28  ;;  %10731 = vmatmul.msk.bf16.gmra.mxu3 %vm1780_vm5, %v8563_v27  ;;  %10762 = vmatmul.msk.bf16.gmra.mxu1 %vm1780_vm5, %v17348_v63  ;;  %v10694_v42 = vadd.f32 -1.0, %v11514_v25  ;;  %v8803_v63 = vsel %vm12035_vm6, %v8700_v0, 0  ;;  %v7166_v41 = vadd.f32 %v17175_v47, %v7131_v3  ;;  %v18977_v6 = vld [vmem:[#allocation79_spill] sm:$0xff]  ;;  %v18979_v3 = vld [vmem:[#allocation42_spill] sm:$0xff] }
 0x6bb   : > { %v8712_v1 = vrot.slane %v8710_v31, 7  ;;  %v7818_v33 = vadd.f32 %v18977_v6, %v18976_v53  ;;  %v8250_v23 = vsel %vm8122_vm13, %v17371_v21, %v10695_v44  ;;  %v7868_v8 = vadd.f32 %v17219_v19, %v7813_v12 }
 0x6bc   : > { %v7165_v0 = vadd.f32 %v17175_v47, %v7130_v56  ;;  %v8249_v28 = vsel %vm8121_vm3, %v17376_v36, %v10694_v42  ;;  %v8319_v32 = vpack.c.bf16 %v8250_v23, %v8250_v23  ;;  %v17453_v27 = vrot.slane %v8478_v62, 7 }
 0x6bd   : > { %v8715_v40 = vor.u32 %v8713_v16, %v8712_v1  ;;  %v7900_v37 = vadd.f32 %v7868_v8, %v7166_v41  ;;  %v7870_v59 = vadd.f32 %v17219_v19, %v7818_v33  ;;  %v8318_v51 = vpack.c.bf16 %v8249_v28, %v8249_v28 }
 0x6be   : > { %v7899_v21 = vadd.f32 %v7867_v49, %v7165_v0  ;;  %v8623_v60 = vunpack.c.l.b16 %v8319_v32  ;;  %v7985_v31 = vmul.f32 1.442695, %v18979_v3  ;;  %v17468_v44 = vsub.f32 0.0, %v18979_v3  ;;  %v7065_v62 = vpop.permute.xlu0 %7064 }
 0x6bf   : > { %v17442_v18 = vsel %vm1186_vm4, %v8704_v14, %v8715_v40  ;;  %v7902_v36 = vadd.f32 %v7870_v59, %v7168_v38  ;;  %v7983_v45 = vmul.f32 1.442695, %v7900_v37  ;;  %v8564_v14 = vsel %vm12035_vm6, %v17382_v9, 0 }
 0x6c0   : > { %v8622_v22 = vunpack.c.l.b16 %v8318_v51  ;;  %v7981_v25 = vmul.f32 1.442695, %v7899_v21  ;;  %v17482_v41 = vsub.f32 0.0, %v7899_v21  ;;  %v17488_v33 = vsub.f32 0.0, %v7900_v37 }
 0x6c1   : > { %10715 = vmatmul.msk.bf16.gmra.mxu2 %vm1780_vm5, %v8803_v63  ;;  %v7987_v43 = vmul.f32 1.442695, %v7902_v36  ;;  %11515 = vpow2.f32 %v7983_v45  ;;  %v17471_v56 = vsub.f32 0.0, %v7902_v36  ;;  %vm7932_vm9 = vcmp.gt.f32.partialorder %v7900_v37, 0.0 }
 0x6c2   : > { %v17460_v50 = vpack.c.b16 %v8623_v60, %v8622_v22  ;;  %11517 = vpow2.f32 %v7981_v25  ;;  %v8173_v8 = vmul.f32 1.442695, %v17482_v41  ;;  %v8175_v38 = vmul.f32 1.442695, %v17488_v33 }
 0x6c3   : > { %11519 = vpow2.f32 %v7987_v43  ;;  %v8179_v53 = vmul.f32 1.442695, %v17471_v56  ;;  %vm7931_vm10 = vcmp.gt.f32.partialorder %v7899_v21, 0.0  ;;  %vm7934_vm12 = vcmp.gt.f32.partialorder %v7902_v36, 0.0 }
 0x6c4   : > { %v8718_v12 = vshrl.u32 %v17460_v50, 16  ;;  %v8721_v11 = vshll.u32 %v17460_v50, 16  ;;  %11521 = vpow2.f32 %v7985_v31  ;;  %vm7933_vm0 = vcmp.gt.f32.partialorder %v18979_v3, 0.0  ;;  %v17507_v31 = vpop.f32.mrf.mxu1 }
 0x6c5   : > { %v17503_v60 = vsub.f32 0.0, %v17178_v7  ;;  %vm8125_vm7 = vcmp.gt.f32.partialorder %v17468_v44, 0.0  ;;  %vm8126_vm14 = vcmp.gt.f32.partialorder %v17471_v56, 0.0  ;;  %vm8123_vm15 = vcmp.gt.f32.partialorder %v17482_v41, 0.0 }
 0x6c6   : > { %v17476_v42 = vrot.slane %v8718_v12, 7  ;;  %v8805_v12 = vsel %vm12035_vm6, %v17442_v18, 0  ;;  %vm8124_vm1 = vcmp.gt.f32.partialorder %v17488_v33, 0.0 }
 0x6c7   : > { %10746 = vmatmul.msk.bf16.gmra.mxu0 %vm1780_vm5, %v17295_v26  ;;  %v8483_v26 = vor.u32 %v8481_v58, %v17453_v27  ;;  %v11516_v16 = vpop.eup %11515  ;;  %v8183_v18 = vmul.f32 1.442695, %v17503_v60  ;;  %vm8128_vm8 = vcmp.gt.f32.partialorder %v17503_v60, 0.0 }
 0x6c8   : > { %v8723_v63 = vor.u32 %v8721_v11, %v17476_v42  ;;  %v10665_v40 = vadd.f32 -1.0, %v11516_v16 }
 0x6c9   : > { %v17464_v9 = vsel %vm1186_vm4, %v17392_v55, %v8483_v26  ;;  %v8177_v55 = vmul.f32 1.442695, %v17468_v44 }
 0x6ca   : > { %10732 = vmatmul.msk.bf16.gmra.mxu3 %vm1780_vm5, %v8564_v14  ;;  %10763 = vmatmul.msk.bf16.gmra.mxu1 %vm1780_vm5, %v17362_v39  ;;  %v8804_v39 = vsel %vm12035_vm6, %v17413_v29, 0  ;;  %v17486_v6 = vsel %vm1186_vm4, %v8712_v1, %v8723_v63  ;;  %v11518_v29 = vpop.eup %11517  ;;  %v8565_v1 = vsel %vm12035_vm6, %v17406_v54, 0  ;;  %v8060_v49 = vsel %vm7932_vm9, %v7900_v37, %v10665_v40  ;;  %v7067_v14 = vpop.permute.xlu1 %7066 }
 0x6cb   : > { %11523 = vpow2.f32 %v8177_v55  ;;  %v11520_v23 = vpop.eup %11519  ;;  %v10664_v28 = vadd.f32 -1.0, %v11518_v29  ;;  %v8289_v45 = vpack.c.bf16 %v8060_v49, %v8060_v49  ;;  %v17517_v55 = vsub.f32 0.0, %v17238_v61 }
 0x6cc   : > { %11525 = vpow2.f32 %v8179_v53  ;;  %v11522_v0 = vpop.eup %11521  ;;  %v10667_v52 = vadd.f32 -1.0, %v11520_v23 }
 0x6cd   : > { %v10666_v32 = vadd.f32 -1.0, %v11522_v0  ;;  %11527 = vpow2.f32 %v8173_v8  ;;  %v8059_v59 = vsel %vm7931_vm10, %v7899_v21, %v10664_v28  ;;  %v18981_v21 = vld [vmem:[#allocation75_spill] sm:$0xff]  ;;  %v8385_v11 = vunpack.c.l.b16 %v8289_v45 }
 0x6ce   : > { %11529 = vpow2.f32 %v8175_v38  ;;  %v8062_v54 = vsel %vm7934_vm12, %v7902_v36, %v10667_v52  ;;  %v8288_v22 = vpack.c.bf16 %v8059_v59, %v8059_v59  ;;  %v7137_v43 = vadd.f32 %v7067_v14, %v18981_v21 }
 0x6cf   : > { %v8061_v37 = vsel %vm7933_vm0, %v18979_v3, %v10666_v32  ;;  %v8291_v36 = vpack.c.bf16 %v8062_v54, %v8062_v54  ;;  %v7828_v3 = vadd.f32 %v17180_v2, %v17182_v13  ;;  %v7873_v13 = vadd.f32 %v17219_v19, %v17061_v24  ;;  %v17537_v32 = vpop.f32.mrf.mxu3 }
 0x6d0   : > { %v8290_v7 = vpack.c.bf16 %v8061_v37, %v8061_v37  ;;  %v8384_v53 = vunpack.c.l.b16 %v8288_v22  ;;  %v7172_v8 = vadd.f32 %v17175_v47, %v7137_v43  ;;  %v8181_v28 = vmul.f32 1.442695, %v17517_v55 }
 0x6d1   : > { %10716 = vmatmul.msk.bf16.gmra.mxu2 %vm1780_vm5, %v8804_v39  ;;  %v8387_v0 = vunpack.c.l.b16 %v8291_v36  ;;  %v7874_v61 = vadd.f32 %v17219_v19, %v7828_v3  ;;  %11531 = vpow2.f32 %v8183_v18  ;;  %vm8127_vm2 = vcmp.gt.f32.partialorder %v17517_v55, 0.0 }
 0x6d2   : > { %v17525_v2 = vpack.c.b16 %v8385_v11, %v8384_v53  ;;  %11533 = vpow2.f32 %v8181_v28  ;;  %v17566_v11 = vpop.f32.mrf.mxu2  ;;  %v8806_v53 = vsel %vm12035_vm6, %v17486_v6, 0  ;;  %vm7939_vm12 = vcmp.gt.f32.partialorder %v17270_v57, 0.0 }
 0x6d3   : > { %v17539_v24 = vadd.f32 %v7874_v61, %v7172_v8 }
 0x6d4   : > { %v8489_v14 = vshll.u32 %v17525_v2, 16 }
 0x6d5   : > { %vm7938_vm11 = vcmp.gt.f32.partialorder %v17539_v24, 0.0 }
 0x6d7   : > { %10747 = vmatmul.msk.bf16.gmra.mxu0 %vm1780_vm5, %v17196_v34  ;;  %v11524_v34 = vpop.eup %11523 }
 0x6d8   : > { %v11526_v51 = vpop.eup %11525  ;;  %v10698_v58 = vadd.f32 -1.0, %v11524_v34 }
 0x6d9   : > { %v10699_v25 = vadd.f32 -1.0, %v11526_v51  ;;  %v11528_v39 = vpop.eup %11527  ;;  %v8566_v51 = vsel %vm12035_vm6, %v17464_v9, 0  ;;  %v7833_v9 = vadd.f32 %v17357_v15, %v17359_v4 }
 0x6da   : > { %10733 = vmatmul.msk.bf16.gmra.mxu3 %vm1780_vm5, %v8565_v1  ;;  %10764 = vmatmul.msk.bf16.gmra.mxu1 %vm1780_vm5, %v17390_v20  ;;  %v18980_v20 = vld [vmem:[#allocation39_spill] sm:$0xff]  ;;  %v11530_v63 = vpop.eup %11529  ;;  %v8253_v16 = vsel %vm8125_vm7, %v17468_v44, %v10698_v58  ;;  %v10696_v29 = vadd.f32 -1.0, %v11528_v39  ;;  %v8386_v1 = vunpack.c.l.b16 %v8290_v7  ;;  %v18982_v39 = vld [vmem:[#allocation41_spill] sm:$0xff] }
 0x6db   : > { %v7136_v26 = vadd.f32 %v7065_v62, %v18980_v20  ;;  %v8254_v40 = vsel %vm8126_vm14, %v17471_v56, %v10699_v25  ;;  %v10697_v44 = vadd.f32 -1.0, %v11530_v63  ;;  %v8322_v38 = vpack.c.bf16 %v8253_v16, %v8253_v16  ;;  %v7071_v62 = vpop.permute.xlu0 %7070  ;;  %v17557_v25 = vpop.f32.mrf.mxu0 }
 0x6dc   : > { %v8323_v56 = vpack.c.bf16 %v8254_v40, %v8254_v40  ;;  %v8251_v52 = vsel %vm8123_vm15, %v17482_v41, %v10696_v29  ;;  %v17541_v59 = vpack.c.b16 %v8387_v0, %v8386_v1  ;;  %v11532_v43 = vpop.eup %11531  ;;  %v7139_v36 = vadd.f32 %v7071_v62, %v18982_v39  ;;  %v17584_v0 = vpop.f32.mrf.mxu3 }
 0x6dd   : > { %v7171_v23 = vadd.f32 %v17175_v47, %v7136_v26  ;;  %v8252_v41 = vsel %vm8124_vm1, %v17488_v33, %v10697_v44  ;;  %v8626_v54 = vunpack.c.l.b16 %v8322_v38  ;;  %v8320_v58 = vpack.c.bf16 %v8251_v52, %v8251_v52  ;;  %v11534_v63 = vpop.eup %11533 }
 0x6de   : > { %v8627_v37 = vunpack.c.l.b16 %v8323_v56  ;;  %v7995_v33 = vmul.f32 1.442695, %v17539_v24  ;;  %v8321_v20 = vpack.c.bf16 %v8252_v41, %v8252_v41  ;;  %v8494_v21 = vshrl.u32 %v17541_v59, 16 }
 0x6df   : > { %v17535_v49 = vadd.f32 %v7873_v13, %v7171_v23  ;;  %v8497_v7 = vshll.u32 %v17541_v59, 16  ;;  %v7876_v16 = vadd.f32 %v17219_v19, %v7833_v9  ;;  %v7174_v8 = vadd.f32 %v17175_v47, %v7139_v36 }
 0x6e0   : > { %v17570_v4 = vrot.slane %v8494_v21, 7  ;;  %11535 = vpow2.f32 %v7995_v33  ;;  %v8625_v29 = vunpack.c.l.b16 %v8321_v20  ;;  %v17587_v13 = vsub.f32 0.0, %v17539_v24  ;;  %v17618_v21 = vpop.f32.mrf.mxu2 }
 0x6e1   : > { %10717 = vmatmul.msk.bf16.gmra.mxu2 %vm1780_vm5, %v8805_v12  ;;  %v7993_v22 = vmul.f32 1.442695, %v17535_v49  ;;  %v17563_v12 = vsub.f32 0.0, %v17535_v49  ;;  %v10701_v28 = vadd.f32 -1.0, %v11532_v43  ;;  %v10700_v38 = vadd.f32 -1.0, %v11534_v63 }
 0x6e2   : > { %v8499_v40 = vor.u32 %v8497_v7, %v17570_v4  ;;  %v17596_v1 = vadd.f32 %v7876_v16, %v7174_v8  ;;  %v17604_v62 = vsub.f32 0.0, %v17270_v57  ;;  %vm7937_vm13 = vcmp.gt.f32.partialorder %v17535_v49, 0.0 }
 0x6e3   : > { %11537 = vpow2.f32 %v7993_v22  ;;  %v8185_v23 = vmul.f32 1.442695, %v17563_v12  ;;  %v8255_v22 = vsel %vm8127_vm2, %v17517_v55, %v10700_v38  ;;  %v8256_v20 = vsel %vm8128_vm8, %v17503_v60, %v10701_v28 }
 0x6e4   : > { %v7999_v9 = vmul.f32 1.442695, %v17596_v1  ;;  %v8189_v7 = vmul.f32 1.442695, %v17604_v62  ;;  %v17627_v55 = vsub.f32 0.0, %v17596_v1  ;;  %v8324_v60 = vpack.c.bf16 %v8255_v22, %v8255_v22 }
 0x6e5   : > { %11539 = vpow2.f32 %v8185_v23  ;;  %vm8129_vm3 = vcmp.gt.f32.partialorder %v17563_v12, 0.0  ;;  %vm7940_vm9 = vcmp.gt.f32.partialorder %v17596_v1, 0.0  ;;  %vm8130_vm10 = vcmp.gt.f32.partialorder %v17587_v13, 0.0 }
 0x6e6   : > { %v11536_v41 = vpop.eup %11535  ;;  %v8191_v8 = vmul.f32 1.442695, %v17627_v55  ;;  %v8628_v28 = vunpack.c.l.b16 %v8324_v60  ;;  %vm8131_vm0 = vcmp.gt.f32.partialorder %v17604_v62, 0.0  ;;  %vm8132_vm7 = vcmp.gt.f32.partialorder %v17627_v55, 0.0 }
 0x6e7   : > { %10748 = vmatmul.msk.bf16.gmra.mxu0 %vm1780_vm5, %v17338_v48  ;;  %v7840_v34 = vpop.f32.mrf.mxu1  ;;  %v8486_v48 = vshrl.u32 %v17525_v2, 16 }
 0x6e9   : > { %v8488_v45 = vrot.slane %v8486_v48, 7 }
 0x6ea   : > { %10734 = vmatmul.msk.bf16.gmra.mxu3 %vm1780_vm5, %v8566_v51  ;;  %10765 = vmatmul.msk.bf16.gmra.mxu1 %vm1780_vm5, %v17418_v30  ;;  %v17560_v30 = vpack.c.b16 %v8627_v37, %v8626_v54 }
 0x6eb   : > { %v8491_v26 = vor.u32 %v8489_v14, %v8488_v45  ;;  %v17592_v6 = vsel %vm1186_vm4, %v8488_v45, %v8499_v40  ;;  %v11538_v45 = vpop.eup %11537  ;;  %v8187_v14 = vmul.f32 1.442695, %v17587_v13  ;;  %v7075_v40 = vpop.permute.xlu2 %7074 }
 0x6ec   : > { %v8734_v3 = vshrl.u32 %v17560_v30, 16  ;;  %v8737_v48 = vshll.u32 %v17560_v30, 16  ;;  %v10670_v36 = vadd.f32 -1.0, %v11538_v45  ;;  %v11540_v16 = vpop.eup %11539  ;;  %v18983_v45 = vld [vmem:[#allocation19_spill] sm:$0xff] }
 0x6ed   : > { %v8492_v15 = vsel %vm1186_vm4, %v17453_v27, %v8491_v26  ;;  %v8624_v27 = vunpack.c.l.b16 %v8320_v58  ;;  %v7997_v58 = vmul.f32 1.442695, %v17270_v57  ;;  %v10671_v26 = vadd.f32 -1.0, %v11536_v41 }
 0x6ee   : > { %v17594_v44 = vrot.slane %v8734_v3, 7  ;;  %v17629_v3 = vpop.f32.mrf.mxu3  ;;  %11541 = vpow2.f32 %v8187_v14  ;;  %v8065_v23 = vsel %vm7937_vm13, %v17535_v49, %v10670_v36  ;;  %v7141_v14 = vadd.f32 %v7075_v40, %v18983_v45 }
 0x6ef   : > { %v17578_v18 = vpop.f32.mrf.mxu1  ;;  %v17589_v61 = vpack.c.b16 %v8625_v29, %v8624_v27  ;;  %11543 = vpow2.f32 %v7999_v9  ;;  %v8502_v27 = vshrl.u32 %v17335_v17, 16  ;;  %v8066_v29 = vsel %vm7938_vm11, %v17539_v24, %v10671_v26 }
 0x6f0   : > { %v8739_v37 = vor.u32 %v8737_v48, %v17594_v44  ;;  %11545 = vpow2.f32 %v7997_v58  ;;  %v8294_v58 = vpack.c.bf16 %v8065_v23, %v8065_v23  ;;  %v7838_v36 = vadd.f32 %v17507_v31, %v17557_v25 }
 0x6f1   : > { %10718 = vmatmul.msk.bf16.gmra.mxu2 %vm1780_vm5, %v8806_v53  ;;  %v8726_v51 = vshrl.u32 %v17589_v61, 16  ;;  %v8729_v54 = vshll.u32 %v17589_v61, 16  ;;  %11547 = vpow2.f32 %v8189_v7 }
 0x6f2   : > { %11549 = vpow2.f32 %v8191_v8 }
 0x6f4   : > { %v7700_v56 = vpop.f32.mrf.mxu0  ;;  %v11542_v41 = vpop.eup %11541 }
 0x6f5   : > { %v17598_v52 = vadd.f32 %v7840_v34, %v7700_v56  ;;  %v8728_v34 = vrot.slane %v8726_v51, 7  ;;  %v8295_v56 = vpack.c.bf16 %v8066_v29, %v8066_v29  ;;  %v8390_v29 = vunpack.c.l.b16 %v8294_v58 }
 0x6f6   : > { %v17667_v7 = vpop.f32.mrf.mxu3 }
 0x6f7   : > { %10749 = vmatmul.msk.bf16.gmra.mxu0 %vm1780_vm5, %v17364_v5  ;;  %v17615_v33 = vpop.f32.mrf.mxu1  ;;  %v8567_v5 = vsel %vm12035_vm6, %v8492_v15, 0  ;;  %v8731_v43 = vor.u32 %v8729_v54, %v8728_v34  ;;  %v17623_v39 = vsel %vm1186_vm4, %v8728_v34, %v8739_v37  ;;  %v8325_v15 = vpack.c.bf16 %v8256_v20, %v8256_v20  ;;  %v17653_v54 = vpop.f32.mrf.mxu2 }
 0x6f8   : > { %v10702_v34 = vadd.f32 -1.0, %v11540_v16  ;;  %v11544_v37 = vpop.eup %11543  ;;  %v9015_v20 = vadd.f32 %v17537_v32, %v17566_v11  ;;  %v7073_v32 = vpop.permute.xlu1 %7072 }
 0x6f9   : > { %v8732_v63 = vsel %vm1186_vm4, %v17476_v42, %v8731_v43  ;;  %v17642_v42 = vrot.slane %v8502_v27, 7  ;;  %v8629_v38 = vunpack.c.l.b16 %v8325_v15  ;;  %v11546_v9 = vpop.eup %11545  ;;  %v8391_v43 = vunpack.c.l.b16 %v8295_v56 }
 0x6fa   : > { %10735 = vmatmul.msk.bf16.gmra.mxu3 %vm1780_vm5, %v8567_v5  ;;  %10766 = vmatmul.msk.bf16.gmra.mxu1 %vm1780_vm5, %v17460_v50  ;;  %v8505_v50 = vshll.u32 %v17335_v17, 16  ;;  %v8807_v51 = vsel %vm12035_vm6, %v8732_v63, 0  ;;  %v11548_v26 = vpop.eup %11547  ;;  %v10703_v5 = vadd.f32 -1.0, %v11542_v41  ;;  %v8257_v15 = vsel %vm8129_vm3, %v17563_v12, %v10702_v34 }
 0x6fb   : > { %v17656_v49 = vpack.c.b16 %v8629_v38, %v8628_v28  ;;  %v10673_v16 = vadd.f32 -1.0, %v11544_v37  ;;  %v10672_v40 = vadd.f32 -1.0, %v11546_v9  ;;  %v10704_v23 = vadd.f32 -1.0, %v11548_v26  ;;  %v11550_v38 = vpop.eup %11549 }
 0x6fc   : > { %v17637_v53 = vpop.f32.mrf.mxu0  ;;  %v8507_v24 = vor.u32 %v8505_v50, %v17642_v42  ;;  %v17683_v25 = vpack.c.b16 %v8391_v43, %v8390_v29  ;;  %v7878_v12 = vadd.f32 %v17219_v19, %v7838_v36  ;;  %v10705_v9 = vadd.f32 -1.0, %v11550_v38 }
 0x6fd   : > { %v8742_v63 = vshrl.u32 %v17656_v49, 16  ;;  %v8745_v50 = vshll.u32 %v17656_v49, 16  ;;  %v8068_v56 = vsel %vm7940_vm9, %v17596_v1, %v10673_v16  ;;  %v8259_v1 = vsel %vm8131_vm0, %v17604_v62, %v10704_v23 }
 0x6fe   : > { %v17660_v22 = vsel %vm1186_vm4, %v17570_v4, %v8507_v24  ;;  %v7176_v4 = vadd.f32 %v17175_v47, %v7141_v14  ;;  %v8258_v47 = vsel %vm8130_vm10, %v17587_v13, %v10703_v5  ;;  %v8326_v13 = vpack.c.bf16 %v8257_v15, %v8257_v15 }
 0x6ff   : > { %v17649_v48 = vpop.f32.mrf.mxu1  ;;  %v17672_v11 = vrot.slane %v8742_v63, 7  ;;  %v8067_v24 = vsel %vm7939_vm12, %v17270_v57, %v10672_v40  ;;  %v8327_v45 = vpack.c.bf16 %v8258_v47, %v8258_v47  ;;  %v9017_v14 = vadd.f32 %v17584_v0, %v17618_v21  ;;  %v17709_v34 = vpop.f32.mrf.mxu2 }
 0x700   : > { %v8297_v57 = vpack.c.bf16 %v8068_v56, %v8068_v56  ;;  %v17713_v37 = vadd.f32 %v7878_v12, %v7176_v4  ;;  %v8510_v62 = vshrl.u32 %v17683_v25, 16  ;;  %v8328_v21 = vpack.c.bf16 %v8259_v1, %v8259_v1 }
 0x701   : > { %10719 = vmatmul.msk.bf16.gmra.mxu2 %vm1780_vm5, %v8807_v51  ;;  %v8747_v28 = vor.u32 %v8745_v50, %v17672_v11  ;;  %v8513_v26 = vshll.u32 %v17683_v25, 16  ;;  %v8630_v36 = vunpack.c.l.b16 %v8326_v13  ;;  %v8808_v15 = vsel %vm12035_vm6, %v17623_v39, 0  ;;  %v7079_v50 = vpop.permute.xlu1 %7078 }
 0x702   : > { %v8393_v63 = vunpack.c.l.b16 %v8297_v57  ;;  %v8003_v4 = vmul.f32 1.442695, %v17713_v37  ;;  %v8260_v29 = vsel %vm8132_vm7, %v17627_v55, %v10705_v9  ;;  %v9020_v12 = vadd.f32 %v17629_v3, %v17653_v54 }
 0x703   : > { %v17702_v41 = vsel %vm1186_vm4, %v17594_v44, %v8747_v28  ;;  %v8329_v39 = vpack.c.bf16 %v8260_v29, %v8260_v29  ;;  %v7843_v13 = vadd.f32 %v17578_v18, %v17637_v53  ;;  %vm7942_vm14 = vcmp.gt.f32.partialorder %v17713_v37, 0.0 }
 0x704   : > { %v9138_v60 = vpop.f32.mrf.mxu0  ;;  %11551 = vpow2.f32 %v8003_v4 }
 0x705   : > { %v9218_v27 = vadd.f32 %v9138_v60, %v9015_v20  ;;  %v17725_v20 = vrot.slane %v8510_v62, 7  ;;  %v8631_v60 = vunpack.c.l.b16 %v8327_v45  ;;  %v18986_v62 = vld [vmem:[#allocation23_spill] sm:$0xff] }
 0x707   : > { %v17678_v31 = vadd.f32 %v17615_v33, %v9218_v27  ;;  %10750 = vmatmul.msk.bf16.gmra.mxu0 %vm1780_vm5, %v17276_v46  ;;  %v17686_v8 = vpop.f32.mrf.mxu1  ;;  %v18984_v33 = vld [vmem:[#allocation80_spill] sm:$0xff]  ;;  %v8568_v46 = vsel %vm12035_vm6, %v17592_v6, 0  ;;  %v7877_v6 = vadd.f32 %v17219_v19, %v17400_v35  ;;  %v17722_v19 = vld [vmem:[%s18391_s10] ss:$0 sm:$0xff]  ;;  %v8515_v27 = vor.u32 %v8513_v26, %v17725_v20 }
 0x708   : > { %v7140_v51 = vadd.f32 %v7073_v32, %v18984_v33  ;;  %v8632_v33 = vunpack.c.l.b16 %v8328_v21 }
 0x709   : > { %9438 = vrot.lane.b32.xlu2 %v17678_v31, %s11779_s29  ;;  %v17750_v32 = vsel %vm1186_vm4, %v17642_v42, %v8515_v27 }
 0x70a   : > { %10736 = vmatmul.msk.bf16.gmra.mxu3 %vm1780_vm5, %v8568_v46  ;;  %10767 = vmatmul.msk.bf16.gmra.mxu1 %vm1780_vm5, %v17589_v61  ;;  %v7175_v35 = vadd.f32 %v17722_v19, %v7140_v51  ;;  %v8296_v61 = vpack.c.bf16 %v8067_v24, %v8067_v24  ;;  %v8633_v51 = vunpack.c.l.b16 %v8329_v39  ;;  %v7077_v46 = vpop.permute.xlu0 %7076 }
 0x70b   : > { %v17715_v44 = vpop.f32.mrf.mxu3  ;;  %v7142_v18 = vadd.f32 %v7077_v46, %v18986_v62 }
 0x70c   : > { %v9140_v58 = vpop.f32.mrf.mxu0  ;;  %v17728_v5 = vadd.f32 %v7877_v6, %v7175_v35  ;;  %v8392_v40 = vunpack.c.l.b16 %v8296_v61  ;;  %v17769_v45 = vpack.c.b16 %v8633_v51, %v8632_v33 }
 0x70d   : > { %v9219_v0 = vadd.f32 %v9140_v58, %v9017_v14  ;;  %v18985_v14 = vld [vmem:[#allocation81_spill] sm:$0xff] }
 0x70e   : > { %v8001_v23 = vmul.f32 1.442695, %v17728_v5  ;;  %v17754_v47 = vsub.f32 0.0, %v17728_v5  ;;  %v17763_v42 = vpack.c.b16 %v8393_v63, %v8392_v40  ;;  %v7143_v6 = vadd.f32 %v7079_v50, %v18985_v14 }
 0x70f   : > { %v17731_v43 = vadd.f32 %v17649_v48, %v9219_v0  ;;  %v17737_v16 = vpop.f32.mrf.mxu1  ;;  %v17743_v48 = vpack.c.b16 %v8631_v60, %v8630_v36  ;;  %v8758_v0 = vshrl.u32 %v17769_v45, 16  ;;  %v11552_v36 = vpop.eup %11551  ;;  %v17796_v60 = vsub.f32 0.0, %v17713_v37 }
 0x710   : > { %v8518_v54 = vshrl.u32 %v17763_v42, 16  ;;  %11553 = vpow2.f32 %v8001_v23  ;;  %v8521_v35 = vshll.u32 %v17763_v42, 16  ;;  %v8193_v61 = vmul.f32 1.442695, %v17754_v47 }
 0x711   : > { %10720 = vmatmul.msk.bf16.gmra.mxu2 %vm1780_vm5, %v8808_v15  ;;  %9440 = vrot.lane.b32.xlu0 %v17731_v43, %s11779_s29  ;;  %v8750_v38 = vshrl.u32 %v17743_v48, 16  ;;  %v8753_v3 = vshll.u32 %v17743_v48, 16  ;;  %v17800_v4 = vrot.slane %v8758_v0, 7  ;;  %v8761_v15 = vshll.u32 %v17769_v45, 16 }
 0x712   : > { %v17778_v9 = vrot.slane %v8518_v54, 7  ;;  %v7178_v27 = vadd.f32 %v17722_v19, %v7143_v6  ;;  %11555 = vpow2.f32 %v8193_v61  ;;  %vm7941_vm15 = vcmp.gt.f32.partialorder %v17728_v5, 0.0 }
 0x713   : > { %v17758_v28 = vpop.f32.mrf.mxu2  ;;  %v17761_v56 = vpop.f32.mrf.mxu3  ;;  %v8752_v1 = vrot.slane %v8750_v38, 7  ;;  %v8763_v23 = vor.u32 %v8761_v15, %v17800_v4  ;;  %v7177_v38 = vadd.f32 %v17722_v19, %v7142_v18  ;;  %v8809_v19 = vsel %vm12035_vm6, %v17702_v41, 0 }
 0x714   : > { %v9143_v55 = vpop.f32.mrf.mxu0  ;;  %v8523_v63 = vor.u32 %v8521_v35, %v17778_v9  ;;  %v9025_v41 = vadd.f32 %v17715_v44, %v17758_v28  ;;  %v8570_v61 = vsel %vm12035_vm6, %v17750_v32, 0  ;;  %vm8133_vm1 = vcmp.gt.f32.partialorder %v17754_v47, 0.0 }
 0x715   : > { %v9220_v24 = vadd.f32 %v9143_v55, %v9020_v12  ;;  %v8755_v58 = vor.u32 %v8753_v3, %v8752_v1  ;;  %vm8134_vm8 = vcmp.gt.f32.partialorder %v17796_v60, 0.0 }
 0x716   : > { %v17813_v50 = vsel %vm1186_vm4, %v17725_v20, %v8523_v63  ;;  %v11554_v12 = vpop.eup %11553 }
 0x717   : > { %v17773_v57 = vadd.f32 %v17686_v8, %v9220_v24  ;;  %10751 = vmatmul.msk.bf16.gmra.mxu0 %vm1780_vm5, %v17525_v2  ;;  %v9304_v53 = vpop.f32.mrf.mxu1  ;;  %v11734_v8 = vld [vmem:[%s18394_s13] ss:$0 sm:$0xff]  ;;  %v8569_v2 = vsel %vm12035_vm6, %v17660_v22, 0  ;;  %v17793_v26 = vsel %vm1186_vm4, %v17672_v11, %v8755_v58  ;;  %v9022_v11 = vadd.f32 %v17667_v7, %v17709_v34 }
 0x718   : > { %v7880_v21 = vadd.f32 %v11734_v8, %v7843_v13  ;;  %v7879_v22 = vadd.f32 %v11734_v8, %v17598_v52  ;;  %v10675_v7 = vadd.f32 -1.0, %v11552_v36  ;;  %v8195_v34 = vmul.f32 1.442695, %v17796_v60  ;;  %v11556_v3 = vpop.eup %11555 }
 0x719   : > { %9442 = vrot.lane.b32.xlu1 %v17773_v57, %s11779_s29  ;;  %v10674_v51 = vadd.f32 -1.0, %v11554_v12  ;;  %v10706_v18 = vadd.f32 -1.0, %v11556_v3 }
 0x71a   : > { %10737 = vmatmul.msk.bf16.gmra.mxu3 %vm1780_vm5, %v8569_v2  ;;  %10768 = vmatmul.msk.bf16.gmra.mxu1 %vm1780_vm5, %v17560_v30  ;;  %v17817_v52 = vadd.f32 %v7880_v21, %v7178_v27  ;;  %v17821_v30 = vsel %vm1186_vm4, %v8752_v1, %v8763_v23  ;;  %v17823_v33 = vadd.f32 %v7879_v22, %v7177_v38  ;;  %11557 = vpow2.f32 %v8195_v34 }
 0x71b   : > { %v8886_v29 = vpop.f32.mrf.mxu2  ;;  %v8070_v24 = vsel %vm7942_vm14, %v17713_v37, %v10675_v7  ;;  %v8069_v54 = vsel %vm7941_vm15, %v17728_v5, %v10674_v51  ;;  %v8261_v21 = vsel %vm8133_vm1, %v17754_v47, %v10706_v18 }
 0x71c   : > { %v9145_v40 = vpop.f32.mrf.mxu0  ;;  %v17809_v39 = vpop.f32.mrf.mxu3  ;;  %v8007_v13 = vmul.f32 1.442695, %v17817_v52  ;;  %v8299_v58 = vpack.c.bf16 %v8070_v24, %v8070_v24  ;;  %v17845_v37 = vsub.f32 0.0, %v17823_v33  ;;  %v8298_v35 = vpack.c.bf16 %v8069_v54, %v8069_v54 }
 0x71d   : > { %v9221_v55 = vadd.f32 %v9145_v40, %v9022_v11  ;;  %v9027_v63 = vadd.f32 %v17761_v56, %v8886_v29  ;;  %v8330_v23 = vpack.c.bf16 %v8261_v21, %v8261_v21  ;;  %vm7944_vm2 = vcmp.gt.f32.partialorder %v17817_v52, 0.0 }
 0x71e   : > { %11559 = vpow2.f32 %v8007_v13  ;;  %v8395_v5 = vunpack.c.l.b16 %v8299_v58  ;;  %v8197_v8 = vmul.f32 1.442695, %v17845_v37  ;;  %v8394_v2 = vunpack.c.l.b16 %v8298_v35 }
 0x71f   : > { %v17826_v20 = vadd.f32 %v17737_v16, %v9221_v55  ;;  %v9306_v46 = vpop.f32.mrf.mxu1  ;;  %v8005_v16 = vmul.f32 1.442695, %v17823_v33  ;;  %v8810_v55 = vsel %vm12035_vm6, %v17793_v26, 0  ;;  %vm7943_vm11 = vcmp.gt.f32.partialorder %v17823_v33, 0.0 }
 0x720   : > { %v11558_v44 = vpop.eup %11557  ;;  %v17869_v40 = vpack.c.b16 %v8395_v5, %v8394_v2  ;;  %vm8135_vm13 = vcmp.gt.f32.partialorder %v17845_v37, 0.0 }
 0x721   : > { %10721 = vmatmul.msk.bf16.gmra.mxu2 %vm1780_vm5, %v8809_v19  ;;  %9444 = vrot.lane.b32.xlu2 %v17826_v20, %s11779_s29  ;;  %11561 = vpow2.f32 %v8005_v16  ;;  %v10707_v36 = vadd.f32 -1.0, %v11558_v44 }
 0x722   : > { %11563 = vpow2.f32 %v8197_v8  ;;  %v8526_v56 = vshrl.u32 %v17869_v40, 16  ;;  %v8529_v19 = vshll.u32 %v17869_v40, 16 }
 0x723   : > { %v8889_v1 = vpop.f32.mrf.mxu2 }
 0x724   : > { %v9148_v14 = vpop.f32.mrf.mxu0  ;;  %v17842_v6 = vpop.f32.mrf.mxu3  ;;  %v17883_v51 = vrot.slane %v8526_v56, 7  ;;  %v9030_v26 = vadd.f32 %v17809_v39, %v8889_v1 }
 0x725   : > { %v9222_v62 = vadd.f32 %v9148_v14, %v9025_v41 }
 0x726   : > { %v8531_v24 = vor.u32 %v8529_v19, %v17883_v51 }
 0x727   : > { %v17847_v0 = vadd.f32 %v9304_v53, %v9222_v62  ;;  %10752 = vmatmul.msk.bf16.gmra.mxu0 %vm1780_vm5, %v17541_v59  ;;  %v9309_v28 = vpop.f32.mrf.mxu1  ;;  %v17859_v53 = vsub.f32 0.0, %v17817_v52  ;;  %v11560_v59 = vpop.eup %11559 }
 0x728   : > { %v11562_v27 = vpop.eup %11561  ;;  %v10677_v47 = vadd.f32 -1.0, %v11560_v59 }
 0x729   : > { %9446 = vrot.lane.b32.xlu0 %v17847_v0, %s11779_s29  ;;  %v8199_v12 = vmul.f32 1.442695, %v17859_v53  ;;  %v10676_v29 = vadd.f32 -1.0, %v11562_v27  ;;  %v11564_v16 = vpop.eup %11563  ;;  %vm8136_vm3 = vcmp.gt.f32.partialorder %v17859_v53, 0.0 }
 0x72a   : > { %10738 = vmatmul.msk.bf16.gmra.mxu3 %vm1780_vm5, %v8570_v61  ;;  %10769 = vmatmul.msk.bf16.gmra.mxu1 %vm1780_vm5, %v17656_v49  ;;  %v8262_v49 = vsel %vm8134_vm8, %v17796_v60, %v10707_v36  ;;  %v8072_v60 = vsel %vm7944_vm2, %v17817_v52, %v10677_v47  ;;  %v8532_v52 = vsel %vm1186_vm4, %v17778_v9, %v8531_v24  ;;  %v10708_v44 = vadd.f32 -1.0, %v11564_v16 }
 0x72b   : > { %v8891_v15 = vpop.f32.mrf.mxu2  ;;  %v8331_v34 = vpack.c.bf16 %v8262_v49, %v8262_v49  ;;  %11565 = vpow2.f32 %v8199_v12  ;;  %v8071_v41 = vsel %vm7943_vm11, %v17823_v33, %v10676_v29  ;;  %v8301_v58 = vpack.c.bf16 %v8072_v60, %v8072_v60 }
 0x72c   : > { %v9150_v32 = vpop.f32.mrf.mxu0  ;;  %v8300_v5 = vpack.c.bf16 %v8071_v41, %v8071_v41  ;;  %v8571_v9 = vsel %vm12035_vm6, %v17813_v50, 0  ;;  %v9032_v36 = vadd.f32 %v17842_v6, %v8891_v15 }
 0x72d   : > { %v9223_v22 = vadd.f32 %v9150_v32, %v9027_v63  ;;  %v17867_v11 = vpop.f32.mrf.mxu3  ;;  %v8635_v13 = vunpack.c.l.b16 %v8331_v34  ;;  %v8397_v59 = vunpack.c.l.b16 %v8301_v58 }
 0x72e   : > { %v8396_v21 = vunpack.c.l.b16 %v8300_v5 }
 0x72f   : > { %v17872_v38 = vadd.f32 %v9306_v46, %v9223_v22  ;;  %v9311_v7 = vpop.f32.mrf.mxu1  ;;  %v8634_v46 = vunpack.c.l.b16 %v8330_v23 }
 0x730   : > { %v17914_v23 = vpack.c.b16 %v8397_v59, %v8396_v21 }
 0x731   : > { %10722 = vmatmul.msk.bf16.gmra.mxu2 %vm1780_vm5, %v8810_v55  ;;  %9448 = vrot.lane.b32.xlu1 %v17872_v38, %s11779_s29  ;;  %v17891_v14 = vpack.c.b16 %v8635_v13, %v8634_v46  ;;  %v11566_v33 = vpop.eup %11565 }
 0x732   : > { %v10709_v2 = vadd.f32 -1.0, %v11566_v33  ;;  %v8534_v12 = vshrl.u32 %v17914_v23, 16  ;;  %v8537_v49 = vshll.u32 %v17914_v23, 16 }
 0x733   : > { %v8766_v35 = vshrl.u32 %v17891_v14, 16  ;;  %v8769_v8 = vshll.u32 %v17891_v14, 16 }
 0x734   : > { %v8894_v3 = vpop.f32.mrf.mxu2  ;;  %v9153_v54 = vpop.f32.mrf.mxu0  ;;  %v8264_v6 = vsel %vm8136_vm3, %v17859_v53, %v10709_v2 }
 0x735   : > { %v9224_v62 = vadd.f32 %v9153_v54, %v9030_v26  ;;  %v9036_v18 = vpop.f32.mrf.mxu3  ;;  %v8768_v61 = vrot.slane %v8766_v35, 7  ;;  %v8333_v56 = vpack.c.bf16 %v8264_v6, %v8264_v6 }
 0x737   : > { %v17896_v39 = vadd.f32 %v9309_v28, %v9224_v62  ;;  %10753 = vmatmul.msk.bf16.gmra.mxu0 %vm1780_vm5, %v17335_v17  ;;  %v9314_v1 = vpop.f32.mrf.mxu1  ;;  %v8771_v28 = vor.u32 %v8769_v8, %v8768_v61  ;;  %v8263_v17 = vsel %vm8135_vm13, %v17845_v37, %v10708_v44  ;;  %v8637_v55 = vunpack.c.l.b16 %v8333_v56 }
 0x738   : > { %v8332_v47 = vpack.c.bf16 %v8263_v17, %v8263_v17 }
 0x739   : > { %9450 = vrot.lane.b32.xlu2 %v17896_v39, %s11779_s29  ;;  %v8772_v27 = vsel %vm1186_vm4, %v17800_v4, %v8771_v28  ;;  %v8536_v4 = vrot.slane %v8534_v12, 7 }
 0x73a   : > { %10739 = vmatmul.msk.bf16.gmra.mxu3 %vm1780_vm5, %v8571_v9  ;;  %10770 = vmatmul.msk.bf16.gmra.mxu1 %vm1780_vm5, %v17743_v48  ;;  %v8811_v48 = vsel %vm12035_vm6, %v17821_v30, 0  ;;  %v8636_v29 = vunpack.c.l.b16 %v8332_v47  ;;  %v8812_v33 = vsel %vm12035_vm6, %v8772_v27, 0 }
 0x73b   : > { %v8539_v34 = vor.u32 %v8537_v49, %v8536_v4 }
 0x73c   : > { %v8896_v63 = vpop.f32.mrf.mxu2  ;;  %v9155_v32 = vpop.f32.mrf.mxu0  ;;  %v8653_v60 = vpack.c.b16 %v8637_v55, %v8636_v29 }
 0x73d   : > { %v9225_v50 = vadd.f32 %v9155_v32, %v9032_v36  ;;  %v9039_v22 = vpop.f32.mrf.mxu3  ;;  %v8540_v13 = vsel %vm1186_vm4, %v17883_v51, %v8539_v34  ;;  %v9037_v58 = vadd.f32 %v9036_v18, %v8896_v63 }
 0x73e   : > { %v8774_v26 = vshrl.u32 %v8653_v60, 16  ;;  %v8777_v54 = vshll.u32 %v8653_v60, 16  ;;  %v8573_v28 = vsel %vm12035_vm6, %v8540_v13, 0 }
 0x73f   : > { %v17917_v37 = vadd.f32 %v9311_v7, %v9225_v50  ;;  %v9316_v15 = vpop.f32.mrf.mxu1  ;;  %v9035_v7 = vadd.f32 %v17867_v11, %v8894_v3  ;;  %v8572_v11 = vsel %vm12035_vm6, %v8532_v52, 0 }
 0x740   : > { %v8776_v41 = vrot.slane %v8774_v26, 7 }
 0x741   : > { %10723 = vmatmul.msk.bf16.gmra.mxu2 %vm1780_vm5, %v8811_v48  ;;  %9452 = vrot.lane.b32.xlu0 %v17917_v37, %s11779_s29 }
 0x742   : > { %v8779_v3 = vor.u32 %v8777_v54, %v8776_v41 }
 0x744   : > { %v8899_v53 = vpop.f32.mrf.mxu2  ;;  %v9158_v19 = vpop.f32.mrf.mxu0 }
 0x745   : > { %v9226_v46 = vadd.f32 %v9158_v19, %v9035_v7  ;;  %v9041_v30 = vpop.f32.mrf.mxu3  ;;  %v9040_v18 = vadd.f32 %v9039_v22, %v8899_v53  ;;  %v17982_v53 = vld [vmem:[%s18397_s16] ss:$0 sm:$0xff] }
 0x747   : > { %v17931_v24 = vadd.f32 %v9314_v1, %v9226_v46  ;;  %10754 = vmatmul.msk.bf16.gmra.mxu0 %vm1780_vm5, %v17683_v25  ;;  %v9319_v16 = vpop.f32.mrf.mxu1  ;;  %v8780_v25 = vsel %vm1186_vm4, %v8768_v61, %v8779_v3 }
 0x749   : > { %9454 = vrot.lane.b32.xlu1 %v17931_v24, %s11779_s29 }
 0x74a   : > { %10740 = vmatmul.msk.bf16.gmra.mxu3 %vm1780_vm5, %v8572_v11  ;;  %10771 = vmatmul.msk.bf16.gmra.mxu1 %vm1780_vm5, %v17769_v45 }
 0x74c   : > { %v8901_v51 = vpop.f32.mrf.mxu2  ;;  %v9160_v62 = vpop.f32.mrf.mxu0 }
 0x74d   : > { %v9227_v35 = vadd.f32 %v9160_v62, %v9037_v58  ;;  %v9044_v44 = vpop.f32.mrf.mxu3  ;;  %v9042_v17 = vadd.f32 %v9041_v30, %v8901_v51 }
 0x74f   : > { %v17943_v5 = vadd.f32 %v9316_v15, %v9227_v35  ;;  %v9321_v1 = vpop.f32.mrf.mxu1 }
 0x751   : > { %10724 = vmatmul.msk.bf16.gmra.mxu2 %vm1780_vm5, %v8812_v33  ;;  %9456 = vrot.lane.b32.xlu2 %v17943_v5, %s11779_s29 }
 0x754   : > { %v8904_v52 = vpop.f32.mrf.mxu2  ;;  %v9163_v45 = vpop.f32.mrf.mxu0 }
 0x755   : > { %v9228_v8 = vadd.f32 %v9163_v45, %v9040_v18  ;;  %v9046_v59 = vpop.f32.mrf.mxu3  ;;  %v9045_v50 = vadd.f32 %v9044_v44, %v8904_v52 }
 0x757   : > { %v17950_v9 = vadd.f32 %v9319_v16, %v9228_v8  ;;  %10755 = vmatmul.msk.bf16.gmra.mxu0 %vm1780_vm5, %v17763_v42  ;;  %v9324_v61 = vpop.f32.mrf.mxu1  ;;  %v8813_v42 = vsel %vm12035_vm6, %v8780_v25, 0 }
 0x759   : > { %9458 = vrot.lane.b32.xlu0 %v17950_v9, %s11779_s29 }
 0x75a   : > { %10741 = vmatmul.msk.bf16.gmra.mxu3 %vm1780_vm5, %v8573_v28  ;;  %10772 = vmatmul.msk.bf16.gmra.mxu1 %vm1780_vm5, %v17891_v14 }
 0x75c   : > { %v8906_v21 = vpop.f32.mrf.mxu2  ;;  %v9165_v2 = vpop.f32.mrf.mxu0 }
 0x75d   : > { %v9229_v36 = vadd.f32 %v9165_v2, %v9042_v17  ;;  %v9049_v63 = vpop.f32.mrf.mxu3  ;;  %v9047_v10 = vadd.f32 %v9046_v59, %v8906_v21 }
 0x75f   : > { %v17961_v32 = vadd.f32 %v9321_v1, %v9229_v36  ;;  %v9326_v27 = vpop.f32.mrf.mxu1 }
 0x761   : > { %10725 = vmatmul.msk.bf16.gmra.mxu2 %vm1780_vm5, %v8813_v42  ;;  %9460 = vrot.lane.b32.xlu1 %v17961_v32, %s11779_s29 }
 0x763   : > { %v9439_v46 = vpop.permute.xlu2 %9438 }
 0x764   : > { %v8909_v22 = vpop.f32.mrf.mxu2  ;;  %v9168_v47 = vpop.f32.mrf.mxu0  ;;  %v17989_v26 = vadd.f32 %v17982_v53, %v9439_v46 }
 0x765   : > { %v9230_v12 = vadd.f32 %v9168_v47, %v9045_v50  ;;  %v9051_v14 = vpop.f32.mrf.mxu3  ;;  %v9050_v7 = vadd.f32 %v9049_v63, %v8909_v22 }
 0x766   : > { %v9601_v11 = vsub.f32 0.0, %v17989_v26 }
 0x767   : > { %v17968_v6 = vadd.f32 %v9324_v61, %v9230_v12  ;;  %10756 = vmatmul.msk.bf16.gmra.mxu0 %vm1780_vm5, %v17869_v40  ;;  %v9329_v48 = vpop.f32.mrf.mxu1 }
 0x768   : > { %v9633_v25 = vmul.f32 1.442695, %v9601_v11 }
 0x769   : > { %9462 = vrot.lane.b32.xlu2 %v17968_v6, %s11779_s29 }
 0x76a   : > { %10773 = vmatmul.msk.bf16.gmra.mxu1 %vm1780_vm5, %v8653_v60  ;;  %11567 = vpow2.f32 %v9633_v25 }
 0x76c   : > { %v8911_v15 = vpop.f32.mrf.mxu2  ;;  %v9170_v56 = vpop.f32.mrf.mxu0 }
 0x76d   : > { %v9231_v4 = vadd.f32 %v9170_v56, %v9047_v10  ;;  %v9054_v49 = vpop.f32.mrf.mxu3  ;;  %v9052_v16 = vadd.f32 %v9051_v14, %v8911_v15 }
 0x76f   : > { %v17975_v29 = vadd.f32 %v9326_v27, %v9231_v4  ;;  %v9331_v55 = vpop.f32.mrf.mxu1 }
 0x770   : > { %v11568_v17 = vpop.eup %11567 }
 0x771   : > { %9464 = vrot.lane.b32.xlu0 %v17975_v29, %s11779_s29  ;;  %v9697_v47 = vadd.f32 1.0, %v11568_v17 }
 0x774   : > { %v8914_v34 = vpop.f32.mrf.mxu2  ;;  %v9173_v40 = vpop.f32.mrf.mxu0 }
 0x775   : > { %v9232_v19 = vadd.f32 %v9173_v40, %v9050_v7  ;;  %v9056_v60 = vpop.f32.mrf.mxu3 }
 0x777   : > { %v17984_v30 = vadd.f32 %v9329_v48, %v9232_v19  ;;  %10757 = vmatmul.msk.bf16.gmra.mxu0 %vm1780_vm5, %v17914_v23  ;;  %v9334_v13 = vpop.f32.mrf.mxu1  ;;  %v9055_v23 = vadd.f32 %v9054_v49, %v8914_v34 }
 0x779   : > { %9466 = vrot.lane.b32.xlu1 %v17984_v30, %s11779_s29 }
 0x77b   : > { %v9445_v28 = vpop.permute.xlu2 %9444 }
 0x77c   : > { %v8916_v41 = vpop.f32.mrf.mxu2  ;;  %v9175_v54 = vpop.f32.mrf.mxu0  ;;  %v9537_v27 = vadd.f32 %v9445_v28, %v17731_v43 }
 0x77d   : > { %v9233_v3 = vadd.f32 %v9175_v54, %v9052_v16  ;;  %v9059_v58 = vpop.f32.mrf.mxu3  ;;  %v9057_v21 = vadd.f32 %v9056_v60, %v8916_v41 }
 0x77e   : > { %v18015_v15 = vadd.f32 %v17982_v53, %v9537_v27 }
 0x77f   : > { %v17994_v51 = vadd.f32 %v9331_v55, %v9233_v3  ;;  %v9336_v62 = vpop.f32.mrf.mxu1 }
 0x780   : > { %v9604_v55 = vsub.f32 0.0, %v18015_v15 }
 0x781   : > { %9468 = vrot.lane.b32.xlu2 %v17994_v51, %s11779_s29 }
 0x783   : > { %v9441_v35 = vpop.permute.xlu0 %9440 }
 0x784   : > { %v8919_v44 = vpop.f32.mrf.mxu2  ;;  %v17999_v33 = vadd.f32 %v17982_v53, %v9441_v35  ;;  %v9178_v1 = vpop.f32.mrf.mxu0 }
 0x785   : > { %v9234_v18 = vadd.f32 %v9178_v1, %v9055_v23  ;;  %v9061_v52 = vpop.f32.mrf.mxu3  ;;  %v9060_v56 = vadd.f32 %v9059_v58, %v8919_v44 }
 0x786   : > { %v9602_v45 = vsub.f32 0.0, %v17999_v33 }
 0x787   : > { %v18002_v8 = vadd.f32 %v9334_v13, %v9234_v18  ;;  %v9339_v59 = vpop.f32.mrf.mxu1  ;;  %v9639_v13 = vmul.f32 1.442695, %v9604_v55 }
 0x788   : > { %v9635_v61 = vmul.f32 1.442695, %v9602_v45 }
 0x789   : > { %9470 = vrot.lane.b32.xlu0 %v18002_v8, %s11779_s29 }
 0x78a   : > { %11569 = vpow2.f32 %v9635_v61 }
 0x78b   : > { %v9443_v2 = vpop.permute.xlu1 %9442  ;;  %11571 = vrcp.f32 %v9697_v47 }
 0x78c   : > { %v8921_v36 = vpop.f32.mrf.mxu2  ;;  %v9536_v63 = vadd.f32 %v9443_v2, %v17678_v31  ;;  %v9180_v42 = vpop.f32.mrf.mxu0 }
 0x78d   : > { %v9235_v50 = vadd.f32 %v9180_v42, %v9057_v21  ;;  %v9064_v22 = vpop.f32.mrf.mxu3  ;;  %v9062_v41 = vadd.f32 %v9061_v52, %v8921_v36 }
 0x78e   : > { %v18009_v12 = vadd.f32 %v17982_v53, %v9536_v63 }
 0x78f   : > { %v18011_v14 = vadd.f32 %v9336_v62, %v9235_v50  ;;  %v9341_v10 = vpop.f32.mrf.mxu1 }
 0x790   : > { %v9603_v48 = vsub.f32 0.0, %v18009_v12  ;;  %v11570_v43 = vpop.eup %11569 }
 0x791   : > { %9472 = vrot.lane.b32.xlu1 %v18011_v14, %s11779_s29  ;;  %v9698_v40 = vadd.f32 1.0, %v11570_v43  ;;  %v11572_v60 = vpop.eup %11571 }
 0x792   : > { %v9637_v31 = vmul.f32 1.442695, %v9603_v48 }
 0x794   : > { %v8924_v4 = vpop.f32.mrf.mxu2  ;;  %v9183_v49 = vpop.f32.mrf.mxu0  ;;  %11573 = vpow2.f32 %v9637_v31 }
 0x795   : > { %v9236_v7 = vadd.f32 %v9183_v49, %v9060_v56  ;;  %v9066_v34 = vpop.f32.mrf.mxu3  ;;  %11575 = vrcp.f32 %v9698_v40  ;;  %v9065_v61 = vadd.f32 %v9064_v22, %v8924_v4 }
 0x796   : > { %11577 = vpow2.f32 %v9639_v13 }
 0x797   : > { %v18020_v19 = vadd.f32 %v9339_v59, %v9236_v7  ;;  %v9344_v46 = vpop.f32.mrf.mxu1 }
 0x799   : > { %9793 = vrot.lane.b32.xlu1 %v11572_v60, %s11778_s25  ;;  %9474 = vrot.lane.b32.xlu2 %v18020_v19, %s11779_s29 }
 0x79a   : > { %v11574_v16 = vpop.eup %11573 }
 0x79b   : > { %v9447_v54 = vpop.permute.xlu0 %9446  ;;  %v9699_v25 = vadd.f32 1.0, %v11574_v16  ;;  %v11576_v1 = vpop.eup %11575 }
 0x79c   : > { %v8926_v11 = vpop.f32.mrf.mxu2  ;;  %v9538_v3 = vadd.f32 %v9447_v54, %v17773_v57  ;;  %v9185_v58 = vpop.f32.mrf.mxu0 }
 0x79d   : > { %v9237_v62 = vadd.f32 %v9185_v58, %v9062_v41  ;;  %v9069_v44 = vpop.f32.mrf.mxu3  ;;  %11579 = vrcp.f32 %v9699_v25  ;;  %v9451_v57 = vpop.permute.xlu2 %9450  ;;  %v9067_v43 = vadd.f32 %v9066_v34, %v8926_v11 }
 0x79e   : > { %v18027_v23 = vadd.f32 %v17982_v53, %v9538_v3  ;;  %v11578_v59 = vpop.eup %11577  ;;  %v9540_v36 = vadd.f32 %v9451_v57, %v17847_v0 }
 0x79f   : > { %v18029_v35 = vadd.f32 %v9341_v10, %v9237_v62  ;;  %v9346_v45 = vpop.f32.mrf.mxu1  ;;  %v9700_v42 = vadd.f32 1.0, %v11578_v59 }
 0x7a0   : > { %v9605_v18 = vsub.f32 0.0, %v18027_v23  ;;  %v18044_v22 = vadd.f32 %v17982_v53, %v9540_v36 }
 0x7a1   : > { %9476 = vrot.lane.b32.xlu0 %v18029_v35, %s11779_s29  ;;  %9795 = vrot.lane.b32.xlu2 %v11576_v1, %s11778_s25 }
 0x7a2   : > { %v9641_v52 = vmul.f32 1.442695, %v9605_v18  ;;  %v9607_v49 = vsub.f32 0.0, %v18044_v22 }
 0x7a3   : > { %v9449_v28 = vpop.permute.xlu1 %9448  ;;  %v11580_v47 = vpop.eup %11579 }
 0x7a4   : > { %v8929_v17 = vpop.f32.mrf.mxu2  ;;  %v9539_v21 = vadd.f32 %v9449_v28, %v17826_v20  ;;  %v9188_v2 = vpop.f32.mrf.mxu0  ;;  %11581 = vpow2.f32 %v9641_v52  ;;  %v9645_v13 = vmul.f32 1.442695, %v9607_v49 }
 0x7a5   : > { %v9238_v63 = vadd.f32 %v9188_v2, %v9065_v61  ;;  %v9071_v31 = vpop.f32.mrf.mxu3  ;;  %11583 = vrcp.f32 %v9700_v42  ;;  %v9070_v34 = vadd.f32 %v9069_v44, %v8929_v17 }
 0x7a6   : > { %v18038_v27 = vadd.f32 %v17982_v53, %v9539_v21 }
 0x7a7   : > { %v18040_v50 = vadd.f32 %v9344_v46, %v9238_v63  ;;  %v9349_v10 = vpop.f32.mrf.mxu1 }
 0x7a8   : > { %v9606_v48 = vsub.f32 0.0, %v18038_v27 }
 0x7a9   : > { %9797 = vrot.lane.b32.xlu0 %v11580_v47, %s11778_s25  ;;  %9478 = vrot.lane.b32.xlu1 %v18040_v50, %s11779_s29 }
 0x7aa   : > { %v9643_v20 = vmul.f32 1.442695, %v9606_v48  ;;  %v11582_v0 = vpop.eup %11581 }
 0x7ab   : > { %v9701_v7 = vadd.f32 1.0, %v11582_v0  ;;  %v11584_v60 = vpop.eup %11583 }
 0x7ac   : > { %v8931_v56 = vpop.f32.mrf.mxu2  ;;  %v9190_v4 = vpop.f32.mrf.mxu0  ;;  %11585 = vpow2.f32 %v9643_v20 }
 0x7ad   : > { %v9239_v55 = vadd.f32 %v9190_v4, %v9067_v43  ;;  %11587 = vrcp.f32 %v9701_v7  ;;  %v9074_v41 = vpop.f32.mrf.mxu3  ;;  %v9072_v59 = vadd.f32 %v9071_v31, %v8931_v56 }
 0x7ae   : > { %11589 = vpow2.f32 %v9645_v13 }
 0x7af   : > { %v18050_v40 = vadd.f32 %v9346_v45, %v9239_v55  ;;  %v9351_v46 = vpop.f32.mrf.mxu1 }
 0x7b1   : > { %9799 = vrot.lane.b32.xlu1 %v11584_v60, %s11778_s25  ;;  %9480 = vrot.lane.b32.xlu2 %v18050_v40, %s11779_s29 }
 0x7b2   : > { %v11586_v16 = vpop.eup %11585 }
 0x7b3   : > { %v9453_v54 = vpop.permute.xlu0 %9452  ;;  %v9702_v25 = vadd.f32 1.0, %v11586_v16  ;;  %v11588_v45 = vpop.eup %11587 }
 0x7b4   : > { %v8934_v11 = vpop.f32.mrf.mxu2  ;;  %v9541_v3 = vadd.f32 %v9453_v54, %v17872_v38  ;;  %v9193_v58 = vpop.f32.mrf.mxu0 }
 0x7b5   : > { %v9240_v62 = vadd.f32 %v9193_v58, %v9070_v34  ;;  %11591 = vrcp.f32 %v9702_v25  ;;  %v11590_v44 = vpop.eup %11589  ;;  %v9076_v2 = vpop.f32.mrf.mxu3  ;;  %v9075_v48 = vadd.f32 %v9074_v41, %v8934_v11 }
 0x7b6   : > { %v18057_v1 = vadd.f32 %v17982_v53, %v9541_v3  ;;  %v9703_v21 = vadd.f32 1.0, %v11590_v44  ;;  %v9457_v34 = vpop.permute.xlu2 %9456 }
 0x7b7   : > { %v18059_v18 = vadd.f32 %v9349_v10, %v9240_v62  ;;  %v9354_v52 = vpop.f32.mrf.mxu1  ;;  %v9543_v3 = vadd.f32 %v9457_v34, %v17917_v37 }
 0x7b8   : > { %v9608_v57 = vsub.f32 0.0, %v18057_v1 }
 0x7b9   : > { %9482 = vrot.lane.b32.xlu0 %v18059_v18, %s11779_s29  ;;  %9801 = vrot.lane.b32.xlu2 %v11588_v45, %s11778_s25  ;;  %v18084_v45 = vadd.f32 %v17982_v53, %v9543_v3 }
 0x7ba   : > { %v9647_v38 = vmul.f32 1.442695, %v9608_v57 }
 0x7bb   : > { %v11592_v63 = vpop.eup %11591 }
 0x7bc   : > { %v8936_v61 = vpop.f32.mrf.mxu2  ;;  %v9195_v28 = vpop.f32.mrf.mxu0  ;;  %11593 = vpow2.f32 %v9647_v38 }
 0x7bd   : > { %v9241_v17 = vadd.f32 %v9195_v28, %v9072_v59  ;;  %11595 = vrcp.f32 %v9703_v21  ;;  %v9079_v4 = vpop.f32.mrf.mxu3  ;;  %v9077_v49 = vadd.f32 %v9076_v2, %v8936_v61  ;;  %v9610_v28 = vsub.f32 0.0, %v18084_v45 }
 0x7bf   : > { %v18065_v36 = vadd.f32 %v9351_v46, %v9241_v17  ;;  %v9356_v42 = vpop.f32.mrf.mxu1 }
 0x7c1   : > { %9803 = vrot.lane.b32.xlu0 %v11592_v63, %s11778_s25  ;;  %9484 = vrot.lane.b32.xlu1 %v18065_v36, %s11779_s29 }
 0x7c2   : > { %v11594_v47 = vpop.eup %11593 }
 0x7c3   : > { %v9704_v20 = vadd.f32 1.0, %v11594_v47  ;;  %v11596_v56 = vpop.eup %11595  ;;  %v9463_v57 = vpop.permute.xlu2 %9462 }
 0x7c4   : > { %v9198_v10 = vpop.f32.mrf.mxu0  ;;  %v8939_v0 = vpop.f32.mrf.mxu2  ;;  %v9546_v37 = vadd.f32 %v9463_v57, %v17950_v9 }
 0x7c5   : > { %v9242_v31 = vadd.f32 %v9198_v10, %v9075_v48  ;;  %11597 = vrcp.f32 %v9704_v20  ;;  %v9081_v41 = vpop.f32.mrf.mxu3  ;;  %v9080_v54 = vadd.f32 %v9079_v4, %v8939_v0  ;;  %v9455_v47 = vpop.permute.xlu1 %9454 }
 0x7c6   : > { %v18094_v48 = vadd.f32 %v17982_v53, %v9546_v37  ;;  %v9542_v0 = vadd.f32 %v9455_v47, %v17896_v39 }
 0x7c7   : > { %v18070_v43 = vadd.f32 %v9354_v52, %v9242_v31  ;;  %v9359_v7 = vpop.f32.mrf.mxu1 }
 0x7c8   : > { %v9613_v4 = vsub.f32 0.0, %v18094_v48  ;;  %v18109_v34 = vadd.f32 %v17982_v53, %v9542_v0 }
 0x7c9   : > { %9805 = vrot.lane.b32.xlu1 %v11596_v56, %s11778_s25  ;;  %9486 = vrot.lane.b32.xlu2 %v18070_v43, %s11779_s29 }
 0x7cb   : > { %v11598_v13 = vpop.eup %11597  ;;  %v9459_v44 = vpop.permute.xlu0 %9458 }
 0x7cc   : > { %v9200_v55 = vpop.f32.mrf.mxu0  ;;  %v8941_v16 = vpop.f32.mrf.mxu2  ;;  %v9544_v21 = vadd.f32 %v9459_v44, %v17931_v24 }
 0x7cd   : > { %v9243_v60 = vadd.f32 %v9200_v55, %v9077_v49  ;;  %v9082_v38 = vadd.f32 %v9081_v41, %v8941_v16  ;;  %v9084_v59 = vpop.f32.mrf.mxu3  ;;  %v9657_v41 = vmul.f32 1.442695, %v9613_v4 }
 0x7ce   : > { %v18099_v10 = vadd.f32 %v17982_v53, %v9544_v21 }
 0x7cf   : > { %v18075_v46 = vadd.f32 %v9356_v42, %v9243_v60  ;;  %v9361_v62 = vpop.f32.mrf.mxu1  ;;  %v9651_v42 = vmul.f32 1.442695, %v9610_v28 }
 0x7d1   : > { %9488 = vrot.lane.b32.xlu0 %v18075_v46, %s11779_s29  ;;  %9807 = vrot.lane.b32.xlu2 %v11598_v13, %s11778_s25  ;;  %11599 = vpow2.f32 %v9651_v42 }
 0x7d2   : > { %11601 = vpow2.f32 %v9657_v41 }
 0x7d3   : > { %v9461_v39 = vpop.permute.xlu1 %9460 }
 0x7d4   : > { %v9203_v11 = vpop.f32.mrf.mxu0  ;;  %v8944_v52 = vpop.f32.mrf.mxu2  ;;  %v9545_v57 = vadd.f32 %v9461_v39, %v17943_v5 }
 0x7d5   : > { %v9244_v58 = vadd.f32 %v9203_v11, %v9080_v54  ;;  %v9085_v20 = vadd.f32 %v9084_v59, %v8944_v52  ;;  %v9086_v60 = vpop.f32.mrf.mxu3 }
 0x7d6   : > { %v18126_v21 = vadd.f32 %v17982_v53, %v9545_v57 }
 0x7d7   : > { %v18081_v25 = vadd.f32 %v9359_v7, %v9244_v58  ;;  %v9364_v63 = vpop.f32.mrf.mxu1  ;;  %v9611_v7 = vsub.f32 0.0, %v18099_v10  ;;  %v11600_v58 = vpop.eup %11599 }
 0x7d8   : > { %v9706_v59 = vadd.f32 1.0, %v11600_v58 }
 0x7d9   : > { %9490 = vrot.lane.b32.xlu1 %v18081_v25, %s11779_s29 }
 0x7db   : > { %v9469_v31 = vpop.permute.xlu2 %9468 }
 0x7dc   : > { %v9205_v61 = vpop.f32.mrf.mxu0  ;;  %v8946_v24 = vpop.f32.mrf.mxu2  ;;  %v9549_v49 = vadd.f32 %v9469_v31, %v17975_v29  ;;  %v9653_v29 = vmul.f32 1.442695, %v9611_v7 }
 0x7dd   : > { %v9245_v17 = vadd.f32 %v9205_v61, %v9082_v38  ;;  %v11602_v31 = vpop.eup %11601 }
 0x7de   : > { %v18112_v54 = vadd.f32 %v17982_v53, %v9549_v49  ;;  %11603 = vpow2.f32 %v9653_v29 }
 0x7df   : > { %v18091_v2 = vadd.f32 %v9361_v62, %v9245_v17  ;;  %v9366_v3 = vpop.f32.mrf.mxu1  ;;  %v9609_v62 = vsub.f32 0.0, %v18109_v34  ;;  %11605 = vrcp.f32 %v9706_v59 }
 0x7e0   : > { %v9616_v38 = vsub.f32 0.0, %v18112_v54 }
 0x7e1   : > { %9492 = vrot.lane.b32.xlu2 %v18091_v2, %s11779_s29  ;;  %v9649_v17 = vmul.f32 1.442695, %v9609_v62 }
 0x7e2   : > { %v9663_v42 = vmul.f32 1.442695, %v9616_v38 }
 0x7e3   : > { %v9465_v9 = vpop.permute.xlu0 %9464  ;;  %11607 = vpow2.f32 %v9649_v17 }
 0x7e4   : > { %v9208_v56 = vpop.f32.mrf.mxu0  ;;  %v9547_v13 = vadd.f32 %v9465_v9, %v17961_v32  ;;  %v9087_v32 = vadd.f32 %v9086_v60, %v8946_v24  ;;  %v8949_v61 = vpop.f32.mrf.mxu2  ;;  %v9612_v24 = vsub.f32 0.0, %v18126_v21  ;;  %11609 = vpow2.f32 %v9663_v42 }
 0x7e5   : > { %v9246_v55 = vadd.f32 %v9208_v56, %v9085_v20  ;;  %v11604_v0 = vpop.eup %11603  ;;  %v9709_v60 = vadd.f32 1.0, %v11602_v31 }
 0x7e6   : > { %v18117_v11 = vadd.f32 %v17982_v53, %v9547_v13  ;;  %v9707_v41 = vadd.f32 1.0, %v11604_v0  ;;  %v11606_v29 = vpop.eup %11605 }
 0x7e7   : > { %v18106_v16 = vadd.f32 %v9364_v63, %v9246_v55  ;;  %v9089_v63 = vpop.f32.mrf.mxu3  ;;  %v9369_v56 = vpop.f32.mrf.mxu1 }
 0x7e8   : > { %v9614_v28 = vsub.f32 0.0, %v18117_v11  ;;  %v9090_v20 = vadd.f32 %v9089_v63, %v8949_v61 }
 0x7e9   : > { %9494 = vrot.lane.b32.xlu0 %v18106_v16, %s11779_s29 }
 0x7ea   : > { %v9659_v5 = vmul.f32 1.442695, %v9614_v28 }
 0x7eb   : > { %v9467_v47 = vpop.permute.xlu1 %9466 }
 0x7ec   : > { %v9210_v52 = vpop.f32.mrf.mxu0  ;;  %v9548_v55 = vadd.f32 %v9467_v47, %v17968_v6  ;;  %11611 = vpow2.f32 %v9659_v5  ;;  %v8951_v58 = vpop.f32.mrf.mxu2 }
 0x7ed   : > { %v9247_v44 = vadd.f32 %v9210_v52, %v9087_v32  ;;  %v11608_v6 = vpop.eup %11607  ;;  %11613 = vrcp.f32 %v9709_v60 }
 0x7ee   : > { %v18138_v62 = vadd.f32 %v17982_v53, %v9548_v55  ;;  %v11610_v52 = vpop.eup %11609  ;;  %11615 = vrcp.f32 %v9707_v41  ;;  %v9705_v42 = vadd.f32 1.0, %v11608_v6 }
 0x7ef   : > { %v18123_v37 = vadd.f32 %v9366_v3, %v9247_v44  ;;  %v9655_v3 = vmul.f32 1.442695, %v9612_v24  ;;  %v9712_v31 = vadd.f32 1.0, %v11610_v52 }
 0x7f0   : > { %v9615_v5 = vsub.f32 0.0, %v18138_v62 }
 0x7f1   : > { %9496 = vrot.lane.b32.xlu1 %v18123_v37, %s11779_s29  ;;  %11617 = vpow2.f32 %v9655_v3 }
 0x7f2   : > { %v11612_v61 = vpop.eup %11611  ;;  %v9661_v55 = vmul.f32 1.442695, %v9615_v5  ;;  %v11736_v5 = vld [vmem:[%s14763_s28] sm:$0xff] }
 0x7f3   : > { %v9475_v9 = vpop.permute.xlu2 %9474 }
 0x7f4   : > { %v9552_v4 = vadd.f32 %v9475_v9, %v18002_v8  ;;  %v9213_v49 = vpop.f32.mrf.mxu0  ;;  %v9091_v8 = vpop.f32.mrf.mxu3  ;;  %v11735_v9 = vld [vmem:[%s14763_s28 + $0x8] sm:$0xff] }
 0x7f5   : > { %v9248_v7 = vadd.f32 %v9213_v49, %v9090_v20  ;;  %v9092_v38 = vadd.f32 %v9091_v8, %v8951_v58  ;;  %v9371_v20 = vpop.f32.mrf.mxu1 }
 0x7f6   : > { %v18134_v13 = vadd.f32 %v17982_v53, %v9552_v4 }
 0x7f7   : > { %v9404_v39 = vadd.f32 %v9369_v56, %v9248_v7  ;;  %v11614_v56 = vpop.eup %11613 }
 0x7f8   : > { %v9619_v32 = vsub.f32 0.0, %v18134_v13  ;;  %v11616_v49 = vpop.eup %11615 }
 0x7f9   : > { %9811 = vrot.lane.b32.xlu1 %v11606_v29, %s11778_s25  ;;  %9498 = vrot.lane.b32.xlu2 %v9404_v39, %s11779_s29  ;;  %v11618_v7 = vpop.eup %11617 }
 0x7fa   : > { %v9669_v57 = vmul.f32 1.442695, %v9619_v32  ;;  %v9708_v3 = vadd.f32 1.0, %v11618_v7  ;;  %v11737_v7 = vld [vmem:[%s14763_s28 + $0x20] sm:$0xff] }
 0x7fb   : > { %v9796_v44 = vpop.permute.xlu2 %9795  ;;  %v9471_v59 = vpop.permute.xlu0 %9470 }
 0x7fc   : > { %v9890_v28 = vmul.f32 %v9796_v44, %v17999_v33  ;;  %v9550_v17 = vadd.f32 %v9471_v59, %v17984_v30  ;;  %v9215_v63 = vpop.f32.mrf.mxu0  ;;  %11619 = vpow2.f32 %v9669_v57  ;;  %v9710_v30 = vadd.f32 1.0, %v11612_v61 }
 0x7fd   : > { %v9249_v47 = vadd.f32 %v9215_v63, %v9092_v38  ;;  %11621 = vrcp.f32 %v9705_v42 }
 0x7fe   : > { %v9922_v0 = vadd.f32 %v11735_v9, %v9890_v28  ;;  %v18153_v33 = vadd.f32 %v17982_v53, %v9550_v17  ;;  %11623 = vrcp.f32 %v9712_v31 }
 0x7ff   : > { %v9405_v24 = vadd.f32 %v9371_v20, %v9249_v47  ;;  %11625 = vrcp.f32 %v9710_v30 }
 0x800   : > { %9954 = vst.msk [vmem:[%s18149_s30 + $0x8] sm:$0xff] %vm1780_vm5, %v9922_v0  ;;  %v9617_v4 = vsub.f32 0.0, %v18153_v33 }
 0x801   : > { %9817 = vrot.lane.b32.xlu1 %v11614_v56, %s11778_s25  ;;  %9500 = vrot.lane.b32.xlu0 %v9405_v24, %s11779_s29 }
 0x802   : > { %v9665_v60 = vmul.f32 1.442695, %v9617_v4  ;;  %9813 = vrot.lane.b32.xlu2 %v11616_v49, %s11778_s25  ;;  %v11620_v41 = vpop.eup %11619 }
 0x803   : > { %v9473_v39 = vpop.permute.xlu1 %9472  ;;  %v9715_v58 = vadd.f32 1.0, %v11620_v41  ;;  %v11622_v6 = vpop.eup %11621 }
 0x804   : > { %11627 = vpow2.f32 %v9665_v60  ;;  %v9551_v29 = vadd.f32 %v9473_v39, %v17994_v51  ;;  %v11624_v8 = vpop.eup %11623 }
 0x805   : > { %11629 = vpow2.f32 %v9661_v55  ;;  %v11626_v52 = vpop.eup %11625 }
 0x806   : > { %v18163_v32 = vadd.f32 %v17982_v53, %v9551_v29  ;;  %11631 = vrcp.f32 %v9708_v3 }
 0x807   : > { %11633 = vrcp.f32 %v9715_v58 }
 0x808   : > { %v9618_v57 = vsub.f32 0.0, %v18163_v32 }
 0x809   : > { %9823 = vrot.lane.b32.xlu1 %v11624_v8, %s11778_s25  ;;  %9809 = vrot.lane.b32.xlu0 %v11622_v6, %s11778_s25 }
 0x80a   : > { %v11628_v38 = vpop.eup %11627  ;;  %v9667_v51 = vmul.f32 1.442695, %v9618_v57  ;;  %9819 = vrot.lane.b32.xlu2 %v11626_v52, %s11778_s25 }
 0x80b   : > { %v11630_v44 = vpop.eup %11629  ;;  %v9713_v59 = vadd.f32 1.0, %v11628_v38  ;;  %v9794_v61 = vpop.permute.xlu1 %9793  ;;  %v11738_v38 = vld [vmem:[%s14763_s28 + $0x10] sm:$0xff] }
 0x80c   : > { %v9481_v28 = vpop.permute.xlu2 %9480  ;;  %11635 = vpow2.f32 %v9667_v51  ;;  %v9889_v17 = vmul.f32 %v9794_v61, %v17989_v26  ;;  %v9711_v42 = vadd.f32 1.0, %v11630_v44  ;;  %v11632_v20 = vpop.eup %11631 }
 0x80d   : > { %v9555_v63 = vadd.f32 %v9481_v28, %v18029_v35  ;;  %11637 = vrcp.f32 %v9713_v59  ;;  %v11634_v9 = vpop.eup %11633 }
 0x80e   : > { %v9921_v47 = vadd.f32 %v11736_v5, %v9889_v17  ;;  %11639 = vrcp.f32 %v9711_v42 }
 0x80f   : > { %v18173_v31 = vadd.f32 %v17982_v53, %v9555_v63 }
 0x810   : > { %9953 = vst.msk [vmem:[%s18149_s30] sm:$0xff] %vm1780_vm5, %v9921_v47  ;;  %v11739_v47 = vld [vmem:[%s14763_s28 + $0x18] sm:$0xff] }
 0x811   : > { %v9622_v0 = vsub.f32 0.0, %v18173_v31  ;;  %9829 = vrot.lane.b32.xlu1 %v11634_v9, %s11778_s25  ;;  %9815 = vrot.lane.b32.xlu0 %v11632_v20, %s11778_s25 }
 0x812   : > { %v11636_v26 = vpop.eup %11635 }
 0x813   : > { %v9675_v35 = vmul.f32 1.442695, %v9622_v0  ;;  %v11638_v30 = vpop.eup %11637  ;;  %v9477_v56 = vpop.permute.xlu0 %9476  ;;  %v9714_v55 = vadd.f32 1.0, %v11636_v26 }
 0x814   : > { %v9802_v24 = vpop.permute.xlu2 %9801  ;;  %v9553_v49 = vadd.f32 %v9477_v56, %v18011_v14  ;;  %9825 = vrot.lane.b32.xlu2 %v11638_v30, %s11778_s25  ;;  %v11640_v39 = vpop.eup %11639 }
 0x815   : > { %11641 = vpow2.f32 %v9675_v35  ;;  %v9893_v4 = vmul.f32 %v9802_v24, %v18027_v23 }
 0x816   : > { %v18185_v41 = vadd.f32 %v17982_v53, %v9553_v49  ;;  %11643 = vrcp.f32 %v9714_v55  ;;  %v11740_v49 = vld [vmem:[%s14763_s28 + $0x38] sm:$0xff] }
 0x817   : > { %v9925_v60 = vadd.f32 %v11737_v7, %v9893_v4 }
 0x818   : > { %v9620_v29 = vsub.f32 0.0, %v18185_v41 }
 0x819   : > { %9957 = vst.msk [vmem:[%s18149_s30 + $0x20] sm:$0xff] %vm1780_vm5, %v9925_v60  ;;  %9821 = vrot.lane.b32.xlu0 %v11640_v39, %s11778_s25 }
 0x81a   : > { %v9671_v14 = vmul.f32 1.442695, %v9620_v29 }
 0x81b   : > { %v11642_v23 = vpop.eup %11641  ;;  %v9479_v58 = vpop.permute.xlu1 %9478 }
 0x81c   : > { %v9718_v3 = vadd.f32 1.0, %v11642_v23  ;;  %v9798_v6 = vpop.permute.xlu0 %9797  ;;  %11645 = vpow2.f32 %v9671_v14  ;;  %v9554_v8 = vadd.f32 %v9479_v58, %v18020_v19  ;;  %v11644_v44 = vpop.eup %11643 }
 0x81d   : > { %v9891_v57 = vmul.f32 %v9798_v6, %v18009_v12 }
 0x81e   : > { %11647 = vrcp.f32 %v9718_v3  ;;  %v18194_v52 = vadd.f32 %v17982_v53, %v9554_v8  ;;  %v11741_v8 = vld [vmem:[%s14763_s28 + $0x28] sm:$0xff] }
 0x81f   : > { %v9923_v51 = vadd.f32 %v11738_v38, %v9891_v57 }
 0x820   : > { %v9621_v59 = vsub.f32 0.0, %v18194_v52 }
 0x821   : > { %9955 = vst.msk [vmem:[%s18149_s30 + $0x10] sm:$0xff] %vm1780_vm5, %v9923_v51  ;;  %9827 = vrot.lane.b32.xlu0 %v11644_v44, %s11778_s25 }
 0x822   : > { %v11646_v61 = vpop.eup %11645  ;;  %v9673_v28 = vmul.f32 1.442695, %v9621_v59 }
 0x823   : > { %v9716_v17 = vadd.f32 1.0, %v11646_v61  ;;  %v9800_v12 = vpop.permute.xlu1 %9799  ;;  %v9487_v63 = vpop.permute.xlu2 %9486 }
 0x824   : > { %v11648_v19 = vpop.eup %11647  ;;  %11649 = vpow2.f32 %v9673_v28  ;;  %v9892_v42 = vmul.f32 %v9800_v12, %v18015_v15  ;;  %v9558_v5 = vadd.f32 %v9487_v63, %v18059_v18 }
 0x825   : > { %9835 = vrot.lane.b32.xlu1 %v11648_v19, %s11778_s25  ;;  %11651 = vrcp.f32 %v9716_v17  ;;  %v11742_v17 = vld [vmem:[%s14763_s28 + $0x30] sm:$0xff] }
 0x826   : > { %v9924_v20 = vadd.f32 %v11739_v47, %v9892_v42  ;;  %v18206_v9 = vadd.f32 %v17982_v53, %v9558_v5 }
 0x828   : > { %9956 = vst.msk [vmem:[%s18149_s30 + $0x18] sm:$0xff] %vm1780_vm5, %v9924_v20  ;;  %v9625_v0 = vsub.f32 0.0, %v18206_v9 }
 0x82a   : > { %v11650_v26 = vpop.eup %11649  ;;  %v9681_v35 = vmul.f32 1.442695, %v9625_v0 }
 0x82b   : > { %v11652_v30 = vpop.eup %11651  ;;  %v9717_v15 = vadd.f32 1.0, %v11650_v26  ;;  %v9808_v24 = vpop.permute.xlu2 %9807 }
 0x82c   : > { %v9483_v18 = vpop.permute.xlu0 %9482  ;;  %11653 = vpow2.f32 %v9681_v35  ;;  %v9896_v56 = vmul.f32 %v9808_v24, %v18057_v1  ;;  %9831 = vrot.lane.b32.xlu2 %v11652_v30, %s11778_s25 }
 0x82d   : > { %v9556_v4 = vadd.f32 %v9483_v18, %v18040_v50  ;;  %11655 = vrcp.f32 %v9717_v15 }
 0x82e   : > { %v9928_v55 = vadd.f32 %v11740_v49, %v9896_v56 }
 0x82f   : > { %v18216_v7 = vadd.f32 %v17982_v53, %v9556_v4 }
 0x830   : > { %9960 = vst.msk [vmem:[%s18149_s30 + $0x38] sm:$0xff] %vm1780_vm5, %v9928_v55 }
 0x831   : > { %v9623_v60 = vsub.f32 0.0, %v18216_v7 }
 0x832   : > { %v11654_v39 = vpop.eup %11653 }
 0x833   : > { %v9677_v29 = vmul.f32 1.442695, %v9623_v60  ;;  %v11656_v23 = vpop.eup %11655  ;;  %v9721_v1 = vadd.f32 1.0, %v11654_v39  ;;  %v9485_v14 = vpop.permute.xlu1 %9484 }
 0x834   : > { %v9804_v50 = vpop.permute.xlu0 %9803  ;;  %v9557_v3 = vadd.f32 %v9485_v14, %v18050_v40  ;;  %9833 = vrot.lane.b32.xlu0 %v11656_v23, %s11778_s25 }
 0x835   : > { %11657 = vpow2.f32 %v9677_v29  ;;  %v9894_v58 = vmul.f32 %v9804_v50, %v18038_v27 }
 0x836   : > { %11659 = vrcp.f32 %v9721_v1  ;;  %v18225_v6 = vadd.f32 %v17982_v53, %v9557_v3 }
 0x837   : > { %v9926_v57 = vadd.f32 %v11741_v8, %v9894_v58 }
 0x838   : > { %v9624_v38 = vsub.f32 0.0, %v18225_v6 }
 0x839   : > { %9958 = vst.msk [vmem:[%s18149_s30 + $0x28] sm:$0xff] %vm1780_vm5, %v9926_v57 }
 0x83a   : > { %v9679_v44 = vmul.f32 1.442695, %v9624_v38 }
 0x83b   : > { %v11658_v51 = vpop.eup %11657  ;;  %v9806_v61 = vpop.permute.xlu1 %9805 }
 0x83c   : > { %v11660_v59 = vpop.eup %11659  ;;  %v9719_v40 = vadd.f32 1.0, %v11658_v51  ;;  %v9493_v27 = vpop.permute.xlu2 %9492  ;;  %11661 = vpow2.f32 %v9679_v44  ;;  %v9895_v28 = vmul.f32 %v9806_v61, %v18044_v22 }
 0x83d   : > { %v9561_v19 = vadd.f32 %v9493_v27, %v18075_v46  ;;  %9841 = vrot.lane.b32.xlu1 %v11660_v59, %s11778_s25  ;;  %v11743_v59 = vld [vmem:[%s14763_s28 + $0x50] sm:$0xff] }
 0x83e   : > { %11663 = vrcp.f32 %v9719_v40  ;;  %v9927_v12 = vadd.f32 %v11742_v17, %v9895_v28 }
 0x83f   : > { %v18236_v63 = vadd.f32 %v17982_v53, %v9561_v19 }
 0x840   : > { %9959 = vst.msk [vmem:[%s18149_s30 + $0x30] sm:$0xff] %vm1780_vm5, %v9927_v12 }
 0x841   : > { %v9628_v42 = vsub.f32 0.0, %v18236_v63 }
 0x842   : > { %v11662_v5 = vpop.eup %11661 }
 0x843   : > { %v9687_v47 = vmul.f32 1.442695, %v9628_v42  ;;  %v9720_v0 = vadd.f32 1.0, %v11662_v5  ;;  %v9489_v26 = vpop.permute.xlu0 %9488 }
 0x844   : > { %v11664_v20 = vpop.eup %11663  ;;  %v9559_v22 = vadd.f32 %v9489_v26, %v18065_v36 }
 0x845   : > { %11665 = vpow2.f32 %v9687_v47  ;;  %9837 = vrot.lane.b32.xlu2 %v11664_v20, %s11778_s25  ;;  %v11744_v47 = vld [vmem:[%s14763_s28 + $0x68] sm:$0xff] }
 0x846   : > { %11667 = vrcp.f32 %v9720_v0  ;;  %v18244_v46 = vadd.f32 %v17982_v53, %v9559_v22 }
 0x848   : > { %v9626_v35 = vsub.f32 0.0, %v18244_v46 }
 0x84a   : > { %v9683_v15 = vmul.f32 1.442695, %v9626_v35 }
 0x84b   : > { %v11666_v30 = vpop.eup %11665  ;;  %v9491_v56 = vpop.permute.xlu1 %9490 }
 0x84c   : > { %v11668_v24 = vpop.eup %11667  ;;  %v9724_v18 = vadd.f32 1.0, %v11666_v30  ;;  %11669 = vpow2.f32 %v9683_v15  ;;  %v9560_v4 = vadd.f32 %v9491_v56, %v18070_v43  ;;  %v11746_v56 = vld [vmem:[%s14763_s28 + $0x80] sm:$0xff] }
 0x84d   : > { %9839 = vrot.lane.b32.xlu0 %v11668_v24, %s11778_s25 }
 0x84e   : > { %11671 = vrcp.f32 %v9724_v18  ;;  %v18250_v36 = vadd.f32 %v17982_v53, %v9560_v4 }
 0x850   : > { %v9627_v49 = vsub.f32 0.0, %v18250_v36 }
 0x852   : > { %v11670_v55 = vpop.eup %11669  ;;  %v9685_v60 = vmul.f32 1.442695, %v9627_v49 }
 0x853   : > { %v9722_v29 = vadd.f32 1.0, %v11670_v55  ;;  %v9499_v23 = vpop.permute.xlu2 %9498 }
 0x854   : > { %v11672_v39 = vpop.eup %11671  ;;  %11673 = vpow2.f32 %v9685_v60  ;;  %v9564_v1 = vadd.f32 %v9499_v23, %v18106_v16 }
 0x855   : > { %9847 = vrot.lane.b32.xlu1 %v11672_v39, %s11778_s25  ;;  %11675 = vrcp.f32 %v9722_v29 }
 0x856   : > { %v18256_v43 = vadd.f32 %v17982_v53, %v9564_v1 }
 0x858   : > { %v9631_v14 = vsub.f32 0.0, %v18256_v43 }
 0x85a   : > { %v11674_v50 = vpop.eup %11673  ;;  %v9693_v3 = vmul.f32 1.442695, %v9631_v14  ;;  %v11748_v14 = vld [vmem:[%s18397_s16] ss:$0 sm:$0xff] }
 0x85b   : > { %v11676_v58 = vpop.eup %11675  ;;  %v9723_v8 = vadd.f32 1.0, %v11674_v50  ;;  %v9495_v57 = vpop.permute.xlu0 %9494 }
 0x85c   : > { %11677 = vpow2.f32 %v9693_v3  ;;  %v9814_v38 = vpop.permute.xlu2 %9813  ;;  %v9562_v51 = vadd.f32 %v9495_v57, %v18081_v25  ;;  %9843 = vrot.lane.b32.xlu2 %v11676_v58, %s11778_s25 }
 0x85d   : > { %11679 = vrcp.f32 %v9723_v8  ;;  %v9899_v16 = vmul.f32 %v9814_v38, %v18099_v10 }
 0x85e   : > { %v18263_v44 = vadd.f32 %v17982_v53, %v9562_v51  ;;  %v11749_v51 = vld [vmem:[%s14763_s28 + $0x78] sm:$0xff] }
 0x85f   : > { %v9931_v40 = vadd.f32 %v11743_v59, %v9899_v16  ;;  %v11750_v59 = vld [vmem:[%s14763_s28 + $0x40] sm:$0xff] }
 0x860   : > { %v9629_v61 = vsub.f32 0.0, %v18263_v44 }
 0x861   : > { %9963 = vst.msk [vmem:[%s18149_s30 + $0x50] sm:$0xff] %vm1780_vm5, %v9931_v40 }
 0x862   : > { %v11678_v27 = vpop.eup %11677  ;;  %v9689_v28 = vmul.f32 1.442695, %v9629_v61 }
 0x863   : > { %v11680_v19 = vpop.eup %11679  ;;  %v9727_v25 = vadd.f32 1.0, %v11678_v27  ;;  %v9497_v17 = vpop.permute.xlu1 %9496 }
 0x864   : > { %11681 = vpow2.f32 %v9689_v28  ;;  %v9563_v12 = vadd.f32 %v9497_v17, %v18091_v2  ;;  %v9820_v10 = vpop.permute.xlu2 %9819  ;;  %9845 = vrot.lane.b32.xlu0 %v11680_v19, %s11778_s25 }
 0x865   : > { %11683 = vrcp.f32 %v9727_v25  ;;  %v9902_v42 = vmul.f32 %v9820_v10, %v18117_v11  ;;  %v11751_v25 = vld [vmem:[%s14763_s28 + $0x90] sm:$0xff] }
 0x866   : > { %v18273_v5 = vadd.f32 %v17982_v53, %v9563_v12  ;;  %v11745_v53 = vld [vmem:[%s14763_s28 + $0x48] sm:$0xff]  ;;  %v11752_v12 = vld [vmem:[%s14763_s28 + $0x58] sm:$0xff] }
 0x867   : > { %v9934_v20 = vadd.f32 %v11744_v47, %v9902_v42 }
 0x868   : > { %v9630_v0 = vsub.f32 0.0, %v18273_v5 }
 0x869   : > { %9966 = vst.msk [vmem:[%s18149_s30 + $0x68] sm:$0xff] %vm1780_vm5, %v9934_v20  ;;  %v11753_v20 = vld [vmem:[%s14763_s28 + $0x98] sm:$0xff] }
 0x86a   : > { %v11682_v26 = vpop.eup %11681  ;;  %v9691_v2 = vmul.f32 1.442695, %v9630_v0 }
 0x86b   : > { %v11684_v22 = vpop.eup %11683  ;;  %v9725_v35 = vadd.f32 1.0, %v11682_v26  ;;  %v9812_v30 = vpop.permute.xlu1 %9811 }
 0x86c   : > { %11685 = vpow2.f32 %v9691_v2  ;;  %v9898_v11 = vmul.f32 %v9812_v30, %v18084_v45  ;;  %9853 = vrot.lane.b32.xlu1 %v11684_v22, %s11778_s25  ;;  %v11754_v2 = vld [vmem:[%s14763_s28 + $0x70] sm:$0xff]  ;;  %v11755_v30 = vld [vmem:[%s14763_s28 + $0x88] sm:$0xff] }
 0x86d   : > { %11687 = vrcp.f32 %v9725_v35 }
 0x86e   : > { %v9930_v15 = vadd.f32 %v11745_v53, %v9898_v11  ;;  %v9826_v24 = vpop.permute.xlu2 %9825 }
 0x86f   : > { %v9905_v18 = vmul.f32 %v9826_v24, %v18153_v33  ;;  %v11747_v33 = vld [vmem:[%s14763_s28 + $0x60] sm:$0xff] }
 0x870   : > { %9962 = vst.msk [vmem:[%s18149_s30 + $0x48] sm:$0xff] %vm1780_vm5, %v9930_v15 }
 0x871   : > { %v9937_v4 = vadd.f32 %v11746_v56, %v9905_v18 }
 0x872   : > { %v11686_v49 = vpop.eup %11685 }
 0x873   : > { %v11688_v55 = vpop.eup %11687  ;;  %v9726_v60 = vadd.f32 1.0, %v11686_v49  ;;  %9969 = vst.msk [vmem:[%s18149_s30 + $0x80] sm:$0xff] %vm1780_vm5, %v9937_v4  ;;  %v9818_v45 = vpop.permute.xlu1 %9817 }
 0x874   : > { %v9501_v39 = vpop.permute.xlu0 %9500  ;;  %v9901_v29 = vmul.f32 %v9818_v45, %v18094_v48  ;;  %9849 = vrot.lane.b32.xlu2 %v11688_v55, %s11778_s25  ;;  %v11758_v55 = vld [vmem:[%s14763_s28 + $0xa0] sm:$0xff] }
 0x875   : > { %v9565_v23 = vadd.f32 %v9501_v39, %v18123_v37  ;;  %11689 = vrcp.f32 %v9726_v60 }
 0x876   : > { %v9933_v1 = vadd.f32 %v11747_v33, %v9901_v29 }
 0x877   : > { %v18295_v50 = vadd.f32 %v11748_v14, %v9565_v23 }
 0x878   : > { %9965 = vst.msk [vmem:[%s18149_s30 + $0x60] sm:$0xff] %vm1780_vm5, %v9933_v1 }
 0x879   : > { %v9632_v48 = vsub.f32 0.0, %v18295_v50 }
 0x87b   : > { %v9695_v37 = vmul.f32 1.442695, %v9632_v48  ;;  %v11690_v3 = vpop.eup %11689  ;;  %v9824_v58 = vpop.permute.xlu1 %9823 }
 0x87c   : > { %v9810_v8 = vpop.permute.xlu0 %9809  ;;  %v9904_v57 = vmul.f32 %v9824_v58, %v18112_v54  ;;  %9851 = vrot.lane.b32.xlu0 %v11690_v3, %s11778_s25 }
 0x87d   : > { %11691 = vpow2.f32 %v9695_v37  ;;  %v9897_v38 = vmul.f32 %v9810_v8, %v18109_v34 }
 0x87e   : > { %v9936_v16 = vadd.f32 %v11749_v51, %v9904_v57 }
 0x87f   : > { %v9929_v40 = vadd.f32 %v11750_v59, %v9897_v38 }
 0x880   : > { %9968 = vst.msk [vmem:[%s18149_s30 + $0x78] sm:$0xff] %vm1780_vm5, %v9936_v16 }
 0x881   : > { %9961 = vst.msk [vmem:[%s18149_s30 + $0x40] sm:$0xff] %vm1780_vm5, %v9929_v40 }
 0x883   : > { %v11692_v61 = vpop.eup %11691  ;;  %v9830_v54 = vpop.permute.xlu1 %9829 }
 0x884   : > { %v9728_v27 = vadd.f32 1.0, %v11692_v61  ;;  %v9816_v28 = vpop.permute.xlu0 %9815  ;;  %v9907_v34 = vmul.f32 %v9830_v54, %v18134_v13  ;;  %v11765_v54 = vld [vmem:[%s14763_s28 + $0xf0] sm:$0xff] }
 0x885   : > { %v9900_v19 = vmul.f32 %v9816_v28, %v18126_v21 }
 0x886   : > { %11693 = vrcp.f32 %v9728_v27  ;;  %v9939_v17 = vadd.f32 %v11751_v25, %v9907_v34  ;;  %v9832_v42 = vpop.permute.xlu2 %9831 }
 0x887   : > { %v9932_v10 = vadd.f32 %v11752_v12, %v9900_v19  ;;  %v9908_v47 = vmul.f32 %v9832_v42, %v18185_v41  ;;  %v11766_v19 = vld [vmem:[%s14763_s28 + $0xf8] sm:$0xff]  ;;  %v11767_v12 = vld [vmem:[%s14763_s28 + $0xe8] sm:$0xff] }
 0x888   : > { %9971 = vst.msk [vmem:[%s18149_s30 + $0x90] sm:$0xff] %vm1780_vm5, %v9939_v17 }
 0x889   : > { %9964 = vst.msk [vmem:[%s18149_s30 + $0x58] sm:$0xff] %vm1780_vm5, %v9932_v10  ;;  %v9940_v13 = vadd.f32 %v11753_v20, %v9908_v47 }
 0x88b   : > { %9972 = vst.msk [vmem:[%s18149_s30 + $0x98] sm:$0xff] %vm1780_vm5, %v9940_v13 }
 0x88c   : > { %v11694_v21 = vpop.eup %11693  ;;  %v9822_v0 = vpop.permute.xlu0 %9821 }
 0x88d   : > { %v9903_v26 = vmul.f32 %v9822_v0, %v18138_v62  ;;  %9855 = vrot.lane.b32.xlu2 %v11694_v21, %s11778_s25  ;;  %v11756_v62 = vld [vmem:[%s14763_s28 + $0xa8] sm:$0xff] }
 0x88f   : > { %v9935_v41 = vadd.f32 %v11754_v2, %v9903_v26 }
 0x891   : > { %9967 = vst.msk [vmem:[%s18149_s30 + $0x70] sm:$0xff] %vm1780_vm5, %v9935_v41 }
 0x894   : > { %v9828_v22 = vpop.permute.xlu0 %9827 }
 0x895   : > { %v9906_v35 = vmul.f32 %v9828_v22, %v18163_v32  ;;  %v11757_v32 = vld [vmem:[%s14763_s28 + $0xb0] sm:$0xff] }
 0x897   : > { %v9938_v11 = vadd.f32 %v11755_v30, %v9906_v35  ;;  %v9836_v53 = vpop.permute.xlu1 %9835 }
 0x898   : > { %v9910_v15 = vmul.f32 %v9836_v53, %v18173_v31 }
 0x899   : > { %9970 = vst.msk [vmem:[%s18149_s30 + $0x88] sm:$0xff] %vm1780_vm5, %v9938_v11 }
 0x89a   : > { %v9942_v24 = vadd.f32 %v11756_v62, %v9910_v15 }
 0x89c   : > { %9974 = vst.msk [vmem:[%s18149_s30 + $0xa8] sm:$0xff] %vm1780_vm5, %v9942_v24 }
 0x89f   : > { %v9838_v18 = vpop.permute.xlu2 %9837 }
 0x8a0   : > { %v9911_v56 = vmul.f32 %v9838_v18, %v18216_v7  ;;  %v11759_v7 = vld [vmem:[%s14763_s28 + $0xc0] sm:$0xff] }
 0x8a2   : > { %v9943_v4 = vadd.f32 %v11757_v32, %v9911_v56 }
 0x8a4   : > { %9975 = vst.msk [vmem:[%s18149_s30 + $0xb0] sm:$0xff] %vm1780_vm5, %v9943_v4 }
 0x8a6   : > { %v9834_v49 = vpop.permute.xlu0 %9833 }
 0x8a7   : > { %v9909_v31 = vmul.f32 %v9834_v49, %v18194_v52  ;;  %v11760_v52 = vld [vmem:[%s14763_s28 + $0xc8] sm:$0xff] }
 0x8a9   : > { %v9941_v60 = vadd.f32 %v11758_v55, %v9909_v31 }
 0x8ab   : > { %9973 = vst.msk [vmem:[%s18149_s30 + $0xa0] sm:$0xff] %vm1780_vm5, %v9941_v60 }
 0x8af   : > { %v9842_v45 = vpop.permute.xlu1 %9841 }
 0x8b0   : > { %v9913_v39 = vmul.f32 %v9842_v45, %v18206_v9  ;;  %v11761_v9 = vld [vmem:[%s14763_s28 + $0xb8] sm:$0xff] }
 0x8b2   : > { %v9945_v29 = vadd.f32 %v11759_v7, %v9913_v39 }
 0x8b4   : > { %9977 = vst.msk [vmem:[%s18149_s30 + $0xc0] sm:$0xff] %vm1780_vm5, %v9945_v29 }
 0x8b6   : > { %v9844_v23 = vpop.permute.xlu2 %9843 }
 0x8b7   : > { %v9914_v33 = vmul.f32 %v9844_v23, %v18244_v46  ;;  %v11762_v46 = vld [vmem:[%s14763_s28 + $0xd8] sm:$0xff] }
 0x8b9   : > { %v9946_v1 = vadd.f32 %v11760_v52, %v9914_v33 }
 0x8bb   : > { %9978 = vst.msk [vmem:[%s18149_s30 + $0xc8] sm:$0xff] %vm1780_vm5, %v9946_v1 }
 0x8bf   : > { %v9840_v14 = vpop.permute.xlu0 %9839 }
 0x8c0   : > { %v9912_v48 = vmul.f32 %v9840_v14, %v18225_v6  ;;  %v11763_v6 = vld [vmem:[%s14763_s28 + $0xe0] sm:$0xff] }
 0x8c2   : > { %v9944_v37 = vadd.f32 %v11761_v9, %v9912_v48 }
 0x8c4   : > { %9976 = vst.msk [vmem:[%s18149_s30 + $0xb8] sm:$0xff] %vm1780_vm5, %v9944_v37 }
 0x8c7   : > { %v9848_v3 = vpop.permute.xlu1 %9847 }
 0x8c8   : > { %v9916_v58 = vmul.f32 %v9848_v3, %v18236_v63  ;;  %v11764_v63 = vld [vmem:[%s14763_s28 + $0xd0] sm:$0xff] }
 0x8ca   : > { %v9948_v8 = vadd.f32 %v11762_v46, %v9916_v58 }
 0x8cc   : > { %9980 = vst.msk [vmem:[%s18149_s30 + $0xd8] sm:$0xff] %vm1780_vm5, %v9948_v8 }
 0x8ce   : > { %v9850_v57 = vpop.permute.xlu2 %9849 }
 0x8cf   : > { %v9917_v38 = vmul.f32 %v9850_v57, %v18263_v44 }
 0x8d1   : > { %v9949_v51 = vadd.f32 %v11763_v6, %v9917_v38 }
 0x8d3   : > { %9981 = vst.msk [vmem:[%s18149_s30 + $0xe0] sm:$0xff] %vm1780_vm5, %v9949_v51 }
 0x8d6   : > { %v9846_v16 = vpop.permute.xlu0 %9845 }
 0x8d7   : > { %v9915_v59 = vmul.f32 %v9846_v16, %v18250_v36 }
 0x8d9   : > { %v9947_v40 = vadd.f32 %v11764_v63, %v9915_v59 }
 0x8db   : > { %9979 = vst.msk [vmem:[%s18149_s30 + $0xd0] sm:$0xff] %vm1780_vm5, %v9947_v40 }
 0x8de   : > { %v9854_v61 = vpop.permute.xlu1 %9853 }
 0x8df   : > { %v9919_v27 = vmul.f32 %v9854_v61, %v18256_v43 }
 0x8e1   : > { %v9951_v44 = vadd.f32 %v11765_v54, %v9919_v27 }
 0x8e3   : > { %9983 = vst.msk [vmem:[%s18149_s30 + $0xf0] sm:$0xff] %vm1780_vm5, %v9951_v44 }
 0x8e7   : > { %v9856_v28 = vpop.permute.xlu2 %9855 }
 0x8e8   : > { %v9920_v34 = vmul.f32 %v9856_v28, %v18295_v50 }
 0x8ea   : > { %v9952_v25 = vadd.f32 %v11766_v19, %v9920_v34 }
 0x8ec   : > { %9984 = vst.msk [vmem:[%s18149_s30 + $0xf8] sm:$0xff] %vm1780_vm5, %v9952_v25 }
 0x8ee   : > { %v9852_v36 = vpop.permute.xlu0 %9851 }
 0x8ef   : > { %v9918_v17 = vmul.f32 %v9852_v36, %v18273_v5 }
 0x8f1   : > { %v9950_v10 = vadd.f32 %v11767_v12, %v9918_v17 }
 0x8f3   : > { %9982 = vst.msk [vmem:[%s18149_s30 + $0xe8] sm:$0xff] %vm1780_vm5, %v9950_v10 }
 0x8f4 PF: > { %s29_s27 = sadd.s32 1, %s11774_s27  }
 0x8f5   : > { %p26_p4 = scmp.ge.s32.totalorder %s29_s27, 4  }
 0x8f7   :  { %28 = sbr.rel (!%p26_p4) target bundleno = 4 (0x4), region = 133 }

</bundles_post_ra>
